<compile_context>
chip_gen: v5e
topology: v5e:2x2
jax: 0.10.0
libtpu: 0.0.40
codegen_flags: <defaults>
</compile_context>

<pallas_src>
import jax
import jax.numpy as jnp
from jax.experimental import pallas as pl
from jax.experimental.pallas import tpu as pltpu


# ----------------------------- Pallas kernel -------------------------------

def mapping_network_kernel(pres_ref,                       # scalar prefetch (SMEM)
                           z_ref, y_ref,
                           sw0, sb0, sw1, sb1, sw2, sb2, sw3, sb3,
                           uw0, ub0, uw1, ub1, uw2, ub2, uw3, ub3,
                           out_ref, h_ref):
    f32 = jnp.float32
    d = pl.program_id(1)                                   # domain grid index

    # ---- once per batch tile: shared 4x(Linear+ReLU) MLP + accumulator init ----
    @pl.when(d == 0)
    def _():
        h = z_ref[...].astype(f32)
        for w, b in ((sw0, sb0), (sw1, sb1), (sw2, sb2), (sw3, sb3)):
            h = jnp.maximum(
                jnp.dot(h, w[...].astype(f32), preferred_element_type=f32)
                + b[...], 0.0)
        h_ref[...] = h
        out_ref[...] = jnp.zeros_like(out_ref)

    # ---- this domain's unshared head; skipped if no row selects domain d ----
    @pl.when(pres_ref[d] > 0)
    def _():
        t = h_ref[...]
        for w, b in ((uw0, ub0), (uw1, ub1), (uw2, ub2)):
            t = jnp.maximum(
                jnp.dot(t, w[...].astype(f32), preferred_element_type=f32)
                + b[...], 0.0)
        s = jnp.dot(t, uw3[...].astype(f32), preferred_element_type=f32) + ub3[...]
        # Select (not multiply-mask) the rows whose label is this domain.
        out_ref[...] += jnp.where(y_ref[...] == d, s, 0.0)


# ------------------------------- wrapper ------------------------------------

def mapping_network_forward(z, y, params):
    """z: (B, latent_dim) f32; y: (B,) int -> (B, out_dim) f32."""
    (sw0, sb0, sw1, sb1, sw2, sb2, sw3, sb3,
     uw0, ub0, uw1, ub1, uw2, ub2, uw3, ub3) = params

    B, latent_dim = z.shape
    num_domains, linear_dim, out_dim = uw3.shape

    # --- pad batch to a multiple of 8 sublanes; tile at most 256 rows ---
    b8 = ((B + 7) // 8) * 8
    tb = min(b8, 256)
    b_pad = ((b8 + tb - 1) // tb) * tb
    z_p = jnp.zeros((b_pad, latent_dim), jnp.float32).at[:B].set(
        z.astype(jnp.float32))
    # padded rows get label -1 -> match no domain -> contribute zeros
    y_p = jnp.full((b_pad, 1), -1, jnp.int32).at[:B, 0].set(y.astype(jnp.int32))

    # --- lane-dense output: pad out_dim to a multiple of 128 ---
    out_pad = ((out_dim + 127) // 128) * 128
    if out_pad != out_dim:
        uw3 = jnp.pad(uw3, ((0, 0), (0, 0), (0, out_pad - out_dim)))
        ub3 = jnp.pad(ub3, ((0, 0), (0, 0), (0, out_pad - out_dim)))

    # --- per-domain row counts (scalar prefetch -> SMEM) ---
    presence = (y.astype(jnp.int32)[:, None]
                == jnp.arange(num_domains, dtype=jnp.int32)[None, :]
                ).sum(axis=0).astype(jnp.int32)

    # --- BlockSpecs (index maps receive (i, d, presence_ref)) ---
    const2 = lambda i, d, p: (0, 0)          # resident shared weights
    bmap = lambda i, d, p: (i, 0)            # batch-tiled arrays
    dmap = lambda i, d, p: (d, 0, 0)         # per-domain head weights

    shared_specs = [pl.BlockSpec((latent_dim, linear_dim), const2),
                    pl.BlockSpec((1, linear_dim), const2)]
    for _ in range(3):
        shared_specs += [pl.BlockSpec((linear_dim, linear_dim), const2),
                         pl.BlockSpec((1, linear_dim), const2)]

    unshared_specs = []
    for _ in range(3):
        unshared_specs += [pl.BlockSpec((None, linear_dim, linear_dim), dmap),
                           pl.BlockSpec((None, 1, linear_dim), dmap)]
    unshared_specs += [pl.BlockSpec((None, linear_dim, out_pad), dmap),
                       pl.BlockSpec((None, 1, out_pad), dmap)]

    grid_spec = pltpu.PrefetchScalarGridSpec(
        num_scalar_prefetch=1,
        grid=(b_pad // tb, num_domains),
        in_specs=[pl.BlockSpec((tb, latent_dim), bmap),
                  pl.BlockSpec((tb, 1), bmap)] + shared_specs + unshared_specs,
        out_specs=pl.BlockSpec((tb, out_pad), bmap),
        scratch_shapes=[pltpu.VMEM((tb, linear_dim), jnp.float32)],
    )

    out = pl.pallas_call(
        mapping_network_kernel,
        out_shape=jax.ShapeDtypeStruct((b_pad, out_pad), jnp.float32),
        grid_spec=grid_spec,
        compiler_params=pltpu.CompilerParams(
            dimension_semantics=("parallel", "arbitrary"),
            vmem_limit_bytes=24 << 20),
    )(presence, z_p, y_p,
      sw0, sb0, sw1, sb1, sw2, sb2, sw3, sb3,
      uw0, ub0, uw1, ub1, uw2, ub2, uw3, ub3)

    return out[:B, :out_dim]


# --------------------------- parameter creation ------------------------------

def init_params(key, latent_dim, style_dim, num_domains,
                num_style_vecs_per_class=1, linear_dim=512):
    """Synthetic weights matching MappingNetwork.__init__ shapes.

    Weights are stored in bfloat16 (HBM-bandwidth optimization), biases in f32.
    Returns a flat list ordered to match the kernel signature.
    """
    out_dim = style_dim * num_style_vecs_per_class

    def linear(k, fan_in, fan_out):
        kw, kb = jax.random.split(k)
        lim = 1.0 / (fan_in ** 0.5)
        w = jax.random.uniform(kw, (fan_in, fan_out), jnp.float32, -lim, lim)
        b = jax.random.uniform(kb, (1, fan_out), jnp.float32, -lim, lim)
        return w.astype(jnp.bfloat16), b

    keys = jax.random.split(key, 4 + num_domains * 4)
    ki = iter(keys)

    shared = [linear(next(ki), latent_dim, linear_dim)]
    for _ in range(3):
        shared.append(linear(next(ki), linear_dim, linear_dim))

    dims = [(linear_dim, linear_dim)] * 3 + [(linear_dim, out_dim)]
    unshared_layers = [[] for _ in range(4)]
    for _d in range(num_domains):
        for li, (fi, fo) in enumerate(dims):
            unshared_layers[li].append(linear(next(ki), fi, fo))

    flat = []
    for w, b in shared:
        flat += [w, b]
    for li in range(4):
        ws = jnp.stack([w for (w, _) in unshared_layers[li]], axis=0)  # (D,in,out) bf16
        bs = jnp.stack([b for (_, b) in unshared_layers[li]], axis=0)  # (D,1,out)  f32
        flat += [ws, bs]
    return flat


# ------------------------------- reference ----------------------------------

def reference_forward(z, y, params, num_domains):
    hp = jax.lax.Precision.HIGHEST
    f32 = jnp.float32
    (sw0, sb0, sw1, sb1, sw2, sb2, sw3, sb3,
     uw0, ub0, uw1, ub1, uw2, ub2, uw3, ub3) = params
    h = z.astype(f32)
    for w, b in ((sw0, sb0), (sw1, sb1), (sw2, sb2), (sw3, sb3)):
        h = jax.nn.relu(jnp.dot(h, w.astype(f32), precision=hp) + b)
    outs = []
    for d in range(num_domains):
        t = h
        for w, b in ((uw0, ub0), (uw1, ub1), (uw2, ub2)):
            t = jax.nn.relu(jnp.dot(t, w[d].astype(f32), precision=hp) + b[d])
        outs.append(jnp.dot(t, uw3[d].astype(f32), precision=hp) + ub3[d])
    out = jnp.stack(outs, axis=1)                 # (B, D, out_dim)
    return out[jnp.arange(z.shape[0]), y]         # (B, out_dim)


# --------------------------------- main --------------------------------------

if __name__ == "__main__":
    latent_dim = 16
    style_dim = 64
    num_domains = 2
    num_style_vecs_per_class = 1
    batch = 4

    key = jax.random.PRNGKey(0)
    kz, ky, kp = jax.random.split(key, 3)

    z = jax.random.normal(kz, (batch, latent_dim), jnp.float32)
    y = jax.random.randint(ky, (batch,), 0, num_domains, jnp.int32)
    params = init_params(kp, latent_dim, style_dim, num_domains,
                         num_style_vecs_per_class)

    out = jax.block_until_ready(mapping_network_forward(z, y, params))
    ref = jax.block_until_ready(reference_forward(z, y, params, num_domains))

    assert out.shape == (batch, style_dim * num_style_vecs_per_class)
    assert jnp.allclose(out, ref, atol=1e-2, rtol=1e-2), "mismatch vs reference"

    print("KERNEL_OK")
</pallas_src>

<mosaic_0001>
module attributes {stable_mosaic.version = 11 : i64} {
  func.func @mapping_network_kernel(%arg0: i32, %arg1: i32, %arg2: memref<2xi32, #tpu.memory_space<smem>>, %arg3: memref<8x16xf32, #tpu.memory_space<vmem>>, %arg4: memref<8x1xi32, #tpu.memory_space<vmem>>, %arg5: memref<16x512xbf16, #tpu.memory_space<vmem>>, %arg6: memref<1x512xf32, #tpu.memory_space<vmem>>, %arg7: memref<512x512xbf16, #tpu.memory_space<vmem>>, %arg8: memref<1x512xf32, #tpu.memory_space<vmem>>, %arg9: memref<512x512xbf16, #tpu.memory_space<vmem>>, %arg10: memref<1x512xf32, #tpu.memory_space<vmem>>, %arg11: memref<512x512xbf16, #tpu.memory_space<vmem>>, %arg12: memref<1x512xf32, #tpu.memory_space<vmem>>, %arg13: memref<1x512x512xbf16, #tpu.memory_space<vmem>>, %arg14: memref<1x1x512xf32, #tpu.memory_space<vmem>>, %arg15: memref<1x512x512xbf16, #tpu.memory_space<vmem>>, %arg16: memref<1x1x512xf32, #tpu.memory_space<vmem>>, %arg17: memref<1x512x512xbf16, #tpu.memory_space<vmem>>, %arg18: memref<1x1x512xf32, #tpu.memory_space<vmem>>, %arg19: memref<1x512x128xbf16, #tpu.memory_space<vmem>>, %arg20: memref<1x1x128xf32, #tpu.memory_space<vmem>>, %arg21: memref<8x128xf32, #tpu.memory_space<vmem>>, %arg22: memref<8x512xf32, #tpu.memory_space<vmem>>) attributes {dimension_semantics = [#tpu.dimension_semantics<parallel>, #tpu.dimension_semantics<arbitrary>], iteration_bounds = array<i64: 1, 2>, scalar_prefetch = 1 : i64, scratch_operands = 1 : i64, tpu.core_type = #tpu.core_type<tc>, window_params = [{transform_indices = @transform_0, window_bounds = array<i64: 8, 16>}, {transform_indices = @transform_1, window_bounds = array<i64: 8, 1>}, {pipeline_mode = #tpu.pipeline_mode<synchronous>, transform_indices = @transform_2, window_bounds = array<i64: 16, 512>}, {pipeline_mode = #tpu.pipeline_mode<synchronous>, transform_indices = @transform_3, window_bounds = array<i64: 1, 512>}, {pipeline_mode = #tpu.pipeline_mode<synchronous>, transform_indices = @transform_4, window_bounds = array<i64: 512, 512>}, {pipeline_mode = #tpu.pipeline_mode<synchronous>, transform_indices = @transform_5, window_bounds = array<i64: 1, 512>}, {pipeline_mode = #tpu.pipeline_mode<synchronous>, transform_indices = @transform_6, window_bounds = array<i64: 512, 512>}, {pipeline_mode = #tpu.pipeline_mode<synchronous>, transform_indices = @transform_7, window_bounds = array<i64: 1, 512>}, {pipeline_mode = #tpu.pipeline_mode<synchronous>, transform_indices = @transform_8, window_bounds = array<i64: 512, 512>}, {pipeline_mode = #tpu.pipeline_mode<synchronous>, transform_indices = @transform_9, window_bounds = array<i64: 1, 512>}, {transform_indices = @transform_10, window_bounds = array<i64: 1, 512, 512>}, {transform_indices = @transform_11, window_bounds = array<i64: 1, 1, 512>}, {transform_indices = @transform_12, window_bounds = array<i64: 1, 512, 512>}, {transform_indices = @transform_13, window_bounds = array<i64: 1, 1, 512>}, {transform_indices = @transform_14, window_bounds = array<i64: 1, 512, 512>}, {transform_indices = @transform_15, window_bounds = array<i64: 1, 1, 512>}, {transform_indices = @transform_16, window_bounds = array<i64: 1, 512, 128>}, {transform_indices = @transform_17, window_bounds = array<i64: 1, 1, 128>}, {transform_indices = @transform_18, window_bounds = array<i64: 8, 128>}]} {
    %c0_i32 = arith.constant 0 : i32
    %0 = arith.cmpi eq, %arg1, %c0_i32 : i32
    %1 = arith.extui %0 : i1 to i32
    %c0_i32_0 = arith.constant 0 : i32
    %2 = arith.cmpi ne, %1, %c0_i32_0 : i32
    scf.if %2 {
      %c0 = arith.constant 0 : index
      %c0_3 = arith.constant 0 : index
      %8 = vector.load %arg3[%c0, %c0_3] : memref<8x16xf32, #tpu.memory_space<vmem>>, vector<8x16xf32>
      %c0_4 = arith.constant 0 : index
      %c0_5 = arith.constant 0 : index
      %9 = vector.load %arg5[%c0_4, %c0_5] : memref<16x512xbf16, #tpu.memory_space<vmem>>, vector<16x512xbf16>
      %10 = arith.extf %9 : vector<16x512xbf16> to vector<16x512xf32>
      %cst = arith.constant dense<0.000000e+00> : vector<8x512xf32>
      %11 = tpu.matmul %8, %10, %cst {dimension_numbers = #tpu.dot_dimension_numbers<[1], [0], [0], [1], [0, 0, 1, 1], [], []>} : vector<8x16xf32>, vector<16x512xf32>, vector<8x512xf32> -> vector<8x512xf32>
      %c0_6 = arith.constant 0 : index
      %c0_7 = arith.constant 0 : index
      %12 = vector.load %arg6[%c0_6, %c0_7] : memref<1x512xf32, #tpu.memory_space<vmem>>, vector<1x512xf32>
      %13 = vector.broadcast %12 : vector<1x512xf32> to vector<8x512xf32>
      %14 = arith.addf %11, %13 : vector<8x512xf32>
      %cst_8 = arith.constant 0.000000e+00 : f32
      %15 = vector.broadcast %cst_8 : f32 to vector<8x512xf32>
      %16 = arith.maximumf %14, %15 : vector<8x512xf32>
      %c0_9 = arith.constant 0 : index
      %c0_10 = arith.constant 0 : index
      %17 = vector.load %arg7[%c0_9, %c0_10] : memref<512x512xbf16, #tpu.memory_space<vmem>>, vector<512x512xbf16>
      %18 = arith.extf %17 : vector<512x512xbf16> to vector<512x512xf32>
      %cst_11 = arith.constant dense<0.000000e+00> : vector<8x512xf32>
      %19 = tpu.matmul %16, %18, %cst_11 {dimension_numbers = #tpu.dot_dimension_numbers<[1], [0], [0], [1], [0, 0, 1, 1], [], []>} : vector<8x512xf32>, vector<512x512xf32>, vector<8x512xf32> -> vector<8x512xf32>
      %c0_12 = arith.constant 0 : index
      %c0_13 = arith.constant 0 : index
      %20 = vector.load %arg8[%c0_12, %c0_13] : memref<1x512xf32, #tpu.memory_space<vmem>>, vector<1x512xf32>
      %21 = vector.broadcast %20 : vector<1x512xf32> to vector<8x512xf32>
      %22 = arith.addf %19, %21 : vector<8x512xf32>
      %cst_14 = arith.constant 0.000000e+00 : f32
      %23 = vector.broadcast %cst_14 : f32 to vector<8x512xf32>
      %24 = arith.maximumf %22, %23 : vector<8x512xf32>
      %c0_15 = arith.constant 0 : index
      %c0_16 = arith.constant 0 : index
      %25 = vector.load %arg9[%c0_15, %c0_16] : memref<512x512xbf16, #tpu.memory_space<vmem>>, vector<512x512xbf16>
      %26 = arith.extf %25 : vector<512x512xbf16> to vector<512x512xf32>
      %cst_17 = arith.constant dense<0.000000e+00> : vector<8x512xf32>
      %27 = tpu.matmul %24, %26, %cst_17 {dimension_numbers = #tpu.dot_dimension_numbers<[1], [0], [0], [1], [0, 0, 1, 1], [], []>} : vector<8x512xf32>, vector<512x512xf32>, vector<8x512xf32> -> vector<8x512xf32>
      %c0_18 = arith.constant 0 : index
      %c0_19 = arith.constant 0 : index
      %28 = vector.load %arg10[%c0_18, %c0_19] : memref<1x512xf32, #tpu.memory_space<vmem>>, vector<1x512xf32>
      %29 = vector.broadcast %28 : vector<1x512xf32> to vector<8x512xf32>
      %30 = arith.addf %27, %29 : vector<8x512xf32>
      %cst_20 = arith.constant 0.000000e+00 : f32
      %31 = vector.broadcast %cst_20 : f32 to vector<8x512xf32>
      %32 = arith.maximumf %30, %31 : vector<8x512xf32>
      %c0_21 = arith.constant 0 : index
      %c0_22 = arith.constant 0 : index
      %33 = vector.load %arg11[%c0_21, %c0_22] : memref<512x512xbf16, #tpu.memory_space<vmem>>, vector<512x512xbf16>
      %34 = arith.extf %33 : vector<512x512xbf16> to vector<512x512xf32>
      %cst_23 = arith.constant dense<0.000000e+00> : vector<8x512xf32>
      %35 = tpu.matmul %32, %34, %cst_23 {dimension_numbers = #tpu.dot_dimension_numbers<[1], [0], [0], [1], [0, 0, 1, 1], [], []>} : vector<8x512xf32>, vector<512x512xf32>, vector<8x512xf32> -> vector<8x512xf32>
      %c0_24 = arith.constant 0 : index
      %c0_25 = arith.constant 0 : index
      %36 = vector.load %arg12[%c0_24, %c0_25] : memref<1x512xf32, #tpu.memory_space<vmem>>, vector<1x512xf32>
      %37 = vector.broadcast %36 : vector<1x512xf32> to vector<8x512xf32>
      %38 = arith.addf %35, %37 : vector<8x512xf32>
      %cst_26 = arith.constant 0.000000e+00 : f32
      %39 = vector.broadcast %cst_26 : f32 to vector<8x512xf32>
      %40 = arith.maximumf %38, %39 : vector<8x512xf32>
      %c0_27 = arith.constant 0 : index
      %c0_28 = arith.constant 0 : index
      %41 = vector.load %arg22[%c0_27, %c0_28] : memref<8x512xf32, #tpu.memory_space<vmem>>, vector<8x512xf32>
      tpu.vector_store %arg22[%c0_27, %c0_28], %40 {strides = array<i32>} : memref<8x512xf32, #tpu.memory_space<vmem>>, vector<8x512xf32>,
      %cst_29 = arith.constant 0.000000e+00 : f32
      %42 = vector.broadcast %cst_29 : f32 to vector<8x128xf32>
      %c0_30 = arith.constant 0 : index
      %c0_31 = arith.constant 0 : index
      %43 = vector.load %arg21[%c0_30, %c0_31] : memref<8x128xf32, #tpu.memory_space<vmem>>, vector<8x128xf32>
      tpu.vector_store %arg21[%c0_30, %c0_31], %42 {strides = array<i32>} : memref<8x128xf32, #tpu.memory_space<vmem>>, vector<8x128xf32>,
    } else {
    }
    %3 = arith.index_cast %arg1 : i32 to index
    %4 = memref.load %arg2[%3] : memref<2xi32, #tpu.memory_space<smem>>
    %c0_i32_1 = arith.constant 0 : i32
    %5 = arith.cmpi sgt, %4, %c0_i32_1 : i32
    %6 = arith.extui %5 : i1 to i32
    %c0_i32_2 = arith.constant 0 : i32
    %7 = arith.cmpi ne, %6, %c0_i32_2 : i32
    scf.if %7 {
      %c0 = arith.constant 0 : index
      %c0_3 = arith.constant 0 : index
      %8 = vector.load %arg22[%c0, %c0_3] : memref<8x512xf32, #tpu.memory_space<vmem>>, vector<8x512xf32>
      %c0_4 = arith.constant 0 : index
      %c0_5 = arith.constant 0 : index
      %c0_6 = arith.constant 0 : index
      %9 = vector.load %arg13[%c0_4, %c0_5, %c0_6] : memref<1x512x512xbf16, #tpu.memory_space<vmem>>, vector<1x512x512xbf16>
      %10 = vector.shape_cast %9 : vector<1x512x512xbf16> to vector<512x512xbf16>
      %11 = arith.extf %10 : vector<512x512xbf16> to vector<512x512xf32>
      %cst = arith.constant dense<0.000000e+00> : vector<8x512xf32>
      %12 = tpu.matmul %8, %11, %cst {dimension_numbers = #tpu.dot_dimension_numbers<[1], [0], [0], [1], [0, 0, 1, 1], [], []>} : vector<8x512xf32>, vector<512x512xf32>, vector<8x512xf32> -> vector<8x512xf32>
      %c0_7 = arith.constant 0 : index
      %c0_8 = arith.constant 0 : index
      %c0_9 = arith.constant 0 : index
      %13 = vector.load %arg14[%c0_7, %c0_8, %c0_9] : memref<1x1x512xf32, #tpu.memory_space<vmem>>, vector<1x1x512xf32>
      %14 = vector.shape_cast %13 : vector<1x1x512xf32> to vector<1x512xf32>
      %15 = vector.broadcast %14 : vector<1x512xf32> to vector<8x512xf32>
      %16 = arith.addf %12, %15 : vector<8x512xf32>
      %cst_10 = arith.constant 0.000000e+00 : f32
      %17 = vector.broadcast %cst_10 : f32 to vector<8x512xf32>
      %18 = arith.maximumf %16, %17 : vector<8x512xf32>
      %c0_11 = arith.constant 0 : index
      %c0_12 = arith.constant 0 : index
      %c0_13 = arith.constant 0 : index
      %19 = vector.load %arg15[%c0_11, %c0_12, %c0_13] : memref<1x512x512xbf16, #tpu.memory_space<vmem>>, vector<1x512x512xbf16>
      %20 = vector.shape_cast %19 : vector<1x512x512xbf16> to vector<512x512xbf16>
      %21 = arith.extf %20 : vector<512x512xbf16> to vector<512x512xf32>
      %cst_14 = arith.constant dense<0.000000e+00> : vector<8x512xf32>
      %22 = tpu.matmul %18, %21, %cst_14 {dimension_numbers = #tpu.dot_dimension_numbers<[1], [0], [0], [1], [0, 0, 1, 1], [], []>} : vector<8x512xf32>, vector<512x512xf32>, vector<8x512xf32> -> vector<8x512xf32>
      %c0_15 = arith.constant 0 : index
      %c0_16 = arith.constant 0 : index
      %c0_17 = arith.constant 0 : index
      %23 = vector.load %arg16[%c0_15, %c0_16, %c0_17] : memref<1x1x512xf32, #tpu.memory_space<vmem>>, vector<1x1x512xf32>
      %24 = vector.shape_cast %23 : vector<1x1x512xf32> to vector<1x512xf32>
      %25 = vector.broadcast %24 : vector<1x512xf32> to vector<8x512xf32>
      %26 = arith.addf %22, %25 : vector<8x512xf32>
      %cst_18 = arith.constant 0.000000e+00 : f32
      %27 = vector.broadcast %cst_18 : f32 to vector<8x512xf32>
      %28 = arith.maximumf %26, %27 : vector<8x512xf32>
      %c0_19 = arith.constant 0 : index
      %c0_20 = arith.constant 0 : index
      %c0_21 = arith.constant 0 : index
      %29 = vector.load %arg17[%c0_19, %c0_20, %c0_21] : memref<1x512x512xbf16, #tpu.memory_space<vmem>>, vector<1x512x512xbf16>
      %30 = vector.shape_cast %29 : vector<1x512x512xbf16> to vector<512x512xbf16>
      %31 = arith.extf %30 : vector<512x512xbf16> to vector<512x512xf32>
      %cst_22 = arith.constant dense<0.000000e+00> : vector<8x512xf32>
      %32 = tpu.matmul %28, %31, %cst_22 {dimension_numbers = #tpu.dot_dimension_numbers<[1], [0], [0], [1], [0, 0, 1, 1], [], []>} : vector<8x512xf32>, vector<512x512xf32>, vector<8x512xf32> -> vector<8x512xf32>
      %c0_23 = arith.constant 0 : index
      %c0_24 = arith.constant 0 : index
      %c0_25 = arith.constant 0 : index
      %33 = vector.load %arg18[%c0_23, %c0_24, %c0_25] : memref<1x1x512xf32, #tpu.memory_space<vmem>>, vector<1x1x512xf32>
      %34 = vector.shape_cast %33 : vector<1x1x512xf32> to vector<1x512xf32>
      %35 = vector.broadcast %34 : vector<1x512xf32> to vector<8x512xf32>
      %36 = arith.addf %32, %35 : vector<8x512xf32>
      %cst_26 = arith.constant 0.000000e+00 : f32
      %37 = vector.broadcast %cst_26 : f32 to vector<8x512xf32>
      %38 = arith.maximumf %36, %37 : vector<8x512xf32>
      %c0_27 = arith.constant 0 : index
      %c0_28 = arith.constant 0 : index
      %c0_29 = arith.constant 0 : index
      %39 = vector.load %arg19[%c0_27, %c0_28, %c0_29] : memref<1x512x128xbf16, #tpu.memory_space<vmem>>, vector<1x512x128xbf16>
      %40 = vector.shape_cast %39 : vector<1x512x128xbf16> to vector<512x128xbf16>
      %41 = arith.extf %40 : vector<512x128xbf16> to vector<512x128xf32>
      %cst_30 = arith.constant dense<0.000000e+00> : vector<8x128xf32>
      %42 = tpu.matmul %38, %41, %cst_30 {dimension_numbers = #tpu.dot_dimension_numbers<[1], [0], [0], [1], [0, 0, 1, 1], [], []>} : vector<8x512xf32>, vector<512x128xf32>, vector<8x128xf32> -> vector<8x128xf32>
      %c0_31 = arith.constant 0 : index
      %c0_32 = arith.constant 0 : index
      %c0_33 = arith.constant 0 : index
      %43 = vector.load %arg20[%c0_31, %c0_32, %c0_33] : memref<1x1x128xf32, #tpu.memory_space<vmem>>, vector<1x1x128xf32>
      %44 = vector.shape_cast %43 : vector<1x1x128xf32> to vector<1x128xf32>
      %45 = vector.broadcast %44 : vector<1x128xf32> to vector<8x128xf32>
      %46 = arith.addf %42, %45 : vector<8x128xf32>
      %c0_34 = arith.constant 0 : index
      %c0_35 = arith.constant 0 : index
      %47 = vector.load %arg21[%c0_34, %c0_35] : memref<8x128xf32, #tpu.memory_space<vmem>>, vector<8x128xf32>
      %c0_36 = arith.constant 0 : index
      %c0_37 = arith.constant 0 : index
      %48 = vector.load %arg4[%c0_36, %c0_37] : memref<8x1xi32, #tpu.memory_space<vmem>>, vector<8x1xi32>
      %49 = vector.broadcast %arg1 : i32 to vector<8x1xi32>
      %50 = arith.cmpi eq, %48, %49 : vector<8x1xi32>
      %cst_38 = arith.constant 0.000000e+00 : f32
      %51 = vector.shape_cast %50 : vector<8x1xi1> to vector<8x1xi1>
      %52 = vector.broadcast %51 : vector<8x1xi1> to vector<8x128xi1>
      %53 = vector.broadcast %cst_38 : f32 to vector<8x128xf32>
      %54 = arith.select %52, %46, %53 : vector<8x128xi1>, vector<8x128xf32>
      %55 = arith.addf %47, %54 : vector<8x128xf32>
      %c0_39 = arith.constant 0 : index
      %c0_40 = arith.constant 0 : index
      %56 = vector.load %arg21[%c0_39, %c0_40] : memref<8x128xf32, #tpu.memory_space<vmem>>, vector<8x128xf32>
      tpu.vector_store %arg21[%c0_39, %c0_40], %55 {strides = array<i32>} : memref<8x128xf32, #tpu.memory_space<vmem>>, vector<8x128xf32>,
    } else {
    }
    return
  }
  func.func @transform_0(%arg0: i32, %arg1: i32, %arg2: memref<2xi32, #tpu.memory_space<smem>>) -> (i32, i32) {
    %c0_i32 = arith.constant 0 : i32
    %c0_i32_0 = arith.constant 0 : i32
    return %arg0, %c0_i32 : i32, i32
  }
  func.func @transform_1(%arg0: i32, %arg1: i32, %arg2: memref<2xi32, #tpu.memory_space<smem>>) -> (i32, i32) {
    %c0_i32 = arith.constant 0 : i32
    %c0_i32_0 = arith.constant 0 : i32
    return %arg0, %c0_i32 : i32, i32
  }
  func.func @transform_2(%arg0: i32, %arg1: i32, %arg2: memref<2xi32, #tpu.memory_space<smem>>) -> (i32, i32) {
    %c0_i32 = arith.constant 0 : i32
    %c0_i32_0 = arith.constant 0 : i32
    %c0_i32_1 = arith.constant 0 : i32
    return %c0_i32, %c0_i32_0 : i32, i32
  }
  func.func @transform_3(%arg0: i32, %arg1: i32, %arg2: memref<2xi32, #tpu.memory_space<smem>>) -> (i32, i32) {
    %c0_i32 = arith.constant 0 : i32
    %c0_i32_0 = arith.constant 0 : i32
    %c0_i32_1 = arith.constant 0 : i32
    return %c0_i32, %c0_i32_0 : i32, i32
  }
  func.func @transform_4(%arg0: i32, %arg1: i32, %arg2: memref<2xi32, #tpu.memory_space<smem>>) -> (i32, i32) {
    %c0_i32 = arith.constant 0 : i32
    %c0_i32_0 = arith.constant 0 : i32
    %c0_i32_1 = arith.constant 0 : i32
    return %c0_i32, %c0_i32_0 : i32, i32
  }
  func.func @transform_5(%arg0: i32, %arg1: i32, %arg2: memref<2xi32, #tpu.memory_space<smem>>) -> (i32, i32) {
    %c0_i32 = arith.constant 0 : i32
    %c0_i32_0 = arith.constant 0 : i32
    %c0_i32_1 = arith.constant 0 : i32
    return %c0_i32, %c0_i32_0 : i32, i32
  }
  func.func @transform_6(%arg0: i32, %arg1: i32, %arg2: memref<2xi32, #tpu.memory_space<smem>>) -> (i32, i32) {
    %c0_i32 = arith.constant 0 : i32
    %c0_i32_0 = arith.constant 0 : i32
    %c0_i32_1 = arith.constant 0 : i32
    return %c0_i32, %c0_i32_0 : i32, i32
  }
  func.func @transform_7(%arg0: i32, %arg1: i32, %arg2: memref<2xi32, #tpu.memory_space<smem>>) -> (i32, i32) {
    %c0_i32 = arith.constant 0 : i32
    %c0_i32_0 = arith.constant 0 : i32
    %c0_i32_1 = arith.constant 0 : i32
    return %c0_i32, %c0_i32_0 : i32, i32
  }
  func.func @transform_8(%arg0: i32, %arg1: i32, %arg2: memref<2xi32, #tpu.memory_space<smem>>) -> (i32, i32) {
    %c0_i32 = arith.constant 0 : i32
    %c0_i32_0 = arith.constant 0 : i32
    %c0_i32_1 = arith.constant 0 : i32
    return %c0_i32, %c0_i32_0 : i32, i32
  }
  func.func @transform_9(%arg0: i32, %arg1: i32, %arg2: memref<2xi32, #tpu.memory_space<smem>>) -> (i32, i32) {
    %c0_i32 = arith.constant 0 : i32
    %c0_i32_0 = arith.constant 0 : i32
    %c0_i32_1 = arith.constant 0 : i32
    return %c0_i32, %c0_i32_0 : i32, i32
  }
  func.func @transform_10(%arg0: i32, %arg1: i32, %arg2: memref<2xi32, #tpu.memory_space<smem>>) -> (i32, i32, i32) {
    %c0_i32 = arith.constant 0 : i32
    %c0_i32_0 = arith.constant 0 : i32
    %c0_i32_1 = arith.constant 0 : i32
    return %arg1, %c0_i32, %c0_i32_0 : i32, i32, i32
  }
  func.func @transform_11(%arg0: i32, %arg1: i32, %arg2: memref<2xi32, #tpu.memory_space<smem>>) -> (i32, i32, i32) {
    %c0_i32 = arith.constant 0 : i32
    %c0_i32_0 = arith.constant 0 : i32
    %c0_i32_1 = arith.constant 0 : i32
    return %arg1, %c0_i32, %c0_i32_0 : i32, i32, i32
  }
  func.func @transform_12(%arg0: i32, %arg1: i32, %arg2: memref<2xi32, #tpu.memory_space<smem>>) -> (i32, i32, i32) {
    %c0_i32 = arith.constant 0 : i32
    %c0_i32_0 = arith.constant 0 : i32
    %c0_i32_1 = arith.constant 0 : i32
    return %arg1, %c0_i32, %c0_i32_0 : i32, i32, i32
  }
  func.func @transform_13(%arg0: i32, %arg1: i32, %arg2: memref<2xi32, #tpu.memory_space<smem>>) -> (i32, i32, i32) {
    %c0_i32 = arith.constant 0 : i32
    %c0_i32_0 = arith.constant 0 : i32
    %c0_i32_1 = arith.constant 0 : i32
    return %arg1, %c0_i32, %c0_i32_0 : i32, i32, i32
  }
  func.func @transform_14(%arg0: i32, %arg1: i32, %arg2: memref<2xi32, #tpu.memory_space<smem>>) -> (i32, i32, i32) {
    %c0_i32 = arith.constant 0 : i32
    %c0_i32_0 = arith.constant 0 : i32
    %c0_i32_1 = arith.constant 0 : i32
    return %arg1, %c0_i32, %c0_i32_0 : i32, i32, i32
  }
  func.func @transform_15(%arg0: i32, %arg1: i32, %arg2: memref<2xi32, #tpu.memory_space<smem>>) -> (i32, i32, i32) {
    %c0_i32 = arith.constant 0 : i32
    %c0_i32_0 = arith.constant 0 : i32
    %c0_i32_1 = arith.constant 0 : i32
    return %arg1, %c0_i32, %c0_i32_0 : i32, i32, i32
  }
  func.func @transform_16(%arg0: i32, %arg1: i32, %arg2: memref<2xi32, #tpu.memory_space<smem>>) -> (i32, i32, i32) {
    %c0_i32 = arith.constant 0 : i32
    %c0_i32_0 = arith.constant 0 : i32
    %c0_i32_1 = arith.constant 0 : i32
    return %arg1, %c0_i32, %c0_i32_0 : i32, i32, i32
  }
  func.func @transform_17(%arg0: i32, %arg1: i32, %arg2: memref<2xi32, #tpu.memory_space<smem>>) -> (i32, i32, i32) {
    %c0_i32 = arith.constant 0 : i32
    %c0_i32_0 = arith.constant 0 : i32
    %c0_i32_1 = arith.constant 0 : i32
    return %arg1, %c0_i32, %c0_i32_0 : i32, i32, i32
  }
  func.func @transform_18(%arg0: i32, %arg1: i32, %arg2: memref<2xi32, #tpu.memory_space<smem>>) -> (i32, i32) {
    %c0_i32 = arith.constant 0 : i32
    %c0_i32_0 = arith.constant 0 : i32
    return %arg0, %c0_i32 : i32, i32
  }
}

</mosaic_0001>

<bundles_post_ra>
// kernel: tpu_custom_call.1
= control target key start
LH: loop header
LB: loop body
LE: loop exit
PB: predicated region body
PF: predicated region fallthrough
CT: control target
= control target key end

     0   :  { %s6879_s21 = smov [#allocation4]   ;;  %s10917_s0 = inlined_call_operand.vmem [shape: s32[2], index: 0, kind: input, shape index: {}]   ;;  %s10918_s1 = inlined_call_operand.vmem [shape: f32[8,16], index: 1, kind: input, shape index: {}]   ;;  %s10919_s2 = inlined_call_operand.vmem [shape: s32[8,1], index: 2, kind: input, shape index: {}]   ;;  %s10920_s3 = inlined_call_operand.hbm [shape: bf16[16,512], index: 3, kind: input, shape index: {}]   ;;  %s10921_s4 = inlined_call_operand.hbm [shape: f32[1,512], index: 4, kind: input, shape index: {}]   ;;  %s10922_s5 = inlined_call_operand.hbm [shape: bf16[512,512], index: 5, kind: input, shape index: {}]   ;;  %s10923_s6 = inlined_call_operand.hbm [shape: f32[1,512], index: 6, kind: input, shape index: {}]   ;;  %s10924_s7 = inlined_call_operand.hbm [shape: bf16[512,512], index: 7, kind: input, shape index: {}]   ;;  %s10925_s8 = inlined_call_operand.hbm [shape: f32[1,512], index: 8, kind: input, shape index: {}]   ;;  %s10926_s9 = inlined_call_operand.hbm [shape: bf16[512,512], index: 9, kind: input, shape index: {}]   ;;  %s10927_s10 = inlined_call_operand.hbm [shape: f32[1,512], index: 10, kind: input, shape index: {}]   ;;  %s10928_s11 = inlined_call_operand.hbm [shape: bf16[2,512,512], index: 11, kind: input, shape index: {}]   ;;  %s10929_s12 = inlined_call_operand.vmem [shape: f32[2,1,512], index: 12, kind: input, shape index: {}]   ;;  %s10930_s13 = inlined_call_operand.hbm [shape: bf16[2,512,512], index: 13, kind: input, shape index: {}]   ;;  %s10931_s14 = inlined_call_operand.hbm [shape: f32[2,1,512], index: 14, kind: input, shape index: {}]   ;;  %s10932_s15 = inlined_call_operand.hbm [shape: bf16[2,512,512], index: 15, kind: input, shape index: {}]   ;;  %s10933_s16 = inlined_call_operand.hbm [shape: f32[2,1,512], index: 16, kind: input, shape index: {}]   ;;  %s10934_s17 = inlined_call_operand.hbm [shape: bf16[2,512,128], index: 17, kind: input, shape index: {}]   ;;  %s10935_s18 = inlined_call_operand.vmem [shape: f32[2,1,128], index: 18, kind: input, shape index: {}]   ;;  %s10936_s19 = inlined_call_operand.hbm [shape: f32[8,128], index: 19, kind: output, shape index: {}]  }
   0x1   :  { %11011 = sst [smem:[#allocation75_spill]] %s10917_s0 }
   0x2   :  { %11012 = sst [smem:[#allocation76_spill]] %s10918_s1 }
   0x3   :  { %11013 = sst [smem:[#allocation77_spill]] %s10919_s2 }
   0x4   :  { %11014 = sst [smem:[#allocation78_spill]] %s10920_s3 }
   0x5   :  { %11015 = sst [smem:[#allocation79_spill]] %s10926_s9 }
   0x6   :  { %11016 = sst [smem:[#allocation80_spill]] %s10927_s10 }
   0x7   :  { %11017 = sst [smem:[#allocation81_spill]] %s10928_s11 }
   0x8   :  { %11018 = sst [smem:[#allocation82_spill]] %s10929_s12 }
   0x9   :  { %11019 = sst [smem:[#allocation83_spill]] %s10930_s13 }
   0xa   :  { %11020 = sst [smem:[#allocation84_spill]] %s10934_s17 }
   0xb   :  { %11021 = sst [smem:[#allocation85_spill]] %s10935_s18 }
   0xc   :  { %11022 = sst [smem:[#allocation86_spill]] %s10936_s19 }
   0xd   :  { %s11023_s20 = sld [smem:[#allocation75_spill]] }
  0x13   :  { %s25_s12 = sshll.u32 %s11023_s20, 4  ;;  %s26_s12 = int_to_ptr.vmem [resolvable:$true] %s25_s12 }
  0x14   :  { %28 = dma.vmem_to_smem %s26_s12, 16, %s6879_s21, [#allocation3] }
  0x15   :  { %6825 = dma.done.wait [#allocation3], 16 }
  0x16   :  { %6826 = vsyncadd [#allocation3], 4294967280 }
  0x17   :  { %31 = sfence }
  0x18   :  { %32 = vsyncpa [#allocation6], 0 }
  0x19   :  { %33 = vsyncpa [#allocation9], 0 }
  0x1a   :  { %34 = vsyncpa [#allocation12], 0 }
  0x1b   :  { %35 = vsyncpa [#allocation15], 0 }
  0x1c   :  { %36 = vsyncpa [#allocation18], 0 }
  0x1d   :  { %37 = vsyncpa [#allocation7], 0  ;;  %s6998_s1 = smov 0   ;;  %s7000_s22 = smov 0  }
  0x1e   :  { %s7002_s2 = smov 0   ;;  %s7004_s23 = smov 0  }
  0x1f   :  { %s7006_s24 = smov 0   ;;  %s7008_s12 = smov 0  }
  0x20 LB: > { %11024 = sst [smem:[#allocation34_spill]] %s6861_s22  ;;  %s7029_s25 = sadd.s32 4294967295, %s6877_s12   ;;  %s6877_s12 = sphi %s7008_s12, %s43_s12   ;;  %s6873_s24 = sphi %s7006_s24, %s11186_s24   ;;  %s6869_s23 = sphi %s7004_s23, %s11185_s23   ;;  %s6865_s2 = sphi %s7002_s2, %s11183_s2   ;;  %s6861_s22 = sphi %s7000_s22, %s11182_s22   ;;  %s6857_s1 = sphi %s6998_s1, %s11181_s1  }
  0x21   : > { %11025 = sst [smem:[#allocation35_spill]] %s6865_s2  ;;  %p5947_p0 = scmp.ge.s32.totalorder %s6877_s12, 1 }
  0x22   : > { %11026 = sst [smem:[#allocation36_spill]] %s6869_s23  ;;  %p296_p1 = scmp.eq.s32.totalorder %s7029_s25, 0 }
  0x23   : > { %11027 = sst [smem:[#allocation37_spill]] %s6877_s12  ;;  %p514_p2 = scmp.lt.s32.totalorder %s6877_s12, 3 }
  0x24   : > { %11028 = sst [smem:[#allocation38_spill]] %s7029_s25  ;;  %s6880_s0 = smov [#allocation5]  }
  0x25   : > { %s11029_s27 = sld [smem:[#allocation78_spill]]  ;;  %p7037_p3 = pnand %p5947_p0, %p514_p2 }
  0x26   : > { %s541_s30 = sshll.u32 %s6880_s0, 4  ;;  %s10937_s21 = smov 256   ;;  %s542_s30 = int_to_ptr.vmem [resolvable:$true] %s541_s30 }
  0x27   : > { %s11030_s29 = scalar_select %p7037_p3, 1, 0 }
  0x28   : > { %p6212_p4 = pneg %p7037_p3  ;;  %s10939_s3 = smov 16  }
  0x29   : > { %11031 = sst [smem:[#allocation39_spill]] %s11030_s29  ;;  %s52_s26 = sadd.s32 1, %s6873_s24 }
  0x2a   : > { %p7045_p5 = pnand %p6212_p4, %p296_p1  ;;  %p53_p6 = scmp.ge.s32.totalorder %s52_s26, 2 }
  0x2b   : > { %s539_s28 = sshll.u32 %s11029_s27, 4  ;;  %s282_s27 = sadd.s32 1, %s6865_s2  ;;  %s540_s28 = int_to_ptr.hbm [resolvable:$true] %s539_s28 }
  0x2c   : > { %6215 = dma.hbm_to_vmem [thread:$0]  (!%p7045_p5), %s540_s28, 512, %s542_s30, [#allocation6], %s10937_s21, %s10937_s21, %s10939_s3  }
  0x2d   : > { %p289_p7 = scmp.ne.s32.totalorder %s6865_s2, %s6861_s22  ;;  %p290_p8 = scmp.eq.s32.totalorder %s6877_s12, 0 }
  0x2e   : > { %s11188_s26 = smov (%p53_p6, %s52_s26), 0  ;;  %p295_p10 = scmp.ne.s32.totalorder %s6861_s22, %s6857_s1 }
  0x2f   : > { %11033 = sst [smem:[#allocation40_spill]] %s11188_s26  ;;  %p7061_p9 = por %p290_p8, %p289_p7 }
  0x30   : > { %s279_s19 = ssub.s32 %s6873_s24, %s11188_s26  ;;  %p6264_p11 = scmp.lt.s32.totalorder %s6877_s12, 2 }
  0x31   : > { %p280_p12 = scmp.eq.s32.totalorder %s279_s19, 0  ;;  %p7072_p13 = por %p296_p1, %p295_p10 }
  0x32   : > { %s645_s30 = sand.u32 1, %s6877_s12   ;;  %s7078_s21 = sand.u32 1, %s6865_s2  }
  0x33   : > { %s11035_s28 = scalar_select %p7072_p13, 1, 0 }
  0x34   : > { %s7081_s3 = scalar_select %p280_p12, %s6865_s2, %s282_s27  }
  0x35   : > { %11036 = sst [smem:[#allocation41_spill]] %s11035_s28  ;;  %s7084_s18 = sshll.u32 %s7078_s21, 10 }
  0x36   : > { %11037 = sst [smem:[#allocation42_spill]] %s7081_s3  ;;  %s7087_s1 = sshll.u32 %s6873_s24, 10 }
  0x37   : > { %s11038_s11 = sld [smem:[#allocation81_spill]]  ;;  %s649_s28 = scalar_lea.vmem [#allocation19], %s7084_s18 }
  0x38   : > { %s657_s22 = sshll.u32 %s649_s28, 4  ;;  %p7098_p0 = pnand %p6264_p11, %p7061_p9  ;;  %s658_s22 = int_to_ptr.vmem [resolvable:$true] %s657_s22 }
  0x39   : > { %s11040_s13 = sld [smem:[#allocation83_spill]]  ;;  %s7106_s28 = scalar_lea.sflag [#allocation6], %s645_s30 }
  0x3a   : > { %s678_s0 = scalar_lea.vmem [#allocation20], %s7084_s18  ;;  %s5965_s3 = sshll.u32 %s7078_s21, 2 }
  0x3b   : > { %s686_s2 = sshll.u32 %s678_s0, 4  ;;  %s5966_s30 = sshll.u32 %s6873_s24, 2  ;;  %s687_s2 = int_to_ptr.vmem [resolvable:$true] %s686_s2 }
  0x3c   : > { %s704_s12 = scalar_lea.hbm %s10931_s14, %s5966_s30  ;;  %s565_s0 = sshll.u32 %s10922_s5, 4  ;;  %s566_s0 = int_to_ptr.hbm [resolvable:$true] %s565_s0 }
  0x3d   : > { %s654_s23 = scalar_lea.hbm %s11038_s11, %s7087_s1  ;;  %s11042_s11 = smov 256  }
  0x3e   : > { %s655_s25 = sshll.u32 %s654_s23, 4  ;;  %s11041_s23 = smov 16   ;;  %s656_s25 = int_to_ptr.hbm [resolvable:$true] %s655_s25 }
  0x3f   : > { %s683_s26 = scalar_lea.hbm %s11040_s13, %s7087_s1  ;;  %s706_s29 = sshll.u32 %s704_s12, 4  ;;  %s707_s29 = int_to_ptr.hbm [resolvable:$true] %s706_s29 }
  0x40   : > { %s684_s19 = sshll.u32 %s683_s26, 4  ;;  %s6883_s12 = smov [#allocation8]   ;;  %s685_s19 = int_to_ptr.hbm [resolvable:$true] %s684_s19 }
  0x41   : > { %6240 = dma.hbm_to_vmem [thread:$0]  (!%p7098_p0), %s656_s25, 16384, %s658_s22, %s7106_s28, %s11042_s11, %s11042_s11, %s11041_s23  }
  0x42   : > { %6243 = dma.hbm_to_vmem [thread:$0]  (!%p7098_p0), %s685_s19, 16384, %s687_s2, %s7106_s28, %s11042_s11, %s11042_s11, %s11041_s23  }
  0x43   : > { %s700_s22 = scalar_lea.vmem [#allocation21], %s5965_s3  ;;  %s724_s19 = scalar_lea.hbm %s10932_s15, %s7087_s1 }
  0x44   : > { %s708_s25 = sshll.u32 %s700_s22, 4  ;;  %s719_s2 = scalar_lea.vmem [#allocation22], %s7084_s18  ;;  %s709_s25 = int_to_ptr.vmem [resolvable:$true] %s708_s25 }
  0x45   : > { %6246 = dma.hbm_to_vmem [thread:$0]  (!%p7098_p0), %s707_s29, 64, %s709_s25, %s7106_s28  }
  0x46   : > { %s727_s10 = sshll.u32 %s719_s2, 4  ;;  %s725_s9 = sshll.u32 %s724_s19, 4  ;;  %s728_s10 = int_to_ptr.vmem [resolvable:$true] %s727_s10  ;;  %s726_s9 = int_to_ptr.hbm [resolvable:$true] %s725_s9 }
  0x47   : > { %s554_s22 = sshll.u32 %s10921_s4, 4  ;;  %s556_s17 = sshll.u32 %s6883_s12, 4  ;;  %s555_s22 = int_to_ptr.hbm [resolvable:$true] %s554_s22  ;;  %s557_s17 = int_to_ptr.vmem [resolvable:$true] %s556_s17 }
  0x48   : > { %6249 = dma.hbm_to_vmem [thread:$0]  (!%p7098_p0), %s726_s9, 16384, %s728_s10, %s7106_s28, %s11042_s11, %s11042_s11, %s11041_s23  }
  0x49   : > { %s580_s1 = sshll.u32 %s10923_s6, 4  ;;  %s606_s19 = sshll.u32 %s10925_s8, 4  ;;  %s581_s1 = int_to_ptr.hbm [resolvable:$true] %s580_s1  ;;  %s607_s19 = int_to_ptr.hbm [resolvable:$true] %s606_s19 }
  0x4a   : > { %6218 = dma.hbm_to_vmem [thread:$0]  (!%p7045_p5), %s555_s22, 64, %s557_s17, [#allocation9]  }
  0x4b   : > { %s6884_s9 = smov [#allocation11]   ;;  %s6885_s2 = smov [#allocation14]  }
  0x4c   : > { %s582_s10 = sshll.u32 %s6884_s9, 4  ;;  %s608_s13 = sshll.u32 %s6885_s2, 4  ;;  %s583_s10 = int_to_ptr.vmem [resolvable:$true] %s582_s10  ;;  %s609_s13 = int_to_ptr.vmem [resolvable:$true] %s608_s13 }
  0x4d   : > { %6224 = dma.hbm_to_vmem [thread:$0]  (!%p7045_p5), %s581_s1, 64, %s583_s10, [#allocation12]  }
  0x4e   : > { %s745_s22 = scalar_lea.hbm %s10933_s16, %s5966_s30  ;;  %s741_s18 = scalar_lea.vmem [#allocation23], %s5965_s3 }
  0x4f   : > { %6230 = dma.hbm_to_vmem [thread:$0]  (!%p7045_p5), %s607_s19, 64, %s609_s13, [#allocation15]  }
  0x50   : > { %s747_s17 = sshll.u32 %s745_s22, 4  ;;  %s749_s29 = sshll.u32 %s741_s18, 4  ;;  %s748_s17 = int_to_ptr.hbm [resolvable:$true] %s747_s17  ;;  %s750_s29 = int_to_ptr.vmem [resolvable:$true] %s749_s29 }
  0x51   : > { %6252 = dma.hbm_to_vmem [thread:$0]  (!%p7098_p0), %s748_s17, 64, %s750_s29, %s7106_s28  }
  0x52   : > { %s6886_s9 = smov [#allocation10]   ;;  %s591_s2 = sshll.u32 %s10924_s7, 4  ;;  %s592_s2 = int_to_ptr.hbm [resolvable:$true] %s591_s2 }
  0x53   : > { %s567_s10 = sshll.u32 %s6886_s9, 4  ;;  %s6887_s3 = smov [#allocation13]   ;;  %s568_s10 = int_to_ptr.vmem [resolvable:$true] %s567_s10 }
  0x54   : > { %6221 = dma.hbm_to_vmem [thread:$0]  (!%p7045_p5), %s566_s0, 16384, %s568_s10, [#allocation9], %s11042_s11, %s11042_s11, %s11041_s23  }
  0x55   : > { %s593_s13 = sshll.u32 %s6887_s3, 4  ;;  %s11043_s22 = sld [smem:[#allocation79_spill]]  ;;  %s594_s13 = int_to_ptr.vmem [resolvable:$true] %s593_s13 }
  0x56   : > { %6227 = dma.hbm_to_vmem [thread:$0]  (!%p7045_p5), %s592_s2, 16384, %s594_s13, [#allocation12], %s11042_s11, %s11042_s11, %s11041_s23  }
  0x57   : > { %s11044_s1 = sld [smem:[#allocation80_spill]]  ;;  %s6888_s0 = smov [#allocation16]  }
  0x58   : > { %s619_s9 = sshll.u32 %s6888_s0, 4  ;;  %s6889_s10 = smov [#allocation17]   ;;  %s620_s9 = int_to_ptr.vmem [resolvable:$true] %s619_s9 }
  0x59   : > { %s634_s30 = sshll.u32 %s6889_s10, 4  ;;  %s5972_s19 = sshll.u32 %s7078_s21, 8  ;;  %s635_s30 = int_to_ptr.vmem [resolvable:$true] %s634_s30 }
  0x5a   : > { %s6004_s2 = sshll.u32 %s6873_s24, 8  ;;  %s760_s3 = scalar_lea.vmem [#allocation24], %s5972_s19 }
  0x5b   : > { %s617_s17 = sshll.u32 %s11043_s22, 4  ;;  %s768_s13 = sshll.u32 %s760_s3, 4  ;;  %s618_s17 = int_to_ptr.hbm [resolvable:$true] %s617_s17  ;;  %s769_s13 = int_to_ptr.vmem [resolvable:$true] %s768_s13 }
  0x5c   : > { %6233 = dma.hbm_to_vmem [thread:$0]  (!%p7045_p5), %s618_s17, 16384, %s620_s9, [#allocation15], %s11042_s11, %s11042_s11, %s11041_s23  }
  0x5d   : > { %s632_s25 = sshll.u32 %s11044_s1, 4  ;;  %s11045_s22 = sld [smem:[#allocation84_spill]]  ;;  %s633_s25 = int_to_ptr.hbm [resolvable:$true] %s632_s25 }
  0x5e   : > { %6236 = dma.hbm_to_vmem [thread:$0]  (!%p7045_p5), %s633_s25, 64, %s635_s30, [#allocation18]  }
  0x5f   : > { %s6890_s1 = smov 64   ;;  %s6891_s0 = smov 4  }
  0x60   : > { %s11047_s21 = sld [smem:[#allocation38_spill]] (!%p7037_p3) }
  0x61   : > { %786 = sbr.rel (%p7037_p3) target bundleno = 1735 (0x6c7), region = 92 }
  0x63   : > { %s765_s18 = scalar_lea.hbm %s11045_s22, %s6004_s2 }
  0x64   : > { %s766_s29 = sshll.u32 %s765_s18, 4  ;;  %s767_s29 = int_to_ptr.hbm [resolvable:$true] %s766_s29 }
  0x65   : > { %6255 = dma.hbm_to_vmem [thread:$0]  (!%p7098_p0), %s767_s29, 4096, %s769_s13, %s7106_s28, %s6890_s1, %s6890_s1, %s6891_s0  }
  0x66   : > { %6828 = dma.done.wait (%p296_p1), [#allocation6], 512  }
  0x67   : > { %6830 = vsyncadd (%p296_p1), [#allocation6], 4294966784 }
  0x68   : > { %6832 = dma.done.wait (%p296_p1), [#allocation9], 16448  }
  0x69   : > { %6834 = vsyncadd (%p296_p1), [#allocation9], 4294950848 }
  0x6a   : > { %6836 = dma.done.wait (%p296_p1), [#allocation12], 16448  }
  0x6b   : > { %6838 = vsyncadd (%p296_p1), [#allocation12], 4294950848 }
  0x6c   : > { %6840 = dma.done.wait (%p296_p1), [#allocation15], 16448  }
  0x6d   : > { %6842 = vsyncadd (%p296_p1), [#allocation15], 4294950848 }
  0x6e   : > { %6844 = dma.done.wait (%p296_p1), [#allocation18], 64  }
  0x6f   : > { %6846 = vsyncadd (%p296_p1), [#allocation18], 4294967232  ;;  %s11048_s20 = sld [smem:[#allocation34_spill]]  ;;  %s828_s28 = sand.u32 1, %s11047_s21  }
  0x70   : > { %s829_s25 = scalar_lea.sflag [#allocation6], %s828_s28 }
  0x75   : > { %s830_s23 = sand.u32 1, %s11048_s20  }
  0x76   : > { %s5984_s17 = sshll.u32 %s830_s23, 10 }
  0x77   : > { %s7230_s9 = scalar_lea.vmem [#allocation19], %s5984_s17 }
  0x78   : > { %6848 = dma.done.wait (%p7072_p13), %s829_s25, 53376  }
  0x79   : > { %6850 = vsyncadd (%p7072_p13), %s829_s25, 4294913920  ;;  %s11050_s10 = sld [smem:[#allocation36_spill]]  ;;  %s5986_s30 = sshll.u32 %s830_s23, 2 }
  0x7a   : > { %s5989_s19 = sshll.u32 %s830_s23, 8  ;;  %s11051_s12 = sld [smem:[#allocation85_spill]] }
  0x7b   : > { %s11052_s1 = sld [smem:[#allocation82_spill]]  ;;  %s7250_s11 = scalar_lea.vmem [#allocation20], %s5984_s17 }
  0x7c   : > { %s7252_s21 = scalar_lea.vmem [#allocation21], %s5986_s30  ;;  %s7254_s20 = scalar_lea.vmem [#allocation22], %s5984_s17 }
  0x7d   : > { %s7256_s27 = scalar_lea.vmem [#allocation23], %s5986_s30  ;;  %s7258_s28 = scalar_lea.vmem [#allocation24], %s5989_s19 }
  0x7f   : > { %p979_p2 = scmp.lt.s32.totalorder %s11050_s10, 1  ;;  %p5991_p1 = scmp.ne.s32.totalorder %s11050_s10, 0 }
  0x81   : > { %s7238_s2 = scalar_select %p979_p2, %s11050_s10, 1 }
  0x82   : > { %989 = sbr.rel (%p5991_p1) target bundleno = 889 (0x379), region = 152 }
  0x83   : > { %s5990_s3 = sshll.u32 %s7238_s2, 2  ;;  %s985_s22 = scalar_lea.vmem %s11051_s12, %s7238_s2 }
  0x84   : > { %s7248_s0 = scalar_lea.vmem %s11052_s1, %s5990_s3 }
  0x87   : > { %v993_v0 = vld [vmem:[#allocation5 + $0x10] sm:$0xff]  ;;  %v994_v1 = vld [vmem:[#allocation5 + $0x18] sm:$0xff]  ;;  %v991_v2 = vld [vmem:[#allocation5] sm:$0xff]  ;;  %s11053_s25 = sld [smem:[#allocation76_spill]]  ;;  %vm1013_vm0 = vcmask 130048  }
  0x88   : > { %v999_v3 = vunpack.c.l.bf16 %v993_v0  ;;  %v1000_v4 = vunpack.c.h.bf16 %v993_v0  ;;  %v1001_v5 = vunpack.c.l.bf16 %v994_v1  ;;  %v1002_v6 = vunpack.c.h.bf16 %v994_v1  ;;  %v992_v7 = vld [vmem:[#allocation5 + $0x8] sm:$0xff]  ;;  %v7261_v12 = vld [vmem:[#allocation10 + $0xf0] sm:$0xff] }
  0x89   : > { %v995_v8 = vunpack.c.l.bf16 %v991_v2  ;;  %v996_v9 = vunpack.c.h.bf16 %v991_v2  ;;  %v997_v10 = vunpack.c.l.bf16 %v992_v7  ;;  %v998_v11 = vunpack.c.h.bf16 %v992_v7  ;;  %v7263_v13 = vld [vmem:[#allocation10 + $0x1f0] sm:$0xff]  ;;  %v7268_v15 = vld [vmem:[#allocation10 + $0xe0] sm:$0xff] }
  0x8a   : > { %1031 = vmatpush.msra.mxu0 %v999_v3  ;;  %1051 = vmatpush.msra.mxu1 %v1000_v4  ;;  %v7270_v16 = vld [vmem:[#allocation10 + $0x1e0] sm:$0xff]  ;;  %v7272_v17 = vld [vmem:[#allocation10 + $0x2f0] sm:$0xff]  ;;  %v1289_v19 = vunpack.c.l.bf16 %v7261_v12  ;;  %v1353_v20 = vunpack.c.l.bf16 %v7263_v13  ;;  %v1285_v25 = vunpack.c.l.bf16 %v7268_v15 }
  0x8b   : > { %1071 = vmatpush.msra.mxu2 %v1001_v5  ;;  %1091 = vmatpush.msra.mxu3 %v1002_v6  ;;  %v7274_v18 = vld [vmem:[#allocation10 + $0x3f0] sm:$0xff]  ;;  %v7282_v23 = vld [vmem:[#allocation10 + $0x2e0] sm:$0xff]  ;;  %v1349_v26 = vunpack.c.l.bf16 %v7270_v16  ;;  %v1417_v28 = vunpack.c.l.bf16 %v7272_v17 }
  0x8c   : > { %1032 = vmatpush.msra.mxu0 %v995_v8  ;;  %1052 = vmatpush.msra.mxu1 %v996_v9  ;;  %v7278_v21 = vld [vmem:[#allocation10 + $0xd0] sm:$0xff]  ;;  %v7284_v24 = vld [vmem:[#allocation10 + $0x3e0] sm:$0xff]  ;;  %v1481_v29 = vunpack.c.l.bf16 %v7274_v18  ;;  %v1413_v36 = vunpack.c.l.bf16 %v7282_v23 }
  0x8d   : > { %v990_v14 = vld [vmem:[%s11053_s25] sm:$0xff]  ;;  %1072 = vmatpush.msra.mxu2 %v997_v10  ;;  %1092 = vmatpush.msra.mxu3 %v998_v11  ;;  %v7280_v22 = vld [vmem:[#allocation10 + $0x1d0] sm:$0xff]  ;;  %v1281_v33 = vunpack.c.l.bf16 %v7278_v21  ;;  %v1477_v37 = vunpack.c.l.bf16 %v7284_v24 }
  0x8e   : > { %5992 = vmatmul.msk.f32.vlgmr.msra.gmra.mxu0 %vm1013_vm0, %v990_v14  ;;  %5993 = vmatmul.msk.f32.vlgmr.msra.gmra.mxu1 %vm1013_vm0, %v990_v14  ;;  %v7290_v27 = vld [vmem:[#allocation10 + $0xc0] sm:$0xff]  ;;  %v7298_v31 = vld [vmem:[#allocation10 + $0x2d0] sm:$0xff]  ;;  %v1345_v34 = vunpack.c.l.bf16 %v7280_v22 }
  0x8f   : > { %5994 = vmatmul.msk.f32.vlgmr.msra.gmra.mxu2 %vm1013_vm0, %v990_v14  ;;  %5995 = vmatmul.msk.f32.vlgmr.msra.gmra.mxu3 %vm1013_vm0, %v990_v14  ;;  %v7296_v30 = vld [vmem:[#allocation10 + $0x1c0] sm:$0xff]  ;;  %v7300_v32 = vld [vmem:[#allocation10 + $0x3d0] sm:$0xff]  ;;  %v1277_v41 = vunpack.c.l.bf16 %v7290_v27  ;;  %v1409_v44 = vunpack.c.l.bf16 %v7298_v31 }
  0x90   : > { %1495 = vmatpush.msrb.mxu0 %v1289_v19  ;;  %1515 = vmatpush.msrb.mxu1 %v1353_v20  ;;  %v7304_v35 = vld [vmem:[#allocation10 + $0xb0] sm:$0xff]  ;;  %v7310_v39 = vld [vmem:[#allocation10 + $0x2c0] sm:$0xff]  ;;  %v1341_v42 = vunpack.c.l.bf16 %v7296_v30  ;;  %v1473_v45 = vunpack.c.l.bf16 %v7300_v32 }
  0x91   : > { %1535 = vmatpush.msrb.mxu2 %v1417_v28  ;;  %1555 = vmatpush.msrb.mxu3 %v1481_v29  ;;  %v7308_v38 = vld [vmem:[#allocation10 + $0x1b0] sm:$0xff]  ;;  %v7312_v40 = vld [vmem:[#allocation10 + $0x3c0] sm:$0xff]  ;;  %v1273_v49 = vunpack.c.l.bf16 %v7304_v35  ;;  %v1405_v52 = vunpack.c.l.bf16 %v7310_v39 }
  0x92   : > { %1496 = vmatpush.msrb.mxu0 %v1285_v25  ;;  %1516 = vmatpush.msrb.mxu1 %v1349_v26  ;;  %v7316_v43 = vld [vmem:[#allocation10 + $0xa0] sm:$0xff]  ;;  %v7322_v47 = vld [vmem:[#allocation10 + $0x2b0] sm:$0xff]  ;;  %v1337_v50 = vunpack.c.l.bf16 %v7308_v38  ;;  %v1469_v53 = vunpack.c.l.bf16 %v7312_v40 }
  0x93   : > { %1536 = vmatpush.msrb.mxu2 %v1413_v36  ;;  %1556 = vmatpush.msrb.mxu3 %v1477_v37  ;;  %v7320_v46 = vld [vmem:[#allocation10 + $0x1a0] sm:$0xff]  ;;  %v7324_v48 = vld [vmem:[#allocation10 + $0x3b0] sm:$0xff]  ;;  %v1269_v57 = vunpack.c.l.bf16 %v7316_v43  ;;  %v1401_v60 = vunpack.c.l.bf16 %v7322_v47 }
  0x94   : > { %1497 = vmatpush.msrb.mxu0 %v1281_v33  ;;  %1517 = vmatpush.msrb.mxu1 %v1345_v34  ;;  %v7328_v51 = vld [vmem:[#allocation10 + $0x90] sm:$0xff]  ;;  %v7334_v55 = vld [vmem:[#allocation10 + $0x2a0] sm:$0xff]  ;;  %v1333_v58 = vunpack.c.l.bf16 %v7320_v46  ;;  %v1465_v61 = vunpack.c.l.bf16 %v7324_v48 }
  0x95   : > { %1537 = vmatpush.msrb.mxu2 %v1409_v44  ;;  %1557 = vmatpush.msrb.mxu3 %v1473_v45  ;;  %v7332_v54 = vld [vmem:[#allocation10 + $0x190] sm:$0xff]  ;;  %v7336_v56 = vld [vmem:[#allocation10 + $0x3a0] sm:$0xff]  ;;  %v1265_v1 = vunpack.c.l.bf16 %v7328_v51  ;;  %v1397_v4 = vunpack.c.l.bf16 %v7334_v55 }
  0x96   : > { %1498 = vmatpush.msrb.mxu0 %v1277_v41  ;;  %1518 = vmatpush.msrb.mxu1 %v1341_v42  ;;  %v7340_v59 = vld [vmem:[#allocation10 + $0x80] sm:$0xff]  ;;  %v7346_v63 = vld [vmem:[#allocation10 + $0x290] sm:$0xff]  ;;  %v1329_v2 = vunpack.c.l.bf16 %v7332_v54  ;;  %v1461_v5 = vunpack.c.l.bf16 %v7336_v56 }
  0x97   : > { %1538 = vmatpush.msrb.mxu2 %v1405_v52  ;;  %1558 = vmatpush.msrb.mxu3 %v1469_v53  ;;  %v7344_v62 = vld [vmem:[#allocation10 + $0x180] sm:$0xff]  ;;  %v7348_v0 = vld [vmem:[#allocation10 + $0x390] sm:$0xff]  ;;  %v1261_v9 = vunpack.c.l.bf16 %v7340_v59  ;;  %v1393_v14 = vunpack.c.l.bf16 %v7346_v63 }
  0x98   : > { %1499 = vmatpush.msrb.mxu0 %v1273_v49  ;;  %1519 = vmatpush.msrb.mxu1 %v1337_v50  ;;  %v7352_v3 = vld [vmem:[#allocation10 + $0x70] sm:$0xff]  ;;  %v7358_v7 = vld [vmem:[#allocation10 + $0x280] sm:$0xff]  ;;  %v1325_v10 = vunpack.c.l.bf16 %v7344_v62  ;;  %v1457_v19 = vunpack.c.l.bf16 %v7348_v0 }
  0x99   : > { %1539 = vmatpush.msrb.mxu2 %v1401_v60  ;;  %1559 = vmatpush.msrb.mxu3 %v1465_v61  ;;  %v7356_v6 = vld [vmem:[#allocation10 + $0x170] sm:$0xff]  ;;  %v7360_v8 = vld [vmem:[#allocation10 + $0x380] sm:$0xff]  ;;  %v1257_v28 = vunpack.c.l.bf16 %v7352_v3  ;;  %v1389_v34 = vunpack.c.l.bf16 %v7358_v7 }
  0x9a   : > { %1500 = vmatpush.msrb.mxu0 %v1269_v57  ;;  %1520 = vmatpush.msrb.mxu1 %v1333_v58  ;;  %v7364_v11 = vld [vmem:[#allocation10 + $0x60] sm:$0xff]  ;;  %v7370_v25 = vld [vmem:[#allocation10 + $0x270] sm:$0xff]  ;;  %v1321_v29 = vunpack.c.l.bf16 %v7356_v6  ;;  %v1453_v36 = vunpack.c.l.bf16 %v7360_v8 }
  0x9b   : > { %1540 = vmatpush.msrb.mxu2 %v1397_v4  ;;  %1560 = vmatpush.msrb.mxu3 %v1461_v5  ;;  %v7368_v20 = vld [vmem:[#allocation10 + $0x160] sm:$0xff]  ;;  %v7372_v26 = vld [vmem:[#allocation10 + $0x370] sm:$0xff]  ;;  %v1253_v44 = vunpack.c.l.bf16 %v7364_v11  ;;  %v1385_v50 = vunpack.c.l.bf16 %v7370_v25 }
  0x9c   : > { %1501 = vmatpush.msrb.mxu0 %v1265_v1  ;;  %1521 = vmatpush.msrb.mxu1 %v1329_v2  ;;  %v7376_v33 = vld [vmem:[#allocation10 + $0x50] sm:$0xff]  ;;  %v7382_v41 = vld [vmem:[#allocation10 + $0x260] sm:$0xff]  ;;  %v1317_v45 = vunpack.c.l.bf16 %v7368_v20  ;;  %v1449_v52 = vunpack.c.l.bf16 %v7372_v26 }
  0x9d   : > { %1541 = vmatpush.msrb.mxu2 %v1393_v14  ;;  %1561 = vmatpush.msrb.mxu3 %v1457_v19  ;;  %v7380_v37 = vld [vmem:[#allocation10 + $0x150] sm:$0xff]  ;;  %v7384_v42 = vld [vmem:[#allocation10 + $0x360] sm:$0xff]  ;;  %v1249_v60 = vunpack.c.l.bf16 %v7376_v33  ;;  %v1381_v2 = vunpack.c.l.bf16 %v7382_v41 }
  0x9e   : > { %1502 = vmatpush.msrb.mxu0 %v1261_v9  ;;  %1522 = vmatpush.msrb.mxu1 %v1325_v10  ;;  %v7388_v49 = vld [vmem:[#allocation10 + $0x40] sm:$0xff]  ;;  %v7394_v57 = vld [vmem:[#allocation10 + $0x250] sm:$0xff]  ;;  %v1313_v61 = vunpack.c.l.bf16 %v7380_v37  ;;  %v1445_v4 = vunpack.c.l.bf16 %v7384_v42 }
  0x9f   : > { %11054 = vst [vmem:[#allocation43_spill] sm:$0xff] %v7388_v49  ;;  %1542 = vmatpush.msrb.mxu2 %v1389_v34  ;;  %1562 = vmatpush.msrb.mxu3 %v1453_v36  ;;  %v7392_v53 = vld [vmem:[#allocation10 + $0x140] sm:$0xff]  ;;  %v7396_v58 = vld [vmem:[#allocation10 + $0x350] sm:$0xff]  ;;  %v1245_v14 = vunpack.c.l.bf16 %v7388_v49 }
  0xa0   : > { %11055 = vst [vmem:[#allocation44_spill] sm:$0xff] %v7392_v53  ;;  %1503 = vmatpush.msrb.mxu0 %v1257_v28  ;;  %1523 = vmatpush.msrb.mxu1 %v1321_v29  ;;  %v7400_v1 = vld [vmem:[#allocation10 + $0x30] sm:$0xff]  ;;  %v7406_v9 = vld [vmem:[#allocation10 + $0x240] sm:$0xff]  ;;  %v1309_v19 = vunpack.c.l.bf16 %v7392_v53  ;;  %v1377_v29 = vunpack.c.l.bf16 %v7394_v57  ;;  %v1441_v34 = vunpack.c.l.bf16 %v7396_v58 }
  0xa1   : > { %11056 = vst [vmem:[#allocation45_spill] sm:$0xff] %v7394_v57  ;;  %1543 = vmatpush.msrb.mxu2 %v1385_v50  ;;  %1563 = vmatpush.msrb.mxu3 %v1449_v52  ;;  %v7404_v5 = vld [vmem:[#allocation10 + $0x130] sm:$0xff]  ;;  %v7408_v10 = vld [vmem:[#allocation10 + $0x340] sm:$0xff]  ;;  %v1373_v53 = vunpack.c.l.bf16 %v7406_v9 }
  0xa2   : > { %11057 = vst [vmem:[#allocation46_spill] sm:$0xff] %v7396_v58  ;;  %1504 = vmatpush.msrb.mxu0 %v1253_v44  ;;  %1524 = vmatpush.msrb.mxu1 %v1317_v45  ;;  %v7412_v28 = vld [vmem:[#allocation10 + $0x20] sm:$0xff]  ;;  %v7418_v50 = vld [vmem:[#allocation10 + $0x230] sm:$0xff]  ;;  %v1241_v44 = vunpack.c.l.bf16 %v7400_v1  ;;  %v1305_v45 = vunpack.c.l.bf16 %v7404_v5  ;;  %v1437_v57 = vunpack.c.l.bf16 %v7408_v10 }
  0xa3   : > { %11058 = vst [vmem:[#allocation47_spill] sm:$0xff] %v7400_v1  ;;  %1544 = vmatpush.msrb.mxu2 %v1381_v2  ;;  %1564 = vmatpush.msrb.mxu3 %v1445_v4  ;;  %v7416_v36 = vld [vmem:[#allocation10 + $0x120] sm:$0xff]  ;;  %v7420_v52 = vld [vmem:[#allocation10 + $0x330] sm:$0xff] }
  0xa4   : > { %11059 = vst [vmem:[#allocation48_spill] sm:$0xff] %v7404_v5  ;;  %1505 = vmatpush.msrb.mxu0 %v1249_v60  ;;  %1525 = vmatpush.msrb.mxu1 %v1313_v61  ;;  %v7426_v49 = vld [vmem:[#allocation10 + $0x220] sm:$0xff]  ;;  %v7430_v4 = vld [vmem:[#allocation10 + $0x10] sm:$0xff]  ;;  %v1237_v60 = vunpack.c.l.bf16 %v7412_v28  ;;  %v1301_v61 = vunpack.c.l.bf16 %v7416_v36 }
  0xa5   : > { %11060 = vst [vmem:[#allocation49_spill] sm:$0xff] %v7406_v9  ;;  %v7428_v2 = vld [vmem:[#allocation10 + $0x320] sm:$0xff]  ;;  %1545 = vmatpush.msrb.mxu2 %v1377_v29  ;;  %1565 = vmatpush.msrb.mxu3 %v1441_v34  ;;  %v7432_v58 = vld [vmem:[#allocation10 + $0x110] sm:$0xff]  ;;  %v1369_v9 = vunpack.c.l.bf16 %v7418_v50 }
  0xa6   : > { %11061 = vst [vmem:[#allocation50_spill] sm:$0xff] %v7408_v10  ;;  %1506 = vmatpush.msrb.mxu0 %v1245_v14  ;;  %1526 = vmatpush.msrb.mxu1 %v1309_v19  ;;  %v1433_v10 = vunpack.c.l.bf16 %v7420_v52  ;;  %v7438_v5 = vld [vmem:[#allocation10 + $0x210] sm:$0xff]  ;;  %v7442_v29 = vld [vmem:[#allocation10] sm:$0xff]  ;;  %v1365_v14 = vunpack.c.l.bf16 %v7426_v49  ;;  %v1429_v19 = vunpack.c.l.bf16 %v7428_v2 }
  0xa7   : > { %11062 = vst [vmem:[#allocation51_spill] sm:$0xff] %v7412_v28  ;;  %v7440_v1 = vld [vmem:[#allocation10 + $0x310] sm:$0xff]  ;;  %1546 = vmatpush.msrb.mxu2 %v1373_v53  ;;  %1566 = vmatpush.msrb.mxu3 %v1437_v57  ;;  %v7444_v34 = vld [vmem:[#allocation10 + $0x100] sm:$0xff] }
  0xa8   : > { %11063 = vst [vmem:[#allocation52_spill] sm:$0xff] %v7416_v36  ;;  %1507 = vmatpush.msrb.mxu0 %v1241_v44  ;;  %1527 = vmatpush.msrb.mxu1 %v1305_v45  ;;  %v1361_v36 = vunpack.c.l.bf16 %v7438_v5  ;;  %v1425_v53 = vunpack.c.l.bf16 %v7440_v1  ;;  %v7452_v57 = vld [vmem:[#allocation10 + $0x200] sm:$0xff]  ;;  %v1293_v44 = vunpack.c.l.bf16 %v7444_v34  ;;  %v1290_v45 = vunpack.c.h.bf16 %v7261_v12 }
  0xa9   : > { %11064 = vst [vmem:[#allocation53_spill] sm:$0xff] %v7418_v50  ;;  %v1233_v50 = vunpack.c.l.bf16 %v7430_v4  ;;  %1547 = vmatpush.msrb.mxu2 %v1369_v9  ;;  %1567 = vmatpush.msrb.mxu3 %v1433_v10  ;;  %v7454_v28 = vld [vmem:[#allocation10 + $0x300] sm:$0xff]  ;;  %v1357_v9 = vunpack.c.l.bf16 %v7452_v57  ;;  %v1482_v12 = vunpack.c.h.bf16 %v7274_v18  ;;  %v1410_v18 = vunpack.c.h.bf16 %v7298_v31 }
  0xaa   : > { %11065 = vst [vmem:[#allocation54_spill] sm:$0xff] %v7420_v52  ;;  %v1297_v52 = vunpack.c.l.bf16 %v7432_v58  ;;  %1508 = vmatpush.msrb.mxu0 %v1237_v60  ;;  %1528 = vmatpush.msrb.mxu1 %v1301_v61  ;;  %v1421_v10 = vunpack.c.l.bf16 %v7454_v28  ;;  %v1350_v60 = vunpack.c.h.bf16 %v7270_v16  ;;  %v1418_v61 = vunpack.c.h.bf16 %v7272_v17 }
  0xab   : > { %11066 = vst [vmem:[#allocation55_spill] sm:$0xff] %v7426_v49  ;;  %v1354_v49 = vunpack.c.h.bf16 %v7263_v13  ;;  %1548 = vmatpush.msrb.mxu2 %v1365_v14  ;;  %1568 = vmatpush.msrb.mxu3 %v1429_v19  ;;  %v1282_v13 = vunpack.c.h.bf16 %v7278_v21  ;;  %v1278_v16 = vunpack.c.h.bf16 %v7290_v27  ;;  %v1342_v17 = vunpack.c.h.bf16 %v7296_v30  ;;  %v11074_v19 = vld [vmem:[#allocation48_spill] sm:$0xff] }
  0xac   : > { %11067 = vst [vmem:[#allocation56_spill] sm:$0xff] %v7428_v2  ;;  %v1229_v2 = vunpack.c.l.bf16 %v7442_v29  ;;  %1509 = vmatpush.msrb.mxu0 %v1233_v50  ;;  %1529 = vmatpush.msrb.mxu1 %v1297_v52  ;;  %v1346_v50 = vunpack.c.h.bf16 %v7280_v22  ;;  %v1414_v52 = vunpack.c.h.bf16 %v7282_v23  ;;  %v1474_v21 = vunpack.c.h.bf16 %v7300_v32 }
  0xad   : > { %11068 = vst [vmem:[#allocation57_spill] sm:$0xff] %v7440_v1  ;;  %v1286_v1 = vunpack.c.h.bf16 %v7268_v15  ;;  %1549 = vmatpush.msrb.mxu2 %v1361_v36  ;;  %1569 = vmatpush.msrb.mxu3 %v1425_v53  ;;  %v1478_v15 = vunpack.c.h.bf16 %v7284_v24  ;;  %v1274_v22 = vunpack.c.h.bf16 %v7304_v35  ;;  %v1338_v23 = vunpack.c.h.bf16 %v7308_v38 }
  0xae   : > { %1510 = vmatpush.msrb.mxu0 %v1229_v2  ;;  %1530 = vmatpush.msrb.mxu1 %v1293_v44  ;;  %v1406_v24 = vunpack.c.h.bf16 %v7310_v39  ;;  %v1470_v27 = vunpack.c.h.bf16 %v7312_v40  ;;  %v1270_v30 = vunpack.c.h.bf16 %v7316_v43  ;;  %v1334_v31 = vunpack.c.h.bf16 %v7320_v46  ;;  %v11072_v2 = vld [vmem:[#allocation46_spill] sm:$0xff] }
  0xaf   : > { %1550 = vmatpush.msrb.mxu2 %v1357_v9  ;;  %1570 = vmatpush.msrb.mxu3 %v1421_v10  ;;  %v1402_v32 = vunpack.c.h.bf16 %v7322_v47  ;;  %v1466_v35 = vunpack.c.h.bf16 %v7324_v48  ;;  %v1266_v38 = vunpack.c.h.bf16 %v7328_v51  ;;  %v1330_v39 = vunpack.c.h.bf16 %v7332_v54  ;;  %v11076_v44 = vld [vmem:[#allocation50_spill] sm:$0xff]  ;;  %v11077_v9 = vld [vmem:[#allocation51_spill] sm:$0xff] }
  0xb0   : > { %1575 = vmatpush.msra.mxu0 %v1290_v45  ;;  %1595 = vmatpush.msra.mxu1 %v1354_v49  ;;  %v1398_v40 = vunpack.c.h.bf16 %v7334_v55  ;;  %v1462_v43 = vunpack.c.h.bf16 %v7336_v56  ;;  %v1262_v46 = vunpack.c.h.bf16 %v7340_v59  ;;  %v1326_v47 = vunpack.c.h.bf16 %v7344_v62 }
  0xb1   : > { %1615 = vmatpush.msra.mxu2 %v1418_v61  ;;  %1635 = vmatpush.msra.mxu3 %v1482_v12  ;;  %v1394_v48 = vunpack.c.h.bf16 %v7346_v63  ;;  %v1458_v51 = vunpack.c.h.bf16 %v7348_v0  ;;  %v1258_v54 = vunpack.c.h.bf16 %v7352_v3  ;;  %v1322_v55 = vunpack.c.h.bf16 %v7356_v6  ;;  %v11079_v12 = vld [vmem:[#allocation53_spill] sm:$0xff] }
  0xb2   : > { %1576 = vmatpush.msra.mxu0 %v1286_v1  ;;  %1596 = vmatpush.msra.mxu1 %v1350_v60  ;;  %v1390_v56 = vunpack.c.h.bf16 %v7358_v7  ;;  %v1454_v59 = vunpack.c.h.bf16 %v7360_v8  ;;  %v1254_v62 = vunpack.c.h.bf16 %v7364_v11  ;;  %v1318_v63 = vunpack.c.h.bf16 %v7368_v20  ;;  %v11069_v20 = vld [vmem:[#allocation43_spill] sm:$0xff]  ;;  %v11070_v1 = vld [vmem:[#allocation44_spill] sm:$0xff] }
  0xb3   : > { %1616 = vmatpush.msra.mxu2 %v1414_v52  ;;  %1636 = vmatpush.msra.mxu3 %v1478_v15  ;;  %v1386_v0 = vunpack.c.h.bf16 %v7370_v25  ;;  %v1450_v3 = vunpack.c.h.bf16 %v7372_v26  ;;  %v1250_v6 = vunpack.c.h.bf16 %v7376_v33  ;;  %v1314_v7 = vunpack.c.h.bf16 %v7380_v37  ;;  %v11071_v26 = vld [vmem:[#allocation45_spill] sm:$0xff]  ;;  %v11073_v37 = vld [vmem:[#allocation47_spill] sm:$0xff]  ;;  %v11078_v60 = vld [vmem:[#allocation52_spill] sm:$0xff] }
  0xb4   : > { %1577 = vmatpush.msra.mxu0 %v1282_v13  ;;  %1597 = vmatpush.msra.mxu1 %v1346_v50  ;;  %v1382_v8 = vunpack.c.h.bf16 %v7382_v41  ;;  %v1446_v11 = vunpack.c.h.bf16 %v7384_v42  ;;  %v1246_v49 = vunpack.c.h.bf16 %v11069_v20  ;;  %v1310_v25 = vunpack.c.h.bf16 %v11070_v1  ;;  %v11075_v42 = vld [vmem:[#allocation49_spill] sm:$0xff]  ;;  %v11080_v50 = vld [vmem:[#allocation54_spill] sm:$0xff] }
  0xb5   : > { %1617 = vmatpush.msra.mxu2 %v1410_v18  ;;  %1637 = vmatpush.msra.mxu3 %v1474_v21  ;;  %v1378_v36 = vunpack.c.h.bf16 %v11071_v26  ;;  %v1442_v33 = vunpack.c.h.bf16 %v11072_v2  ;;  %v1242_v14 = vunpack.c.h.bf16 %v11073_v37  ;;  %v1306_v41 = vunpack.c.h.bf16 %v11074_v19  ;;  %v11082_v21 = vld [vmem:[#allocation56_spill] sm:$0xff]  ;;  %v7552_v20 = vld [vmem:[#allocation10 + $0x2f8] sm:$0xff] }
  0xb6   : > { %1578 = vmatpush.msra.mxu0 %v1278_v16  ;;  %1598 = vmatpush.msra.mxu1 %v1342_v17  ;;  %v1374_v53 = vunpack.c.h.bf16 %v11075_v42  ;;  %v1438_v45 = vunpack.c.h.bf16 %v11076_v44  ;;  %v1238_v10 = vunpack.c.h.bf16 %v11077_v9  ;;  %v1302_v61 = vunpack.c.h.bf16 %v11078_v60  ;;  %v11081_v17 = vld [vmem:[#allocation55_spill] sm:$0xff]  ;;  %v7556_v26 = vld [vmem:[#allocation10 + $0x1b8] sm:$0xff] }
  0xb7   : > { %1618 = vmatpush.msra.mxu2 %v1406_v24  ;;  %1638 = vmatpush.msra.mxu3 %v1470_v27  ;;  %v1370_v13 = vunpack.c.h.bf16 %v11079_v12  ;;  %v1434_v52 = vunpack.c.h.bf16 %v11080_v50  ;;  %v1234_v15 = vunpack.c.h.bf16 %v7430_v4  ;;  %v1298_v16 = vunpack.c.h.bf16 %v7432_v58  ;;  %v7562_v37 = vld [vmem:[#allocation10 + $0x2e8] sm:$0xff]  ;;  %v7583_v12 = vld [vmem:[#allocation10 + $0x3d8] sm:$0xff] }
  0xb8   : > { %1579 = vmatpush.msra.mxu0 %v1274_v22  ;;  %1599 = vmatpush.msra.mxu1 %v1338_v23  ;;  %v1366_v18 = vunpack.c.h.bf16 %v11081_v17  ;;  %v1430_v22 = vunpack.c.h.bf16 %v11082_v21  ;;  %v1230_v23 = vunpack.c.h.bf16 %v7442_v29  ;;  %v1294_v24 = vunpack.c.h.bf16 %v7444_v34  ;;  %v1003_v29 = vld [vmem:[#allocation8] sm:$0xf]  ;;  %v7575_v9 = vld [vmem:[#allocation10 + $0x1a8] sm:$0xff] }
  0xb9   : > { %1619 = vmatpush.msra.mxu2 %v1402_v32  ;;  %1639 = vmatpush.msra.mxu3 %v1466_v35  ;;  %v1362_v27 = vunpack.c.h.bf16 %v7438_v5  ;;  %v1358_v58 = vunpack.c.h.bf16 %v7452_v57  ;;  %v1005_v5 = vperm.slane %v1003_v29, 0  ;;  %v1006_v34 = vperm.slane %v1003_v29, 1  ;;  %v7524_v32 = vld [vmem:[#allocation10 + $0xf8] sm:$0xff]  ;;  %v7592_v17 = vld [vmem:[#allocation10 + $0x2c8] sm:$0xff] }
  0xba   : > { %1580 = vmatpush.msra.mxu0 %v1270_v30  ;;  %1600 = vmatpush.msra.mxu1 %v1334_v31  ;;  %v11083_v30 = vld [vmem:[#allocation57_spill] sm:$0xff]  ;;  %v1422_v31 = vunpack.c.h.bf16 %v7454_v28  ;;  %v7528_v28 = vld [vmem:[#allocation10 + $0xe8] sm:$0xff]  ;;  %v1339_v44 = vunpack.c.l.bf16 %v7556_v26  ;;  %v1415_v60 = vunpack.c.l.bf16 %v7562_v37 }
  0xbb   : > { %1620 = vmatpush.msra.mxu2 %v1398_v40  ;;  %1640 = vmatpush.msra.mxu3 %v1462_v43  ;;  %v1426_v4 = vunpack.c.h.bf16 %v11083_v30  ;;  %v7526_v35 = vld [vmem:[#allocation10 + $0x1f8] sm:$0xff]  ;;  %v7530_v43 = vld [vmem:[#allocation10 + $0x1e8] sm:$0xff] }
  0xbc   : > { %1581 = vmatpush.msra.mxu0 %v1266_v38  ;;  %1601 = vmatpush.msra.mxu1 %v1330_v39  ;;  %v7586_v50 = vld [vmem:[#allocation10 + $0x98] sm:$0xff]  ;;  %v7603_v30 = vld [vmem:[#allocation10 + $0x188] sm:$0xff] }
  0xbd   : > { %1621 = vmatpush.msra.mxu2 %v1394_v48  ;;  %1641 = vmatpush.msra.mxu3 %v1458_v51 }
  0xbe   : > { %1582 = vmatpush.msra.mxu0 %v1262_v46  ;;  %1602 = vmatpush.msra.mxu1 %v1326_v47  ;;  %v1291_v46 = vunpack.c.l.bf16 %v7524_v32  ;;  %v1355_v47 = vunpack.c.l.bf16 %v7526_v35 }
  0xbf   : > { %1622 = vmatpush.msra.mxu2 %v1390_v56  ;;  %1642 = vmatpush.msra.mxu3 %v1454_v59  ;;  %v1007_v56 = vperm.slane %v1003_v29, 2  ;;  %v1008_v59 = vperm.slane %v1003_v29, 3  ;;  %v7610_v29 = vld [vmem:[#allocation10 + $0x3b8] sm:$0xff] }
  0xc0   : > { %1583 = vmatpush.msra.mxu0 %v1258_v54  ;;  %1603 = vmatpush.msra.mxu1 %v1322_v55  ;;  %v7538_v54 = vld [vmem:[#allocation10 + $0xd8] sm:$0xff] }
  0xc1   : > { %1623 = vmatpush.msra.mxu2 %v1386_v0  ;;  %1643 = vmatpush.msra.mxu3 %v1450_v3  ;;  %v7540_v55 = vld [vmem:[#allocation10 + $0x1d8] sm:$0xff]  ;;  %v1283_v0 = vunpack.c.l.bf16 %v7538_v54 }
  0xc2   : > { %1584 = vmatpush.msra.mxu0 %v1254_v62  ;;  %1604 = vmatpush.msra.mxu1 %v1318_v63  ;;  %v1287_v62 = vunpack.c.l.bf16 %v7528_v28  ;;  %v1351_v63 = vunpack.c.l.bf16 %v7530_v43  ;;  %v1347_v3 = vunpack.c.l.bf16 %v7540_v55 }
  0xc3   : > { %1624 = vmatpush.msra.mxu2 %v1382_v8  ;;  %1644 = vmatpush.msra.mxu3 %v1446_v11 }
  0xc4   : > { %1585 = vmatpush.msra.mxu0 %v1250_v6  ;;  %1605 = vmatpush.msra.mxu1 %v1314_v7  ;;  %v7548_v6 = vld [vmem:[#allocation10 + $0xc8] sm:$0xff] }
  0xc5   : > { %1625 = vmatpush.msra.mxu2 %v1378_v36  ;;  %1645 = vmatpush.msra.mxu3 %v1442_v33  ;;  %v7550_v7 = vld [vmem:[#allocation10 + $0x1c8] sm:$0xff]  ;;  %v1279_v36 = vunpack.c.l.bf16 %v7548_v6  ;;  %v7560_v33 = vld [vmem:[#allocation10 + $0xb8] sm:$0xff] }
  0xc6   : > { %1586 = vmatpush.msra.mxu0 %v1246_v49  ;;  %1606 = vmatpush.msra.mxu1 %v1310_v25  ;;  %v7554_v49 = vld [vmem:[#allocation10 + $0x3f8] sm:$0xff]  ;;  %v1343_v2 = vunpack.c.l.bf16 %v7550_v7 }
  0xc7   : > { %1626 = vmatpush.msra.mxu2 %v1374_v53  ;;  %1646 = vmatpush.msra.mxu3 %v1438_v45  ;;  %v1483_v42 = vunpack.c.l.bf16 %v7554_v49  ;;  %v7570_v53 = vld [vmem:[#allocation10 + $0x3e8] sm:$0xff] }
  0xc8   : > { %1587 = vmatpush.msra.mxu0 %v1242_v14  ;;  %1607 = vmatpush.msra.mxu1 %v1306_v41  ;;  %v1419_v41 = vunpack.c.l.bf16 %v7552_v20  ;;  %v7573_v45 = vld [vmem:[#allocation10 + $0xa8] sm:$0xff] }
  0xc9   : > { %1627 = vmatpush.msra.mxu2 %v1370_v13  ;;  %1647 = vmatpush.msra.mxu3 %v1434_v52  ;;  %v1479_v13 = vunpack.c.l.bf16 %v7570_v53  ;;  %v7588_v52 = vld [vmem:[#allocation10 + $0x198] sm:$0xff] }
  0xca   : > { %1588 = vmatpush.msra.mxu0 %v1238_v10  ;;  %1608 = vmatpush.msra.mxu1 %v1302_v61  ;;  %v1275_v10 = vunpack.c.l.bf16 %v7560_v33  ;;  %v7581_v61 = vld [vmem:[#allocation10 + $0x2d8] sm:$0xff] }
  0xcb   : > { %1628 = vmatpush.msra.mxu2 %v1366_v18  ;;  %1648 = vmatpush.msra.mxu3 %v1430_v22  ;;  %v7594_v18 = vld [vmem:[#allocation10 + $0x3c8] sm:$0xff]  ;;  %v1411_v21 = vunpack.c.l.bf16 %v7581_v61  ;;  %v1475_v22 = vunpack.c.l.bf16 %v7583_v12 }
  0xcc   : > { %1589 = vmatpush.msra.mxu0 %v1234_v15  ;;  %1609 = vmatpush.msra.mxu1 %v1298_v16  ;;  %v1271_v15 = vunpack.c.l.bf16 %v7573_v45  ;;  %v1335_v16 = vunpack.c.l.bf16 %v7575_v9 }
  0xcd   : > { %1629 = vmatpush.msra.mxu2 %v1362_v27  ;;  %1649 = vmatpush.msra.mxu3 %v1426_v4  ;;  %v7601_v27 = vld [vmem:[#allocation10 + $0x88] sm:$0xff]  ;;  %v1407_v4 = vunpack.c.l.bf16 %v7592_v17 }
  0xce   : > { %1590 = vmatpush.msra.mxu0 %v1230_v23  ;;  %1610 = vmatpush.msra.mxu1 %v1294_v24  ;;  %v1267_v23 = vunpack.c.l.bf16 %v7586_v50  ;;  %v1331_v24 = vunpack.c.l.bf16 %v7588_v52 }
  0xcf   : > { %1630 = vmatpush.msra.mxu2 %v1358_v58  ;;  %1650 = vmatpush.msra.mxu3 %v1422_v31  ;;  %v1471_v58 = vunpack.c.l.bf16 %v7594_v18  ;;  %v7608_v31 = vld [vmem:[#allocation10 + $0x2b8] sm:$0xff] }
 0x10b   : > { %v1034_v38 = vpop.f32.mrf.mxu0  ;;  %v1054_v39 = vpop.f32.mrf.mxu1 }
 0x10c   : > { %v1035_v57 = vadd.f32 %v1034_v38, %v1005_v5  ;;  %v1055_v40 = vadd.f32 %v1054_v39, %v1006_v34  ;;  %v7612_v5 = vld [vmem:[#allocation10 + $0x78] sm:$0xff]  ;;  %v1263_v38 = vunpack.c.l.bf16 %v7601_v27  ;;  %v1327_v39 = vunpack.c.l.bf16 %v7603_v30 }
 0x10d   : > { %v7614_v34 = vld [vmem:[#allocation10 + $0x178] sm:$0xff] }
 0x10e   : > { %v7534_v48 = vmax.f32 %v1035_v57, 0.0  ;;  %v7536_v51 = vmax.f32 %v1055_v40, 0.0  ;;  %v7618_v57 = vld [vmem:[#allocation10 + $0x2a8] sm:$0xff] }
 0x10f   : > { %v7620_v40 = vld [vmem:[#allocation10 + $0x3a8] sm:$0xff] }
 0x110   : > { %1511 = vmatmul.f32.vlgmr.msrb.gmra.mxu0 %v7534_v48  ;;  %1531 = vmatmul.f32.vlgmr.msrb.gmra.mxu1 %v7536_v51 }
 0x111   : > { %1655 = vmatpush.msrb.mxu0 %v1291_v46  ;;  %1675 = vmatpush.msrb.mxu1 %v1355_v47  ;;  %v1403_v46 = vunpack.c.l.bf16 %v7608_v31  ;;  %v1467_v47 = vunpack.c.l.bf16 %v7610_v29 }
 0x112   : > { %v1074_v8 = vpop.f32.mrf.mxu2  ;;  %v1094_v11 = vpop.f32.mrf.mxu3 }
 0x113   : > { %v1075_v1 = vadd.f32 %v1074_v8, %v1007_v56  ;;  %v1095_v25 = vadd.f32 %v1094_v11, %v1008_v59  ;;  %1656 = vmatpush.msrb.mxu0 %v1287_v62  ;;  %1676 = vmatpush.msrb.mxu1 %v1351_v63  ;;  %v7624_v56 = vld [vmem:[#allocation10 + $0x68] sm:$0xff]  ;;  %v1259_v62 = vunpack.c.l.bf16 %v7612_v5  ;;  %v1323_v63 = vunpack.c.l.bf16 %v7614_v34 }
 0x114   : > { %v7626_v59 = vld [vmem:[#allocation10 + $0x168] sm:$0xff]  ;;  %v1399_v8 = vunpack.c.l.bf16 %v7618_v57  ;;  %v1463_v11 = vunpack.c.l.bf16 %v7620_v40 }
 0x115   : > { %v7564_v14 = vmax.f32 %v1075_v1, 0.0  ;;  %v7566_v19 = vmax.f32 %v1095_v25, 0.0  ;;  %1657 = vmatpush.msrb.mxu0 %v1283_v0  ;;  %1677 = vmatpush.msrb.mxu1 %v1347_v3  ;;  %v7630_v0 = vld [vmem:[#allocation10 + $0x298] sm:$0xff] }
 0x116   : > { %v7632_v3 = vld [vmem:[#allocation10 + $0x398] sm:$0xff] }
 0x117   : > { %1551 = vmatmul.f32.vlgmr.msrb.gmra.mxu2 %v7564_v14  ;;  %1571 = vmatmul.f32.vlgmr.msrb.gmra.mxu3 %v7566_v19  ;;  %v7638_v1 = vld [vmem:[#allocation10 + $0x58] sm:$0xff] }
 0x118   : > { %1658 = vmatpush.msrb.mxu0 %v1279_v36  ;;  %1678 = vmatpush.msrb.mxu1 %v1343_v2  ;;  %v7640_v25 = vld [vmem:[#allocation10 + $0x158] sm:$0xff]  ;;  %v1255_v36 = vunpack.c.l.bf16 %v7624_v56  ;;  %v1319_v2 = vunpack.c.l.bf16 %v7626_v59 }
 0x119   : > { %1695 = vmatpush.msrb.mxu2 %v1419_v41  ;;  %1715 = vmatpush.msrb.mxu3 %v1483_v42  ;;  %v7644_v41 = vld [vmem:[#allocation10 + $0x288] sm:$0xff] }
 0x11a   : > { %1591 = vmatmul.f32.vlgmr.msra.gmra.mxu0 %v7534_v48  ;;  %1679 = vmatpush.msrb.mxu1 %v1339_v44  ;;  %v7646_v42 = vld [vmem:[#allocation10 + $0x388] sm:$0xff]  ;;  %v1395_v44 = vunpack.c.l.bf16 %v7630_v0 }
 0x11b   : > { %1659 = vmatpush.msrb.mxu0 %v1275_v10  ;;  %1696 = vmatpush.msrb.mxu2 %v1415_v60  ;;  %v1459_v10 = vunpack.c.l.bf16 %v7632_v3  ;;  %v7650_v60 = vld [vmem:[#allocation10 + $0x48] sm:$0xff] }
 0x11c   : > { %1716 = vmatpush.msrb.mxu3 %v1479_v13  ;;  %1611 = vmatmul.f32.vlgmr.msra.gmra.mxu1 %v7536_v51  ;;  %11084 = vst [vmem:[#allocation43_spill] sm:$0xff] %v7650_v60  ;;  %v7652_v13 = vld [vmem:[#allocation10 + $0x148] sm:$0xff] }
 0x11d   : > { %1660 = vmatpush.msrb.mxu0 %v1271_v15  ;;  %1680 = vmatpush.msrb.mxu1 %v1335_v16  ;;  %11085 = vst [vmem:[#allocation44_spill] sm:$0xff] %v7652_v13  ;;  %v1251_v15 = vunpack.c.l.bf16 %v7638_v1  ;;  %v1315_v16 = vunpack.c.l.bf16 %v7640_v25 }
 0x11e   : > { %1697 = vmatpush.msrb.mxu2 %v1411_v21  ;;  %1717 = vmatpush.msrb.mxu3 %v1475_v22  ;;  %v7656_v21 = vld [vmem:[#allocation10 + $0x278] sm:$0xff] }
 0x11f   : > { %1661 = vmatpush.msrb.mxu0 %v1267_v23  ;;  %1681 = vmatpush.msrb.mxu1 %v1331_v24  ;;  %11086 = vst [vmem:[#allocation45_spill] sm:$0xff] %v7656_v21  ;;  %v7658_v22 = vld [vmem:[#allocation10 + $0x378] sm:$0xff]  ;;  %v1391_v23 = vunpack.c.l.bf16 %v7644_v41  ;;  %v1455_v24 = vunpack.c.l.bf16 %v7646_v42 }
 0x120   : > { %1698 = vmatpush.msrb.mxu2 %v1407_v4  ;;  %1718 = vmatpush.msrb.mxu3 %v1471_v58  ;;  %11087 = vst [vmem:[#allocation46_spill] sm:$0xff] %v7658_v22  ;;  %v7662_v4 = vld [vmem:[#allocation10 + $0x38] sm:$0xff] }
 0x121   : > { %1631 = vmatmul.f32.vlgmr.msra.gmra.mxu2 %v7564_v14  ;;  %1651 = vmatmul.f32.vlgmr.msra.gmra.mxu3 %v7566_v19  ;;  %11088 = vst [vmem:[#allocation47_spill] sm:$0xff] %v7662_v4  ;;  %v7664_v58 = vld [vmem:[#allocation10 + $0x138] sm:$0xff] }
 0x122   : > { %1662 = vmatpush.msrb.mxu0 %v1263_v38  ;;  %1682 = vmatpush.msrb.mxu1 %v1327_v39  ;;  %11089 = vst [vmem:[#allocation48_spill] sm:$0xff] %v7664_v58  ;;  %v1247_v38 = vunpack.c.l.bf16 %v7650_v60  ;;  %v1311_v39 = vunpack.c.l.bf16 %v7652_v13  ;;  %v7680_v13 = vld [vmem:[#allocation10 + $0x258] sm:$0xff] }
 0x123   : > { %1699 = vmatpush.msrb.mxu2 %v1403_v46  ;;  %1719 = vmatpush.msrb.mxu3 %v1467_v47  ;;  %v7668_v46 = vld [vmem:[#allocation10 + $0x268] sm:$0xff]  ;;  %v7682_v60 = vld [vmem:[#allocation10 + $0x358] sm:$0xff] }
 0x124   : > { %1663 = vmatpush.msrb.mxu0 %v1259_v62  ;;  %1683 = vmatpush.msrb.mxu1 %v1323_v63  ;;  %11090 = vst [vmem:[#allocation49_spill] sm:$0xff] %v7668_v46  ;;  %v7670_v47 = vld [vmem:[#allocation10 + $0x368] sm:$0xff]  ;;  %v1387_v62 = vunpack.c.l.bf16 %v7656_v21  ;;  %v1451_v63 = vunpack.c.l.bf16 %v7658_v22  ;;  %v7686_v22 = vld [vmem:[#allocation10 + $0x18] sm:$0xff] }
 0x125   : > { %1700 = vmatpush.msrb.mxu2 %v1399_v8  ;;  %1720 = vmatpush.msrb.mxu3 %v1463_v11  ;;  %11091 = vst [vmem:[#allocation50_spill] sm:$0xff] %v7670_v47  ;;  %v7674_v8 = vld [vmem:[#allocation10 + $0x28] sm:$0xff]  ;;  %v7688_v21 = vld [vmem:[#allocation10 + $0x118] sm:$0xff] }
 0x126   : > { %1664 = vmatpush.msrb.mxu0 %v1255_v36  ;;  %1684 = vmatpush.msrb.mxu1 %v1319_v2  ;;  %11092 = vst [vmem:[#allocation51_spill] sm:$0xff] %v7674_v8  ;;  %v7676_v11 = vld [vmem:[#allocation10 + $0x128] sm:$0xff]  ;;  %v1243_v36 = vunpack.c.l.bf16 %v7662_v4  ;;  %v1307_v2 = vunpack.c.l.bf16 %v7664_v58 }
 0x127   : > { %1701 = vmatpush.msrb.mxu2 %v1395_v44  ;;  %1721 = vmatpush.msrb.mxu3 %v1459_v10  ;;  %11093 = vst [vmem:[#allocation52_spill] sm:$0xff] %v7676_v11  ;;  %v1383_v44 = vunpack.c.l.bf16 %v7668_v46  ;;  %v1447_v10 = vunpack.c.l.bf16 %v7670_v47  ;;  %v7692_v58 = vld [vmem:[#allocation10 + $0x248] sm:$0xff] }
 0x128   : > { %1665 = vmatpush.msrb.mxu0 %v1251_v15  ;;  %1685 = vmatpush.msrb.mxu1 %v1315_v16  ;;  %11094 = vst [vmem:[#allocation53_spill] sm:$0xff] %v7682_v60  ;;  %v1239_v15 = vunpack.c.l.bf16 %v7674_v8  ;;  %v1303_v16 = vunpack.c.l.bf16 %v7676_v11  ;;  %v7694_v4 = vld [vmem:[#allocation10 + $0x348] sm:$0xff]  ;;  %v7704_v11 = vld [vmem:[#allocation10 + $0x238] sm:$0xff] }
 0x129   : > { %1702 = vmatpush.msrb.mxu2 %v1391_v23  ;;  %1722 = vmatpush.msrb.mxu3 %v1455_v24  ;;  %11095 = vst [vmem:[#allocation54_spill] sm:$0xff] %v7686_v22  ;;  %v1379_v23 = vunpack.c.l.bf16 %v7680_v13  ;;  %v1443_v24 = vunpack.c.l.bf16 %v7682_v60  ;;  %v7698_v47 = vld [vmem:[#allocation10 + $0x8] sm:$0xff]  ;;  %v7706_v8 = vld [vmem:[#allocation10 + $0x338] sm:$0xff] }
 0x12a   : > { %11096 = vst [vmem:[#allocation55_spill] sm:$0xff] %v7688_v21  ;;  %1666 = vmatpush.msrb.mxu0 %v1247_v38  ;;  %1686 = vmatpush.msrb.mxu1 %v1311_v39  ;;  %v7700_v46 = vld [vmem:[#allocation10 + $0x108] sm:$0xff]  ;;  %v1235_v38 = vunpack.c.l.bf16 %v7686_v22  ;;  %v1299_v39 = vunpack.c.l.bf16 %v7688_v21  ;;  %v1231_v60 = vunpack.c.l.bf16 %v7698_v47  ;;  %v1435_v21 = vunpack.c.l.bf16 %v7706_v8 }
 0x12b   : > { %1703 = vmatpush.msrb.mxu2 %v1387_v62  ;;  %1723 = vmatpush.msrb.mxu3 %v1451_v63  ;;  %11097 = vst [vmem:[#allocation56_spill] sm:$0xff] %v7706_v8  ;;  %v1375_v62 = vunpack.c.l.bf16 %v7692_v58  ;;  %v1439_v63 = vunpack.c.l.bf16 %v7694_v4  ;;  %v7714_v22 = vld [vmem:[#allocation10 + $0x228] sm:$0xff] }
 0x12c   : > { %1667 = vmatpush.msrb.mxu0 %v1243_v36  ;;  %1687 = vmatpush.msrb.mxu1 %v1307_v2  ;;  %v1295_v36 = vunpack.c.l.bf16 %v7700_v46  ;;  %v1371_v2 = vunpack.c.l.bf16 %v7704_v11 }
 0x12d   : > { %1704 = vmatpush.msrb.mxu2 %v1383_v44  ;;  %1724 = vmatpush.msrb.mxu3 %v1447_v10  ;;  %v7716_v44 = vld [vmem:[#allocation10 + $0x328] sm:$0xff]  ;;  %v1292_v10 = vunpack.c.h.bf16 %v7524_v32 }
 0x12e   : > { %1668 = vmatpush.msrb.mxu0 %v1239_v15  ;;  %1688 = vmatpush.msrb.mxu1 %v1303_v16  ;;  %v1356_v15 = vunpack.c.h.bf16 %v7526_v35  ;;  %v7720_v16 = vld [vmem:[#allocation10 + $0x218] sm:$0xff]  ;;  %v1431_v8 = vunpack.c.l.bf16 %v7716_v44  ;;  %v7730_v32 = vld [vmem:[#allocation10 + $0x308] sm:$0xff] }
 0x12f   : > { %1705 = vmatpush.msrb.mxu2 %v1379_v23  ;;  %1725 = vmatpush.msrb.mxu3 %v1443_v24  ;;  %v7722_v23 = vld [vmem:[#allocation10 + $0x318] sm:$0xff]  ;;  %v1367_v24 = vunpack.c.l.bf16 %v7714_v22  ;;  %v1363_v35 = vunpack.c.l.bf16 %v7720_v16 }
 0x130   : > { %1669 = vmatpush.msrb.mxu0 %v1235_v38  ;;  %1689 = vmatpush.msrb.mxu1 %v1299_v39  ;;  %v1288_v38 = vunpack.c.h.bf16 %v7528_v28  ;;  %v1352_v39 = vunpack.c.h.bf16 %v7530_v43  ;;  %v1348_v28 = vunpack.c.h.bf16 %v7540_v55  ;;  %v1484_v55 = vunpack.c.h.bf16 %v7554_v49 }
 0x131   : > { %1706 = vmatpush.msrb.mxu2 %v1375_v62  ;;  %1726 = vmatpush.msrb.mxu3 %v1439_v63  ;;  %v7728_v62 = vld [vmem:[#allocation10 + $0x208] sm:$0xff]  ;;  %v1423_v63 = vunpack.c.l.bf16 %v7730_v32  ;;  %v1336_v49 = vunpack.c.h.bf16 %v7575_v9  ;;  %v1264_v9 = vunpack.c.h.bf16 %v7601_v27  ;;  %v1464_v27 = vunpack.c.h.bf16 %v7620_v40 }
 0x132   : > { %1670 = vmatpush.msrb.mxu0 %v1231_v60  ;;  %1690 = vmatpush.msrb.mxu1 %v1295_v36  ;;  %v1427_v60 = vunpack.c.l.bf16 %v7722_v23  ;;  %v1359_v43 = vunpack.c.l.bf16 %v7728_v62  ;;  %v1280_v36 = vunpack.c.h.bf16 %v7548_v6  ;;  %v1416_v6 = vunpack.c.h.bf16 %v7562_v37 }
 0x133   : > { %1707 = vmatpush.msrb.mxu2 %v1371_v2  ;;  %1727 = vmatpush.msrb.mxu3 %v1435_v21  ;;  %v1284_v21 = vunpack.c.h.bf16 %v7538_v54  ;;  %v1344_v2 = vunpack.c.h.bf16 %v7550_v7  ;;  %v1420_v54 = vunpack.c.h.bf16 %v7552_v20  ;;  %v1480_v7 = vunpack.c.h.bf16 %v7570_v53 }
 0x134   : > { %1671 = vmatmul.f32.vlgmr.msrb.gmra.mxu0 %v7534_v48  ;;  %1691 = vmatmul.f32.vlgmr.msrb.gmra.mxu1 %v7536_v51  ;;  %v1272_v20 = vunpack.c.h.bf16 %v7573_v45  ;;  %v1332_v37 = vunpack.c.h.bf16 %v7588_v52  ;;  %v1408_v53 = vunpack.c.h.bf16 %v7592_v17  ;;  %v1472_v45 = vunpack.c.h.bf16 %v7594_v18 }
 0x135   : > { %1735 = vmatpush.msra.mxu0 %v1292_v10  ;;  %1755 = vmatpush.msra.mxu1 %v1356_v15  ;;  %v1340_v10 = vunpack.c.h.bf16 %v7556_v26  ;;  %v1476_v26 = vunpack.c.h.bf16 %v7583_v12  ;;  %v1268_v15 = vunpack.c.h.bf16 %v7586_v50  ;;  %v1404_v12 = vunpack.c.h.bf16 %v7608_v31 }
 0x136   : > { %1708 = vmatpush.msrb.mxu2 %v1367_v24  ;;  %1728 = vmatpush.msrb.mxu3 %v1431_v8  ;;  %v1276_v8 = vunpack.c.h.bf16 %v7560_v33  ;;  %v1412_v33 = vunpack.c.h.bf16 %v7581_v61  ;;  %v1328_v61 = vunpack.c.h.bf16 %v7603_v30  ;;  %v1468_v50 = vunpack.c.h.bf16 %v7610_v29 }
 0x137   : > { %1736 = vmatpush.msra.mxu0 %v1288_v38  ;;  %1756 = vmatpush.msra.mxu1 %v1352_v39  ;;  %v1260_v52 = vunpack.c.h.bf16 %v7612_v5  ;;  %v1324_v17 = vunpack.c.h.bf16 %v7614_v34  ;;  %v1400_v18 = vunpack.c.h.bf16 %v7618_v57  ;;  %v1256_v30 = vunpack.c.h.bf16 %v7624_v56  ;;  %v11099_v38 = vld [vmem:[#allocation44_spill] sm:$0xff] }
 0x138   : > { %1709 = vmatpush.msrb.mxu2 %v1363_v35  ;;  %1729 = vmatpush.msrb.mxu3 %v1427_v60  ;;  %v1320_v31 = vunpack.c.h.bf16 %v7626_v59  ;;  %v1396_v29 = vunpack.c.h.bf16 %v7630_v0  ;;  %v1460_v5 = vunpack.c.h.bf16 %v7632_v3  ;;  %v1252_v34 = vunpack.c.h.bf16 %v7638_v1  ;;  %v11098_v59 = vld [vmem:[#allocation43_spill] sm:$0xff]  ;;  %v11100_v3 = vld [vmem:[#allocation45_spill] sm:$0xff]  ;;  %v11101_v35 = vld [vmem:[#allocation46_spill] sm:$0xff] }
 0x139   : > { %1737 = vmatpush.msra.mxu0 %v1284_v21  ;;  %1757 = vmatpush.msra.mxu1 %v1348_v28  ;;  %v1316_v57 = vunpack.c.h.bf16 %v7640_v25  ;;  %v1392_v40 = vunpack.c.h.bf16 %v7644_v41  ;;  %v1456_v56 = vunpack.c.h.bf16 %v7646_v42  ;;  %v1248_v24 = vunpack.c.h.bf16 %v11098_v59  ;;  %v11102_v25 = vld [vmem:[#allocation47_spill] sm:$0xff]  ;;  %v11103_v21 = vld [vmem:[#allocation48_spill] sm:$0xff]  ;;  %v11104_v42 = vld [vmem:[#allocation49_spill] sm:$0xff] }
 0x13a   : > { %1710 = vmatpush.msrb.mxu2 %v1359_v43  ;;  %1730 = vmatpush.msrb.mxu3 %v1423_v63  ;;  %v1312_v0 = vunpack.c.h.bf16 %v11099_v38  ;;  %v1388_v39 = vunpack.c.h.bf16 %v11100_v3  ;;  %v1452_v1 = vunpack.c.h.bf16 %v11101_v35  ;;  %v1244_v60 = vunpack.c.h.bf16 %v11102_v25  ;;  %v11105_v43 = vld [vmem:[#allocation50_spill] sm:$0xff]  ;;  %v7839_v59 = vld [vmem:[#allocation13 + $0xa0] sm:$0xff]  ;;  %v7848_v35 = vld [vmem:[#allocation13 + $0x90] sm:$0xff] }
 0x13b   : > { %1711 = vmatmul.f32.vlgmr.msrb.gmra.mxu2 %v7564_v14  ;;  %1731 = vmatmul.f32.vlgmr.msrb.gmra.mxu3 %v7566_v19  ;;  %v1308_v41 = vunpack.c.h.bf16 %v11103_v21  ;;  %v1384_v28 = vunpack.c.h.bf16 %v11104_v42  ;;  %v1448_v63 = vunpack.c.h.bf16 %v11105_v43  ;;  %v7857_v21 = vld [vmem:[#allocation13 + $0x80] sm:$0xff] }
 0x13c   : > { %1738 = vmatpush.msra.mxu0 %v1280_v36  ;;  %1758 = vmatpush.msra.mxu1 %v1344_v2  ;;  %v11106_v36 = vld [vmem:[#allocation51_spill] sm:$0xff] }
 0x13d   : > { %1775 = vmatpush.msra.mxu2 %v1420_v54  ;;  %1795 = vmatpush.msra.mxu3 %v1484_v55  ;;  %v1240_v2 = vunpack.c.h.bf16 %v11106_v36  ;;  %v11107_v54 = vld [vmem:[#allocation52_spill] sm:$0xff]  ;;  %v7866_v36 = vld [vmem:[#allocation13 + $0x70] sm:$0xff] }
 0x13e   : > { %1739 = vmatpush.msra.mxu0 %v1276_v8  ;;  %1759 = vmatpush.msra.mxu1 %v1340_v10  ;;  %v1304_v55 = vunpack.c.h.bf16 %v11107_v54  ;;  %v1380_v8 = vunpack.c.h.bf16 %v7680_v13  ;;  %v11108_v10 = vld [vmem:[#allocation53_spill] sm:$0xff]  ;;  %v1296_v13 = vunpack.c.h.bf16 %v7700_v46  ;;  %v7802_v46 = vld [vmem:[#allocation13 + $0x1e0] sm:$0xff] }
 0x13f   : > { %1776 = vmatpush.msra.mxu2 %v1416_v6  ;;  %1796 = vmatpush.msra.mxu3 %v1480_v7  ;;  %v1444_v6 = vunpack.c.h.bf16 %v11108_v10  ;;  %v11109_v7 = vld [vmem:[#allocation54_spill] sm:$0xff]  ;;  %v7873_v10 = vld [vmem:[#allocation13 + $0x60] sm:$0xff] }
 0x140   : > { %1740 = vmatpush.msra.mxu0 %v1272_v20  ;;  %1760 = vmatpush.msra.mxu1 %v1336_v49  ;;  %v1236_v20 = vunpack.c.h.bf16 %v11109_v7  ;;  %v11110_v49 = vld [vmem:[#allocation55_spill] sm:$0xff] }
 0x141   : > { %1777 = vmatpush.msra.mxu2 %v1412_v33  ;;  %1797 = vmatpush.msra.mxu3 %v1476_v26  ;;  %v1300_v33 = vunpack.c.h.bf16 %v11110_v49  ;;  %v1376_v26 = vunpack.c.h.bf16 %v7692_v58  ;;  %v1432_v58 = vunpack.c.h.bf16 %v7716_v44  ;;  %v7811_v44 = vld [vmem:[#allocation13 + $0xd0] sm:$0xff] }
 0x142   : > { %1741 = vmatpush.msra.mxu0 %v1268_v15  ;;  %1761 = vmatpush.msra.mxu1 %v1332_v37  ;;  %v1440_v15 = vunpack.c.h.bf16 %v7694_v4  ;;  %v1232_v37 = vunpack.c.h.bf16 %v7698_v47  ;;  %v1368_v4 = vunpack.c.h.bf16 %v7714_v22  ;;  %v7800_v47 = vld [vmem:[#allocation13 + $0xe0] sm:$0xff] }
 0x143   : > { %1778 = vmatpush.msra.mxu2 %v1408_v53  ;;  %1798 = vmatpush.msra.mxu3 %v1472_v45  ;;  %v1372_v53 = vunpack.c.h.bf16 %v7704_v11  ;;  %v11111_v45 = vld [vmem:[#allocation56_spill] sm:$0xff]  ;;  %v2003_v22 = vunpack.c.l.bf16 %v7800_v47 }
 0x144   : > { %1742 = vmatpush.msra.mxu0 %v1264_v9  ;;  %1762 = vmatpush.msra.mxu1 %v1328_v61  ;;  %v1436_v9 = vunpack.c.h.bf16 %v11111_v45  ;;  %v7794_v61 = vld [vmem:[#allocation13 + $0xf0] sm:$0xff] }
 0x145   : > { %1779 = vmatpush.msra.mxu2 %v1404_v12  ;;  %1799 = vmatpush.msra.mxu3 %v1468_v50  ;;  %v7796_v12 = vld [vmem:[#allocation13 + $0x1f0] sm:$0xff]  ;;  %v2007_v11 = vunpack.c.l.bf16 %v7794_v61 }
 0x146   : > { %1743 = vmatpush.msra.mxu0 %v1260_v52  ;;  %1763 = vmatpush.msra.mxu1 %v1324_v17  ;;  %v2071_v50 = vunpack.c.l.bf16 %v7796_v12  ;;  %v1364_v52 = vunpack.c.h.bf16 %v7720_v16  ;;  %v1428_v17 = vunpack.c.h.bf16 %v7722_v23  ;;  %v1424_v16 = vunpack.c.h.bf16 %v7730_v32  ;;  %v7830_v32 = vld [vmem:[#allocation13 + $0x1b0] sm:$0xff] }
 0x147   : > { %1780 = vmatpush.msra.mxu2 %v1400_v18  ;;  %1800 = vmatpush.msra.mxu3 %v1464_v27  ;;  %v2067_v18 = vunpack.c.l.bf16 %v7802_v46  ;;  %v7814_v27 = vld [vmem:[#allocation13 + $0x1d0] sm:$0xff]  ;;  %v1999_v23 = vunpack.c.l.bf16 %v7811_v44  ;;  %v2055_v3 = vunpack.c.l.bf16 %v7830_v32 }
 0x148   : > { %1744 = vmatpush.msra.mxu0 %v1256_v30  ;;  %1764 = vmatpush.msra.mxu1 %v1320_v31  ;;  %v1360_v30 = vunpack.c.h.bf16 %v7728_v62  ;;  %v7818_v31 = vld [vmem:[#allocation13 + $0x2f0] sm:$0xff] }
 0x149   : > { %1781 = vmatpush.msra.mxu2 %v1396_v29  ;;  %1801 = vmatpush.msra.mxu3 %v1460_v5  ;;  %v2063_v29 = vunpack.c.l.bf16 %v7814_v27  ;;  %v7826_v5 = vld [vmem:[#allocation13 + $0x2e0] sm:$0xff]  ;;  %v7828_v62 = vld [vmem:[#allocation13 + $0xb0] sm:$0xff] }
 0x14a   : > { %1745 = vmatpush.msra.mxu0 %v1252_v34  ;;  %1765 = vmatpush.msra.mxu1 %v1316_v57  ;;  %v2135_v34 = vunpack.c.l.bf16 %v7818_v31  ;;  %v2131_v38 = vunpack.c.l.bf16 %v7826_v5 }
 0x14b   : > { %1782 = vmatpush.msra.mxu2 %v1392_v40  ;;  %1802 = vmatpush.msra.mxu3 %v1456_v56  ;;  %v7835_v56 = vld [vmem:[#allocation13 + $0x2d0] sm:$0xff] }
 0x14c   : > { %1746 = vmatpush.msra.mxu0 %v1248_v24  ;;  %1766 = vmatpush.msra.mxu1 %v1312_v0  ;;  %v7841_v24 = vld [vmem:[#allocation13 + $0x1a0] sm:$0xff]  ;;  %v1991_v0 = vunpack.c.l.bf16 %v7828_v62 }
 0x14d   : > { %1783 = vmatpush.msra.mxu2 %v1388_v39  ;;  %1803 = vmatpush.msra.mxu3 %v1452_v1  ;;  %v7846_v39 = vld [vmem:[#allocation13 + $0x2c0] sm:$0xff]  ;;  %v7850_v1 = vld [vmem:[#allocation13 + $0x190] sm:$0xff]  ;;  %v2051_v25 = vunpack.c.l.bf16 %v7841_v24 }
 0x14e   : > { %1747 = vmatpush.msra.mxu0 %v1244_v60  ;;  %1767 = vmatpush.msra.mxu1 %v1308_v41  ;;  %v7855_v60 = vld [vmem:[#allocation13 + $0x2b0] sm:$0xff]  ;;  %v7859_v41 = vld [vmem:[#allocation13 + $0x180] sm:$0xff]  ;;  %v2123_v42 = vunpack.c.l.bf16 %v7846_v39  ;;  %v2047_v43 = vunpack.c.l.bf16 %v7850_v1 }
 0x14f   : > { %1784 = vmatpush.msra.mxu2 %v1384_v28  ;;  %1804 = vmatpush.msra.mxu3 %v1448_v63  ;;  %v1983_v28 = vunpack.c.l.bf16 %v7848_v35  ;;  %v7864_v63 = vld [vmem:[#allocation13 + $0x2a0] sm:$0xff]  ;;  %v2119_v54 = vunpack.c.l.bf16 %v7855_v60 }
 0x150   : > { %1748 = vmatpush.msra.mxu0 %v1240_v2  ;;  %1768 = vmatpush.msra.mxu1 %v1304_v55  ;;  %v7868_v2 = vld [vmem:[#allocation13 + $0x170] sm:$0xff]  ;;  %v1979_v55 = vunpack.c.l.bf16 %v7857_v21  ;;  %v2115_v7 = vunpack.c.l.bf16 %v7864_v63 }
 0x151   : > { %1785 = vmatpush.msra.mxu2 %v1380_v8  ;;  %1805 = vmatpush.msra.mxu3 %v1444_v6  ;;  %v2043_v8 = vunpack.c.l.bf16 %v7859_v41  ;;  %v7875_v6 = vld [vmem:[#allocation13 + $0x160] sm:$0xff]  ;;  %v2039_v49 = vunpack.c.l.bf16 %v7868_v2 }
 0x152   : > { %1749 = vmatpush.msra.mxu0 %v1236_v20  ;;  %1769 = vmatpush.msra.mxu1 %v1300_v33  ;;  %v1975_v20 = vunpack.c.l.bf16 %v7866_v36  ;;  %v7880_v33 = vld [vmem:[#allocation13 + $0x50] sm:$0xff] }
 0x153   : > { %1786 = vmatpush.msra.mxu2 %v1376_v26  ;;  %1806 = vmatpush.msra.mxu3 %v1440_v15  ;;  %v7882_v26 = vld [vmem:[#allocation13 + $0x150] sm:$0xff]  ;;  %v1971_v15 = vunpack.c.l.bf16 %v7873_v10  ;;  %v1967_v45 = vunpack.c.l.bf16 %v7880_v33 }
 0x154   : > { %1750 = vmatpush.msra.mxu0 %v1232_v37  ;;  %1770 = vmatpush.msra.mxu1 %v1296_v13  ;;  %v2035_v37 = vunpack.c.l.bf16 %v7875_v6  ;;  %v7886_v13 = vld [vmem:[#allocation13 + $0x40] sm:$0xff] }
 0x155   : > { %1787 = vmatpush.msra.mxu2 %v1372_v53  ;;  %1807 = vmatpush.msra.mxu3 %v1436_v9  ;;  %v7888_v53 = vld [vmem:[#allocation13 + $0x140] sm:$0xff]  ;;  %v2031_v9 = vunpack.c.l.bf16 %v7882_v26 }
 0x156   : > { %1751 = vmatmul.f32.vlgmr.msra.gmra.mxu0 %v7534_v48  ;;  %1771 = vmatmul.f32.vlgmr.msra.gmra.mxu1 %v7536_v51  ;;  %v7820_v48 = vld [vmem:[#allocation13 + $0xc0] sm:$0xff] }
 0x157   : > { %1788 = vmatpush.msra.mxu2 %v1368_v4  ;;  %1808 = vmatpush.msra.mxu3 %v1432_v58  ;;  %v7822_v51 = vld [vmem:[#allocation13 + $0x1c0] sm:$0xff]  ;;  %v1995_v57 = vunpack.c.l.bf16 %v7820_v48  ;;  %v7892_v4 = vld [vmem:[#allocation13 + $0x30] sm:$0xff] }
 0x158   : > { %2213 = vmatpush.msrb.mxu0 %v2007_v11  ;;  %2233 = vmatpush.msrb.mxu1 %v2071_v50  ;;  %v2059_v40 = vunpack.c.l.bf16 %v7822_v51  ;;  %v7894_v58 = vld [vmem:[#allocation13 + $0x130] sm:$0xff]  ;;  %v1963_v11 = vunpack.c.l.bf16 %v7886_v13  ;;  %v2027_v50 = vunpack.c.l.bf16 %v7888_v53 }
 0x159   : > { %1789 = vmatpush.msra.mxu2 %v1364_v52  ;;  %1809 = vmatpush.msra.mxu3 %v1428_v17  ;;  %v7898_v52 = vld [vmem:[#allocation13 + $0x20] sm:$0xff] }
 0x15a   : > { %2214 = vmatpush.msrb.mxu0 %v2003_v22  ;;  %2234 = vmatpush.msrb.mxu1 %v2067_v18  ;;  %v7900_v17 = vld [vmem:[#allocation13 + $0x120] sm:$0xff]  ;;  %v1959_v22 = vunpack.c.l.bf16 %v7892_v4  ;;  %v2023_v18 = vunpack.c.l.bf16 %v7894_v58 }
 0x15b   : > { %1790 = vmatpush.msra.mxu2 %v1360_v30  ;;  %1810 = vmatpush.msra.mxu3 %v1424_v16  ;;  %v7904_v30 = vld [vmem:[#allocation13 + $0x10] sm:$0xff] }
 0x15c   : > { %1791 = vmatmul.f32.vlgmr.msra.gmra.mxu2 %v7564_v14  ;;  %1811 = vmatmul.f32.vlgmr.msra.gmra.mxu3 %v7566_v19  ;;  %v2127_v14 = vunpack.c.l.bf16 %v7835_v56  ;;  %v1987_v19 = vunpack.c.l.bf16 %v7839_v59  ;;  %v7906_v16 = vld [vmem:[#allocation13 + $0x110] sm:$0xff] }
 0x15d   : > { %2215 = vmatpush.msrb.mxu0 %v1999_v23  ;;  %2235 = vmatpush.msrb.mxu1 %v2063_v29  ;;  %v7908_v23 = vld [vmem:[#allocation13 + $0x290] sm:$0xff]  ;;  %v1955_v29 = vunpack.c.l.bf16 %v7898_v52 }
 0x15e   : > { %2253 = vmatpush.msrb.mxu2 %v2135_v34  ;;  %v7911_v34 = vld [vmem:[#allocation13] sm:$0xff] }
 0x15f   : > { %2216 = vmatpush.msrb.mxu0 %v1995_v57  ;;  %2236 = vmatpush.msrb.mxu1 %v2059_v40  ;;  %v2019_v57 = vunpack.c.l.bf16 %v7900_v17  ;;  %v2111_v40 = vunpack.c.l.bf16 %v7908_v23 }
 0x160   : > { %2254 = vmatpush.msrb.mxu2 %v2131_v38  ;;  %v7915_v38 = vld [vmem:[#allocation13 + $0x100] sm:$0xff] }
 0x161   : > { %2217 = vmatpush.msrb.mxu0 %v1991_v0  ;;  %2237 = vmatpush.msrb.mxu1 %v2055_v3  ;;  %v7917_v0 = vld [vmem:[#allocation13 + $0x280] sm:$0xff]  ;;  %v7919_v3 = vld [vmem:[#allocation13 + $0x270] sm:$0xff] }
 0x162   : > { %2255 = vmatpush.msrb.mxu2 %v2127_v14  ;;  %v1951_v14 = vunpack.c.l.bf16 %v7904_v30 }
 0x163   : > { %2218 = vmatpush.msrb.mxu0 %v1987_v19  ;;  %2238 = vmatpush.msrb.mxu1 %v2051_v25  ;;  %v2015_v19 = vunpack.c.l.bf16 %v7906_v16  ;;  %v2107_v25 = vunpack.c.l.bf16 %v7917_v0 }
 0x164   : > { %2256 = vmatpush.msrb.mxu2 %v2123_v42  ;;  %v2103_v42 = vunpack.c.l.bf16 %v7919_v3 }
 0x165   : > { %2219 = vmatpush.msrb.mxu0 %v1983_v28  ;;  %2239 = vmatpush.msrb.mxu1 %v2047_v43  ;;  %v7925_v28 = vld [vmem:[#allocation13 + $0x260] sm:$0xff]  ;;  %v1947_v43 = vunpack.c.l.bf16 %v7911_v34 }
 0x166   : > { %2257 = vmatpush.msrb.mxu2 %v2119_v54  ;;  %v2011_v54 = vunpack.c.l.bf16 %v7915_v38 }
 0x167   : > { %2220 = vmatpush.msrb.mxu0 %v1979_v55  ;;  %2240 = vmatpush.msrb.mxu1 %v2043_v8  ;;  %v2008_v55 = vunpack.c.h.bf16 %v7794_v61  ;;  %v2072_v8 = vunpack.c.h.bf16 %v7796_v12  ;;  %v2064_v61 = vunpack.c.h.bf16 %v7814_v27  ;;  %v2056_v27 = vunpack.c.h.bf16 %v7830_v32 }
 0x168   : > { %2258 = vmatpush.msrb.mxu2 %v2115_v7  ;;  %v2099_v7 = vunpack.c.l.bf16 %v7925_v28  ;;  %v2048_v32 = vunpack.c.h.bf16 %v7850_v1 }
 0x169   : > { %2221 = vmatpush.msrb.mxu0 %v1975_v20  ;;  %2241 = vmatpush.msrb.mxu1 %v2039_v49  ;;  %v2004_v20 = vunpack.c.h.bf16 %v7800_v47  ;;  %v2068_v49 = vunpack.c.h.bf16 %v7802_v46  ;;  %v2060_v47 = vunpack.c.h.bf16 %v7822_v51  ;;  %v7941_v46 = vld [vmem:[#allocation13 + $0x240] sm:$0xff] }
 0x16a   : > { %2259 = vmatpush.msrb.mxu2 %v2111_v40  ;;  %v1980_v40 = vunpack.c.h.bf16 %v7857_v21  ;;  %v1972_v21 = vunpack.c.h.bf16 %v7873_v10  ;;  %v2128_v10 = vunpack.c.h.bf16 %v7835_v56  ;;  %v1960_v56 = vunpack.c.h.bf16 %v7892_v4 }
 0x16b   : > { %2222 = vmatpush.msrb.mxu0 %v1971_v15  ;;  %2242 = vmatpush.msrb.mxu1 %v2035_v37  ;;  %v2000_v15 = vunpack.c.h.bf16 %v7811_v44  ;;  %v7936_v37 = vld [vmem:[#allocation13 + $0x250] sm:$0xff]  ;;  %v1992_v44 = vunpack.c.h.bf16 %v7828_v62  ;;  %v1984_v62 = vunpack.c.h.bf16 %v7848_v35 }
 0x16c   : > { %2260 = vmatpush.msrb.mxu2 %v2107_v25  ;;  %v2095_v12 = vunpack.c.l.bf16 %v7936_v37  ;;  %v2040_v25 = vunpack.c.h.bf16 %v7868_v2 }
 0x16d   : > { %2223 = vmatpush.msrb.mxu0 %v1967_v45  ;;  %2243 = vmatpush.msrb.mxu1 %v2031_v9  ;;  %v1996_v45 = vunpack.c.h.bf16 %v7820_v48  ;;  %v2091_v9 = vunpack.c.l.bf16 %v7941_v46  ;;  %v2052_v48 = vunpack.c.h.bf16 %v7841_v24 }
 0x16e   : > { %2261 = vmatpush.msrb.mxu2 %v2103_v42  ;;  %v2136_v42 = vunpack.c.h.bf16 %v7818_v31  ;;  %v7978_v31 = vld [vmem:[#allocation13 + $0x3d0] sm:$0xff] }
 0x16f   : > { %2224 = vmatpush.msrb.mxu0 %v1963_v11  ;;  %2244 = vmatpush.msrb.mxu1 %v2027_v50  ;;  %v1988_v11 = vunpack.c.h.bf16 %v7839_v59  ;;  %v7948_v50 = vld [vmem:[#allocation13 + $0x230] sm:$0xff]  ;;  %v7958_v59 = vld [vmem:[#allocation13 + $0x200] sm:$0xff] }
 0x170   : > { %2262 = vmatpush.msrb.mxu2 %v2099_v7  ;;  %v2087_v51 = vunpack.c.l.bf16 %v7948_v50  ;;  %v2075_v1 = vunpack.c.l.bf16 %v7958_v59  ;;  %v2191_v7 = vunpack.c.l.bf16 %v7978_v31 }
 0x171   : > { %2225 = vmatpush.msrb.mxu0 %v1959_v22  ;;  %2245 = vmatpush.msrb.mxu1 %v2023_v18  ;;  %v7951_v22 = vld [vmem:[#allocation13 + $0x220] sm:$0xff]  ;;  %v7953_v18 = vld [vmem:[#allocation13 + $0x210] sm:$0xff] }
 0x172   : > { %2263 = vmatpush.msrb.mxu2 %v2095_v12  ;;  %v2079_v24 = vunpack.c.l.bf16 %v7953_v18  ;;  %v2020_v12 = vunpack.c.h.bf16 %v7900_v17  ;;  %v1948_v17 = vunpack.c.h.bf16 %v7911_v34 }
 0x173   : > { %2226 = vmatpush.msrb.mxu0 %v1955_v29  ;;  %2246 = vmatpush.msrb.mxu1 %v2019_v57  ;;  %v2083_v29 = vunpack.c.l.bf16 %v7951_v22  ;;  %v7961_v57 = vld [vmem:[#allocation13 + $0x3f0] sm:$0xff] }
 0x174   : > { %2264 = vmatpush.msrb.mxu2 %v2091_v9  ;;  %v2199_v35 = vunpack.c.l.bf16 %v7961_v57 }
 0x175   : > { %2227 = vmatpush.msrb.mxu0 %v1951_v14  ;;  %2247 = vmatpush.msrb.mxu1 %v2015_v19  ;;  %v2044_v14 = vunpack.c.h.bf16 %v7859_v41  ;;  %v1976_v19 = vunpack.c.h.bf16 %v7866_v36  ;;  %v2036_v41 = vunpack.c.h.bf16 %v7875_v6  ;;  %v2032_v36 = vunpack.c.h.bf16 %v7882_v26 }
 0x176   : > { %2265 = vmatpush.msrb.mxu2 %v2087_v51  ;;  %2273 = vmatpush.msrb.mxu3 %v2199_v35  ;;  %v1964_v6 = vunpack.c.h.bf16 %v7886_v13  ;;  %v2024_v13 = vunpack.c.h.bf16 %v7894_v58  ;;  %v2116_v58 = vunpack.c.h.bf16 %v7864_v63  ;;  %v2112_v63 = vunpack.c.h.bf16 %v7908_v23  ;;  %v8015_v51 = vld [vmem:[#allocation13 + $0x370] sm:$0xff]  ;;  %v8019_v23 = vld [vmem:[#allocation13 + $0x360] sm:$0xff] }
 0x177   : > { %2228 = vmatpush.msrb.mxu0 %v1947_v43  ;;  %2248 = vmatpush.msrb.mxu1 %v2011_v54  ;;  %v7972_v43 = vld [vmem:[#allocation13 + $0x3e0] sm:$0xff]  ;;  %v1968_v54 = vunpack.c.h.bf16 %v7880_v33  ;;  %v2028_v33 = vunpack.c.h.bf16 %v7888_v53  ;;  %v2167_v34 = vunpack.c.l.bf16 %v8015_v51 }
 0x178   : > { %2266 = vmatpush.msrb.mxu2 %v2083_v29  ;;  %v2195_v2 = vunpack.c.l.bf16 %v7972_v43 }
 0x179   : > { %2293 = vmatpush.msra.mxu0 %v2008_v55  ;;  %2313 = vmatpush.msra.mxu1 %v2072_v8  ;;  %v2132_v55 = vunpack.c.h.bf16 %v7826_v5  ;;  %v7981_v8 = vld [vmem:[#allocation13 + $0x3c0] sm:$0xff]  ;;  %v2124_v5 = vunpack.c.h.bf16 %v7846_v39  ;;  %v1956_v39 = vunpack.c.h.bf16 %v7898_v52  ;;  %v8005_v52 = vld [vmem:[#allocation13 + $0x390] sm:$0xff] }
 0x17a   : > { %2267 = vmatpush.msrb.mxu2 %v2079_v24  ;;  %2274 = vmatpush.msrb.mxu3 %v2195_v2  ;;  %v2187_v26 = vunpack.c.l.bf16 %v7981_v8  ;;  %v2100_v24 = vunpack.c.h.bf16 %v7925_v28  ;;  %v2092_v28 = vunpack.c.h.bf16 %v7941_v46  ;;  %v8045_v46 = vld [vmem:[#allocation13 + $0x320] sm:$0xff] }
 0x17b   : > { %2294 = vmatpush.msra.mxu0 %v2004_v20  ;;  %2314 = vmatpush.msra.mxu1 %v2068_v49  ;;  %v7988_v20 = vld [vmem:[#allocation13 + $0x3b0] sm:$0xff]  ;;  %v7990_v49 = vld [vmem:[#allocation11] sm:$0xf] }
 0x17c   : > { %2268 = vmatpush.msrb.mxu2 %v2075_v1  ;;  %2275 = vmatpush.msrb.mxu3 %v2191_v7  ;;  %v2183_v53 = vunpack.c.l.bf16 %v7988_v20  ;;  %v1488_v1 = vperm.slane %v7990_v49, 1  ;;  %v8043_v7 = vld [vmem:[#allocation13 + $0xd8] sm:$0xff] }
 0x17d   : > { %2295 = vmatpush.msra.mxu0 %v2000_v15  ;;  %2315 = vmatpush.msra.mxu1 %v2064_v61  ;;  %v7994_v15 = vld [vmem:[#allocation13 + $0x3a0] sm:$0xff]  ;;  %v2120_v61 = vunpack.c.h.bf16 %v7855_v60  ;;  %v2016_v60 = vunpack.c.h.bf16 %v7906_v16 }
 0x17e   : > { %2333 = vmatpush.msra.mxu2 %v2136_v42  ;;  %2276 = vmatpush.msrb.mxu3 %v2187_v26  ;;  %v2179_v4 = vunpack.c.l.bf16 %v7994_v15 }
 0x17f   : > { %2296 = vmatpush.msra.mxu0 %v1996_v45  ;;  %2316 = vmatpush.msra.mxu1 %v2060_v47  ;;  %v1487_v45 = vperm.slane %v7990_v49, 0  ;;  %v1952_v47 = vunpack.c.h.bf16 %v7904_v30  ;;  %v8011_v30 = vld [vmem:[#allocation13 + $0x380] sm:$0xff] }
 0x180   : > { %2334 = vmatpush.msra.mxu2 %v2132_v55  ;;  %2277 = vmatpush.msrb.mxu3 %v2183_v53  ;;  %v2171_v16 = vunpack.c.l.bf16 %v8011_v30  ;;  %v8051_v53 = vld [vmem:[#allocation13 + $0xc8] sm:$0xff] }
 0x181   : > { %2297 = vmatpush.msra.mxu0 %v1992_v44  ;;  %2317 = vmatpush.msra.mxu1 %v2056_v27  ;;  %v2012_v44 = vunpack.c.h.bf16 %v7915_v38  ;;  %v2175_v27 = vunpack.c.l.bf16 %v8005_v52  ;;  %v2104_v38 = vunpack.c.h.bf16 %v7919_v3 }
 0x182   : > { %2335 = vmatpush.msra.mxu2 %v2128_v10  ;;  %2278 = vmatpush.msrb.mxu3 %v2179_v4  ;;  %v2088_v10 = vunpack.c.h.bf16 %v7948_v50  ;;  %v8053_v50 = vld [vmem:[#allocation13 + $0x310] sm:$0xff]  ;;  %v8058_v4 = vld [vmem:[#allocation13 + $0xb8] sm:$0xff] }
 0x183   : > { %2298 = vmatpush.msra.mxu0 %v1988_v11  ;;  %2318 = vmatpush.msra.mxu1 %v2052_v48  ;;  %v2108_v48 = vunpack.c.h.bf16 %v7917_v0  ;;  %v2163_v0 = vunpack.c.l.bf16 %v8019_v23 }
 0x184   : > { %2336 = vmatpush.msra.mxu2 %v2124_v5  ;;  %2279 = vmatpush.msrb.mxu3 %v2175_v27  ;;  %v8067_v27 = vld [vmem:[#allocation13 + $0xa8] sm:$0xff] }
 0x185   : > { %2299 = vmatpush.msra.mxu0 %v1984_v62  ;;  %2319 = vmatpush.msra.mxu1 %v2048_v32  ;;  %v8021_v32 = vld [vmem:[#allocation13 + $0x350] sm:$0xff] }
 0x186   : > { %2337 = vmatpush.msra.mxu2 %v2120_v61  ;;  %2280 = vmatpush.msrb.mxu3 %v2171_v16  ;;  %v2159_v3 = vunpack.c.l.bf16 %v8021_v32  ;;  %v2001_v61 = vunpack.c.l.bf16 %v8043_v7 }
 0x187   : > { %2300 = vmatpush.msra.mxu0 %v1980_v40  ;;  %2320 = vmatpush.msra.mxu1 %v2044_v14  ;;  %v8025_v40 = vld [vmem:[#allocation13 + $0x340] sm:$0xff]  ;;  %v2096_v14 = vunpack.c.h.bf16 %v7936_v37  ;;  %v8036_v37 = vld [vmem:[#allocation13 + $0x330] sm:$0xff] }
 0x188   : > { %2338 = vmatpush.msra.mxu2 %v2116_v58  ;;  %2281 = vmatpush.msrb.mxu3 %v2167_v34  ;;  %v2155_v42 = vunpack.c.l.bf16 %v8025_v40  ;;  %v2151_v55 = vunpack.c.l.bf16 %v8036_v37  ;;  %v8073_v34 = vld [vmem:[#allocation13 + $0x98] sm:$0xff] }
 0x189   : > { %2301 = vmatpush.msra.mxu0 %v1976_v19  ;;  %2321 = vmatpush.msra.mxu1 %v2040_v25  ;;  %v8030_v25 = vld [vmem:[#allocation13 + $0xf8] sm:$0xff] }
 0x18a   : > { %2339 = vmatpush.msra.mxu2 %v2112_v63  ;;  %2282 = vmatpush.msrb.mxu3 %v2163_v0  ;;  %v2009_v2 = vunpack.c.l.bf16 %v8030_v25  ;;  %v8083_v0 = vld [vmem:[#allocation13 + $0x88] sm:$0xff] }
 0x18b   : > { %2302 = vmatpush.msra.mxu0 %v1972_v21  ;;  %2322 = vmatpush.msra.mxu1 %v2036_v41 }
 0x18c   : > { %2340 = vmatpush.msra.mxu2 %v2108_v48  ;;  %2283 = vmatpush.msrb.mxu3 %v2159_v3  ;;  %v8071_v48 = vld [vmem:[#allocation13 + $0x1e8] sm:$0xff]  ;;  %v1985_v3 = vunpack.c.l.bf16 %v8073_v34 }
 0x18d   : > { %2303 = vmatpush.msra.mxu0 %v1968_v54  ;;  %2323 = vmatpush.msra.mxu1 %v2032_v36  ;;  %v1512_v9 = vpop.f32.mrf.mxu0  ;;  %v1532_v62 = vpop.f32.mrf.mxu1  ;;  %v8034_v36 = vld [vmem:[#allocation13 + $0xe8] sm:$0xff] }
 0x18e   : > { %v1513_v11 = vadd.f32 %v1512_v9, %v1487_v45  ;;  %2341 = vmatpush.msra.mxu2 %v2104_v38  ;;  %2284 = vmatpush.msrb.mxu3 %v2155_v42  ;;  %v2005_v5 = vunpack.c.l.bf16 %v8034_v36  ;;  %v2076_v9 = vunpack.c.h.bf16 %v7958_v59  ;;  %v2196_v59 = vunpack.c.h.bf16 %v7972_v43  ;;  %v8096_v42 = vld [vmem:[#allocation13 + $0x1b8] sm:$0xff] }
 0x18f   : > { %2304 = vmatpush.msra.mxu0 %v1964_v6  ;;  %2324 = vmatpush.msra.mxu1 %v2028_v33  ;;  %v2069_v43 = vunpack.c.l.bf16 %v8071_v48 }
 0x190   : > { %v1533_v29 = vadd.f32 %v1532_v62, %v1513_v11  ;;  %2342 = vmatpush.msra.mxu2 %v2100_v24  ;;  %2285 = vmatpush.msrb.mxu3 %v2151_v55  ;;  %v1993_v11 = vunpack.c.l.bf16 %v8058_v4  ;;  %v1989_v62 = vunpack.c.l.bf16 %v8067_v27  ;;  %v2192_v24 = vunpack.c.h.bf16 %v7978_v31 }
 0x191   : > { %2305 = vmatpush.msra.mxu0 %v1960_v56  ;;  %2325 = vmatpush.msra.mxu1 %v2024_v13  ;;  %v2147_v56 = vunpack.c.l.bf16 %v8045_v46  ;;  %v2084_v13 = vunpack.c.h.bf16 %v7951_v22  ;;  %v8060_v22 = vld [vmem:[#allocation13 + $0x300] sm:$0xff]  ;;  %v1981_v31 = vunpack.c.l.bf16 %v8083_v0  ;;  %v2180_v55 = vunpack.c.h.bf16 %v7994_v15  ;;  %v8118_v15 = vld [vmem:[#allocation13 + $0x188] sm:$0xff] }
 0x192   : > { %2343 = vmatpush.msra.mxu2 %v2096_v14  ;;  %v8089_v14 = vld [vmem:[#allocation13 + $0x1c8] sm:$0xff] }
 0x193   : > { %2306 = vmatpush.msra.mxu0 %v1956_v39  ;;  %2326 = vmatpush.msra.mxu1 %v2020_v12  ;;  %v2143_v39 = vunpack.c.l.bf16 %v8053_v50  ;;  %v2080_v12 = vunpack.c.h.bf16 %v7953_v18  ;;  %v2200_v18 = vunpack.c.h.bf16 %v7961_v57 }
 0x194   : > { %2344 = vmatpush.msra.mxu2 %v2092_v28  ;;  %2286 = vmatpush.msrb.mxu3 %v2147_v56  ;;  %v8098_v28 = vld [vmem:[#allocation13 + $0x68] sm:$0xff] }
 0x195   : > { %2307 = vmatpush.msra.mxu0 %v1952_v47  ;;  %2327 = vmatpush.msra.mxu1 %v2016_v60  ;;  %v1997_v47 = vunpack.c.l.bf16 %v8051_v53  ;;  %v2139_v60 = vunpack.c.l.bf16 %v8060_v22 }
 0x196   : > { %2345 = vmatpush.msra.mxu2 %v2088_v10  ;;  %2287 = vmatpush.msrb.mxu3 %v2143_v39  ;;  %v2057_v10 = vunpack.c.l.bf16 %v8096_v42  ;;  %v2172_v39 = vunpack.c.h.bf16 %v8011_v30  ;;  %v2045_v30 = vunpack.c.l.bf16 %v8118_v15 }
 0x197   : > { %2308 = vmatpush.msra.mxu0 %v1948_v17  ;;  %2328 = vmatpush.msra.mxu1 %v2012_v44  ;;  %v1592_v21 = vpop.f32.mrf.mxu0  ;;  %v8065_v44 = vld [vmem:[#allocation13 + $0x1f8] sm:$0xff] }
 0x198   : > { %v1593_v6 = vadd.f32 %v1592_v21, %v1488_v1  ;;  %2346 = vmatpush.msra.mxu2 %v2084_v13  ;;  %2288 = vmatpush.msrb.mxu3 %v2139_v60  ;;  %v2073_v38 = vunpack.c.l.bf16 %v8065_v44  ;;  %v2188_v1 = vunpack.c.h.bf16 %v7981_v8  ;;  %v2184_v21 = vunpack.c.h.bf16 %v7988_v20  ;;  %v8103_v8 = vld [vmem:[#allocation13 + $0x1a8] sm:$0xff]  ;;  %v8110_v20 = vld [vmem:[#allocation13 + $0x198] sm:$0xff] }
 0x199   : > { %v1612_v26 = vpop.f32.mrf.mxu1  ;;  %v2053_v56 = vunpack.c.l.bf16 %v8103_v8  ;;  %v2168_v60 = vunpack.c.h.bf16 %v8015_v51 }
 0x19a   : > { %v1552_v35 = vpop.f32.mrf.mxu2  ;;  %v1572_v41 = vpop.f32.mrf.mxu3  ;;  %v1613_v45 = vadd.f32 %v1612_v26, %v1593_v6  ;;  %2347 = vmatpush.msra.mxu2 %v2080_v12  ;;  %2353 = vmatpush.msra.mxu3 %v2200_v18  ;;  %v1973_v6 = vunpack.c.l.bf16 %v8098_v28  ;;  %v8112_v26 = vld [vmem:[#allocation13 + $0x48] sm:$0xff]  ;;  %v2049_v12 = vunpack.c.l.bf16 %v8110_v20 }
 0x19b   : > { %v1553_v19 = vadd.f32 %v1552_v35, %v1533_v29  ;;  %v8081_v29 = vld [vmem:[#allocation13 + $0x1d8] sm:$0xff]  ;;  %v8133_v18 = vld [vmem:[#allocation13 + $0x168] sm:$0xff] }
 0x19c   : > { %2348 = vmatpush.msra.mxu2 %v2076_v9  ;;  %v8091_v35 = vld [vmem:[#allocation13 + $0x78] sm:$0xff]  ;;  %2354 = vmatpush.msra.mxu3 %v2196_v59 }
 0x19d   : > { %v1573_v54 = vadd.f32 %v1572_v41, %v1553_v19  ;;  %v2065_v19 = vunpack.c.l.bf16 %v8081_v29  ;;  %v2061_v41 = vunpack.c.l.bf16 %v8089_v14 }
 0x19e   : > { %2355 = vmatpush.msra.mxu3 %v2192_v24  ;;  %v2160_v24 = vunpack.c.h.bf16 %v8021_v32  ;;  %v8152_v32 = vld [vmem:[#allocation13 + $0x138] sm:$0xff] }
 0x19f   : > { %v8041_v33 = vmax.f32 %v1573_v54, 0.0  ;;  %v1977_v54 = vunpack.c.l.bf16 %v8091_v35 }
 0x1a0   : > { %2356 = vmatpush.msra.mxu3 %v2188_v1  ;;  %v2156_v1 = vunpack.c.h.bf16 %v8025_v40  ;;  %v2010_v40 = vunpack.c.h.bf16 %v8030_v25  ;;  %v8167_v25 = vld [vmem:[#allocation13 + $0x118] sm:$0xff] }
 0x1a1   : > { %2229 = vmatmul.f32.vlgmr.msrb.gmra.mxu0 %v8041_v33 }
 0x1a2   : > { %2373 = vmatpush.msrb.mxu0 %v2009_v2  ;;  %v8105_v2 = vld [vmem:[#allocation13 + $0x58] sm:$0xff]  ;;  %2357 = vmatpush.msra.mxu3 %v2184_v21 }
 0x1a3   : > { %v1969_v13 = vunpack.c.l.bf16 %v8105_v2 }
 0x1a4   : > { %v1632_v58 = vpop.f32.mrf.mxu2  ;;  %2374 = vmatpush.msrb.mxu0 %v2005_v5  ;;  %v1652_v63 = vpop.f32.mrf.mxu3  ;;  %v2176_v5 = vunpack.c.h.bf16 %v8005_v52  ;;  %2358 = vmatpush.msra.mxu3 %v2180_v55  ;;  %v1965_v52 = vunpack.c.l.bf16 %v8112_v26 }
 0x1a5   : > { %v1633_v17 = vadd.f32 %v1632_v58, %v1613_v45  ;;  %v1489_v45 = vperm.slane %v7990_v49, 2  ;;  %v8126_v58 = vld [vmem:[#allocation13 + $0x178] sm:$0xff] }
 0x1a6   : > { %2375 = vmatpush.msrb.mxu0 %v2001_v61  ;;  %v8120_v61 = vld [vmem:[#allocation13 + $0x38] sm:$0xff]  ;;  %2359 = vmatpush.msra.mxu3 %v2176_v5 }
 0x1a7   : > { %v1653_v16 = vadd.f32 %v1652_v63, %v1633_v17  ;;  %v1961_v17 = vunpack.c.l.bf16 %v8120_v61  ;;  %v8135_v63 = vld [vmem:[#allocation13 + $0x18] sm:$0xff] }
 0x1a8   : > { %2376 = vmatpush.msrb.mxu0 %v1997_v47  ;;  %v8128_v47 = vld [vmem:[#allocation13 + $0x28] sm:$0xff]  ;;  %2360 = vmatpush.msra.mxu3 %v2172_v39  ;;  %v8157_v5 = vld [vmem:[#allocation13 + $0x2f8] sm:$0xff] }
 0x1a9   : > { %v8078_v57 = vmax.f32 %v1653_v16, 0.0  ;;  %2309 = vmatmul.f32.vlgmr.msra.gmra.mxu0 %v8041_v33  ;;  %v2041_v16 = vunpack.c.l.bf16 %v8126_v58  ;;  %v1957_v51 = vunpack.c.l.bf16 %v8128_v47 }
 0x1aa   : > { %2377 = vmatpush.msrb.mxu0 %v1993_v11  ;;  %v2164_v11 = vunpack.c.h.bf16 %v8019_v23  ;;  %2361 = vmatpush.msra.mxu3 %v2168_v60  ;;  %v1953_v23 = vunpack.c.l.bf16 %v8135_v63  ;;  %v2144_v60 = vunpack.c.h.bf16 %v8053_v50 }
 0x1ab   : > { %2249 = vmatmul.f32.vlgmr.msrb.gmra.mxu1 %v8078_v57 }
 0x1ac   : > { %2393 = vmatpush.msrb.mxu1 %v2073_v38  ;;  %2378 = vmatpush.msrb.mxu0 %v1989_v62  ;;  %v8140_v38 = vld [vmem:[#allocation13 + $0x158] sm:$0xff]  ;;  %v8142_v62 = vld [vmem:[#allocation13 + $0x8] sm:$0xff] }
 0x1ad   : > { %2362 = vmatpush.msra.mxu3 %v2164_v11  ;;  %v1949_v21 = vunpack.c.l.bf16 %v8142_v62  ;;  %v8177_v11 = vld [vmem:[#allocation13 + $0x108] sm:$0xff] }
 0x1ae   : > { %2394 = vmatpush.msrb.mxu1 %v2069_v43  ;;  %2379 = vmatpush.msrb.mxu0 %v1985_v3  ;;  %v2037_v43 = vunpack.c.l.bf16 %v8133_v18  ;;  %v8147_v3 = vld [vmem:[#allocation13 + $0x148] sm:$0xff] }
 0x1af   : > { %2363 = vmatpush.msra.mxu3 %v2160_v24  ;;  %v1998_v24 = vunpack.c.h.bf16 %v8051_v53  ;;  %v8193_v53 = vld [vmem:[#allocation13 + $0x2a8] sm:$0xff] }
 0x1b0   : > { %2395 = vmatpush.msrb.mxu1 %v2065_v19  ;;  %2380 = vmatpush.msrb.mxu0 %v1981_v31  ;;  %v2033_v31 = vunpack.c.l.bf16 %v8140_v38 }
 0x1b1   : > { %v1672_v9 = vpop.f32.mrf.mxu0  ;;  %v1692_v19 = vpop.f32.mrf.mxu1  ;;  %2364 = vmatpush.msra.mxu3 %v2156_v1 }
 0x1b2   : > { %2396 = vmatpush.msrb.mxu1 %v2061_v41  ;;  %2381 = vmatpush.msrb.mxu0 %v1977_v54  ;;  %v1673_v59 = vadd.f32 %v1672_v9, %v1489_v45  ;;  %v2152_v54 = vunpack.c.h.bf16 %v8036_v37  ;;  %v2025_v37 = vunpack.c.l.bf16 %v8152_v32  ;;  %v8165_v45 = vld [vmem:[#allocation13 + $0x2e8] sm:$0xff] }
 0x1b3   : > { %2329 = vmatmul.f32.vlgmr.msra.gmra.mxu1 %v8078_v57  ;;  %v2133_v50 = vunpack.c.l.bf16 %v8165_v45 }
 0x1b4   : > { %2397 = vmatpush.msrb.mxu1 %v2057_v10  ;;  %2382 = vmatpush.msrb.mxu0 %v1973_v6  ;;  %v1693_v41 = vadd.f32 %v1692_v19, %v1673_v59  ;;  %v2029_v10 = vunpack.c.l.bf16 %v8147_v3  ;;  %v8183_v59 = vld [vmem:[#allocation13 + $0x2c8] sm:$0xff]  ;;  %v2074_v19 = vunpack.c.h.bf16 %v8065_v44  ;;  %v2117_v44 = vunpack.c.l.bf16 %v8193_v53 }
 0x1b5   : > { %2365 = vmatpush.msra.mxu3 %v2152_v54  ;;  %v2125_v1 = vunpack.c.l.bf16 %v8183_v59  ;;  %v1986_v54 = vunpack.c.h.bf16 %v8073_v34  ;;  %v8210_v34 = vld [vmem:[#allocation13 + $0x278] sm:$0xff] }
 0x1b6   : > { %2398 = vmatpush.msrb.mxu1 %v2053_v56  ;;  %2383 = vmatpush.msrb.mxu0 %v1969_v13  ;;  %v8159_v56 = vld [vmem:[#allocation13 + $0x128] sm:$0xff]  ;;  %v2148_v13 = vunpack.c.h.bf16 %v8045_v46  ;;  %v2137_v46 = vunpack.c.l.bf16 %v8157_v5 }
 0x1b7   : > { %v2021_v9 = vunpack.c.l.bf16 %v8159_v56 }
 0x1b8   : > { %2399 = vmatpush.msrb.mxu1 %v2049_v12  ;;  %2384 = vmatpush.msrb.mxu0 %v1965_v52  ;;  %v2006_v12 = vunpack.c.h.bf16 %v8034_v36  ;;  %v2002_v36 = vunpack.c.h.bf16 %v8043_v7 }
 0x1b9   : > { %2366 = vmatpush.msra.mxu3 %v2148_v13  ;;  %v2058_v13 = vunpack.c.h.bf16 %v8096_v42 }
 0x1ba   : > { %2400 = vmatpush.msrb.mxu1 %v2045_v30  ;;  %2385 = vmatpush.msrb.mxu0 %v1961_v17  ;;  %v8174_v17 = vld [vmem:[#allocation13 + $0x2d8] sm:$0xff] }
 0x1bb   : > { %2367 = vmatpush.msra.mxu3 %v2144_v60  ;;  %v2129_v7 = vunpack.c.l.bf16 %v8174_v17  ;;  %v8225_v60 = vld [vmem:[#allocation13 + $0x248] sm:$0xff] }
 0x1bc   : > { %2401 = vmatpush.msrb.mxu1 %v2041_v16  ;;  %2386 = vmatpush.msrb.mxu0 %v1957_v51  ;;  %v2140_v16 = vunpack.c.h.bf16 %v8060_v22  ;;  %v2017_v51 = vunpack.c.l.bf16 %v8167_v25  ;;  %v8188_v22 = vld [vmem:[#allocation13 + $0x2b8] sm:$0xff] }
 0x1be   : > { %v1712_v55 = vpop.f32.mrf.mxu2  ;;  %2402 = vmatpush.msrb.mxu1 %v2037_v43  ;;  %2387 = vmatpush.msrb.mxu0 %v1953_v23  ;;  %v1732_v39 = vpop.f32.mrf.mxu3  ;;  %v2013_v43 = vunpack.c.l.bf16 %v8177_v11  ;;  %v1994_v23 = vunpack.c.h.bf16 %v8058_v4  ;;  %v8199_v4 = vld [vmem:[#allocation13 + $0x298] sm:$0xff] }
 0x1bf   : > { %v1713_v6 = vadd.f32 %v1712_v55, %v1693_v41  ;;  %2368 = vmatpush.msra.mxu3 %v2140_v16  ;;  %v2070_v41 = vunpack.c.h.bf16 %v8071_v48  ;;  %v2066_v55 = vunpack.c.h.bf16 %v8081_v29  ;;  %v1982_v48 = vunpack.c.h.bf16 %v8083_v0 }
 0x1c0   : > { %2403 = vmatpush.msrb.mxu1 %v2033_v31  ;;  %2388 = vmatpush.msrb.mxu0 %v1949_v21  ;;  %v1990_v31 = vunpack.c.h.bf16 %v8067_v27  ;;  %v2121_v21 = vunpack.c.l.bf16 %v8188_v22  ;;  %v8205_v27 = vld [vmem:[#allocation13 + $0x288] sm:$0xff]  ;;  %v1974_v0 = vunpack.c.h.bf16 %v8098_v28  ;;  %v1966_v28 = vunpack.c.h.bf16 %v8112_v26 }
 0x1c1   : > { %v1733_v52 = vadd.f32 %v1732_v39, %v1713_v6  ;;  %2389 = vmatmul.f32.vlgmr.msrb.gmra.mxu0 %v8041_v33  ;;  %v1978_v6 = vunpack.c.h.bf16 %v8091_v35  ;;  %v2109_v29 = vunpack.c.l.bf16 %v8205_v27  ;;  %v8215_v39 = vld [vmem:[#allocation13 + $0x268] sm:$0xff]  ;;  %v1970_v35 = vunpack.c.h.bf16 %v8105_v2 }
 0x1c2   : > { %2404 = vmatpush.msrb.mxu1 %v2029_v10  ;;  %2453 = vmatpush.msra.mxu0 %v2010_v40  ;;  %v2113_v10 = vunpack.c.l.bf16 %v8199_v4  ;;  %v2062_v40 = vunpack.c.h.bf16 %v8089_v14  ;;  %v2105_v14 = vunpack.c.l.bf16 %v8210_v34  ;;  %v2101_v42 = vunpack.c.l.bf16 %v8215_v39 }
 0x1c3   : > { %v8172_v30 = vmax.f32 %v1733_v52, 0.0  ;;  %v2050_v52 = vunpack.c.h.bf16 %v8110_v20  ;;  %v1962_v16 = vunpack.c.h.bf16 %v8120_v61  ;;  %v2093_v20 = vunpack.c.l.bf16 %v8225_v60  ;;  %v8241_v61 = vld [vmem:[#allocation13 + $0x218] sm:$0xff] }
 0x1c4   : > { %2405 = vmatpush.msrb.mxu1 %v2025_v37  ;;  %2454 = vmatpush.msra.mxu0 %v2006_v12  ;;  %v2054_v37 = vunpack.c.h.bf16 %v8103_v8  ;;  %v8220_v12 = vld [vmem:[#allocation13 + $0x258] sm:$0xff]  ;;  %v2042_v26 = vunpack.c.h.bf16 %v8126_v58 }
 0x1c5   : > { %2269 = vmatmul.f32.vlgmr.msrb.gmra.mxu2 %v8172_v30  ;;  %v2097_v8 = vunpack.c.l.bf16 %v8220_v12 }
 0x1c6   : > { %2413 = vmatpush.msrb.mxu2 %v2137_v46  ;;  %2406 = vmatpush.msrb.mxu1 %v2021_v9  ;;  %v1490_v46 = vperm.slane %v7990_v49, 3  ;;  %v2046_v9 = vunpack.c.h.bf16 %v8118_v15  ;;  %v8236_v49 = vld [vmem:[#allocation13 + $0x228] sm:$0xff] }
 0x1c7   : > { %2455 = vmatpush.msra.mxu0 %v2002_v36  ;;  %v8231_v36 = vld [vmem:[#allocation13 + $0x238] sm:$0xff]  ;;  %v2085_v58 = vunpack.c.l.bf16 %v8236_v49 }
 0x1c8   : > { %2414 = vmatpush.msrb.mxu2 %v2133_v50  ;;  %2407 = vmatpush.msrb.mxu1 %v2017_v51  ;;  %v1958_v50 = vunpack.c.h.bf16 %v8128_v47  ;;  %v2089_v15 = vunpack.c.l.bf16 %v8231_v36  ;;  %v8246_v47 = vld [vmem:[#allocation13 + $0x208] sm:$0xff] }
 0x1c9   : > { %2456 = vmatpush.msra.mxu0 %v1998_v24  ;;  %v2038_v24 = vunpack.c.h.bf16 %v8133_v18  ;;  %v2081_v18 = vunpack.c.l.bf16 %v8241_v61 }
 0x1ca   : > { %2415 = vmatpush.msrb.mxu2 %v2129_v7  ;;  %2408 = vmatpush.msrb.mxu1 %v2013_v43  ;;  %v1954_v7 = vunpack.c.h.bf16 %v8135_v63  ;;  %v2034_v43 = vunpack.c.h.bf16 %v8140_v38  ;;  %v2077_v38 = vunpack.c.l.bf16 %v8246_v47 }
 0x1cb   : > { %2409 = vmatmul.f32.vlgmr.msrb.gmra.mxu1 %v8078_v57  ;;  %2457 = vmatpush.msra.mxu0 %v1994_v23 }
 0x1cc   : > { %2416 = vmatpush.msrb.mxu2 %v2125_v1  ;;  %2473 = vmatpush.msra.mxu1 %v2074_v19  ;;  %v1950_v1 = vunpack.c.h.bf16 %v8142_v62 }
 0x1cd   : > { %2349 = vmatmul.f32.vlgmr.msra.gmra.mxu2 %v8172_v30  ;;  %2458 = vmatpush.msra.mxu0 %v1990_v31  ;;  %v2030_v31 = vunpack.c.h.bf16 %v8147_v3 }
 0x1ce   : > { %2417 = vmatpush.msrb.mxu2 %v2121_v21  ;;  %2474 = vmatpush.msra.mxu1 %v2070_v41  ;;  %v8252_v41 = vld [vmem:[#allocation13 + $0x3f8] sm:$0xff] }
 0x1cf   : > { %2459 = vmatpush.msra.mxu0 %v1986_v54  ;;  %v2026_v54 = vunpack.c.h.bf16 %v8152_v32  ;;  %v2201_v3 = vunpack.c.l.bf16 %v8252_v41  ;;  %v2134_v32 = vunpack.c.h.bf16 %v8165_v45  ;;  %v2014_v45 = vunpack.c.h.bf16 %v8177_v11 }
 0x1d0   : > { %2418 = vmatpush.msrb.mxu2 %v2117_v44  ;;  %2475 = vmatpush.msra.mxu1 %v2066_v55  ;;  %v2138_v55 = vunpack.c.h.bf16 %v8157_v5  ;;  %v2118_v11 = vunpack.c.h.bf16 %v8193_v53 }
 0x1d1   : > { %2460 = vmatpush.msra.mxu0 %v1982_v48  ;;  %v8256_v48 = vld [vmem:[#allocation13 + $0x3e8] sm:$0xff] }
 0x1d2   : > { %2419 = vmatpush.msrb.mxu2 %v2113_v10  ;;  %2476 = vmatpush.msra.mxu1 %v2062_v40  ;;  %v2022_v10 = vunpack.c.h.bf16 %v8159_v56  ;;  %v2197_v5 = vunpack.c.l.bf16 %v8256_v48  ;;  %v8271_v56 = vld [vmem:[#allocation13 + $0x3c8] sm:$0xff] }
 0x1d3   : > { %2461 = vmatpush.msra.mxu0 %v1978_v6  ;;  %v1752_v2 = vpop.f32.mrf.mxu0  ;;  %v1772_v23 = vpop.f32.mrf.mxu1  ;;  %v8264_v6 = vld [vmem:[#allocation13 + $0x3d8] sm:$0xff] }
 0x1d4   : > { %2420 = vmatpush.msrb.mxu2 %v2109_v29  ;;  %2477 = vmatpush.msra.mxu1 %v2058_v13  ;;  %v1753_v51 = vadd.f32 %v1752_v2, %v1490_v46  ;;  %v2018_v29 = vunpack.c.h.bf16 %v8167_v25  ;;  %v2193_v13 = vunpack.c.l.bf16 %v8264_v6  ;;  %v2189_v25 = vunpack.c.l.bf16 %v8271_v56  ;;  %v8294_v46 = vld [vmem:[#allocation13 + $0x378] sm:$0xff] }
 0x1d5   : > { %2462 = vmatpush.msra.mxu0 %v1974_v0  ;;  %v2126_v0 = vunpack.c.h.bf16 %v8183_v59  ;;  %v8285_v59 = vld [vmem:[#allocation13 + $0x398] sm:$0xff]  ;;  %v2102_v2 = vunpack.c.h.bf16 %v8215_v39 }
 0x1d6   : > { %2421 = vmatpush.msrb.mxu2 %v2105_v14  ;;  %2478 = vmatpush.msra.mxu1 %v2054_v37  ;;  %v1773_v19 = vadd.f32 %v1772_v23, %v1753_v51  ;;  %v8276_v14 = vld [vmem:[#allocation13 + $0x3b8] sm:$0xff]  ;;  %v8280_v37 = vld [vmem:[#allocation13 + $0x3a8] sm:$0xff] }
 0x1d7   : > { %2463 = vmatpush.msra.mxu0 %v1970_v35  ;;  %v2185_v35 = vunpack.c.l.bf16 %v8276_v14  ;;  %v8310_v51 = vld [vmem:[#allocation13 + $0x338] sm:$0xff]  ;;  %v8322_v23 = vld [vmem:[#allocation13 + $0x308] sm:$0xff] }
 0x1d8   : > { %2422 = vmatpush.msrb.mxu2 %v2101_v42  ;;  %2479 = vmatpush.msra.mxu1 %v2050_v52  ;;  %v2181_v42 = vunpack.c.l.bf16 %v8280_v37  ;;  %v8290_v52 = vld [vmem:[#allocation13 + $0x388] sm:$0xff] }
 0x1d9   : > { %2464 = vmatpush.msra.mxu0 %v1966_v28  ;;  %v2177_v28 = vunpack.c.l.bf16 %v8285_v59  ;;  %v2173_v53 = vunpack.c.l.bf16 %v8290_v52 }
 0x1da   : > { %2423 = vmatpush.msrb.mxu2 %v2097_v8  ;;  %2480 = vmatpush.msra.mxu1 %v2046_v9  ;;  %v2106_v8 = vunpack.c.h.bf16 %v8210_v34  ;;  %v8298_v9 = vld [vmem:[#allocation13 + $0x368] sm:$0xff] }
 0x1db   : > { %2465 = vmatpush.msra.mxu0 %v1962_v16  ;;  %v8302_v16 = vld [vmem:[#allocation13 + $0x358] sm:$0xff] }
 0x1dc   : > { %2424 = vmatpush.msrb.mxu2 %v2093_v20  ;;  %2481 = vmatpush.msra.mxu1 %v2042_v26  ;;  %v2098_v20 = vunpack.c.h.bf16 %v8220_v12  ;;  %v8306_v26 = vld [vmem:[#allocation13 + $0x348] sm:$0xff]  ;;  %v2161_v34 = vunpack.c.l.bf16 %v8302_v16  ;;  %v2153_v12 = vunpack.c.l.bf16 %v8310_v51 }
 0x1dd   : > { %2466 = vmatpush.msra.mxu0 %v1958_v50  ;;  %v2094_v50 = vunpack.c.h.bf16 %v8225_v60  ;;  %v2157_v39 = vunpack.c.l.bf16 %v8306_v26 }
 0x1de   : > { %2425 = vmatpush.msrb.mxu2 %v2089_v15  ;;  %2482 = vmatpush.msra.mxu1 %v2038_v24  ;;  %v2090_v15 = vunpack.c.h.bf16 %v8231_v36  ;;  %v8314_v24 = vld [vmem:[#allocation13 + $0x328] sm:$0xff] }
 0x1df   : > { %v1792_v63 = vpop.f32.mrf.mxu2  ;;  %2467 = vmatpush.msra.mxu0 %v1954_v7  ;;  %v1812_v44 = vpop.f32.mrf.mxu3  ;;  %v2086_v7 = vunpack.c.h.bf16 %v8236_v49  ;;  %v2149_v60 = vunpack.c.l.bf16 %v8314_v24  ;;  %v2202_v49 = vunpack.c.h.bf16 %v8252_v41  ;;  %v2186_v41 = vunpack.c.h.bf16 %v8276_v14  ;;  %v8365_v14 = vld [vmem:[#allocation16 + $0x1c0] sm:$0xff] }
 0x1e0   : > { %v1793_v21 = vadd.f32 %v1792_v63, %v1773_v19  ;;  %2426 = vmatpush.msrb.mxu2 %v2085_v58  ;;  %2483 = vmatpush.msra.mxu1 %v2034_v43  ;;  %v8318_v58 = vld [vmem:[#allocation13 + $0x318] sm:$0xff]  ;;  %v2082_v43 = vunpack.c.h.bf16 %v8241_v61  ;;  %v2141_v19 = vunpack.c.l.bf16 %v8322_v23  ;;  %v2198_v61 = vunpack.c.h.bf16 %v8256_v48  ;;  %v8335_v63 = vld [vmem:[#allocation16 + $0xe0] sm:$0xff] }
 0x1e1   : > { %2468 = vmatpush.msra.mxu0 %v1950_v1  ;;  %v2145_v36 = vunpack.c.l.bf16 %v8318_v58  ;;  %v2078_v1 = vunpack.c.h.bf16 %v8246_v47  ;;  %v2190_v47 = vunpack.c.h.bf16 %v8271_v56  ;;  %v8346_v48 = vld [vmem:[#allocation16 + $0xc0] sm:$0xff]  ;;  %v2170_v56 = vunpack.c.h.bf16 %v8294_v46 }
 0x1e2   : > { %v1813_v62 = vadd.f32 %v1812_v44, %v1793_v21  ;;  %2427 = vmatpush.msrb.mxu2 %v2081_v18  ;;  %2484 = vmatpush.msra.mxu1 %v2030_v31  ;;  %v2194_v18 = vunpack.c.h.bf16 %v8264_v6  ;;  %v8333_v31 = vld [vmem:[#allocation16 + $0xf0] sm:$0xff]  ;;  %v2182_v44 = vunpack.c.h.bf16 %v8280_v37  ;;  %v2166_v37 = vunpack.c.h.bf16 %v8298_v9 }
 0x1e3   : > { %2469 = vmatmul.f32.vlgmr.msra.gmra.mxu0 %v8041_v33  ;;  %v2130_v33 = vunpack.c.h.bf16 %v8174_v17  ;;  %v2122_v17 = vunpack.c.h.bf16 %v8188_v22  ;;  %v2114_v22 = vunpack.c.h.bf16 %v8199_v4  ;;  %v2169_v4 = vunpack.c.l.bf16 %v8294_v46  ;;  %v8337_v21 = vld [vmem:[#allocation16 + $0xd0] sm:$0xff] }
 0x1e4   : > { %v8261_v40 = vmax.f32 %v1813_v62, 0.0  ;;  %2428 = vmatpush.msrb.mxu2 %v2077_v38  ;;  %2485 = vmatpush.msra.mxu1 %v2026_v54  ;;  %v2725_v38 = vunpack.c.l.bf16 %v8333_v31  ;;  %v2717_v54 = vunpack.c.l.bf16 %v8337_v21  ;;  %v2178_v62 = vunpack.c.h.bf16 %v8285_v59 }
 0x1e5   : > { %2429 = vmatmul.f32.vlgmr.msrb.gmra.mxu2 %v8172_v30 }
 0x1e6   : > { %2289 = vmatmul.f32.vlgmr.msrb.gmra.mxu3 %v8261_v40  ;;  %2493 = vmatpush.msra.mxu2 %v2138_v55  ;;  %v2174_v55 = vunpack.c.h.bf16 %v8290_v52  ;;  %v8377_v52 = vld [vmem:[#allocation16 + $0x70] sm:$0xff] }
 0x1e7   : > { %2433 = vmatpush.msrb.mxu3 %v2201_v3  ;;  %2486 = vmatpush.msra.mxu1 %v2022_v10  ;;  %v8348_v3 = vld [vmem:[#allocation16 + $0xb0] sm:$0xff] }
 0x1e8   : > { %2494 = vmatpush.msra.mxu2 %v2134_v32  ;;  %2931 = vmatpush.msrb.mxu0 %v2725_v38  ;;  %v8350_v10 = vld [vmem:[#allocation16 + $0x1f0] sm:$0xff]  ;;  %v2713_v32 = vunpack.c.l.bf16 %v8346_v48  ;;  %v2709_v6 = vunpack.c.l.bf16 %v8348_v3  ;;  %v8423_v38 = vld [vmem:[#allocation16] sm:$0xff] }
 0x1e9   : > { %2434 = vmatpush.msrb.mxu3 %v2197_v5  ;;  %2487 = vmatpush.msra.mxu1 %v2018_v29  ;;  %v2789_v5 = vunpack.c.l.bf16 %v8350_v10  ;;  %v8355_v29 = vld [vmem:[#allocation16 + $0xa0] sm:$0xff] }
 0x1ea   : > { %2495 = vmatpush.msra.mxu2 %v2130_v33  ;;  %v8357_v33 = vld [vmem:[#allocation16 + $0x1e0] sm:$0xff] }
 0x1eb   : > { %2435 = vmatpush.msrb.mxu3 %v2193_v13  ;;  %2488 = vmatpush.msra.mxu1 %v2014_v45  ;;  %v2785_v13 = vunpack.c.l.bf16 %v8357_v33  ;;  %v8361_v45 = vld [vmem:[#allocation16 + $0x90] sm:$0xff] }
 0x1ec   : > { %2496 = vmatpush.msra.mxu2 %v2126_v0  ;;  %2489 = vmatmul.f32.vlgmr.msra.gmra.mxu1 %v8078_v57  ;;  %v2110_v57 = vunpack.c.h.bf16 %v8205_v27  ;;  %v2165_v27 = vunpack.c.l.bf16 %v8298_v9  ;;  %v8363_v0 = vld [vmem:[#allocation16 + $0x1d0] sm:$0xff]  ;;  %v2701_v59 = vunpack.c.l.bf16 %v8361_v45  ;;  %v2693_v9 = vunpack.c.l.bf16 %v8377_v52 }
 0x1ed   : > { %2436 = vmatpush.msrb.mxu3 %v2189_v25  ;;  %2951 = vmatpush.msrb.mxu1 %v2789_v5  ;;  %v2705_v25 = vunpack.c.l.bf16 %v8355_v29 }
 0x1ee   : > { %2369 = vmatmul.f32.vlgmr.msra.gmra.mxu3 %v8261_v40  ;;  %2497 = vmatpush.msra.mxu2 %v2122_v17  ;;  %v2781_v17 = vunpack.c.l.bf16 %v8363_v0 }
 0x1ef   : > { %2437 = vmatpush.msrb.mxu3 %v2185_v35  ;;  %v8370_v35 = vld [vmem:[#allocation16 + $0x80] sm:$0xff]  ;;  %2952 = vmatpush.msrb.mxu1 %v2785_v13  ;;  %v2722_v13 = vunpack.c.h.bf16 %v8335_v63 }
 0x1f0   : > { %2498 = vmatpush.msra.mxu2 %v2118_v11  ;;  %v8372_v11 = vld [vmem:[#allocation16 + $0x1b0] sm:$0xff] }
 0x1f1   : > { %2438 = vmatpush.msrb.mxu3 %v2181_v42  ;;  %v2777_v42 = vunpack.c.l.bf16 %v8365_v14  ;;  %2953 = vmatpush.msrb.mxu1 %v2781_v17  ;;  %v2773_v46 = vunpack.c.l.bf16 %v8372_v11  ;;  %v8443_v17 = vld [vmem:[#allocation16 + $0x2d0] sm:$0xff] }
 0x1f2   : > { %2499 = vmatpush.msra.mxu2 %v2114_v22  ;;  %v2162_v22 = vunpack.c.h.bf16 %v8302_v16 }
 0x1f3   : > { %2439 = vmatpush.msrb.mxu3 %v2177_v28  ;;  %v8379_v28 = vld [vmem:[#allocation16 + $0x1a0] sm:$0xff]  ;;  %2954 = vmatpush.msrb.mxu1 %v2777_v42  ;;  %v2845_v42 = vunpack.c.l.bf16 %v8443_v17 }
 0x1f4   : > { %2500 = vmatpush.msra.mxu2 %v2110_v57  ;;  %v2697_v57 = vunpack.c.l.bf16 %v8370_v35 }
 0x1f5   : > { %2440 = vmatpush.msrb.mxu3 %v2173_v53  ;;  %v2158_v53 = vunpack.c.h.bf16 %v8306_v26  ;;  %2955 = vmatpush.msrb.mxu1 %v2773_v46  ;;  %v8392_v26 = vld [vmem:[#allocation16 + $0x50] sm:$0xff] }
 0x1f6   : > { %2501 = vmatpush.msra.mxu2 %v2106_v8  ;;  %v8384_v8 = vld [vmem:[#allocation16 + $0x60] sm:$0xff]  ;;  %v8455_v46 = vld [vmem:[#allocation16 + $0x2b0] sm:$0xff] }
 0x1f7   : > { %2441 = vmatpush.msrb.mxu3 %v2169_v4  ;;  %v2769_v4 = vunpack.c.l.bf16 %v8379_v28  ;;  %v2689_v16 = vunpack.c.l.bf16 %v8384_v8 }
 0x1f8   : > { %2502 = vmatpush.msra.mxu2 %v2102_v2  ;;  %v2154_v2 = vunpack.c.h.bf16 %v8310_v51  ;;  %v2685_v51 = vunpack.c.l.bf16 %v8392_v26 }
 0x1f9   : > { %2442 = vmatpush.msrb.mxu3 %v2165_v27  ;;  %v2150_v27 = vunpack.c.h.bf16 %v8314_v24  ;;  %2956 = vmatpush.msrb.mxu1 %v2769_v4  ;;  %v8403_v24 = vld [vmem:[#allocation16 + $0x30] sm:$0xff] }
 0x1fa   : > { %2503 = vmatpush.msra.mxu2 %v2098_v20  ;;  %v2146_v20 = vunpack.c.h.bf16 %v8318_v58  ;;  %v2142_v58 = vunpack.c.h.bf16 %v8322_v23  ;;  %v8416_v23 = vld [vmem:[#allocation16 + $0x10] sm:$0xff] }
 0x1fb   : > { %2443 = vmatpush.msrb.mxu3 %v2161_v34  ;;  %v8394_v34 = vld [vmem:[#allocation16 + $0x190] sm:$0xff] }
 0x1fc   : > { %2504 = vmatpush.msra.mxu2 %v2094_v50  ;;  %v8396_v50 = vld [vmem:[#allocation16 + $0x40] sm:$0xff] }
 0x1fd   : > { %2444 = vmatpush.msrb.mxu3 %v2157_v39  ;;  %v2765_v39 = vunpack.c.l.bf16 %v8394_v34 }
 0x1fe   : > { %2505 = vmatpush.msra.mxu2 %v2090_v15  ;;  %v2681_v15 = vunpack.c.l.bf16 %v8396_v50 }
 0x1ff   : > { %2445 = vmatpush.msrb.mxu3 %v2153_v12  ;;  %v8401_v12 = vld [vmem:[#allocation16 + $0x180] sm:$0xff]  ;;  %2957 = vmatpush.msrb.mxu1 %v2765_v39  ;;  %v2786_v39 = vunpack.c.h.bf16 %v8357_v33  ;;  %v2778_v33 = vunpack.c.h.bf16 %v8365_v14  ;;  %v2770_v14 = vunpack.c.h.bf16 %v8379_v28  ;;  %v2682_v28 = vunpack.c.h.bf16 %v8396_v50 }
 0x200   : > { %2506 = vmatpush.msra.mxu2 %v2086_v7  ;;  %v8405_v7 = vld [vmem:[#allocation16 + $0x170] sm:$0xff] }
 0x201   : > { %2446 = vmatpush.msrb.mxu3 %v2149_v60  ;;  %v2761_v60 = vunpack.c.l.bf16 %v8401_v12 }
 0x202   : > { %2507 = vmatpush.msra.mxu2 %v2082_v43  ;;  %v2677_v43 = vunpack.c.l.bf16 %v8403_v24 }
 0x203   : > { %2447 = vmatpush.msrb.mxu3 %v2145_v36  ;;  %v2757_v36 = vunpack.c.l.bf16 %v8405_v7  ;;  %2958 = vmatpush.msrb.mxu1 %v2761_v60  ;;  %v8475_v60 = vld [vmem:[#allocation16 + $0x270] sm:$0xff] }
 0x204   : > { %2508 = vmatpush.msra.mxu2 %v2078_v1  ;;  %v8412_v1 = vld [vmem:[#allocation16 + $0x20] sm:$0xff] }
 0x205   : > { %2448 = vmatpush.msrb.mxu3 %v2141_v19  ;;  %2509 = vmatmul.f32.vlgmr.msra.gmra.mxu2 %v8172_v30  ;;  %v2721_v30 = vunpack.c.l.bf16 %v8335_v63  ;;  %v8414_v19 = vld [vmem:[#allocation16 + $0x160] sm:$0xff] }
 0x206   : > { %2449 = vmatmul.f32.vlgmr.msrb.gmra.mxu3 %v8261_v40  ;;  %2959 = vmatpush.msrb.mxu1 %v2757_v36  ;;  %v8451_v63 = vld [vmem:[#allocation16 + $0x2c0] sm:$0xff] }
 0x207   : > { %2513 = vmatpush.msra.mxu3 %v2202_v49  ;;  %2932 = vmatpush.msrb.mxu0 %v2721_v30  ;;  %v2673_v49 = vunpack.c.l.bf16 %v8412_v1  ;;  %v8425_v30 = vld [vmem:[#allocation16 + $0x140] sm:$0xff] }
 0x208   : > { %v8480_v36 = vld [vmem:[#allocation16 + $0x260] sm:$0xff] }
 0x209   : > { %2514 = vmatpush.msra.mxu3 %v2198_v61  ;;  %2933 = vmatpush.msrb.mxu0 %v2717_v54  ;;  %v2753_v61 = vunpack.c.l.bf16 %v8414_v19  ;;  %v8430_v54 = vld [vmem:[#allocation16 + $0x130] sm:$0xff] }
 0x20b   : > { %2515 = vmatpush.msra.mxu3 %v2194_v18  ;;  %2934 = vmatpush.msrb.mxu0 %v2713_v32  ;;  %v2669_v18 = vunpack.c.l.bf16 %v8416_v23 }
 0x20c   : > { %2960 = vmatpush.msrb.mxu1 %v2753_v61  ;;  %v2817_v61 = vunpack.c.l.bf16 %v8480_v36 }
 0x20d   : > { %2516 = vmatpush.msra.mxu3 %v2190_v47  ;;  %2935 = vmatpush.msrb.mxu0 %v2709_v6  ;;  %v8421_v47 = vld [vmem:[#allocation16 + $0x150] sm:$0xff]  ;;  %v2726_v6 = vunpack.c.h.bf16 %v8333_v31 }
 0x20e   : > { %v8446_v31 = vld [vmem:[#allocation16 + $0x110] sm:$0xff] }
 0x20f   : > { %2517 = vmatpush.msra.mxu3 %v2186_v41  ;;  %2936 = vmatpush.msrb.mxu0 %v2705_v25  ;;  %v8428_v41 = vld [vmem:[#allocation16 + $0x2f0] sm:$0xff]  ;;  %v8441_v25 = vld [vmem:[#allocation16 + $0x120] sm:$0xff] }
 0x210   : > { %v2853_v32 = vunpack.c.l.bf16 %v8428_v41 }
 0x211   : > { %2518 = vmatpush.msra.mxu3 %v2182_v44  ;;  %2937 = vmatpush.msrb.mxu0 %v2701_v59  ;;  %v8432_v44 = vld [vmem:[#allocation16 + $0x2e0] sm:$0xff]  ;;  %v2737_v59 = vunpack.c.l.bf16 %v8441_v25 }
 0x212   : > { %v2849_v5 = vunpack.c.l.bf16 %v8432_v44  ;;  %2971 = vmatpush.msrb.mxu2 %v2853_v32  ;;  %v2762_v32 = vunpack.c.h.bf16 %v8401_v12  ;;  %v2674_v12 = vunpack.c.h.bf16 %v8412_v1 }
 0x213   : > { %2519 = vmatpush.msra.mxu3 %v2178_v62  ;;  %2938 = vmatpush.msrb.mxu0 %v2697_v57  ;;  %v2665_v62 = vunpack.c.l.bf16 %v8423_v38  ;;  %v8453_v57 = vld [vmem:[#allocation16 + $0x100] sm:$0xff] }
 0x214   : > { %2972 = vmatpush.msrb.mxu2 %v2849_v5  ;;  %v2729_v4 = vunpack.c.l.bf16 %v8453_v57  ;;  %v8503_v5 = vld [vmem:[#allocation16 + $0x220] sm:$0xff] }
 0x215   : > { %2520 = vmatpush.msra.mxu3 %v2174_v55  ;;  %2939 = vmatpush.msrb.mxu0 %v2693_v9  ;;  %v2745_v55 = vunpack.c.l.bf16 %v8425_v30  ;;  %v8459_v9 = vld [vmem:[#allocation16 + $0x2a0] sm:$0xff]  ;;  %v2801_v50 = vunpack.c.l.bf16 %v8503_v5 }
 0x216   : > { %2973 = vmatpush.msrb.mxu2 %v2845_v42  ;;  %v2666_v42 = vunpack.c.h.bf16 %v8423_v38  ;;  %v2850_v38 = vunpack.c.h.bf16 %v8432_v44 }
 0x217   : > { %2521 = vmatpush.msra.mxu3 %v2170_v56  ;;  %2940 = vmatpush.msrb.mxu0 %v2689_v16  ;;  %v2741_v56 = vunpack.c.l.bf16 %v8430_v54  ;;  %v2710_v16 = vunpack.c.h.bf16 %v8348_v3  ;;  %v2702_v3 = vunpack.c.h.bf16 %v8361_v45  ;;  %v2694_v45 = vunpack.c.h.bf16 %v8377_v52 }
 0x218   : > { %v2766_v52 = vunpack.c.h.bf16 %v8394_v34  ;;  %v2678_v34 = vunpack.c.h.bf16 %v8403_v24 }
 0x219   : > { %2522 = vmatpush.msra.mxu3 %v2166_v37  ;;  %2941 = vmatpush.msrb.mxu0 %v2685_v51  ;;  %v2718_v37 = vunpack.c.h.bf16 %v8337_v21  ;;  %v2714_v21 = vunpack.c.h.bf16 %v8346_v48  ;;  %v2833_v51 = vunpack.c.l.bf16 %v8459_v9  ;;  %v2706_v48 = vunpack.c.h.bf16 %v8355_v29 }
 0x21a   : > { %v2698_v29 = vunpack.c.h.bf16 %v8370_v35  ;;  %v2690_v35 = vunpack.c.h.bf16 %v8384_v8 }
 0x21b   : > { %2523 = vmatpush.msra.mxu3 %v2162_v22  ;;  %2942 = vmatpush.msrb.mxu0 %v2681_v15  ;;  %v2733_v22 = vunpack.c.l.bf16 %v8446_v31  ;;  %v8470_v15 = vld [vmem:[#allocation16 + $0x280] sm:$0xff] }
 0x21d   : > { %2524 = vmatpush.msra.mxu3 %v2158_v53  ;;  %2943 = vmatpush.msrb.mxu0 %v2677_v43  ;;  %v2841_v53 = vunpack.c.l.bf16 %v8451_v63  ;;  %v2825_v43 = vunpack.c.l.bf16 %v8470_v15 }
 0x21f   : > { %2525 = vmatpush.msra.mxu3 %v2154_v2  ;;  %2944 = vmatpush.msrb.mxu0 %v2673_v49  ;;  %v2837_v2 = vunpack.c.l.bf16 %v8455_v46  ;;  %v2821_v49 = vunpack.c.l.bf16 %v8475_v60 }
 0x220   : > { %2974 = vmatpush.msrb.mxu2 %v2841_v53 }
 0x221   : > { %2526 = vmatpush.msra.mxu3 %v2150_v27  ;;  %2945 = vmatpush.msrb.mxu0 %v2669_v18  ;;  %v2790_v27 = vunpack.c.h.bf16 %v8350_v10  ;;  %v2782_v10 = vunpack.c.h.bf16 %v8363_v0  ;;  %v2774_v0 = vunpack.c.h.bf16 %v8372_v11  ;;  %v8488_v18 = vld [vmem:[#allocation16 + $0x250] sm:$0xff] }
 0x222   : > { %2975 = vmatpush.msrb.mxu2 %v2837_v2  ;;  %v8494_v11 = vld [vmem:[#allocation16 + $0x230] sm:$0xff] }
 0x223   : > { %2527 = vmatpush.msra.mxu3 %v2146_v20  ;;  %2946 = vmatpush.msrb.mxu0 %v2665_v62  ;;  %v8465_v20 = vld [vmem:[#allocation16 + $0x290] sm:$0xff]  ;;  %v8492_v62 = vld [vmem:[#allocation16 + $0x240] sm:$0xff] }
 0x224   : > { %2976 = vmatpush.msrb.mxu2 %v2833_v51  ;;  %v2809_v8 = vunpack.c.l.bf16 %v8492_v62  ;;  %v8528_v2 = vld [vmem:[#allocation16 + $0x3d0] sm:$0xff]  ;;  %v2842_v51 = vunpack.c.h.bf16 %v8451_v63 }
 0x225   : > { %2528 = vmatpush.msra.mxu3 %v2142_v58  ;;  %3011 = vmatpush.msra.mxu0 %v2726_v6  ;;  %v2829_v58 = vunpack.c.l.bf16 %v8465_v20  ;;  %v2758_v6 = vunpack.c.h.bf16 %v8405_v7  ;;  %v2670_v7 = vunpack.c.h.bf16 %v8416_v23  ;;  %v2854_v23 = vunpack.c.h.bf16 %v8428_v41 }
 0x226   : > { %2529 = vmatmul.f32.vlgmr.msra.gmra.mxu3 %v8261_v40  ;;  %v2749_v40 = vunpack.c.l.bf16 %v8421_v47  ;;  %v2909_v41 = vunpack.c.l.bf16 %v8528_v2 }
 0x227   : > { %3012 = vmatpush.msra.mxu0 %v2722_v13  ;;  %2977 = vmatpush.msrb.mxu2 %v2829_v58  ;;  %v8508_v13 = vld [vmem:[#allocation16 + $0x210] sm:$0xff]  ;;  %v2834_v58 = vunpack.c.h.bf16 %v8459_v9 }
 0x228   : > { %2961 = vmatpush.msrb.mxu1 %v2749_v40  ;;  %v2686_v40 = vunpack.c.h.bf16 %v8392_v26  ;;  %v2805_v26 = vunpack.c.l.bf16 %v8494_v11  ;;  %v2797_v24 = vunpack.c.l.bf16 %v8508_v13 }
 0x229   : > { %3013 = vmatpush.msra.mxu0 %v2718_v37  ;;  %2978 = vmatpush.msrb.mxu2 %v2825_v43  ;;  %v2750_v37 = vunpack.c.h.bf16 %v8421_v47  ;;  %v2742_v47 = vunpack.c.h.bf16 %v8430_v54  ;;  %v2734_v54 = vunpack.c.h.bf16 %v8446_v31  ;;  %v8542_v31 = vld [vmem:[#allocation16 + $0x3a0] sm:$0xff] }
 0x22a   : > { %2962 = vmatpush.msrb.mxu1 %v2745_v55  ;;  %v2813_v55 = vunpack.c.l.bf16 %v8488_v18  ;;  %v2897_v63 = vunpack.c.l.bf16 %v8542_v31  ;;  %v8550_v43 = vld [vmem:[#allocation16 + $0x380] sm:$0xff] }
 0x22b   : > { %3014 = vmatpush.msra.mxu0 %v2714_v21  ;;  %2979 = vmatpush.msrb.mxu2 %v2821_v49  ;;  %v8523_v21 = vld [vmem:[#allocation16 + $0x3e0] sm:$0xff]  ;;  %v2889_v9 = vunpack.c.l.bf16 %v8550_v43 }
 0x22c   : > { %2963 = vmatpush.msrb.mxu1 %v2741_v56  ;;  %v2754_v56 = vunpack.c.h.bf16 %v8414_v19  ;;  %v8518_v19 = vld [vmem:[#allocation16 + $0x3f0] sm:$0xff] }
 0x22d   : > { %3015 = vmatpush.msra.mxu0 %v2710_v16  ;;  %2980 = vmatpush.msrb.mxu2 %v2817_v61  ;;  %v2917_v53 = vunpack.c.l.bf16 %v8518_v19  ;;  %v2846_v16 = vunpack.c.h.bf16 %v8443_v17  ;;  %v2818_v61 = vunpack.c.h.bf16 %v8480_v36  ;;  %v2810_v36 = vunpack.c.h.bf16 %v8492_v62  ;;  %v8580_v62 = vld [vmem:[#allocation16 + $0xf8] sm:$0xff] }
 0x22e   : > { %2964 = vmatpush.msrb.mxu1 %v2737_v59  ;;  %v8513_v59 = vld [vmem:[#allocation16 + $0x200] sm:$0xff] }
 0x22f   : > { %3016 = vmatpush.msra.mxu0 %v2706_v48  ;;  %2981 = vmatpush.msrb.mxu2 %v2813_v55  ;;  %v2793_v1 = vunpack.c.l.bf16 %v8513_v59  ;;  %v8538_v48 = vld [vmem:[#allocation16 + $0x3b0] sm:$0xff] }
 0x230   : > { %2965 = vmatpush.msrb.mxu1 %v2733_v22  ;;  %v2746_v22 = vunpack.c.h.bf16 %v8425_v30  ;;  %2991 = vmatpush.msrb.mxu3 %v2917_v53  ;;  %v2913_v30 = vunpack.c.l.bf16 %v8523_v21  ;;  %v2901_v17 = vunpack.c.l.bf16 %v8538_v48 }
 0x231   : > { %3017 = vmatpush.msra.mxu0 %v2702_v3  ;;  %2982 = vmatpush.msrb.mxu2 %v2809_v8  ;;  %v8546_v3 = vld [vmem:[#allocation16 + $0x390] sm:$0xff]  ;;  %v8569_v8 = vld [vmem:[#allocation16 + $0x340] sm:$0xff] }
 0x232   : > { %2966 = vmatpush.msrb.mxu1 %v2729_v4  ;;  %v2738_v4 = vunpack.c.h.bf16 %v8441_v25  ;;  %2992 = vmatpush.msrb.mxu3 %v2913_v30  ;;  %v2730_v25 = vunpack.c.h.bf16 %v8453_v57  ;;  %v2830_v57 = vunpack.c.h.bf16 %v8465_v20  ;;  %v2822_v20 = vunpack.c.h.bf16 %v8475_v60  ;;  %v8591_v30 = vld [vmem:[#allocation16 + $0x300] sm:$0xff] }
 0x233   : > { %3018 = vmatpush.msra.mxu0 %v2698_v29  ;;  %2983 = vmatpush.msrb.mxu2 %v2805_v26  ;;  %v8554_v29 = vld [vmem:[#allocation14] sm:$0xf]  ;;  %v8573_v26 = vld [vmem:[#allocation16 + $0x330] sm:$0xff] }
 0x234   : > { %3031 = vmatpush.msra.mxu1 %v2790_v27  ;;  %v8533_v27 = vld [vmem:[#allocation16 + $0x3c0] sm:$0xff]  ;;  %2993 = vmatpush.msrb.mxu3 %v2909_v41  ;;  %v8595_v41 = vld [vmem:[#allocation16 + $0xd8] sm:$0xff] }
 0x235   : > { %3019 = vmatpush.msra.mxu0 %v2694_v45  ;;  %2984 = vmatpush.msrb.mxu2 %v2801_v50  ;;  %v2905_v44 = vunpack.c.l.bf16 %v8533_v27  ;;  %v2230_v45 = vpop.f32.mrf.mxu0  ;;  %v8577_v50 = vld [vmem:[#allocation16 + $0x320] sm:$0xff] }
 0x236   : > { %3032 = vmatpush.msra.mxu1 %v2786_v39  ;;  %v2838_v39 = vunpack.c.h.bf16 %v8455_v46  ;;  %v2826_v46 = vunpack.c.h.bf16 %v8470_v15  ;;  %v2205_v15 = vperm.slane %v8554_v29, 0 }
 0x237   : > { %3020 = vmatpush.msra.mxu0 %v2690_v35  ;;  %2985 = vmatpush.msrb.mxu2 %v2797_v24  ;;  %v2865_v24 = vunpack.c.l.bf16 %v8577_v50 }
 0x238   : > { %3033 = vmatpush.msra.mxu1 %v2782_v10  ;;  %2994 = vmatpush.msrb.mxu3 %v2905_v44  ;;  %v2893_v10 = vunpack.c.l.bf16 %v8546_v3 }
 0x239   : > { %3021 = vmatpush.msra.mxu0 %v2686_v40  ;;  %2986 = vmatpush.msrb.mxu2 %v2793_v1  ;;  %v8565_v40 = vld [vmem:[#allocation16 + $0x350] sm:$0xff]  ;;  %v8586_v1 = vld [vmem:[#allocation16 + $0xe8] sm:$0xff] }
 0x23a   : > { %3034 = vmatpush.msra.mxu1 %v2778_v33  ;;  %2995 = vmatpush.msrb.mxu3 %v2901_v17  ;;  %v8556_v33 = vld [vmem:[#allocation16 + $0x370] sm:$0xff]  ;;  %v2877_v60 = vunpack.c.l.bf16 %v8565_v40  ;;  %v8602_v17 = vld [vmem:[#allocation16 + $0xc8] sm:$0xff] }
 0x23b   : > { %3022 = vmatpush.msra.mxu0 %v2682_v28  ;;  %3051 = vmatpush.msra.mxu2 %v2854_v23  ;;  %v2885_v49 = vunpack.c.l.bf16 %v8556_v33  ;;  %v2231_v28 = vadd.f32 %v2230_v45, %v2205_v15  ;;  %v2798_v23 = vunpack.c.h.bf16 %v8508_v13  ;;  %v2918_v13 = vunpack.c.h.bf16 %v8518_v19  ;;  %v8620_v15 = vld [vmem:[#allocation16 + $0x98] sm:$0xff] }
 0x23c   : > { %3035 = vmatpush.msra.mxu1 %v2774_v0  ;;  %2996 = vmatpush.msrb.mxu3 %v2897_v63  ;;  %v8560_v0 = vld [vmem:[#allocation16 + $0x360] sm:$0xff] }
 0x23d   : > { %3023 = vmatpush.msra.mxu0 %v2678_v34  ;;  %3052 = vmatpush.msra.mxu2 %v2850_v38  ;;  %v2881_v35 = vunpack.c.l.bf16 %v8560_v0  ;;  %v2806_v34 = vunpack.c.h.bf16 %v8494_v11  ;;  %v8584_v11 = vld [vmem:[#allocation16 + $0x310] sm:$0xff]  ;;  %v2727_v38 = vunpack.c.l.bf16 %v8580_v62 }
 0x23e   : > { %3036 = vmatpush.msra.mxu1 %v2770_v14  ;;  %2997 = vmatpush.msrb.mxu3 %v2893_v10  ;;  %v2250_v14 = vpop.f32.mrf.mxu1  ;;  %v2861_v53 = vunpack.c.l.bf16 %v8584_v11  ;;  %v2715_v10 = vunpack.c.l.bf16 %v8602_v17 }
 0x23f   : > { %3024 = vmatpush.msra.mxu0 %v2674_v12  ;;  %3053 = vmatpush.msra.mxu2 %v2846_v16  ;;  %v2206_v12 = vperm.slane %v8554_v29, 1  ;;  %v2857_v16 = vunpack.c.l.bf16 %v8591_v30 }
 0x240   : > { %3037 = vmatpush.msra.mxu1 %v2766_v52  ;;  %2998 = vmatpush.msrb.mxu3 %v2889_v9  ;;  %v2814_v52 = vunpack.c.h.bf16 %v8488_v18  ;;  %v2869_v18 = vunpack.c.l.bf16 %v8573_v26 }
 0x241   : > { %3025 = vmatpush.msra.mxu0 %v2670_v7  ;;  %3054 = vmatpush.msra.mxu2 %v2842_v51  ;;  %v2802_v7 = vunpack.c.h.bf16 %v8503_v5  ;;  %v2723_v51 = vunpack.c.l.bf16 %v8586_v1 }
 0x242   : > { %3038 = vmatpush.msra.mxu1 %v2762_v32  ;;  %2999 = vmatpush.msrb.mxu3 %v2885_v49  ;;  %v2873_v32 = vunpack.c.l.bf16 %v8569_v8  ;;  %v8612_v49 = vld [vmem:[#allocation16 + $0xa8] sm:$0xff] }
 0x243   : > { %3026 = vmatpush.msra.mxu0 %v2666_v42  ;;  %3055 = vmatpush.msra.mxu2 %v2838_v39  ;;  %v2719_v39 = vunpack.c.l.bf16 %v8595_v41 }
 0x244   : > { %3039 = vmatpush.msra.mxu1 %v2758_v6  ;;  %3000 = vmatpush.msrb.mxu3 %v2881_v35  ;;  %v2251_v6 = vadd.f32 %v2250_v14, %v2231_v28  ;;  %v8622_v35 = vld [vmem:[#allocation16 + $0x1d8] sm:$0xff]  ;;  %v2707_v14 = vunpack.c.l.bf16 %v8612_v49  ;;  %v2703_v28 = vunpack.c.l.bf16 %v8620_v15 }
 0x245   : > { %3056 = vmatpush.msra.mxu2 %v2834_v58  ;;  %v2914_v58 = vunpack.c.h.bf16 %v8523_v21 }
 0x246   : > { %3040 = vmatpush.msra.mxu1 %v2754_v56  ;;  %3001 = vmatpush.msrb.mxu3 %v2877_v60  ;;  %v8629_v60 = vld [vmem:[#allocation16 + $0x88] sm:$0xff] }
 0x247   : > { %3057 = vmatpush.msra.mxu2 %v2830_v57  ;;  %v8608_v57 = vld [vmem:[#allocation16 + $0x1f8] sm:$0xff] }
 0x248   : > { %3041 = vmatpush.msra.mxu1 %v2750_v37  ;;  %v2270_v55 = vpop.f32.mrf.mxu2  ;;  %3002 = vmatpush.msrb.mxu3 %v2873_v32  ;;  %v2310_v37 = vpop.f32.mrf.mxu0  ;;  %v2791_v45 = vunpack.c.l.bf16 %v8608_v57  ;;  %v8636_v32 = vld [vmem:[#allocation16 + $0x78] sm:$0xff] }
 0x249   : > { %3058 = vmatpush.msra.mxu2 %v2826_v46  ;;  %v2271_v56 = vadd.f32 %v2270_v55, %v2251_v6  ;;  %v2311_v5 = vadd.f32 %v2310_v37, %v2206_v12  ;;  %v2910_v46 = vunpack.c.h.bf16 %v8528_v2  ;;  %v2906_v2 = vunpack.c.h.bf16 %v8533_v27  ;;  %v8631_v55 = vld [vmem:[#allocation16 + $0x1c8] sm:$0xff] }
 0x24a   : > { %3042 = vmatpush.msra.mxu1 %v2746_v22  ;;  %3003 = vmatpush.msrb.mxu3 %v2869_v18  ;;  %v2783_v27 = vunpack.c.l.bf16 %v8622_v35  ;;  %v2898_v6 = vunpack.c.h.bf16 %v8542_v31  ;;  %v2699_v18 = vunpack.c.l.bf16 %v8629_v60  ;;  %v2779_v12 = vunpack.c.l.bf16 %v8631_v55  ;;  %v8650_v31 = vld [vmem:[#allocation16 + $0x58] sm:$0xff] }
 0x24b   : > { %3059 = vmatpush.msra.mxu2 %v2822_v20  ;;  %v8614_v20 = vld [vmem:[#allocation16 + $0x1e8] sm:$0xff] }
 0x24c   : > { %3043 = vmatpush.msra.mxu1 %v2742_v47  ;;  %3004 = vmatpush.msrb.mxu3 %v2865_v24  ;;  %v2330_v47 = vpop.f32.mrf.mxu1  ;;  %v2894_v24 = vunpack.c.h.bf16 %v8546_v3  ;;  %v8658_v3 = vld [vmem:[#allocation16 + $0x48] sm:$0xff] }
 0x24d   : > { %3060 = vmatpush.msra.mxu2 %v2818_v61 }
 0x24e   : > { %3044 = vmatpush.msra.mxu1 %v2738_v4  ;;  %3005 = vmatpush.msrb.mxu3 %v2861_v53 }
 0x24f   : > { %3061 = vmatpush.msra.mxu2 %v2814_v52  ;;  %v2787_v52 = vunpack.c.l.bf16 %v8614_v20 }
 0x250   : > { %3045 = vmatpush.msra.mxu1 %v2734_v54  ;;  %v2794_v54 = vunpack.c.h.bf16 %v8513_v59  ;;  %v2350_v44 = vpop.f32.mrf.mxu2  ;;  %3006 = vmatpush.msrb.mxu3 %v2857_v16  ;;  %v8606_v59 = vld [vmem:[#allocation16 + $0xb8] sm:$0xff]  ;;  %v2207_v16 = vperm.slane %v8554_v29, 2 }
 0x251   : > { %3062 = vmatpush.msra.mxu2 %v2810_v36  ;;  %v2711_v21 = vunpack.c.l.bf16 %v8606_v59  ;;  %v2902_v36 = vunpack.c.h.bf16 %v8538_v48  ;;  %v8643_v48 = vld [vmem:[#allocation16 + $0x68] sm:$0xff] }
 0x252   : > { %3046 = vmatpush.msra.mxu1 %v2730_v25  ;;  %v2331_v25 = vadd.f32 %v2330_v47, %v2311_v5  ;;  %3071 = vmatpush.msra.mxu3 %v2918_v13  ;;  %v2691_v53 = vunpack.c.l.bf16 %v8643_v48  ;;  %v8660_v47 = vld [vmem:[#allocation16 + $0x188] sm:$0xff]  ;;  %v2687_v5 = vunpack.c.l.bf16 %v8650_v31  ;;  %v2390_v13 = vpop.f32.mrf.mxu0 }
 0x253   : > { %3063 = vmatpush.msra.mxu2 %v2806_v34  ;;  %v8638_v34 = vld [vmem:[#allocation16 + $0x1b8] sm:$0xff] }
 0x254   : > { %v2351_v63 = vadd.f32 %v2350_v44, %v2331_v25  ;;  %3072 = vmatpush.msra.mxu3 %v2914_v58  ;;  %v2775_v37 = vunpack.c.l.bf16 %v8638_v34  ;;  %v8668_v44 = vld [vmem:[#allocation16 + $0x178] sm:$0xff]  ;;  %v2763_v25 = vunpack.c.l.bf16 %v8660_v47  ;;  %v8675_v58 = vld [vmem:[#allocation16 + $0x168] sm:$0xff] }
 0x255   : > { %3064 = vmatpush.msra.mxu2 %v2802_v7  ;;  %v2695_v7 = vunpack.c.l.bf16 %v8636_v32 }
 0x256   : > { %3073 = vmatpush.msra.mxu3 %v2910_v46  ;;  %v2391_v46 = vadd.f32 %v2390_v13, %v2207_v16  ;;  %v2862_v13 = vunpack.c.h.bf16 %v8584_v11 }
 0x257   : > { %3065 = vmatpush.msra.mxu2 %v2798_v23 }
 0x258   : > { %3074 = vmatpush.msra.mxu3 %v2906_v2 }
 0x259   : > { %3066 = vmatpush.msra.mxu2 %v2794_v54  ;;  %v8666_v54 = vld [vmem:[#allocation16 + $0x38] sm:$0xff] }
 0x25a   : > { %3075 = vmatpush.msra.mxu3 %v2902_v36  ;;  %v8687_v36 = vld [vmem:[#allocation16 + $0x8] sm:$0xff] }
 0x25c   : > { %3076 = vmatpush.msra.mxu3 %v2898_v6 }
 0x25e   : > { %3077 = vmatpush.msra.mxu3 %v2894_v24  ;;  %v2866_v24 = vunpack.c.h.bf16 %v8577_v50  ;;  %v8705_v50 = vld [vmem:[#allocation16 + $0x128] sm:$0xff] }
 0x268   : > { %v2430_v2 = vpop.f32.mrf.mxu2 }
 0x269   : > { %v2290_v42 = vpop.f32.mrf.mxu3 }
 0x26a   : > { %v2291_v22 = vadd.f32 %v2290_v42, %v2271_v56  ;;  %v8645_v56 = vld [vmem:[#allocation16 + $0x1a8] sm:$0xff]  ;;  %v8652_v42 = vld [vmem:[#allocation16 + $0x198] sm:$0xff] }
 0x26b   : > { %v2771_v23 = vunpack.c.l.bf16 %v8645_v56 }
 0x26c   : > { %v8593_v4 = vmax.f32 %v2291_v22, 0.0  ;;  %v2890_v22 = vunpack.c.h.bf16 %v8550_v43  ;;  %v2767_v43 = vunpack.c.l.bf16 %v8652_v42 }
 0x26e   : > { %2947 = vmatmul.f32.vlgmr.msrb.gmra.mxu0 %v8593_v4  ;;  %3078 = vmatpush.msra.mxu3 %v2890_v22 }
 0x26f   : > { %3091 = vmatpush.msrb.mxu0 %v2727_v38  ;;  %v2886_v38 = vunpack.c.h.bf16 %v8556_v33  ;;  %v2683_v33 = vunpack.c.l.bf16 %v8658_v3 }
 0x271   : > { %3092 = vmatpush.msrb.mxu0 %v2723_v51  ;;  %v2370_v19 = vpop.f32.mrf.mxu3  ;;  %v2882_v51 = vunpack.c.h.bf16 %v8560_v0  ;;  %3079 = vmatpush.msra.mxu3 %v2886_v38  ;;  %v2759_v0 = vunpack.c.l.bf16 %v8668_v44 }
 0x272   : > { %v2371_v9 = vadd.f32 %v2370_v19, %v2351_v63  ;;  %v2878_v63 = vunpack.c.h.bf16 %v8565_v40  ;;  %v2410_v19 = vpop.f32.mrf.mxu1 }
 0x273   : > { %3093 = vmatpush.msrb.mxu0 %v2719_v39  ;;  %v8673_v39 = vld [vmem:[#allocation16 + $0x28] sm:$0xff]  ;;  %3080 = vmatpush.msra.mxu3 %v2882_v51  ;;  %v8710_v51 = vld [vmem:[#allocation16 + $0x2d8] sm:$0xff] }
 0x274   : > { %v8618_v61 = vmax.f32 %v2371_v9, 0.0  ;;  %v8680_v9 = vld [vmem:[#allocation16 + $0x18] sm:$0xff]  ;;  %v2675_v40 = vunpack.c.l.bf16 %v8673_v39  ;;  %v2847_v11 = vunpack.c.l.bf16 %v8710_v51 }
 0x275   : > { %3094 = vmatpush.msrb.mxu0 %v2715_v10  ;;  %v2679_v10 = vunpack.c.l.bf16 %v8666_v54  ;;  %3081 = vmatpush.msra.mxu3 %v2878_v63  ;;  %v2671_v6 = vunpack.c.l.bf16 %v8680_v9  ;;  %v8715_v63 = vld [vmem:[#allocation16 + $0x118] sm:$0xff] }
 0x276   : > { %2967 = vmatmul.f32.vlgmr.msrb.gmra.mxu1 %v8618_v61  ;;  %3027 = vmatmul.f32.vlgmr.msra.gmra.mxu0 %v8593_v4 }
 0x277   : > { %3095 = vmatpush.msrb.mxu0 %v2711_v21  ;;  %3111 = vmatpush.msrb.mxu1 %v2791_v45  ;;  %v8682_v21 = vld [vmem:[#allocation16 + $0x158] sm:$0xff]  ;;  %v2874_v45 = vunpack.c.h.bf16 %v8569_v8 }
 0x278   : > { %v2751_v8 = vunpack.c.l.bf16 %v8682_v21 }
 0x279   : > { %3096 = vmatpush.msrb.mxu0 %v2707_v14  ;;  %3112 = vmatpush.msrb.mxu1 %v2787_v52  ;;  %v2755_v14 = vunpack.c.l.bf16 %v8675_v58  ;;  %v2411_v52 = vadd.f32 %v2410_v19, %v2391_v46  ;;  %v8720_v19 = vld [vmem:[#allocation16 + $0x2c8] sm:$0xff] }
 0x27a   : > { %3082 = vmatpush.msra.mxu3 %v2874_v45  ;;  %v8725_v46 = vld [vmem:[#allocation16 + $0x108] sm:$0xff]  ;;  %v8728_v45 = vld [vmem:[#allocation16 + $0x2b8] sm:$0xff] }
 0x27b   : > { %3097 = vmatpush.msrb.mxu0 %v2703_v28  ;;  %3113 = vmatpush.msrb.mxu1 %v2783_v27  ;;  %v8689_v28 = vld [vmem:[#allocation16 + $0x148] sm:$0xff]  ;;  %v2870_v27 = vunpack.c.h.bf16 %v8573_v26  ;;  %v8699_v26 = vld [vmem:[#allocation16 + $0x138] sm:$0xff] }
 0x27c   : > { %v2747_v22 = vunpack.c.l.bf16 %v8689_v28  ;;  %v2743_v16 = vunpack.c.l.bf16 %v8699_v26 }
 0x27d   : > { %3098 = vmatpush.msrb.mxu0 %v2699_v18  ;;  %3114 = vmatpush.msrb.mxu1 %v2779_v12  ;;  %v2431_v18 = vadd.f32 %v2430_v2, %v2411_v52  ;;  %v8694_v12 = vld [vmem:[#allocation16 + $0x2f8] sm:$0xff]  ;;  %v2843_v2 = vunpack.c.l.bf16 %v8720_v19  ;;  %v2712_v52 = vunpack.c.h.bf16 %v8606_v59 }
 0x27e   : > { %3047 = vmatmul.f32.vlgmr.msra.gmra.mxu1 %v8618_v61  ;;  %3083 = vmatpush.msra.mxu3 %v2870_v27  ;;  %v2855_v38 = vunpack.c.l.bf16 %v8694_v12  ;;  %v2792_v27 = vunpack.c.h.bf16 %v8608_v57  ;;  %v2704_v57 = vunpack.c.h.bf16 %v8620_v15  ;;  %v2696_v15 = vunpack.c.h.bf16 %v8636_v32 }
 0x27f   : > { %3099 = vmatpush.msrb.mxu0 %v2695_v7  ;;  %3115 = vmatpush.msrb.mxu1 %v2775_v37  ;;  %v2667_v37 = vunpack.c.l.bf16 %v8687_v36  ;;  %v2208_v32 = vperm.slane %v8554_v29, 3  ;;  %v2490_v29 = vpop.f32.mrf.mxu1 }
 0x280   : > { %3084 = vmatpush.msra.mxu3 %v2866_v24  ;;  %v8744_v24 = vld [vmem:[#allocation16 + $0x288] sm:$0xff] }
 0x281   : > { %3100 = vmatpush.msrb.mxu0 %v2691_v53  ;;  %3116 = vmatpush.msrb.mxu1 %v2771_v23  ;;  %v8701_v23 = vld [vmem:[#allocation16 + $0x2e8] sm:$0xff] }
 0x282   : > { %3085 = vmatpush.msra.mxu3 %v2862_v13  ;;  %v8765_v13 = vld [vmem:[#allocation16 + $0x248] sm:$0xff] }
 0x283   : > { %3101 = vmatpush.msrb.mxu0 %v2687_v5  ;;  %3117 = vmatpush.msrb.mxu1 %v2767_v43  ;;  %v2728_v5 = vunpack.c.h.bf16 %v8580_v62  ;;  %v2739_v62 = vunpack.c.l.bf16 %v8705_v50 }
 0x285   : > { %3102 = vmatpush.msrb.mxu0 %v2683_v33  ;;  %3118 = vmatpush.msrb.mxu1 %v2763_v25  ;;  %v2851_v33 = vunpack.c.l.bf16 %v8701_v23  ;;  %v2724_v25 = vunpack.c.h.bf16 %v8586_v1  ;;  %v2735_v1 = vunpack.c.l.bf16 %v8715_v63 }
 0x287   : > { %3103 = vmatpush.msrb.mxu0 %v2679_v10  ;;  %3119 = vmatpush.msrb.mxu1 %v2759_v0  ;;  %v2858_v10 = vunpack.c.h.bf16 %v8591_v30  ;;  %v2720_v0 = vunpack.c.h.bf16 %v8595_v41  ;;  %v2716_v30 = vunpack.c.h.bf16 %v8602_v17  ;;  %v2839_v41 = vunpack.c.l.bf16 %v8728_v45 }
 0x289   : > { %v2450_v7 = vpop.f32.mrf.mxu3  ;;  %3104 = vmatpush.msrb.mxu0 %v2675_v40  ;;  %3120 = vmatpush.msrb.mxu1 %v2755_v14  ;;  %v2731_v40 = vunpack.c.l.bf16 %v8725_v46  ;;  %v8733_v14 = vld [vmem:[#allocation16 + $0x2a8] sm:$0xff] }
 0x28a   : > { %v2451_v53 = vadd.f32 %v2450_v7, %v2431_v18  ;;  %3086 = vmatpush.msra.mxu3 %v2858_v10  ;;  %v2835_v17 = vunpack.c.l.bf16 %v8733_v14  ;;  %v2788_v18 = vunpack.c.h.bf16 %v8614_v20  ;;  %v2784_v7 = vunpack.c.h.bf16 %v8622_v35  ;;  %v2470_v10 = vpop.f32.mrf.mxu0 }
 0x28b   : > { %3105 = vmatpush.msrb.mxu0 %v2671_v6  ;;  %3121 = vmatpush.msrb.mxu1 %v2751_v8  ;;  %v8738_v6 = vld [vmem:[#allocation16 + $0x298] sm:$0xff]  ;;  %v2708_v8 = vunpack.c.h.bf16 %v8612_v49  ;;  %v2827_v49 = vunpack.c.l.bf16 %v8744_v24  ;;  %v2700_v20 = vunpack.c.h.bf16 %v8629_v60  ;;  %v2776_v35 = vunpack.c.h.bf16 %v8638_v34 }
 0x28c   : > { %v8707_v43 = vmax.f32 %v2451_v53, 0.0  ;;  %v2831_v59 = vunpack.c.l.bf16 %v8738_v6  ;;  %v8755_v53 = vld [vmem:[#allocation16 + $0x268] sm:$0xff]  ;;  %v2692_v60 = vunpack.c.h.bf16 %v8643_v48  ;;  %v2688_v34 = vunpack.c.h.bf16 %v8650_v31 }
 0x28d   : > { %3106 = vmatpush.msrb.mxu0 %v2667_v37  ;;  %3122 = vmatpush.msrb.mxu1 %v2747_v22  ;;  %v8750_v37 = vld [vmem:[#allocation16 + $0x278] sm:$0xff]  ;;  %v2780_v22 = vunpack.c.h.bf16 %v8631_v55  ;;  %v2772_v55 = vunpack.c.h.bf16 %v8645_v56  ;;  %v2811_v48 = vunpack.c.l.bf16 %v8765_v13  ;;  %v2684_v56 = vunpack.c.h.bf16 %v8658_v3 }
 0x28e   : > { %2987 = vmatmul.f32.vlgmr.msrb.gmra.mxu2 %v8707_v43  ;;  %3107 = vmatmul.f32.vlgmr.msrb.gmra.mxu0 %v8593_v4 }
 0x28f   : > { %3131 = vmatpush.msrb.mxu2 %v2855_v38  ;;  %3171 = vmatpush.msra.mxu0 %v2728_v5  ;;  %v2823_v38 = vunpack.c.l.bf16 %v8750_v37  ;;  %v8760_v5 = vld [vmem:[#allocation16 + $0x258] sm:$0xff] }
 0x290   : > { %3123 = vmatpush.msrb.mxu1 %v2743_v16  ;;  %v2819_v16 = vunpack.c.l.bf16 %v8755_v53 }
 0x291   : > { %3132 = vmatpush.msrb.mxu2 %v2851_v33  ;;  %3172 = vmatpush.msra.mxu0 %v2724_v25  ;;  %v2815_v33 = vunpack.c.l.bf16 %v8760_v5  ;;  %v2768_v25 = vunpack.c.h.bf16 %v8652_v42  ;;  %v2680_v42 = vunpack.c.h.bf16 %v8666_v54 }
 0x292   : > { %3124 = vmatpush.msrb.mxu1 %v2739_v62  ;;  %v8771_v62 = vld [vmem:[#allocation16 + $0x238] sm:$0xff] }
 0x293   : > { %3133 = vmatpush.msrb.mxu2 %v2847_v11  ;;  %3173 = vmatpush.msra.mxu0 %v2720_v0  ;;  %v2764_v11 = vunpack.c.h.bf16 %v8660_v47  ;;  %v8776_v0 = vld [vmem:[#allocation16 + $0x228] sm:$0xff]  ;;  %v2807_v31 = vunpack.c.l.bf16 %v8771_v62 }
 0x294   : > { %3125 = vmatpush.msrb.mxu1 %v2735_v1  ;;  %v2471_v1 = vadd.f32 %v2470_v10, %v2208_v32  ;;  %v2803_v3 = vunpack.c.l.bf16 %v8776_v0 }
 0x295   : > { %3134 = vmatpush.msrb.mxu2 %v2843_v2  ;;  %3174 = vmatpush.msra.mxu0 %v2716_v30  ;;  %v2760_v2 = vunpack.c.h.bf16 %v8668_v44  ;;  %v8781_v30 = vld [vmem:[#allocation16 + $0x218] sm:$0xff]  ;;  %v2672_v44 = vunpack.c.h.bf16 %v8680_v9 }
 0x296   : > { %3126 = vmatpush.msrb.mxu1 %v2731_v40  ;;  %3067 = vmatmul.f32.vlgmr.msra.gmra.mxu2 %v8707_v43  ;;  %v2510_v40 = vpop.f32.mrf.mxu2  ;;  %v2491_v47 = vadd.f32 %v2490_v29, %v2471_v1  ;;  %v2799_v54 = vunpack.c.l.bf16 %v8781_v30  ;;  %v2820_v29 = vunpack.c.h.bf16 %v8755_v53 }
 0x297   : > { %3127 = vmatmul.f32.vlgmr.msrb.gmra.mxu1 %v8618_v61  ;;  %3135 = vmatpush.msrb.mxu2 %v2839_v41  ;;  %v2676_v41 = vunpack.c.h.bf16 %v8673_v39 }
 0x298   : > { %3175 = vmatpush.msra.mxu0 %v2712_v52  ;;  %3191 = vmatpush.msra.mxu1 %v2792_v27  ;;  %v2756_v52 = vunpack.c.h.bf16 %v8675_v58  ;;  %v8786_v27 = vld [vmem:[#allocation16 + $0x208] sm:$0xff]  ;;  %v2668_v58 = vunpack.c.h.bf16 %v8687_v36 }
 0x299   : > { %3136 = vmatpush.msrb.mxu2 %v2835_v17  ;;  %v2511_v17 = vadd.f32 %v2510_v40, %v2491_v47  ;;  %v2812_v40 = vunpack.c.h.bf16 %v8765_v13  ;;  %v2808_v47 = vunpack.c.h.bf16 %v8771_v62 }
 0x29a   : > { %3176 = vmatpush.msra.mxu0 %v2708_v8  ;;  %3192 = vmatpush.msra.mxu1 %v2788_v18  ;;  %v2752_v8 = vunpack.c.h.bf16 %v8682_v21  ;;  %v2856_v21 = vunpack.c.h.bf16 %v8694_v12 }
 0x29b   : > { %3137 = vmatpush.msrb.mxu2 %v2831_v59  ;;  %v2795_v59 = vunpack.c.l.bf16 %v8786_v27 }
 0x29c   : > { %3177 = vmatpush.msra.mxu0 %v2704_v57  ;;  %3193 = vmatpush.msra.mxu1 %v2784_v7  ;;  %v8792_v57 = vld [vmem:[#allocation16 + $0x3f8] sm:$0xff]  ;;  %v2748_v7 = vunpack.c.h.bf16 %v8689_v28  ;;  %v2852_v28 = vunpack.c.h.bf16 %v8701_v23  ;;  %v2844_v23 = vunpack.c.h.bf16 %v8720_v19  ;;  %v2836_v19 = vunpack.c.h.bf16 %v8733_v14 }
 0x29d   : > { %3138 = vmatpush.msrb.mxu2 %v2827_v49  ;;  %v8796_v49 = vld [vmem:[#allocation16 + $0x3e8] sm:$0xff]  ;;  %v2919_v9 = vunpack.c.l.bf16 %v8792_v57  ;;  %v2828_v14 = vunpack.c.h.bf16 %v8744_v24  ;;  %v2816_v24 = vunpack.c.h.bf16 %v8760_v5  ;;  %v2920_v62 = vunpack.c.h.bf16 %v8792_v57 }
 0x29e   : > { %3178 = vmatpush.msra.mxu0 %v2700_v20  ;;  %3194 = vmatpush.msra.mxu1 %v2780_v22  ;;  %v2744_v22 = vunpack.c.h.bf16 %v8699_v26  ;;  %v2915_v36 = vunpack.c.l.bf16 %v8796_v49  ;;  %v2848_v26 = vunpack.c.h.bf16 %v8710_v51 }
 0x29f   : > { %3139 = vmatpush.msrb.mxu2 %v2823_v38  ;;  %v8803_v38 = vld [vmem:[#allocation16 + $0x3d8] sm:$0xff] }
 0x2a0   : > { %3179 = vmatpush.msra.mxu0 %v2696_v15  ;;  %3195 = vmatpush.msra.mxu1 %v2776_v35  ;;  %v2740_v15 = vunpack.c.h.bf16 %v8705_v50  ;;  %v8810_v35 = vld [vmem:[#allocation16 + $0x3c8] sm:$0xff]  ;;  %v2911_v12 = vunpack.c.l.bf16 %v8803_v38  ;;  %v2732_v50 = vunpack.c.h.bf16 %v8725_v46 }
 0x2a1   : > { %3140 = vmatpush.msrb.mxu2 %v2819_v16  ;;  %v2736_v16 = vunpack.c.h.bf16 %v8715_v63  ;;  %v2840_v63 = vunpack.c.h.bf16 %v8728_v45  ;;  %v8831_v46 = vld [vmem:[#allocation16 + $0x388] sm:$0xff]  ;;  %v2832_v45 = vunpack.c.h.bf16 %v8738_v6 }
 0x2a2   : > { %3180 = vmatpush.msra.mxu0 %v2692_v60  ;;  %3196 = vmatpush.msra.mxu1 %v2772_v55  ;;  %v2907_v60 = vunpack.c.l.bf16 %v8810_v35  ;;  %v8817_v55 = vld [vmem:[#allocation16 + $0x3b8] sm:$0xff]  ;;  %v2891_v10 = vunpack.c.l.bf16 %v8831_v46  ;;  %v2892_v57 = vunpack.c.h.bf16 %v8831_v46 }
 0x2a3   : > { %3141 = vmatpush.msrb.mxu2 %v2815_v33  ;;  %v2903_v51 = vunpack.c.l.bf16 %v8817_v55  ;;  %v8825_v33 = vld [vmem:[#allocation16 + $0x398] sm:$0xff] }
 0x2a4   : > { %3181 = vmatpush.msra.mxu0 %v2688_v34  ;;  %3197 = vmatpush.msra.mxu1 %v2768_v25  ;;  %v2895_v34 = vunpack.c.l.bf16 %v8825_v33  ;;  %v8835_v25 = vld [vmem:[#allocation16 + $0x378] sm:$0xff] }
 0x2a5   : > { %3142 = vmatpush.msrb.mxu2 %v2811_v48  ;;  %v8839_v48 = vld [vmem:[#allocation16 + $0x368] sm:$0xff] }
 0x2a6   : > { %3182 = vmatpush.msra.mxu0 %v2684_v56  ;;  %3198 = vmatpush.msra.mxu1 %v2764_v11  ;;  %v2824_v56 = vunpack.c.h.bf16 %v8750_v37  ;;  %v2644_v11 = vld [vmem:[#allocation16 + $0x358] sm:$0xff]  ;;  %v2883_v6 = vunpack.c.l.bf16 %v8839_v48  ;;  %v2638_v37 = vld [vmem:[#allocation16 + $0x328] sm:$0xff] }
 0x2a7   : > { %3143 = vmatpush.msrb.mxu2 %v2807_v31  ;;  %v2642_v31 = vld [vmem:[#allocation16 + $0x348] sm:$0xff]  ;;  %v2879_v1 = vunpack.c.l.bf16 %v2644_v11  ;;  %v2867_v53 = vunpack.c.l.bf16 %v2638_v37 }
 0x2a8   : > { %3183 = vmatpush.msra.mxu0 %v2680_v42  ;;  %3199 = vmatpush.msra.mxu1 %v2760_v2  ;;  %v2640_v42 = vld [vmem:[#allocation16 + $0x338] sm:$0xff]  ;;  %v2875_v2 = vunpack.c.l.bf16 %v2642_v31 }
 0x2a9   : > { %v2530_v18 = vpop.f32.mrf.mxu3  ;;  %3144 = vmatpush.msrb.mxu2 %v2803_v3  ;;  %v2871_v3 = vunpack.c.l.bf16 %v2640_v42 }
 0x2aa   : > { %v2531_v39 = vadd.f32 %v2530_v18, %v2511_v17  ;;  %3184 = vmatpush.msra.mxu0 %v2676_v41  ;;  %3200 = vmatpush.msra.mxu1 %v2756_v52  ;;  %v2636_v41 = vld [vmem:[#allocation16 + $0x318] sm:$0xff]  ;;  %v2804_v52 = vunpack.c.h.bf16 %v8776_v0  ;;  %v2800_v17 = vunpack.c.h.bf16 %v8781_v30  ;;  %v2912_v0 = vunpack.c.h.bf16 %v8803_v38  ;;  %v2921_v38 = vld [vmem:[#allocation17] sm:$0xf] }
 0x2ab   : > { %3145 = vmatpush.msrb.mxu2 %v2799_v54  ;;  %v2634_v54 = vld [vmem:[#allocation16 + $0x308] sm:$0xff]  ;;  %v2863_v5 = vunpack.c.l.bf16 %v2636_v41  ;;  %v2908_v30 = vunpack.c.h.bf16 %v8810_v35 }
 0x2ac   : > { %v8798_v20 = vmax.f32 %v2531_v39, 0.0  ;;  %3185 = vmatpush.msra.mxu0 %v2672_v44  ;;  %3201 = vmatpush.msra.mxu1 %v2752_v8  ;;  %v2859_v13 = vunpack.c.l.bf16 %v2634_v54  ;;  %v2796_v44 = vunpack.c.h.bf16 %v8786_v27  ;;  %v2916_v8 = vunpack.c.h.bf16 %v8796_v49 }
 0x2ad   : > { %3146 = vmatpush.msrb.mxu2 %v2795_v59  ;;  %v2904_v27 = vunpack.c.h.bf16 %v8817_v55  ;;  %v2896_v59 = vunpack.c.h.bf16 %v8825_v33  ;;  %v2884_v39 = vunpack.c.h.bf16 %v8839_v48  ;;  %v2872_v49 = vunpack.c.h.bf16 %v2640_v42 }
 0x2ae   : > { %3186 = vmatpush.msra.mxu0 %v2668_v58  ;;  %3202 = vmatpush.msra.mxu1 %v2748_v7  ;;  %v2880_v58 = vunpack.c.h.bf16 %v2644_v11  ;;  %v2876_v7 = vunpack.c.h.bf16 %v2642_v31  ;;  %v6892_v31 = vmov 0.0  }
 0x2af   : > { %3007 = vmatmul.f32.vlgmr.msrb.gmra.mxu3 %v8798_v20  ;;  %3147 = vmatmul.f32.vlgmr.msrb.gmra.mxu2 %v8707_v43  ;;  %3259 = vst [vmem:[#allocation25] sm:$0xff] %v6892_v31 }
 0x2b0   : > { %3151 = vmatpush.msrb.mxu3 %v2919_v9  ;;  %3187 = vmatmul.f32.vlgmr.msra.gmra.mxu0 %v8593_v4  ;;  %v8821_v4 = vld [vmem:[#allocation16 + $0x3a8] sm:$0xff]  ;;  %v2868_v9 = vunpack.c.h.bf16 %v2638_v37 }
 0x2b1   : > { %3211 = vmatpush.msra.mxu2 %v2856_v21  ;;  %3203 = vmatpush.msra.mxu1 %v2744_v22  ;;  %v2899_v32 = vunpack.c.l.bf16 %v8821_v4  ;;  %v2900_v18 = vunpack.c.h.bf16 %v8821_v4  ;;  %v2864_v21 = vunpack.c.h.bf16 %v2636_v41  ;;  %v2860_v22 = vunpack.c.h.bf16 %v2634_v54 }
 0x2b2   : > { %3152 = vmatpush.msrb.mxu3 %v2915_v36  ;;  %v2923_v36 = vperm.slane %v2921_v38, 0 }
 0x2b3   : > { %3212 = vmatpush.msra.mxu2 %v2852_v28  ;;  %3204 = vmatpush.msra.mxu1 %v2740_v15 }
 0x2b4   : > { %3153 = vmatpush.msrb.mxu3 %v2911_v12 }
 0x2b5   : > { %3213 = vmatpush.msra.mxu2 %v2848_v26  ;;  %3205 = vmatpush.msra.mxu1 %v2736_v16 }
 0x2b6   : > { %3154 = vmatpush.msrb.mxu3 %v2907_v60  ;;  %v2924_v60 = vperm.slane %v2921_v38, 1 }
 0x2b7   : > { %3214 = vmatpush.msra.mxu2 %v2844_v23  ;;  %3206 = vmatpush.msra.mxu1 %v2732_v50 }
 0x2b8   : > { %3087 = vmatmul.f32.vlgmr.msra.gmra.mxu3 %v8798_v20  ;;  %3207 = vmatmul.f32.vlgmr.msra.gmra.mxu1 %v8618_v61  ;;  %v2887_v61 = vunpack.c.l.bf16 %v8835_v25 }
 0x2b9   : > { %3155 = vmatpush.msrb.mxu3 %v2903_v51  ;;  %3215 = vmatpush.msra.mxu2 %v2840_v63 }
 0x2bb   : > { %3156 = vmatpush.msrb.mxu3 %v2899_v32  ;;  %3216 = vmatpush.msra.mxu2 %v2836_v19 }
 0x2bd   : > { %3157 = vmatpush.msrb.mxu3 %v2895_v34  ;;  %3217 = vmatpush.msra.mxu2 %v2832_v45  ;;  %v2925_v45 = vperm.slane %v2921_v38, 2 }
 0x2bf   : > { %3158 = vmatpush.msrb.mxu3 %v2891_v10  ;;  %3218 = vmatpush.msra.mxu2 %v2828_v14 }
 0x2c1   : > { %3159 = vmatpush.msrb.mxu3 %v2887_v61  ;;  %3219 = vmatpush.msra.mxu2 %v2824_v56 }
 0x2c3   : > { %3160 = vmatpush.msrb.mxu3 %v2883_v6  ;;  %3220 = vmatpush.msra.mxu2 %v2820_v29 }
 0x2c5   : > { %3161 = vmatpush.msrb.mxu3 %v2879_v1  ;;  %3221 = vmatpush.msra.mxu2 %v2816_v24  ;;  %v2926_v1 = vperm.slane %v2921_v38, 3 }
 0x2c7   : > { %3162 = vmatpush.msrb.mxu3 %v2875_v2  ;;  %3222 = vmatpush.msra.mxu2 %v2812_v40 }
 0x2c9   : > { %3163 = vmatpush.msrb.mxu3 %v2871_v3  ;;  %3223 = vmatpush.msra.mxu2 %v2808_v47 }
 0x2cb   : > { %3164 = vmatpush.msrb.mxu3 %v2867_v53  ;;  %3224 = vmatpush.msra.mxu2 %v2804_v52 }
 0x2cd   : > { %3165 = vmatpush.msrb.mxu3 %v2863_v5  ;;  %3225 = vmatpush.msra.mxu2 %v2800_v17 }
 0x2cf   : > { %3166 = vmatpush.msrb.mxu3 %v2859_v13  ;;  %3226 = vmatpush.msra.mxu2 %v2796_v44 }
 0x2d0   : > { %3167 = vmatmul.f32.vlgmr.msrb.gmra.mxu3 %v8798_v20  ;;  %3227 = vmatmul.f32.vlgmr.msra.gmra.mxu2 %v8707_v43  ;;  %v2888_v43 = vunpack.c.h.bf16 %v8835_v25 }
 0x2d1   : > { %3231 = vmatpush.msra.mxu3 %v2920_v62 }
 0x2d3   : > { %3232 = vmatpush.msra.mxu3 %v2916_v8 }
 0x2d5   : > { %3233 = vmatpush.msra.mxu3 %v2912_v0 }
 0x2d7   : > { %3234 = vmatpush.msra.mxu3 %v2908_v30 }
 0x2d9   : > { %3235 = vmatpush.msra.mxu3 %v2904_v27 }
 0x2db   : > { %3236 = vmatpush.msra.mxu3 %v2900_v18 }
 0x2dd   : > { %3237 = vmatpush.msra.mxu3 %v2896_v59 }
 0x2df   : > { %3238 = vmatpush.msra.mxu3 %v2892_v57 }
 0x2e1   : > { %3239 = vmatpush.msra.mxu3 %v2888_v43 }
 0x2e3   : > { %3240 = vmatpush.msra.mxu3 %v2884_v39 }
 0x2e5   : > { %3241 = vmatpush.msra.mxu3 %v2880_v58 }
 0x2e7   : > { %3242 = vmatpush.msra.mxu3 %v2876_v7 }
 0x2e9   : > { %3243 = vmatpush.msra.mxu3 %v2872_v49 }
 0x2eb   : > { %3244 = vmatpush.msra.mxu3 %v2868_v9  ;;  %v2948_v28 = vpop.f32.mrf.mxu0 }
 0x2ec   : > { %v2949_v35 = vadd.f32 %v2948_v28, %v2923_v36 }
 0x2ed   : > { %3245 = vmatpush.msra.mxu3 %v2864_v21 }
 0x2ef   : > { %3246 = vmatpush.msra.mxu3 %v2860_v22 }
 0x2f0   : > { %3247 = vmatmul.f32.vlgmr.msra.gmra.mxu3 %v8798_v20 }
 0x2f3   : > { %v2968_v15 = vpop.f32.mrf.mxu1  ;;  %v3028_v23 = vpop.f32.mrf.mxu0 }
 0x2f4   : > { %v2969_v26 = vadd.f32 %v2968_v15, %v2949_v35  ;;  %v3029_v63 = vadd.f32 %v3028_v23, %v2924_v60 }
 0x2fb   : > { %v3048_v4 = vpop.f32.mrf.mxu1 }
 0x2fc   : > { %v3049_v32 = vadd.f32 %v3048_v4, %v3029_v63 }
 0x30b   : > { %v3108_v25 = vpop.f32.mrf.mxu0 }
 0x30c   : > { %v3109_v14 = vadd.f32 %v3108_v25, %v2925_v45 }
 0x311   : > { %v2988_v12 = vpop.f32.mrf.mxu2 }
 0x312   : > { %v2989_v16 = vadd.f32 %v2988_v12, %v2969_v26 }
 0x314   : > { %v3128_v10 = vpop.f32.mrf.mxu1 }
 0x315   : > { %v3129_v61 = vadd.f32 %v3128_v10, %v3109_v14 }
 0x319   : > { %v3068_v33 = vpop.f32.mrf.mxu2 }
 0x31a   : > { %v3069_v19 = vadd.f32 %v3068_v33, %v3049_v32 }
 0x32d   : > { %v3188_v24 = vpop.f32.mrf.mxu0 }
 0x32e   : > { %v3189_v2 = vadd.f32 %v3188_v24, %v2926_v1 }
 0x332   : > { %v3008_v55 = vpop.f32.mrf.mxu3  ;;  %v3148_v48 = vpop.f32.mrf.mxu2 }
 0x333   : > { %v3009_v50 = vadd.f32 %v3008_v55, %v2989_v16  ;;  %v3149_v56 = vadd.f32 %v3148_v48, %v3129_v61 }
 0x335   : > { %v3251_v51 = vmax.f32 %v3009_v50, 0.0  ;;  %v3208_v42 = vpop.f32.mrf.mxu1 }
 0x336   : > { %v3209_v37 = vadd.f32 %v3208_v42, %v3189_v2 }
 0x337   : > { %3255 = vst [vmem:[#allocation2 + $0x10] sm:$0xff] %v3251_v51 }
 0x33b   : > { %v3088_v20 = vpop.f32.mrf.mxu3 }
 0x33c   : > { %v3089_v46 = vadd.f32 %v3088_v20, %v3069_v19 }
 0x33e   : > { %v3252_v34 = vmax.f32 %v3089_v46, 0.0 }
 0x340   : > { %3256 = vst [vmem:[#allocation2] sm:$0xff] %v3252_v34 }
 0x353   : > { %v3168_v11 = vpop.f32.mrf.mxu3  ;;  %v3228_v40 = vpop.f32.mrf.mxu2 }
 0x354   : > { %v3169_v6 = vadd.f32 %v3168_v11, %v3149_v56  ;;  %v3229_v3 = vadd.f32 %v3228_v40, %v3209_v37 }
 0x356   : > { %v3253_v29 = vmax.f32 %v3169_v6, 0.0 }
 0x358   : > { %3257 = vst [vmem:[#allocation2 + $0x18] sm:$0xff] %v3253_v29 }
 0x373   : > { %v3248_v47 = vpop.f32.mrf.mxu3 }
 0x374   : > { %v3249_v41 = vadd.f32 %v3248_v47, %v3229_v3 }
 0x376   : > { %v3254_v53 = vmax.f32 %v3249_v41, 0.0 }
 0x378   : > { %3258 = vst [vmem:[#allocation2 + $0x8] sm:$0xff] %v3254_v53 }
 0x379 PF: > { %s11112_s10 = sld [smem:[#allocation36_spill]] }
 0x37f   : > { %s3260_s30 = sld [smem:[#allocation4 + %s11112_s10]] }
 0x385   : > { %p5996_p3 = scmp.le.s32.totalorder %s3260_s30, 0 }
 0x387   : > { %3264 = sbr.rel (%p5996_p3) target bundleno = 1724 (0x6bc), region = 156 }
 0x38c   : > { %v8866_v52 = vld [vmem:[%s7230_s9 + $0xf0] sm:$0xff]  ;;  %v8872_v5 = vld [vmem:[%s7230_s9 + $0xe0] sm:$0xff]  ;;  %s11176_s13 = sld [smem:[#allocation77_spill]] }
 0x38d   : > { %v8869_v54 = vld [vmem:[%s7230_s9 + $0x2f0] sm:$0xff]  ;;  %v3457_v17 = vunpack.c.l.bf16 %v8866_v52  ;;  %v3453_v44 = vunpack.c.l.bf16 %v8872_v5  ;;  %v8878_v62 = vld [vmem:[%s7230_s9 + $0x2e0] sm:$0xff] }
 0x38e   : > { %v3585_v13 = vunpack.c.l.bf16 %v8869_v54  ;;  %v8881_v8 = vld [vmem:[%s7230_s9 + $0x3f0] sm:$0xff]  ;;  %v3581_v30 = vunpack.c.l.bf16 %v8878_v62  ;;  %v8895_v57 = vld [vmem:[%s7230_s9 + $0x3e0] sm:$0xff] }
 0x38f   : > { %v8884_v0 = vld [vmem:[%s7230_s9 + $0xd0] sm:$0xff]  ;;  %v3649_v27 = vunpack.c.l.bf16 %v8881_v8  ;;  %3663 = vmatpush.msra.mxu0 %v3457_v17  ;;  %v3645_v7 = vunpack.c.l.bf16 %v8895_v57  ;;  %v8902_v49 = vld [vmem:[%s7230_s9 + $0xc0] sm:$0xff] }
 0x390   : > { %v8889_v18 = vld [vmem:[%s7230_s9 + $0x1f0] sm:$0xff]  ;;  %3703 = vmatpush.msra.mxu2 %v3585_v13  ;;  %v3449_v43 = vunpack.c.l.bf16 %v8884_v0  ;;  %v8905_v9 = vld [vmem:[%s7230_s9 + $0x1e0] sm:$0xff]  ;;  %v3445_v15 = vunpack.c.l.bf16 %v8902_v49 }
 0x391   : > { %v8892_v59 = vld [vmem:[%s7230_s9 + $0x2d0] sm:$0xff]  ;;  %v3521_v39 = vunpack.c.l.bf16 %v8889_v18  ;;  %v8908_v21 = vld [vmem:[%s7230_s9 + $0x2c0] sm:$0xff]  ;;  %3723 = vmatpush.msra.mxu3 %v3649_v27  ;;  %v3517_v22 = vunpack.c.l.bf16 %v8905_v9  ;;  %3664 = vmatpush.msra.mxu0 %v3453_v44 }
 0x392   : > { %v3577_v58 = vunpack.c.l.bf16 %v8892_v59  ;;  %v8912_v38 = vld [vmem:[%s7230_s9 + $0x3d0] sm:$0xff]  ;;  %3704 = vmatpush.msra.mxu2 %v3581_v30  ;;  %v3573_v35 = vunpack.c.l.bf16 %v8908_v21  ;;  %v8927_v16 = vld [vmem:[%s7230_s9 + $0x3c0] sm:$0xff] }
 0x393   : > { %v8915_v36 = vld [vmem:[%s7230_s9 + $0xb0] sm:$0xff]  ;;  %v3641_v12 = vunpack.c.l.bf16 %v8912_v38  ;;  %v8930_v60 = vld [vmem:[%s7230_s9 + $0xa0] sm:$0xff]  ;;  %3683 = vmatpush.msra.mxu1 %v3521_v39  ;;  %3724 = vmatpush.msra.mxu3 %v3645_v7  ;;  %v3637_v23 = vunpack.c.l.bf16 %v8927_v16 }
 0x394   : > { %v8918_v28 = vld [vmem:[%s7230_s9 + $0x1d0] sm:$0xff]  ;;  %v8935_v50 = vld [vmem:[%s7230_s9 + $0x1c0] sm:$0xff]  ;;  %3665 = vmatpush.msra.mxu0 %v3449_v43  ;;  %3705 = vmatpush.msra.mxu2 %v3577_v58  ;;  %v3441_v63 = vunpack.c.l.bf16 %v8915_v36  ;;  %v3437_v25 = vunpack.c.l.bf16 %v8930_v60 }
 0x395   : > { %v8924_v26 = vld [vmem:[%s7230_s9 + $0x2b0] sm:$0xff]  ;;  %v3513_v55 = vunpack.c.l.bf16 %v8918_v28  ;;  %v8938_v4 = vld [vmem:[%s7230_s9 + $0x2a0] sm:$0xff]  ;;  %3684 = vmatpush.msra.mxu1 %v3517_v22  ;;  %3725 = vmatpush.msra.mxu3 %v3641_v12  ;;  %v3509_v19 = vunpack.c.l.bf16 %v8935_v50 }
 0x396   : > { %v8941_v51 = vld [vmem:[%s7230_s9 + $0x3b0] sm:$0xff]  ;;  %v3569_v33 = vunpack.c.l.bf16 %v8924_v26  ;;  %v8957_v45 = vld [vmem:[%s7230_s9 + $0x3a0] sm:$0xff]  ;;  %3666 = vmatpush.msra.mxu0 %v3445_v15  ;;  %3706 = vmatpush.msra.mxu2 %v3573_v35  ;;  %v3565_v10 = vunpack.c.l.bf16 %v8938_v4 }
 0x397   : > { %v8946_v32 = vld [vmem:[%s7230_s9 + $0x1b0] sm:$0xff]  ;;  %v3633_v20 = vunpack.c.l.bf16 %v8941_v51  ;;  %v8962_v14 = vld [vmem:[%s7230_s9 + $0x1a0] sm:$0xff]  ;;  %3685 = vmatpush.msra.mxu1 %v3513_v55  ;;  %3726 = vmatpush.msra.mxu3 %v3637_v23  ;;  %v3629_v56 = vunpack.c.l.bf16 %v8957_v45 }
 0x398   : > { %v8951_v46 = vld [vmem:[%s7230_s9 + $0x90] sm:$0xff]  ;;  %v3505_v61 = vunpack.c.l.bf16 %v8946_v32  ;;  %v8970_v11 = vld [vmem:[%s7230_s9 + $0x80] sm:$0xff]  ;;  %3667 = vmatpush.msra.mxu0 %v3441_v63  ;;  %3707 = vmatpush.msra.mxu2 %v3569_v33  ;;  %v3501_v42 = vunpack.c.l.bf16 %v8962_v14 }
 0x399   : > { %v8954_v34 = vld [vmem:[%s7230_s9 + $0x290] sm:$0xff]  ;;  %v8973_v6 = vld [vmem:[%s7230_s9 + $0x280] sm:$0xff]  ;;  %v3433_v29 = vunpack.c.l.bf16 %v8951_v46  ;;  %3686 = vmatpush.msra.mxu1 %v3509_v19  ;;  %3727 = vmatpush.msra.mxu3 %v3633_v20  ;;  %v3429_v3 = vunpack.c.l.bf16 %v8970_v11 }
 0x39a   : > { %v8965_v48 = vld [vmem:[%s7230_s9 + $0x390] sm:$0xff]  ;;  %v3561_v31 = vunpack.c.l.bf16 %v8954_v34  ;;  %v8981_v24 = vld [vmem:[%s7230_s9 + $0x380] sm:$0xff]  ;;  %3668 = vmatpush.msra.mxu0 %v3437_v25  ;;  %3708 = vmatpush.msra.mxu2 %v3565_v10  ;;  %v3557_v47 = vunpack.c.l.bf16 %v8973_v6 }
 0x39b   : > { %v8978_v1 = vld [vmem:[%s7230_s9 + $0x190] sm:$0xff]  ;;  %v3625_v2 = vunpack.c.l.bf16 %v8965_v48  ;;  %v8994_v41 = vld [vmem:[%s7230_s9 + $0x180] sm:$0xff]  ;;  %3687 = vmatpush.msra.mxu1 %v3505_v61  ;;  %3728 = vmatpush.msra.mxu3 %v3629_v56  ;;  %v3621_v13 = vunpack.c.l.bf16 %v8981_v24 }
 0x39c   : > { %v8986_v40 = vld [vmem:[%s7230_s9 + $0x70] sm:$0xff]  ;;  %v3497_v17 = vunpack.c.l.bf16 %v8978_v1  ;;  %v9002_v44 = vld [vmem:[%s7230_s9 + $0x60] sm:$0xff]  ;;  %3669 = vmatpush.msra.mxu0 %v3433_v29  ;;  %3709 = vmatpush.msra.mxu2 %v3561_v31  ;;  %v3493_v7 = vunpack.c.l.bf16 %v8994_v41 }
 0x39d   : > { %v8989_v37 = vld [vmem:[%s7230_s9 + $0x270] sm:$0xff]  ;;  %v9005_v30 = vld [vmem:[%s7230_s9 + $0x260] sm:$0xff]  ;;  %v3425_v27 = vunpack.c.l.bf16 %v8986_v40  ;;  %3688 = vmatpush.msra.mxu1 %v3501_v42  ;;  %3729 = vmatpush.msra.mxu3 %v3625_v2  ;;  %v3421_v12 = vunpack.c.l.bf16 %v9002_v44 }
 0x39e   : > { %v8997_v53 = vld [vmem:[%s7230_s9 + $0x370] sm:$0xff]  ;;  %v3553_v43 = vunpack.c.l.bf16 %v8989_v37  ;;  %v9013_v58 = vld [vmem:[%s7230_s9 + $0x360] sm:$0xff]  ;;  %3670 = vmatpush.msra.mxu0 %v3429_v3  ;;  %3710 = vmatpush.msra.mxu2 %v3557_v47  ;;  %v3549_v55 = vunpack.c.l.bf16 %v9005_v30 }
 0x39f   : > { %v9010_v39 = vld [vmem:[%s7230_s9 + $0x170] sm:$0xff]  ;;  %v3617_v22 = vunpack.c.l.bf16 %v8997_v53  ;;  %v9026_v23 = vld [vmem:[%s7230_s9 + $0x160] sm:$0xff]  ;;  %3689 = vmatpush.msra.mxu1 %v3497_v17  ;;  %3730 = vmatpush.msra.mxu3 %v3621_v13  ;;  %v3613_v19 = vunpack.c.l.bf16 %v9013_v58 }
 0x3a0   : > { %v9018_v15 = vld [vmem:[%s7230_s9 + $0x50] sm:$0xff]  ;;  %v3489_v33 = vunpack.c.l.bf16 %v9010_v39  ;;  %v9034_v20 = vld [vmem:[%s7230_s9 + $0x40] sm:$0xff]  ;;  %3671 = vmatpush.msra.mxu0 %v3425_v27  ;;  %3711 = vmatpush.msra.mxu2 %v3553_v43  ;;  %v3485_v31 = vunpack.c.l.bf16 %v9026_v23 }
 0x3a1   : > { %v9021_v35 = vld [vmem:[%s7230_s9 + $0x250] sm:$0xff]  ;;  %v9037_v25 = vld [vmem:[%s7230_s9 + $0x240] sm:$0xff]  ;;  %v3417_v10 = vunpack.c.l.bf16 %v9018_v15  ;;  %3690 = vmatpush.msra.mxu1 %v3493_v7  ;;  %3731 = vmatpush.msra.mxu3 %v3617_v22  ;;  %v3413_v47 = vunpack.c.l.bf16 %v9034_v20 }
 0x3a2   : > { %v9029_v63 = vld [vmem:[%s7230_s9 + $0x350] sm:$0xff]  ;;  %11114 = vst [vmem:[#allocation59_spill] sm:$0xff] %v9037_v25  ;;  %v3545_v61 = vunpack.c.l.bf16 %v9021_v35  ;;  %v9045_v29 = vld [vmem:[%s7230_s9 + $0x340] sm:$0xff]  ;;  %3672 = vmatpush.msra.mxu0 %v3421_v12  ;;  %3712 = vmatpush.msra.mxu2 %v3549_v55  ;;  %v3541_v17 = vunpack.c.l.bf16 %v9037_v25 }
 0x3a3   : > { %11113 = vst [vmem:[#allocation58_spill] sm:$0xff] %v9029_v63  ;;  %v9042_v56 = vld [vmem:[%s7230_s9 + $0x150] sm:$0xff]  ;;  %v3609_v42 = vunpack.c.l.bf16 %v9029_v63  ;;  %v9058_v13 = vld [vmem:[%s7230_s9 + $0x140] sm:$0xff]  ;;  %3691 = vmatpush.msra.mxu1 %v3489_v33  ;;  %3732 = vmatpush.msra.mxu3 %v3613_v19  ;;  %v3605_v7 = vunpack.c.l.bf16 %v9045_v29 }
 0x3a4   : > { %11115 = vst [vmem:[#allocation60_spill] sm:$0xff] %v9042_v56  ;;  %v9050_v2 = vld [vmem:[%s7230_s9 + $0x30] sm:$0xff]  ;;  %v3481_v43 = vunpack.c.l.bf16 %v9042_v56  ;;  %v9066_v22 = vld [vmem:[%s7230_s9 + $0x20] sm:$0xff]  ;;  %3673 = vmatpush.msra.mxu0 %v3417_v10  ;;  %3713 = vmatpush.msra.mxu2 %v3545_v61 }
 0x3a5   : > { %11116 = vst [vmem:[#allocation61_spill] sm:$0xff] %v9045_v29  ;;  %v9053_v3 = vld [vmem:[%s7230_s9 + $0x230] sm:$0xff]  ;;  %v9069_v12 = vld [vmem:[%s7230_s9 + $0x220] sm:$0xff]  ;;  %v3409_v55 = vunpack.c.l.bf16 %v9050_v2  ;;  %3692 = vmatpush.msra.mxu1 %v3485_v31  ;;  %3733 = vmatpush.msra.mxu3 %v3609_v42  ;;  %v3477_v29 = vunpack.c.l.bf16 %v9058_v13 }
 0x3a6   : > { %11117 = vst [vmem:[#allocation62_spill] sm:$0xff] %v9050_v2  ;;  %v9061_v27 = vld [vmem:[%s7230_s9 + $0x330] sm:$0xff]  ;;  %v3537_v63 = vunpack.c.l.bf16 %v9053_v3  ;;  %v9077_v19 = vld [vmem:[%s7230_s9 + $0x320] sm:$0xff]  ;;  %3674 = vmatpush.msra.mxu0 %v3413_v47  ;;  %3714 = vmatpush.msra.mxu2 %v3541_v17  ;;  %v3533_v2 = vunpack.c.l.bf16 %v9069_v12 }
 0x3a7   : > { %11118 = vst [vmem:[#allocation63_spill] sm:$0xff] %v9053_v3  ;;  %v9074_v33 = vld [vmem:[%s7230_s9 + $0x130] sm:$0xff]  ;;  %v3601_v56 = vunpack.c.l.bf16 %v9061_v27  ;;  %v3405_v3 = vunpack.c.l.bf16 %v9066_v22  ;;  %v9090_v25 = vld [vmem:[%s7230_s9 + $0x120] sm:$0xff]  ;;  %3693 = vmatpush.msra.mxu1 %v3481_v43  ;;  %3734 = vmatpush.msra.mxu3 %v3605_v7 }
 0x3a8   : > { %11119 = vst [vmem:[#allocation64_spill] sm:$0xff] %v9058_v13  ;;  %v9082_v10 = vld [vmem:[%s7230_s9 + $0x10] sm:$0xff]  ;;  %v3473_v42 = vunpack.c.l.bf16 %v9074_v33  ;;  %v9098_v13 = vld [vmem:[%s7230_s9] sm:$0xff]  ;;  %3675 = vmatpush.msra.mxu0 %v3409_v55  ;;  %3715 = vmatpush.msra.mxu2 %v3537_v63  ;;  %v3469_v43 = vunpack.c.l.bf16 %v9090_v25 }
 0x3a9   : > { %11120 = vst [vmem:[#allocation65_spill] sm:$0xff] %v9061_v27  ;;  %v9085_v61 = vld [vmem:[%s7230_s9 + $0x210] sm:$0xff]  ;;  %v3597_v27 = vunpack.c.l.bf16 %v9077_v19  ;;  %v9101_v47 = vld [vmem:[%s7230_s9 + $0x200] sm:$0xff]  ;;  %v3401_v17 = vunpack.c.l.bf16 %v9082_v10  ;;  %3694 = vmatpush.msra.mxu1 %v3477_v29  ;;  %3735 = vmatpush.msra.mxu3 %v3601_v56  ;;  %v3397_v55 = vunpack.c.l.bf16 %v9098_v13  ;;  %v3586_v56 = vunpack.c.h.bf16 %v8869_v54 }
 0x3aa   : > { %11121 = vst [vmem:[#allocation66_spill] sm:$0xff] %v9069_v12  ;;  %v9093_v31 = vld [vmem:[%s7230_s9 + $0x310] sm:$0xff]  ;;  %v3529_v12 = vunpack.c.l.bf16 %v9085_v61  ;;  %3676 = vmatpush.msra.mxu0 %v3405_v3  ;;  %3716 = vmatpush.msra.mxu2 %v3533_v2  ;;  %v3525_v63 = vunpack.c.l.bf16 %v9101_v47  ;;  %v9118_v29 = vld [vmem:[%s7230_s9 + $0x100] sm:$0xff]  ;;  %v3454_v2 = vunpack.c.h.bf16 %v8872_v5  ;;  %v3582_v3 = vunpack.c.h.bf16 %v8878_v62 }
 0x3ab   : > { %11122 = vst [vmem:[#allocation67_spill] sm:$0xff] %v9074_v33  ;;  %v3593_v7 = vunpack.c.l.bf16 %v9093_v31  ;;  %v9108_v33 = vld [vmem:[%s7230_s9 + $0x110] sm:$0xff]  ;;  %3695 = vmatpush.msra.mxu1 %v3473_v42  ;;  %3736 = vmatpush.msra.mxu3 %v3597_v27  ;;  %v3461_v54 = vunpack.c.l.bf16 %v9118_v29  ;;  %v3450_v27 = vunpack.c.h.bf16 %v8884_v0  ;;  %v3578_v42 = vunpack.c.h.bf16 %v8892_v59 }
 0x3ac   : > { %11123 = vst [vmem:[#allocation68_spill] sm:$0xff] %v9077_v19  ;;  %v9111_v19 = vld [vmem:[%s7230_s9 + $0x300] sm:$0xff]  ;;  %3677 = vmatpush.msra.mxu0 %v3401_v17  ;;  %3717 = vmatpush.msra.mxu2 %v3529_v12  ;;  %v3522_v12 = vunpack.c.h.bf16 %v8889_v18  ;;  %v3646_v5 = vunpack.c.h.bf16 %v8895_v57  ;;  %v3446_v62 = vunpack.c.h.bf16 %v8902_v49  ;;  %v3642_v0 = vunpack.c.h.bf16 %v8912_v38 }
 0x3ad   : > { %11124 = vst [vmem:[#allocation69_spill] sm:$0xff] %v9085_v61  ;;  %v3458_v61 = vunpack.c.h.bf16 %v8866_v52  ;;  %3696 = vmatpush.msra.mxu1 %v3469_v43  ;;  %3737 = vmatpush.msra.mxu3 %v3593_v7  ;;  %v3650_v52 = vunpack.c.h.bf16 %v8881_v8  ;;  %v3518_v8 = vunpack.c.h.bf16 %v8905_v9  ;;  %v3442_v18 = vunpack.c.h.bf16 %v8915_v36  ;;  %v11127_v17 = vld [vmem:[#allocation59_spill] sm:$0xff]  ;;  %v11128_v43 = vld [vmem:[#allocation58_spill] sm:$0xff] }
 0x3ae   : > { %11125 = vst [vmem:[#allocation70_spill] sm:$0xff] %v9090_v25  ;;  %v3589_v25 = vunpack.c.l.bf16 %v9111_v19  ;;  %3678 = vmatpush.msra.mxu0 %v3397_v55  ;;  %3718 = vmatpush.msra.mxu2 %v3525_v63  ;;  %v3514_v59 = vunpack.c.h.bf16 %v8918_v28  ;;  %v3570_v57 = vunpack.c.h.bf16 %v8924_v26  ;;  %v3638_v49 = vunpack.c.h.bf16 %v8927_v16  ;;  %v11129_v7 = vld [vmem:[#allocation62_spill] sm:$0xff]  ;;  %v11130_v55 = vld [vmem:[#allocation60_spill] sm:$0xff] }
 0x3af   : > { %11126 = vst [vmem:[#allocation71_spill] sm:$0xff] %v9093_v31  ;;  %v3465_v31 = vunpack.c.l.bf16 %v9108_v33  ;;  %v3438_v9 = vunpack.c.h.bf16 %v8930_v60  ;;  %v3566_v38 = vunpack.c.h.bf16 %v8938_v4  ;;  %v3634_v36 = vunpack.c.h.bf16 %v8941_v51 }
 0x3b0   : > { %3743 = vmatpush.msrb.mxu0 %v3458_v61  ;;  %3783 = vmatpush.msrb.mxu2 %v3586_v56  ;;  %v3574_v61 = vunpack.c.h.bf16 %v8908_v21  ;;  %v3510_v21 = vunpack.c.h.bf16 %v8935_v50  ;;  %v3434_v28 = vunpack.c.h.bf16 %v8951_v46  ;;  %v3506_v26 = vunpack.c.h.bf16 %v8946_v32  ;;  %v11131_v56 = vld [vmem:[#allocation63_spill] sm:$0xff] }
 0x3b1   : > { %3697 = vmatpush.msra.mxu1 %v3465_v31  ;;  %3738 = vmatpush.msra.mxu3 %v3589_v25  ;;  %v3562_v16 = vunpack.c.h.bf16 %v8954_v34  ;;  %v3630_v60 = vunpack.c.h.bf16 %v8957_v45  ;;  %v3430_v50 = vunpack.c.h.bf16 %v8970_v11  ;;  %v3502_v4 = vunpack.c.h.bf16 %v8962_v14 }
 0x3b2   : > { %3744 = vmatpush.msrb.mxu0 %v3454_v2  ;;  %3784 = vmatpush.msrb.mxu2 %v3582_v3  ;;  %v3558_v51 = vunpack.c.h.bf16 %v8973_v6  ;;  %v3626_v46 = vunpack.c.h.bf16 %v8965_v48  ;;  %v3426_v32 = vunpack.c.h.bf16 %v8986_v40  ;;  %v3498_v34 = vunpack.c.h.bf16 %v8978_v1  ;;  %v9155_v6 = vld [vmem:[#allocation2 + $0x18] sm:$0xff]  ;;  %v11132_v2 = vld [vmem:[#allocation61_spill] sm:$0xff] }
 0x3b3   : > { %3803 = vmatpush.msrb.mxu3 %v3650_v52  ;;  %3698 = vmatpush.msra.mxu1 %v3461_v54  ;;  %v3554_v45 = vunpack.c.h.bf16 %v8989_v37  ;;  %v3622_v11 = vunpack.c.h.bf16 %v8981_v24  ;;  %v3422_v14 = vunpack.c.h.bf16 %v9002_v44  ;;  %v3494_v48 = vunpack.c.h.bf16 %v8994_v41  ;;  %v9160_v37 = vld [vmem:[#allocation2 + $0x10] sm:$0xff]  ;;  %v9164_v44 = vld [vmem:[#allocation2 + $0x8] sm:$0xff]  ;;  %v11133_v52 = vld [vmem:[#allocation64_spill] sm:$0xff] }
 0x3b4   : > { %3745 = vmatpush.msrb.mxu0 %v3450_v27  ;;  %3785 = vmatpush.msrb.mxu2 %v3578_v42  ;;  %v3550_v40 = vunpack.c.h.bf16 %v9005_v30  ;;  %v3618_v1 = vunpack.c.h.bf16 %v8997_v53  ;;  %v3418_v24 = vunpack.c.h.bf16 %v9018_v15  ;;  %v3490_v25 = vunpack.c.h.bf16 %v9010_v39  ;;  %v9170_v53 = vld [vmem:[#allocation2] sm:$0xff]  ;;  %v11134_v27 = vld [vmem:[#allocation66_spill] sm:$0xff] }
 0x3b5   : > { %3763 = vmatpush.msrb.mxu1 %v3522_v12  ;;  %3804 = vmatpush.msrb.mxu3 %v3646_v5  ;;  %v3546_v41 = vunpack.c.h.bf16 %v9021_v35  ;;  %v3614_v30 = vunpack.c.h.bf16 %v9013_v58  ;;  %v3414_v15 = vunpack.c.h.bf16 %v9034_v20  ;;  %v3486_v31 = vunpack.c.h.bf16 %v9026_v23  ;;  %v11135_v42 = vld [vmem:[#allocation65_spill] sm:$0xff] }
 0x3b6   : > { %3746 = vmatpush.msrb.mxu0 %v3446_v62  ;;  %3786 = vmatpush.msrb.mxu2 %v3574_v61  ;;  %v3542_v39 = vunpack.c.h.bf16 %v11127_v17  ;;  %v3610_v35 = vunpack.c.h.bf16 %v11128_v43  ;;  %v3410_v58 = vunpack.c.h.bf16 %v11129_v7  ;;  %v3482_v63 = vunpack.c.h.bf16 %v11130_v55  ;;  %v9260_v43 = vld [vmem:[%s7230_s9 + $0x3c8] sm:$0xff] }
 0x3b7   : > { %3764 = vmatpush.msrb.mxu1 %v3518_v8  ;;  %3805 = vmatpush.msrb.mxu3 %v3642_v0  ;;  %v3538_v20 = vunpack.c.h.bf16 %v11131_v56  ;;  %v3606_v23 = vunpack.c.h.bf16 %v11132_v2  ;;  %v3406_v3 = vunpack.c.h.bf16 %v9066_v22  ;;  %v3478_v54 = vunpack.c.h.bf16 %v11133_v52  ;;  %v11136_v8 = vld [vmem:[#allocation67_spill] sm:$0xff]  ;;  %v11137_v0 = vld [vmem:[#allocation69_spill] sm:$0xff]  ;;  %v9268_v55 = vld [vmem:[%s7230_s9 + $0x2a8] sm:$0xff] }
 0x3b8   : > { %3747 = vmatpush.msrb.mxu0 %v3442_v18  ;;  %3787 = vmatpush.msrb.mxu2 %v3570_v57  ;;  %v3534_v12 = vunpack.c.h.bf16 %v11134_v27  ;;  %v3602_v5 = vunpack.c.h.bf16 %v11135_v42  ;;  %v3402_v62 = vunpack.c.h.bf16 %v9082_v10  ;;  %v3474_v61 = vunpack.c.h.bf16 %v11136_v8  ;;  %v11138_v18 = vld [vmem:[#allocation68_spill] sm:$0xff]  ;;  %v9191_v57 = vld [vmem:[%s7230_s9 + $0xf8] sm:$0xff] }
 0x3b9   : > { %3765 = vmatpush.msrb.mxu1 %v3514_v59  ;;  %3806 = vmatpush.msrb.mxu3 %v3638_v49  ;;  %v3530_v22 = vunpack.c.h.bf16 %v11137_v0  ;;  %v3598_v59 = vunpack.c.h.bf16 %v11138_v18  ;;  %v3398_v49 = vunpack.c.h.bf16 %v9098_v13  ;;  %v9196_v10 = vld [vmem:[%s7230_s9 + $0x2f8] sm:$0xff]  ;;  %v9301_v0 = vld [vmem:[%s7230_s9 + $0x288] sm:$0xff] }
 0x3ba   : > { %3748 = vmatpush.msrb.mxu0 %v3438_v9  ;;  %3788 = vmatpush.msrb.mxu2 %v3566_v38  ;;  %v11139_v9 = vld [vmem:[#allocation70_spill] sm:$0xff]  ;;  %v3526_v38 = vunpack.c.h.bf16 %v9101_v47  ;;  %v3587_v13 = vunpack.c.l.bf16 %v9196_v10 }
 0x3bb   : > { %3766 = vmatpush.msrb.mxu1 %v3510_v21  ;;  %3807 = vmatpush.msrb.mxu3 %v3634_v36  ;;  %v3470_v21 = vunpack.c.h.bf16 %v11139_v9  ;;  %v11140_v36 = vld [vmem:[#allocation71_spill] sm:$0xff]  ;;  %v9210_v47 = vld [vmem:[%s7230_s9 + $0x3f8] sm:$0xff] }
 0x3bc   : > { %3749 = vmatpush.msrb.mxu0 %v3434_v28  ;;  %3789 = vmatpush.msrb.mxu2 %v3562_v16  ;;  %v3594_v28 = vunpack.c.h.bf16 %v11140_v36  ;;  %v9202_v16 = vld [vmem:[%s7230_s9 + $0xe8] sm:$0xff]  ;;  %v9277_v2 = vld [vmem:[%s7230_s9 + $0x3b8] sm:$0xff] }
 0x3bd   : > { %3767 = vmatpush.msrb.mxu1 %v3506_v26  ;;  %3808 = vmatpush.msrb.mxu3 %v3630_v60  ;;  %v3459_v26 = vunpack.c.l.bf16 %v9191_v57  ;;  %v3466_v60 = vunpack.c.h.bf16 %v9108_v33  ;;  %v9282_v52 = vld [vmem:[%s7230_s9 + $0x98] sm:$0xff]  ;;  %v3635_v8 = vunpack.c.l.bf16 %v9277_v2 }
 0x3be   : > { %3750 = vmatpush.msrb.mxu0 %v3430_v50  ;;  %3790 = vmatpush.msrb.mxu2 %v3558_v51  ;;  %v9207_v50 = vld [vmem:[%s7230_s9 + $0x2e8] sm:$0xff]  ;;  %v9214_v51 = vld [vmem:[%s7230_s9 + $0xd8] sm:$0xff] }
 0x3bf   : > { %3768 = vmatpush.msrb.mxu1 %v3502_v4  ;;  %3809 = vmatpush.msrb.mxu3 %v3626_v46  ;;  %v3590_v4 = vunpack.c.h.bf16 %v9111_v19  ;;  %v3455_v46 = vunpack.c.l.bf16 %v9202_v16  ;;  %v3583_v33 = vunpack.c.l.bf16 %v9207_v50  ;;  %v9224_v19 = vld [vmem:[%s7230_s9 + $0x1f8] sm:$0xff] }
 0x3c0   : > { %3751 = vmatpush.msrb.mxu0 %v3426_v32  ;;  %3791 = vmatpush.msrb.mxu2 %v3554_v45  ;;  %v9218_v32 = vld [vmem:[%s7230_s9 + $0x2d8] sm:$0xff]  ;;  %v9227_v45 = vld [vmem:[%s7230_s9 + $0x3e8] sm:$0xff] }
 0x3c1   : > { %3769 = vmatpush.msrb.mxu1 %v3498_v34  ;;  %3810 = vmatpush.msrb.mxu3 %v3622_v11  ;;  %v3651_v34 = vunpack.c.l.bf16 %v9210_v47  ;;  %v3462_v11 = vunpack.c.h.bf16 %v9118_v29  ;;  %v3523_v29 = vunpack.c.l.bf16 %v9224_v19  ;;  %v9290_v42 = vld [vmem:[%s7230_s9 + $0x1b8] sm:$0xff] }
 0x3c2   : > { %3719 = vmatmul.f32.vlgmr.msra.gmra.mxu2 %v9155_v6  ;;  %3752 = vmatpush.msrb.mxu0 %v3422_v14  ;;  %v3451_v14 = vunpack.c.l.bf16 %v9214_v51  ;;  %v3507_v9 = vunpack.c.l.bf16 %v9290_v42  ;;  %v9317_v36 = vld [vmem:[%s7230_s9 + $0x278] sm:$0xff] }
 0x3c3   : > { %3770 = vmatpush.msrb.mxu1 %v3494_v48  ;;  %3792 = vmatpush.msrb.mxu2 %v3550_v40  ;;  %v9232_v48 = vld [vmem:[%s7230_s9 + $0xc8] sm:$0xff] }
 0x3c4   : > { %3811 = vmatpush.msrb.mxu3 %v3618_v1  ;;  %3679 = vmatmul.f32.vlgmr.msra.gmra.mxu0 %v9160_v37  ;;  %v9235_v40 = vld [vmem:[%s7230_s9 + $0x2c8] sm:$0xff]  ;;  %v3579_v1 = vunpack.c.l.bf16 %v9218_v32 }
 0x3c5   : > { %3739 = vmatmul.f32.vlgmr.msra.gmra.mxu3 %v9164_v44  ;;  %3753 = vmatpush.msrb.mxu0 %v3418_v24  ;;  %v9240_v24 = vld [vmem:[%s7230_s9 + $0x1e8] sm:$0xff]  ;;  %v3575_v17 = vunpack.c.l.bf16 %v9235_v40 }
 0x3c6   : > { %3771 = vmatpush.msrb.mxu1 %v3490_v25  ;;  %3793 = vmatpush.msrb.mxu2 %v3546_v41  ;;  %v9243_v25 = vld [vmem:[%s7230_s9 + $0x3d8] sm:$0xff]  ;;  %v3647_v41 = vunpack.c.l.bf16 %v9227_v45 }
 0x3c7   : > { %3812 = vmatpush.msrb.mxu3 %v3614_v30  ;;  %3699 = vmatmul.f32.vlgmr.msra.gmra.mxu1 %v9170_v53  ;;  %v9249_v30 = vld [vmem:[%s7230_s9 + $0xb8] sm:$0xff]  ;;  %v3643_v7 = vunpack.c.l.bf16 %v9243_v25 }
 0x3c8   : > { %3754 = vmatpush.msrb.mxu0 %v3414_v15  ;;  %3772 = vmatpush.msrb.mxu1 %v3486_v31  ;;  %v9252_v15 = vld [vmem:[%s7230_s9 + $0x2b8] sm:$0xff]  ;;  %v3447_v31 = vunpack.c.l.bf16 %v9232_v48 }
 0x3c9   : > { %3794 = vmatpush.msrb.mxu2 %v3542_v39  ;;  %3813 = vmatpush.msrb.mxu3 %v3610_v35  ;;  %v9257_v39 = vld [vmem:[%s7230_s9 + $0x1d8] sm:$0xff]  ;;  %v3519_v35 = vunpack.c.l.bf16 %v9240_v24  ;;  %v3571_v56 = vunpack.c.l.bf16 %v9252_v15 }
 0x3ca   : > { %3755 = vmatpush.msrb.mxu0 %v3410_v58  ;;  %3773 = vmatpush.msrb.mxu1 %v3482_v63  ;;  %v9265_v58 = vld [vmem:[%s7230_s9 + $0xa8] sm:$0xff]  ;;  %v3443_v63 = vunpack.c.l.bf16 %v9249_v30 }
 0x3cb   : > { %3795 = vmatpush.msrb.mxu2 %v3538_v20  ;;  %3814 = vmatpush.msrb.mxu3 %v3606_v23  ;;  %v9274_v20 = vld [vmem:[%s7230_s9 + $0x1c8] sm:$0xff]  ;;  %v3515_v23 = vunpack.c.l.bf16 %v9257_v39  ;;  %v3439_v27 = vunpack.c.l.bf16 %v9265_v58 }
 0x3cc   : > { %3756 = vmatpush.msrb.mxu0 %v3406_v3  ;;  %3774 = vmatpush.msrb.mxu1 %v3478_v54  ;;  %v3639_v3 = vunpack.c.l.bf16 %v9260_v43  ;;  %v9285_v54 = vld [vmem:[%s7230_s9 + $0x298] sm:$0xff] }
 0x3cd   : > { %3796 = vmatpush.msrb.mxu2 %v3534_v12  ;;  %3815 = vmatpush.msrb.mxu3 %v3602_v5  ;;  %v3567_v12 = vunpack.c.l.bf16 %v9268_v55  ;;  %v9293_v5 = vld [vmem:[%s7230_s9 + $0x3a8] sm:$0xff]  ;;  %v3563_v18 = vunpack.c.l.bf16 %v9285_v54 }
 0x3ce   : > { %3757 = vmatpush.msrb.mxu0 %v3402_v62  ;;  %3775 = vmatpush.msrb.mxu1 %v3474_v61  ;;  %v3511_v62 = vunpack.c.l.bf16 %v9274_v20  ;;  %v9298_v61 = vld [vmem:[%s7230_s9 + $0x88] sm:$0xff] }
 0x3cf   : > { %3797 = vmatpush.msrb.mxu2 %v3530_v22  ;;  %3816 = vmatpush.msrb.mxu3 %v3598_v59  ;;  %v3435_v22 = vunpack.c.l.bf16 %v9282_v52  ;;  %v9306_v59 = vld [vmem:[%s7230_s9 + $0x1a8] sm:$0xff] }
 0x3d0   : > { %3758 = vmatpush.msrb.mxu0 %v3398_v49  ;;  %3776 = vmatpush.msrb.mxu1 %v3470_v21  ;;  %v9309_v49 = vld [vmem:[%s7230_s9 + $0x398] sm:$0xff]  ;;  %v3631_v21 = vunpack.c.l.bf16 %v9293_v5 }
 0x3d1   : > { %3798 = vmatpush.msrb.mxu2 %v3526_v38  ;;  %3817 = vmatpush.msrb.mxu3 %v3594_v28  ;;  %v9314_v38 = vld [vmem:[%s7230_s9 + $0x78] sm:$0xff]  ;;  %v3431_v28 = vunpack.c.l.bf16 %v9298_v61 }
 0x3d2   : > { %3799 = vmatmul.f32.vlgmr.msrb.gmra.mxu2 %v9155_v6  ;;  %3823 = vmatpush.msra.mxu0 %v3459_v26  ;;  %v3559_v26 = vunpack.c.l.bf16 %v9301_v0 }
 0x3d3   : > { %3863 = vmatpush.msra.mxu2 %v3587_v13  ;;  %3777 = vmatpush.msrb.mxu1 %v3466_v60  ;;  %v9322_v13 = vld [vmem:[%s7230_s9 + $0x198] sm:$0xff]  ;;  %v9325_v60 = vld [vmem:[%s7230_s9 + $0x388] sm:$0xff] }
 0x3d4   : > { %3818 = vmatpush.msrb.mxu3 %v3590_v4  ;;  %3759 = vmatmul.f32.vlgmr.msrb.gmra.mxu0 %v9160_v37  ;;  %v3503_v4 = vunpack.c.l.bf16 %v9306_v59 }
 0x3d5   : > { %3819 = vmatmul.f32.vlgmr.msrb.gmra.mxu3 %v9164_v44  ;;  %3824 = vmatpush.msra.mxu0 %v3455_v46  ;;  %v3627_v46 = vunpack.c.l.bf16 %v9309_v49 }
 0x3d6   : > { %3864 = vmatpush.msra.mxu2 %v3583_v33  ;;  %3883 = vmatpush.msra.mxu3 %v3651_v34  ;;  %v9330_v33 = vld [vmem:[%s7230_s9 + $0x68] sm:$0xff] }
 0x3d7   : > { %3778 = vmatpush.msrb.mxu1 %v3462_v11  ;;  %3825 = vmatpush.msra.mxu0 %v3451_v14  ;;  %v9333_v34 = vld [vmem:[%s7230_s9 + $0x268] sm:$0xff]  ;;  %v3427_v11 = vunpack.c.l.bf16 %v9314_v38  ;;  %v3555_v14 = vunpack.c.l.bf16 %v9317_v36 }
 0x3d8   : > { %3779 = vmatmul.f32.vlgmr.msrb.gmra.mxu1 %v9170_v53  ;;  %3865 = vmatpush.msra.mxu2 %v3579_v1  ;;  %v9338_v1 = vld [vmem:[%s7230_s9 + $0x188] sm:$0xff] }
 0x3d9   : > { %3843 = vmatpush.msra.mxu1 %v3523_v29  ;;  %3884 = vmatpush.msra.mxu3 %v3647_v41  ;;  %v9341_v29 = vld [vmem:[%s7230_s9 + $0x378] sm:$0xff]  ;;  %v3499_v41 = vunpack.c.l.bf16 %v9322_v13 }
 0x3da   : > { %3826 = vmatpush.msra.mxu0 %v3447_v31  ;;  %3866 = vmatpush.msra.mxu2 %v3575_v17  ;;  %v3623_v31 = vunpack.c.l.bf16 %v9325_v60  ;;  %v9346_v17 = vld [vmem:[%s7230_s9 + $0x58] sm:$0xff] }
 0x3db   : > { %3844 = vmatpush.msra.mxu1 %v3519_v35  ;;  %3885 = vmatpush.msra.mxu3 %v3643_v7  ;;  %v9349_v35 = vld [vmem:[%s7230_s9 + $0x258] sm:$0xff]  ;;  %v3423_v7 = vunpack.c.l.bf16 %v9330_v33 }
 0x3dc   : > { %3827 = vmatpush.msra.mxu0 %v3443_v63  ;;  %3867 = vmatpush.msra.mxu2 %v3571_v56  ;;  %v3551_v63 = vunpack.c.l.bf16 %v9333_v34  ;;  %v9354_v56 = vld [vmem:[%s7230_s9 + $0x178] sm:$0xff] }
 0x3dd   : > { %3845 = vmatpush.msra.mxu1 %v3515_v23  ;;  %3886 = vmatpush.msra.mxu3 %v3639_v3  ;;  %11141 = vst [vmem:[#allocation59_spill] sm:$0xff] %v9354_v56  ;;  %v9357_v23 = vld [vmem:[%s7230_s9 + $0x368] sm:$0xff]  ;;  %v3495_v3 = vunpack.c.l.bf16 %v9338_v1 }
 0x3de   : > { %3828 = vmatpush.msra.mxu0 %v3439_v27  ;;  %3868 = vmatpush.msra.mxu2 %v3567_v12  ;;  %11142 = vst [vmem:[#allocation58_spill] sm:$0xff] %v9357_v23  ;;  %v3619_v27 = vunpack.c.l.bf16 %v9341_v29  ;;  %v9362_v12 = vld [vmem:[%s7230_s9 + $0x48] sm:$0xff] }
 0x3df   : > { %3846 = vmatpush.msra.mxu1 %v3511_v62  ;;  %3887 = vmatpush.msra.mxu3 %v3635_v8  ;;  %11143 = vst [vmem:[#allocation62_spill] sm:$0xff] %v9362_v12  ;;  %v9365_v62 = vld [vmem:[%s7230_s9 + $0x248] sm:$0xff]  ;;  %v3419_v8 = vunpack.c.l.bf16 %v9346_v17 }
 0x3e0   : > { %3829 = vmatpush.msra.mxu0 %v3435_v22  ;;  %3869 = vmatpush.msra.mxu2 %v3563_v18  ;;  %11144 = vst [vmem:[#allocation60_spill] sm:$0xff] %v9365_v62  ;;  %v3547_v22 = vunpack.c.l.bf16 %v9349_v35  ;;  %v9370_v18 = vld [vmem:[%s7230_s9 + $0x168] sm:$0xff] }
 0x3e1   : > { %3847 = vmatpush.msra.mxu1 %v3507_v9  ;;  %3888 = vmatpush.msra.mxu3 %v3631_v21  ;;  %11145 = vst [vmem:[#allocation63_spill] sm:$0xff] %v9370_v18  ;;  %v9373_v9 = vld [vmem:[%s7230_s9 + $0x358] sm:$0xff]  ;;  %v3491_v21 = vunpack.c.l.bf16 %v9354_v56  ;;  %v9426_v56 = vld [vmem:[%s7230_s9 + $0x8] sm:$0xff] }
 0x3e2   : > { %3830 = vmatpush.msra.mxu0 %v3431_v28  ;;  %3870 = vmatpush.msra.mxu2 %v3559_v26  ;;  %11146 = vst [vmem:[#allocation61_spill] sm:$0xff] %v9373_v9  ;;  %v3615_v28 = vunpack.c.l.bf16 %v9357_v23  ;;  %v9378_v26 = vld [vmem:[%s7230_s9 + $0x38] sm:$0xff]  ;;  %v3611_v23 = vunpack.c.l.bf16 %v9373_v9 }
 0x3e3   : > { %3848 = vmatpush.msra.mxu1 %v3503_v4  ;;  %3889 = vmatpush.msra.mxu3 %v3627_v46  ;;  %11147 = vst [vmem:[#allocation64_spill] sm:$0xff] %v9378_v26  ;;  %v9381_v4 = vld [vmem:[%s7230_s9 + $0x238] sm:$0xff]  ;;  %v3415_v46 = vunpack.c.l.bf16 %v9362_v12 }
 0x3e4   : > { %3831 = vmatpush.msra.mxu0 %v3427_v11  ;;  %3871 = vmatpush.msra.mxu2 %v3555_v14  ;;  %11148 = vst [vmem:[#allocation66_spill] sm:$0xff] %v9381_v4  ;;  %v3543_v11 = vunpack.c.l.bf16 %v9365_v62  ;;  %v9386_v14 = vld [vmem:[%s7230_s9 + $0x158] sm:$0xff]  ;;  %v3411_v62 = vunpack.c.l.bf16 %v9378_v26  ;;  %v3539_v12 = vunpack.c.l.bf16 %v9381_v4 }
 0x3e5   : > { %3849 = vmatpush.msra.mxu1 %v3499_v41  ;;  %3890 = vmatpush.msra.mxu3 %v3623_v31  ;;  %11149 = vst [vmem:[#allocation65_spill] sm:$0xff] %v9386_v14  ;;  %v9389_v41 = vld [vmem:[%s7230_s9 + $0x348] sm:$0xff]  ;;  %v3487_v31 = vunpack.c.l.bf16 %v9370_v18  ;;  %v3483_v9 = vunpack.c.l.bf16 %v9386_v14 }
 0x3e6   : > { %3832 = vmatpush.msra.mxu0 %v3423_v7  ;;  %3872 = vmatpush.msra.mxu2 %v3551_v63  ;;  %11150 = vst [vmem:[#allocation67_spill] sm:$0xff] %v9389_v41  ;;  %v9394_v7 = vld [vmem:[%s7230_s9 + $0x28] sm:$0xff]  ;;  %v3607_v18 = vunpack.c.l.bf16 %v9389_v41 }
 0x3e7   : > { %3850 = vmatpush.msra.mxu1 %v3495_v3  ;;  %3891 = vmatpush.msra.mxu3 %v3619_v27  ;;  %11151 = vst [vmem:[#allocation69_spill] sm:$0xff] %v9394_v7  ;;  %v9397_v63 = vld [vmem:[%s7230_s9 + $0x228] sm:$0xff]  ;;  %v9405_v27 = vld [vmem:[%s7230_s9 + $0x338] sm:$0xff]  ;;  %v3407_v4 = vunpack.c.l.bf16 %v9394_v7 }
 0x3e8   : > { %11152 = vst [vmem:[#allocation68_spill] sm:$0xff] %v9397_v63  ;;  %3833 = vmatpush.msra.mxu0 %v3419_v8  ;;  %3873 = vmatpush.msra.mxu2 %v3547_v22  ;;  %v9402_v3 = vld [vmem:[%s7230_s9 + $0x148] sm:$0xff]  ;;  %v9410_v8 = vld [vmem:[%s7230_s9 + $0x18] sm:$0xff]  ;;  %v3535_v26 = vunpack.c.l.bf16 %v9397_v63  ;;  %v3603_v14 = vunpack.c.l.bf16 %v9405_v27 }
 0x3e9   : > { %11153 = vst [vmem:[#allocation70_spill] sm:$0xff] %v9405_v27  ;;  %3851 = vmatpush.msra.mxu1 %v3491_v21  ;;  %3892 = vmatpush.msra.mxu3 %v3615_v28  ;;  %v9413_v22 = vld [vmem:[%s7230_s9 + $0x218] sm:$0xff]  ;;  %v9421_v28 = vld [vmem:[%s7230_s9 + $0x328] sm:$0xff]  ;;  %v3479_v41 = vunpack.c.l.bf16 %v9402_v3 }
 0x3ea   : > { %11154 = vst [vmem:[#allocation71_spill] sm:$0xff] %v9410_v8  ;;  %3834 = vmatpush.msra.mxu0 %v3415_v46  ;;  %3874 = vmatpush.msra.mxu2 %v3543_v11  ;;  %v9418_v21 = vld [vmem:[%s7230_s9 + $0x138] sm:$0xff]  ;;  %v9429_v46 = vld [vmem:[%s7230_s9 + $0x208] sm:$0xff]  ;;  %v3403_v11 = vunpack.c.l.bf16 %v9410_v8  ;;  %v3531_v63 = vunpack.c.l.bf16 %v9413_v22  ;;  %v3599_v27 = vunpack.c.l.bf16 %v9421_v28 }
 0x3eb   : > { %11155 = vst [vmem:[#allocation72_spill] sm:$0xff] %v9413_v22  ;;  %3852 = vmatpush.msra.mxu1 %v3487_v31  ;;  %3893 = vmatpush.msra.mxu3 %v3611_v23  ;;  %v9434_v7 = vld [vmem:[%s7230_s9 + $0x128] sm:$0xff]  ;;  %v9437_v31 = vld [vmem:[%s7230_s9 + $0x318] sm:$0xff]  ;;  %v3475_v23 = vunpack.c.l.bf16 %v9418_v21 }
 0x3ec   : > { %11156 = vst [vmem:[#allocation73_spill] sm:$0xff] %v9429_v46  ;;  %3835 = vmatpush.msra.mxu0 %v3411_v62  ;;  %3875 = vmatpush.msra.mxu2 %v3539_v12  ;;  %v3399_v62 = vunpack.c.l.bf16 %v9426_v56  ;;  %v3527_v12 = vunpack.c.l.bf16 %v9429_v46  ;;  %v9444_v8 = vld [vmem:[%s7230_s9 + $0x118] sm:$0xff]  ;;  %v3471_v22 = vunpack.c.l.bf16 %v9434_v7 }
 0x3ed   : > { %11157 = vst [vmem:[#allocation74_spill] sm:$0xff] %v9437_v31  ;;  %3853 = vmatpush.msra.mxu1 %v3483_v9  ;;  %3894 = vmatpush.msra.mxu3 %v3607_v18  ;;  %v3595_v9 = vunpack.c.l.bf16 %v9437_v31  ;;  %v9449_v18 = vld [vmem:[%s7230_s9 + $0x308] sm:$0xff]  ;;  %v3467_v46 = vunpack.c.l.bf16 %v9444_v8  ;;  %v3456_v31 = vunpack.c.h.bf16 %v9202_v16  ;;  %v3524_v16 = vunpack.c.h.bf16 %v9224_v19 }
 0x3ee   : > { %3836 = vmatpush.msra.mxu0 %v3407_v4  ;;  %3876 = vmatpush.msra.mxu2 %v3535_v26  ;;  %v3460_v4 = vunpack.c.h.bf16 %v9191_v57  ;;  %v3588_v26 = vunpack.c.h.bf16 %v9196_v10  ;;  %v3584_v57 = vunpack.c.h.bf16 %v9207_v50  ;;  %v3648_v50 = vunpack.c.h.bf16 %v9227_v45 }
 0x3ef   : > { %3854 = vmatpush.msra.mxu1 %v3479_v41  ;;  %3895 = vmatpush.msra.mxu3 %v3603_v14  ;;  %v3591_v14 = vunpack.c.l.bf16 %v9449_v18  ;;  %v9456_v41 = vld [vmem:[%s7230_s9 + $0x108] sm:$0xff]  ;;  %v3572_v19 = vunpack.c.h.bf16 %v9252_v15  ;;  %v3516_v45 = vunpack.c.h.bf16 %v9257_v39  ;;  %v3436_v15 = vunpack.c.h.bf16 %v9282_v52  ;;  %s11175_s9 = sld [smem:[#allocation36_spill]] }
 0x3f0   : > { %3837 = vmatpush.msra.mxu0 %v3403_v11  ;;  %3877 = vmatpush.msra.mxu2 %v3531_v63  ;;  %v3652_v63 = vunpack.c.h.bf16 %v9210_v47  ;;  %v3463_v10 = vunpack.c.l.bf16 %v9456_v41  ;;  %v3448_v47 = vunpack.c.h.bf16 %v9232_v48  ;;  %v3644_v11 = vunpack.c.h.bf16 %v9243_v25 }
 0x3f1   : > { %3855 = vmatpush.msra.mxu1 %v3475_v23  ;;  %3896 = vmatpush.msra.mxu3 %v3599_v27  ;;  %v3452_v27 = vunpack.c.h.bf16 %v9214_v51  ;;  %v3520_v51 = vunpack.c.h.bf16 %v9240_v24  ;;  %v3640_v48 = vunpack.c.h.bf16 %v9260_v43  ;;  %v3568_v24 = vunpack.c.h.bf16 %v9268_v55  ;;  %v11159_v23 = vld [vmem:[#allocation58_spill] sm:$0xff] }
 0x3f2   : > { %3838 = vmatpush.msra.mxu0 %v3399_v62  ;;  %3878 = vmatpush.msra.mxu2 %v3527_v12  ;;  %v3512_v25 = vunpack.c.h.bf16 %v9274_v20  ;;  %v3564_v39 = vunpack.c.h.bf16 %v9285_v54  ;;  %v3508_v43 = vunpack.c.h.bf16 %v9290_v42  ;;  %v3432_v55 = vunpack.c.h.bf16 %v9298_v61  ;;  %v11161_v12 = vld [vmem:[#allocation60_spill] sm:$0xff] }
 0x3f3   : > { %3856 = vmatpush.msra.mxu1 %v3471_v22  ;;  %3897 = vmatpush.msra.mxu3 %v3595_v9  ;;  %v3580_v22 = vunpack.c.h.bf16 %v9218_v32  ;;  %v3444_v32 = vunpack.c.h.bf16 %v9249_v30  ;;  %v3636_v30 = vunpack.c.h.bf16 %v9277_v2  ;;  %v3560_v20 = vunpack.c.h.bf16 %v9301_v0 }
 0x3f4   : > { %3879 = vmatmul.f32.vlgmr.msra.gmra.mxu2 %v9155_v6  ;;  %3903 = vmatpush.msrb.mxu0 %v3460_v4  ;;  %v3504_v2 = vunpack.c.h.bf16 %v9306_v59  ;;  %v3628_v52 = vunpack.c.h.bf16 %v9309_v49  ;;  %v3428_v54 = vunpack.c.h.bf16 %v9314_v38  ;;  %v3556_v42 = vunpack.c.h.bf16 %v9317_v36  ;;  %v11163_v4 = vld [vmem:[#allocation61_spill] sm:$0xff] }
 0x3f5   : > { %3943 = vmatpush.msrb.mxu2 %v3588_v26  ;;  %3857 = vmatpush.msra.mxu1 %v3467_v46  ;;  %v3576_v46 = vunpack.c.h.bf16 %v9235_v40  ;;  %v3440_v40 = vunpack.c.h.bf16 %v9265_v58  ;;  %v3632_v58 = vunpack.c.h.bf16 %v9293_v5  ;;  %v3500_v5 = vunpack.c.h.bf16 %v9322_v13 }
 0x3f6   : > { %3898 = vmatpush.msra.mxu3 %v3591_v14  ;;  %3839 = vmatmul.f32.vlgmr.msra.gmra.mxu0 %v9160_v37  ;;  %v3624_v61 = vunpack.c.h.bf16 %v9325_v60  ;;  %v3424_v0 = vunpack.c.h.bf16 %v9330_v33  ;;  %v3552_v59 = vunpack.c.h.bf16 %v9333_v34  ;;  %v3496_v49 = vunpack.c.h.bf16 %v9338_v1  ;;  %v11158_v60 = vld [vmem:[#allocation59_spill] sm:$0xff]  ;;  %v11160_v34 = vld [vmem:[#allocation62_spill] sm:$0xff] }
 0x3f7   : > { %3899 = vmatmul.f32.vlgmr.msra.gmra.mxu3 %v9164_v44  ;;  %3904 = vmatpush.msrb.mxu0 %v3456_v31  ;;  %v3620_v38 = vunpack.c.h.bf16 %v9341_v29  ;;  %v3420_v36 = vunpack.c.h.bf16 %v9346_v17  ;;  %v3548_v13 = vunpack.c.h.bf16 %v9349_v35  ;;  %v3492_v31 = vunpack.c.h.bf16 %v11158_v60  ;;  %v11162_v29 = vld [vmem:[#allocation63_spill] sm:$0xff]  ;;  %v11164_v35 = vld [vmem:[#allocation64_spill] sm:$0xff]  ;;  %v11165_v14 = vld [vmem:[#allocation66_spill] sm:$0xff] }
 0x3f8   : > { %3944 = vmatpush.msrb.mxu2 %v3584_v57  ;;  %3963 = vmatpush.msrb.mxu3 %v3652_v63  ;;  %v3616_v33 = vunpack.c.h.bf16 %v11159_v23  ;;  %v3416_v62 = vunpack.c.h.bf16 %v11160_v34  ;;  %v3544_v1 = vunpack.c.h.bf16 %v11161_v12  ;;  %v3488_v9 = vunpack.c.h.bf16 %v11162_v29  ;;  %v11166_v63 = vld [vmem:[#allocation65_spill] sm:$0xff]  ;;  %v9576_v60 = vld [vmem:[%s7250_s11 + $0x80] sm:$0xff] }
 0x3f9   : > { %3858 = vmatpush.msra.mxu1 %v3463_v10  ;;  %3905 = vmatpush.msrb.mxu0 %v3452_v27  ;;  %v3612_v17 = vunpack.c.h.bf16 %v11163_v4  ;;  %v3412_v26 = vunpack.c.h.bf16 %v11164_v35  ;;  %v3540_v57 = vunpack.c.h.bf16 %v11165_v14  ;;  %v3484_v10 = vunpack.c.h.bf16 %v11166_v63  ;;  %v11167_v27 = vld [vmem:[#allocation67_spill] sm:$0xff]  ;;  %v9584_v34 = vld [vmem:[%s7250_s11 + $0x70] sm:$0xff] }
 0x3fa   : > { %3859 = vmatmul.f32.vlgmr.msra.gmra.mxu1 %v9170_v53  ;;  %3945 = vmatpush.msrb.mxu2 %v3580_v22  ;;  %v3608_v22 = vunpack.c.h.bf16 %v11167_v27  ;;  %v4147_v12 = vunpack.c.l.bf16 %v9576_v60  ;;  %v9592_v29 = vld [vmem:[%s7250_s11 + $0x2f0] sm:$0xff]  ;;  %v9598_v4 = vld [vmem:[%s7250_s11 + $0x180] sm:$0xff]  ;;  %v4143_v35 = vunpack.c.l.bf16 %v9584_v34 }
 0x3fb   : > { %3923 = vmatpush.msrb.mxu1 %v3524_v16  ;;  %3964 = vmatpush.msrb.mxu3 %v3648_v50  ;;  %v11168_v16 = vld [vmem:[#allocation69_spill] sm:$0xff]  ;;  %v9604_v14 = vld [vmem:[%s7250_s11 + $0x2e0] sm:$0xff] }
 0x3fc   : > { %3906 = vmatpush.msrb.mxu0 %v3448_v47  ;;  %3946 = vmatpush.msrb.mxu2 %v3576_v46  ;;  %v3408_v50 = vunpack.c.h.bf16 %v11168_v16  ;;  %v11169_v47 = vld [vmem:[#allocation68_spill] sm:$0xff]  ;;  %v9610_v63 = vld [vmem:[%s7250_s11 + $0x170] sm:$0xff] }
 0x3fd   : > { %3924 = vmatpush.msrb.mxu1 %v3520_v51  ;;  %3965 = vmatpush.msrb.mxu3 %v3644_v11  ;;  %v3536_v46 = vunpack.c.h.bf16 %v11169_v47  ;;  %v3480_v51 = vunpack.c.h.bf16 %v9402_v3  ;;  %v11170_v11 = vld [vmem:[#allocation70_spill] sm:$0xff]  ;;  %v3400_v3 = vunpack.c.h.bf16 %v9426_v56  ;;  %v3468_v56 = vunpack.c.h.bf16 %v9444_v8  ;;  %v9541_v8 = vld [vmem:[%s7250_s11 + $0xc0] sm:$0xff]  ;;  %v9616_v16 = vld [vmem:[%s7250_s11 + $0x2d0] sm:$0xff] }
 0x3fe   : > { %3907 = vmatpush.msrb.mxu0 %v3444_v32  ;;  %3947 = vmatpush.msrb.mxu2 %v3572_v19  ;;  %v3604_v32 = vunpack.c.h.bf16 %v11170_v11  ;;  %v11171_v19 = vld [vmem:[#allocation71_spill] sm:$0xff]  ;;  %v4207_v11 = vunpack.c.l.bf16 %v9610_v63 }
 0x3ff   : > { %3925 = vmatpush.msrb.mxu1 %v3516_v45  ;;  %3966 = vmatpush.msrb.mxu3 %v3640_v48  ;;  %v3404_v45 = vunpack.c.h.bf16 %v11171_v19  ;;  %v11172_v48 = vld [vmem:[#allocation72_spill] sm:$0xff]  ;;  %v9622_v47 = vld [vmem:[%s7250_s11 + $0x160] sm:$0xff]  ;;  %v9631_v19 = vld [vmem:[%s7250_s11 + $0x30] sm:$0xff] }
 0x400   : > { %3908 = vmatpush.msrb.mxu0 %v3440_v40  ;;  %3948 = vmatpush.msrb.mxu2 %v3568_v24  ;;  %v3532_v40 = vunpack.c.h.bf16 %v11172_v48  ;;  %v3476_v24 = vunpack.c.h.bf16 %v9418_v21 }
 0x401   : > { %3926 = vmatpush.msrb.mxu1 %v3512_v25  ;;  %3967 = vmatpush.msrb.mxu3 %v3636_v30  ;;  %v3600_v25 = vunpack.c.h.bf16 %v9421_v28  ;;  %v9519_v30 = vld [vmem:[%s7250_s11 + $0xf0] sm:$0xff]  ;;  %v9527_v28 = vld [vmem:[%s7250_s11 + $0xe0] sm:$0xff] }
 0x402   : > { %3909 = vmatpush.msrb.mxu0 %v3436_v15  ;;  %3949 = vmatpush.msrb.mxu2 %v3564_v39  ;;  %v11173_v15 = vld [vmem:[#allocation73_spill] sm:$0xff]  ;;  %v4175_v21 = vunpack.c.l.bf16 %v9519_v30 }
 0x403   : > { %3927 = vmatpush.msrb.mxu1 %v3508_v43  ;;  %3968 = vmatpush.msrb.mxu3 %v3632_v58  ;;  %v3528_v39 = vunpack.c.h.bf16 %v11173_v15  ;;  %v3472_v43 = vunpack.c.h.bf16 %v9434_v7  ;;  %v11174_v58 = vld [vmem:[#allocation74_spill] sm:$0xff]  ;;  %v9535_v7 = vld [vmem:[%s7250_s11 + $0x1f0] sm:$0xff]  ;;  %v9646_v15 = vld [vmem:[%s7250_s11 + $0x140] sm:$0xff] }
 0x404   : > { %3910 = vmatpush.msrb.mxu0 %v3432_v55  ;;  %3950 = vmatpush.msrb.mxu2 %v3560_v20  ;;  %v3596_v55 = vunpack.c.h.bf16 %v11174_v58  ;;  %v3592_v20 = vunpack.c.h.bf16 %v9449_v18  ;;  %v9544_v18 = vld [vmem:[%s7250_s11 + $0x1e0] sm:$0xff] }
 0x405   : > { %3928 = vmatpush.msrb.mxu1 %v3504_v2  ;;  %3969 = vmatpush.msrb.mxu3 %v3628_v52  ;;  %v9532_v2 = vld [vmem:[%s7250_s11 + $0xd0] sm:$0xff]  ;;  %v4171_v52 = vunpack.c.l.bf16 %v9527_v28 }
 0x406   : > { %3911 = vmatpush.msrb.mxu0 %v3428_v54  ;;  %3951 = vmatpush.msrb.mxu2 %v3556_v42  ;;  %v3464_v54 = vunpack.c.h.bf16 %v9456_v41  ;;  %v4167_v42 = vunpack.c.l.bf16 %v9532_v2  ;;  %v9554_v41 = vld [vmem:[%s7250_s11 + $0x1d0] sm:$0xff] }
 0x407   : > { %3929 = vmatpush.msrb.mxu1 %v3500_v5  ;;  %3970 = vmatpush.msrb.mxu3 %v3624_v61  ;;  %v4239_v5 = vunpack.c.l.bf16 %v9535_v7  ;;  %v4163_v61 = vunpack.c.l.bf16 %v9541_v8 }
 0x408   : > { %3912 = vmatpush.msrb.mxu0 %v3424_v0  ;;  %3952 = vmatpush.msrb.mxu2 %v3552_v59  ;;  %v4235_v0 = vunpack.c.l.bf16 %v9544_v18  ;;  %v9560_v59 = vld [vmem:[%s7250_s11 + $0xa0] sm:$0xff] }
 0x409   : > { %3930 = vmatpush.msrb.mxu1 %v3496_v49  ;;  %3971 = vmatpush.msrb.mxu3 %v3620_v38  ;;  %v4231_v49 = vunpack.c.l.bf16 %v9554_v41  ;;  %v9568_v38 = vld [vmem:[%s7250_s11 + $0x90] sm:$0xff] }
 0x40a   : > { %3913 = vmatpush.msrb.mxu0 %v3420_v36  ;;  %3953 = vmatpush.msrb.mxu2 %v3548_v13  ;;  %v9571_v36 = vld [vmem:[%s7250_s11 + $0x1b0] sm:$0xff]  ;;  %v4151_v23 = vunpack.c.l.bf16 %v9568_v38 }
 0x40b   : > { %3931 = vmatpush.msrb.mxu1 %v3492_v31  ;;  %3972 = vmatpush.msrb.mxu3 %v3616_v33  ;;  %v9579_v31 = vld [vmem:[%s7250_s11 + $0x1a0] sm:$0xff]  ;;  %v4223_v33 = vunpack.c.l.bf16 %v9571_v36 }
 0x40c   : > { %3914 = vmatpush.msrb.mxu0 %v3416_v62  ;;  %3954 = vmatpush.msrb.mxu2 %v3544_v1  ;;  %v9587_v62 = vld [vmem:[%s7250_s11 + $0x190] sm:$0xff]  ;;  %v4219_v1 = vunpack.c.l.bf16 %v9579_v31 }
 0x40d   : > { %3932 = vmatpush.msrb.mxu1 %v3488_v9  ;;  %3973 = vmatpush.msrb.mxu3 %v3612_v17  ;;  %v9595_v9 = vld [vmem:[%s7250_s11 + $0x60] sm:$0xff]  ;;  %v4303_v17 = vunpack.c.l.bf16 %v9592_v29 }
 0x40e   : > { %3915 = vmatpush.msrb.mxu0 %v3412_v26  ;;  %3955 = vmatpush.msrb.mxu2 %v3540_v57  ;;  %v4215_v26 = vunpack.c.l.bf16 %v9587_v62  ;;  %v9607_v57 = vld [vmem:[%s7250_s11 + $0x50] sm:$0xff]  ;;  %v4139_v27 = vunpack.c.l.bf16 %v9595_v9 }
 0x40f   : > { %3933 = vmatpush.msrb.mxu1 %v3484_v10  ;;  %3974 = vmatpush.msrb.mxu3 %v3608_v22  ;;  %v4299_v10 = vunpack.c.l.bf16 %v9604_v14  ;;  %v4211_v22 = vunpack.c.l.bf16 %v9598_v4 }
 0x410   : > { %3916 = vmatpush.msrb.mxu0 %v3408_v50  ;;  %3956 = vmatpush.msrb.mxu2 %v3536_v46  ;;  %v9619_v50 = vld [vmem:[%s7250_s11 + $0x40] sm:$0xff]  ;;  %v4295_v46 = vunpack.c.l.bf16 %v9616_v16 }
 0x411   : > { %3934 = vmatpush.msrb.mxu1 %v3480_v51  ;;  %3975 = vmatpush.msrb.mxu3 %v3604_v32  ;;  %v4135_v51 = vunpack.c.l.bf16 %v9607_v57  ;;  %v9628_v32 = vld [vmem:[%s7250_s11 + $0x2c0] sm:$0xff] }
 0x412   : > { %3917 = vmatpush.msrb.mxu0 %v3404_v45  ;;  %3957 = vmatpush.msrb.mxu2 %v3532_v40  ;;  %v9634_v45 = vld [vmem:[%s7250_s11 + $0x150] sm:$0xff]  ;;  %v4291_v48 = vunpack.c.l.bf16 %v9628_v32  ;;  %v4131_v40 = vunpack.c.l.bf16 %v9619_v50 }
 0x413   : > { %3935 = vmatpush.msrb.mxu1 %v3476_v24  ;;  %3976 = vmatpush.msrb.mxu3 %v3600_v25  ;;  %v4203_v24 = vunpack.c.l.bf16 %v9622_v47  ;;  %v9640_v25 = vld [vmem:[%s7250_s11 + $0x2b0] sm:$0xff]  ;;  %v4199_v58 = vunpack.c.l.bf16 %v9634_v45 }
 0x414   : > { %3918 = vmatpush.msrb.mxu0 %v3400_v3  ;;  %3958 = vmatpush.msrb.mxu2 %v3528_v39  ;;  %v9643_v3 = vld [vmem:[%s7250_s11 + $0x20] sm:$0xff]  ;;  %v4287_v39 = vunpack.c.l.bf16 %v9640_v25 }
 0x415   : > { %3936 = vmatpush.msrb.mxu1 %v3472_v43  ;;  %3977 = vmatpush.msrb.mxu3 %v3596_v55  ;;  %v4127_v43 = vunpack.c.l.bf16 %v9631_v19  ;;  %v9652_v55 = vld [vmem:[%s7250_s11 + $0x2a0] sm:$0xff] }
 0x416   : > { %3959 = vmatmul.f32.vlgmr.msrb.gmra.mxu2 %v9155_v6  ;;  %4381 = vmatpush.msra.mxu0 %v4175_v21  ;;  %v9551_v6 = vld [vmem:[%s7250_s11 + $0xb0] sm:$0xff] }
 0x417   : > { %3937 = vmatpush.msrb.mxu1 %v3468_v56  ;;  %3978 = vmatpush.msrb.mxu3 %v3592_v20  ;;  %v9655_v21 = vld [vmem:[%s7250_s11 + $0x10] sm:$0xff]  ;;  %v4283_v20 = vunpack.c.l.bf16 %v9652_v55 }
 0x418   : > { %3919 = vmatmul.f32.vlgmr.msrb.gmra.mxu0 %v9160_v37  ;;  %3979 = vmatmul.f32.vlgmr.msrb.gmra.mxu3 %v9164_v44  ;;  %v9563_v37 = vld [vmem:[%s7250_s11 + $0x1c0] sm:$0xff]  ;;  %v4159_v44 = vunpack.c.l.bf16 %v9551_v6  ;;  %v9658_v56 = vld [vmem:[%s7250_s11 + $0x130] sm:$0xff] }
 0x419   : > { %4382 = vmatpush.msra.mxu0 %v4171_v52  ;;  %3938 = vmatpush.msrb.mxu1 %v3464_v54  ;;  %v4227_v13 = vunpack.c.l.bf16 %v9563_v37  ;;  %v4123_v52 = vunpack.c.l.bf16 %v9643_v3  ;;  %v4195_v54 = vunpack.c.l.bf16 %v9646_v15 }
 0x41a   : > { %3939 = vmatmul.f32.vlgmr.msrb.gmra.mxu1 %v9170_v53  ;;  %v4155_v53 = vunpack.c.l.bf16 %v9560_v59  ;;  %4421 = vmatpush.msra.mxu2 %v4303_v17  ;;  %v4176_v17 = vunpack.c.h.bf16 %v9519_v30 }
 0x41b   : > { %4383 = vmatpush.msra.mxu0 %v4167_v42  ;;  %4401 = vmatpush.msra.mxu1 %v4239_v5  ;;  %v9664_v42 = vld [vmem:[%s7250_s11 + $0x290] sm:$0xff]  ;;  %v9667_v5 = vld [vmem:[%s7250_s11] sm:$0xff] }
 0x41c   : > { %4422 = vmatpush.msra.mxu2 %v4299_v10 }
 0x41d   : > { %4384 = vmatpush.msra.mxu0 %v4163_v61  ;;  %4402 = vmatpush.msra.mxu1 %v4235_v0  ;;  %v9670_v61 = vld [vmem:[%s7250_s11 + $0x120] sm:$0xff]  ;;  %v4279_v0 = vunpack.c.l.bf16 %v9664_v42 }
 0x41e   : > { %4423 = vmatpush.msra.mxu2 %v4295_v46 }
 0x41f   : > { %4385 = vmatpush.msra.mxu0 %v4159_v44  ;;  %4403 = vmatpush.msra.mxu1 %v4231_v49  ;;  %v4119_v44 = vunpack.c.l.bf16 %v9655_v21  ;;  %v4191_v49 = vunpack.c.l.bf16 %v9658_v56 }
 0x420   : > { %4424 = vmatpush.msra.mxu2 %v4291_v48  ;;  %v4240_v48 = vunpack.c.h.bf16 %v9535_v7  ;;  %v4160_v7 = vunpack.c.h.bf16 %v9551_v6  ;;  %v9727_v6 = vld [vmem:[%s7250_s11 + $0x210] sm:$0xff] }
 0x421   : > { %4386 = vmatpush.msra.mxu0 %v4155_v53  ;;  %4404 = vmatpush.msra.mxu1 %v4227_v13  ;;  %v9676_v53 = vld [vmem:[%s7250_s11 + $0x280] sm:$0xff]  ;;  %v9679_v13 = vld [vmem:[%s7250_s11 + $0x110] sm:$0xff] }
 0x422   : > { %4425 = vmatpush.msra.mxu2 %v4287_v39  ;;  %v4183_v10 = vunpack.c.l.bf16 %v9679_v13  ;;  %v4236_v39 = vunpack.c.h.bf16 %v9544_v18  ;;  %v4156_v18 = vunpack.c.h.bf16 %v9560_v59  ;;  %v9734_v59 = vld [vmem:[%s7250_s11 + $0x200] sm:$0xff] }
 0x423   : > { %4387 = vmatpush.msra.mxu0 %v4151_v23  ;;  %4405 = vmatpush.msra.mxu1 %v4223_v33  ;;  %v4275_v23 = vunpack.c.l.bf16 %v9676_v53  ;;  %v4115_v33 = vunpack.c.l.bf16 %v9667_v5 }
 0x424   : > { %4426 = vmatpush.msra.mxu2 %v4283_v20 }
 0x425   : > { %4388 = vmatpush.msra.mxu0 %v4147_v12  ;;  %4406 = vmatpush.msra.mxu1 %v4219_v1  ;;  %v4187_v12 = vunpack.c.l.bf16 %v9670_v61  ;;  %v9685_v1 = vld [vmem:[%s7250_s11 + $0x270] sm:$0xff] }
 0x426   : > { %4427 = vmatpush.msra.mxu2 %v4279_v0 }
 0x427   : > { %4389 = vmatpush.msra.mxu0 %v4143_v35  ;;  %4407 = vmatpush.msra.mxu1 %v4215_v26  ;;  %v9689_v35 = vld [vmem:[%s7250_s11 + $0x100] sm:$0xff]  ;;  %v4271_v26 = vunpack.c.l.bf16 %v9685_v1 }
 0x428   : > { %4428 = vmatpush.msra.mxu2 %v4275_v23  ;;  %v4179_v30 = vunpack.c.l.bf16 %v9689_v35  ;;  %v4247_v23 = vunpack.c.l.bf16 %v9727_v6 }
 0x429   : > { %4390 = vmatpush.msra.mxu0 %v4139_v27  ;;  %4408 = vmatpush.msra.mxu1 %v4211_v22  ;;  %v9694_v27 = vld [vmem:[%s7250_s11 + $0x260] sm:$0xff]  ;;  %v4172_v22 = vunpack.c.h.bf16 %v9527_v28 }
 0x42a   : > { %4429 = vmatpush.msra.mxu2 %v4271_v26  ;;  %v4267_v46 = vunpack.c.l.bf16 %v9694_v27  ;;  %v9706_v28 = vld [vmem:[%s7250_s11 + $0x240] sm:$0xff]  ;;  %v4304_v26 = vunpack.c.h.bf16 %v9592_v29  ;;  %v4140_v29 = vunpack.c.h.bf16 %v9595_v9  ;;  %v4208_v9 = vunpack.c.h.bf16 %v9610_v63 }
 0x42b   : > { %4391 = vmatpush.msra.mxu0 %v4135_v51  ;;  %4409 = vmatpush.msra.mxu1 %v4207_v11  ;;  %v9700_v51 = vld [vmem:[%s7250_s11 + $0x250] sm:$0xff]  ;;  %v4168_v11 = vunpack.c.h.bf16 %v9532_v2 }
 0x42c   : > { %4430 = vmatpush.msra.mxu2 %v4267_v46  ;;  %v9712_v2 = vld [vmem:[%s7250_s11 + $0x230] sm:$0xff]  ;;  %v9747_v46 = vld [vmem:[%s7250_s11 + $0x3e0] sm:$0xff] }
 0x42d   : > { %4392 = vmatpush.msra.mxu0 %v4131_v40  ;;  %4410 = vmatpush.msra.mxu1 %v4203_v24  ;;  %v4263_v40 = vunpack.c.l.bf16 %v9700_v51  ;;  %v4164_v24 = vunpack.c.h.bf16 %v9541_v8  ;;  %v4255_v20 = vunpack.c.l.bf16 %v9712_v2  ;;  %v9721_v8 = vld [vmem:[%s7250_s11 + $0x220] sm:$0xff] }
 0x42e   : > { %v4251_v0 = vunpack.c.l.bf16 %v9721_v8 }
 0x42f   : > { %4393 = vmatpush.msra.mxu0 %v4127_v43  ;;  %4411 = vmatpush.msra.mxu1 %v4199_v58  ;;  %v4259_v43 = vunpack.c.l.bf16 %v9706_v28  ;;  %v4232_v58 = vunpack.c.h.bf16 %v9554_v41  ;;  %v4152_v41 = vunpack.c.h.bf16 %v9568_v38  ;;  %v9740_v38 = vld [vmem:[%s7250_s11 + $0x3f0] sm:$0xff] }
 0x430   : > { %4431 = vmatpush.msra.mxu2 %v4263_v40 }
 0x431   : > { %4394 = vmatpush.msra.mxu0 %v4123_v52  ;;  %4412 = vmatpush.msra.mxu1 %v4195_v54  ;;  %v9718_v52 = vld [vmem:[%s7248_s0] sm:$0xf]  ;;  %v4228_v54 = vunpack.c.h.bf16 %v9563_v37  ;;  %v4148_v37 = vunpack.c.h.bf16 %v9576_v60  ;;  %v4216_v60 = vunpack.c.h.bf16 %v9587_v62 }
 0x432   : > { %4432 = vmatpush.msra.mxu2 %v4259_v43  ;;  %v9761_v43 = vld [vmem:[%s7250_s11 + $0x3c0] sm:$0xff] }
 0x433   : > { %4395 = vmatpush.msra.mxu0 %v4119_v44  ;;  %4413 = vmatpush.msra.mxu1 %v4191_v49  ;;  %v3655_v44 = vperm.slane %v9718_v52, 0  ;;  %v4224_v49 = vunpack.c.h.bf16 %v9571_v36  ;;  %v4367_v36 = vunpack.c.l.bf16 %v9740_v38 }
 0x434   : > { %4433 = vmatpush.msra.mxu2 %v4255_v20 }
 0x435   : > { %4396 = vmatpush.msra.mxu0 %v4115_v33  ;;  %4414 = vmatpush.msra.mxu1 %v4187_v12  ;;  %v4220_v33 = vunpack.c.h.bf16 %v9579_v31  ;;  %v4243_v12 = vunpack.c.l.bf16 %v9734_v59  ;;  %v4363_v31 = vunpack.c.l.bf16 %v9747_v46 }
 0x436   : > { %4434 = vmatpush.msra.mxu2 %v4251_v0  ;;  %4441 = vmatpush.msra.mxu3 %v4367_v36  ;;  %v4288_v0 = vunpack.c.h.bf16 %v9640_v25  ;;  %v4124_v25 = vunpack.c.h.bf16 %v9643_v3  ;;  %v3656_v3 = vperm.slane %v9718_v52, 1  ;;  %v4116_v36 = vunpack.c.h.bf16 %v9667_v5 }
 0x437   : > { %4461 = vmatpush.msrb.mxu0 %v4176_v17  ;;  %4415 = vmatpush.msra.mxu1 %v4183_v10  ;;  %v4144_v10 = vunpack.c.h.bf16 %v9584_v34  ;;  %v4212_v34 = vunpack.c.h.bf16 %v9598_v4  ;;  %v4184_v5 = vunpack.c.h.bf16 %v9679_v13 }
 0x438   : > { %4435 = vmatpush.msra.mxu2 %v4247_v23  ;;  %4442 = vmatpush.msra.mxu3 %v4363_v31  ;;  %v9784_v23 = vld [vmem:[%s7250_s11 + $0x390] sm:$0xff]  ;;  %v9811_v31 = vld [vmem:[%s7250_s11 + $0xd8] sm:$0xff] }
 0x439   : > { %4462 = vmatpush.msrb.mxu0 %v4172_v22  ;;  %4416 = vmatpush.msra.mxu1 %v4179_v30  ;;  %v4300_v30 = vunpack.c.h.bf16 %v9604_v14  ;;  %v4136_v14 = vunpack.c.h.bf16 %v9607_v57  ;;  %v4204_v57 = vunpack.c.h.bf16 %v9622_v47  ;;  %v4169_v13 = vunpack.c.l.bf16 %v9811_v31 }
 0x43a   : > { %4436 = vmatpush.msra.mxu2 %v4243_v12  ;;  %v9796_v12 = vld [vmem:[%s7250_s11 + $0x380] sm:$0xff] }
 0x43b   : > { %4463 = vmatpush.msrb.mxu0 %v4168_v11  ;;  %4481 = vmatpush.msrb.mxu1 %v4240_v48  ;;  %v9754_v48 = vld [vmem:[%s7250_s11 + $0x3d0] sm:$0xff] }
 0x43c   : > { %4501 = vmatpush.msrb.mxu2 %v4304_v26  ;;  %v4188_v26 = vunpack.c.h.bf16 %v9670_v61 }
 0x43d   : > { %4464 = vmatpush.msrb.mxu0 %v4164_v24  ;;  %4482 = vmatpush.msrb.mxu1 %v4236_v39  ;;  %v4359_v24 = vunpack.c.l.bf16 %v9754_v48  ;;  %v4296_v39 = vunpack.c.h.bf16 %v9616_v16  ;;  %v4132_v16 = vunpack.c.h.bf16 %v9619_v50  ;;  %v4200_v50 = vunpack.c.h.bf16 %v9634_v45 }
 0x43e   : > { %4502 = vmatpush.msrb.mxu2 %v4300_v30  ;;  %v4343_v45 = vunpack.c.l.bf16 %v9784_v23  ;;  %v4272_v30 = vunpack.c.h.bf16 %v9685_v1  ;;  %v4268_v1 = vunpack.c.h.bf16 %v9694_v27  ;;  %v9837_v27 = vld [vmem:[%s7250_s11 + $0x340] sm:$0xff] }
 0x43f   : > { %4465 = vmatpush.msrb.mxu0 %v4160_v7  ;;  %4483 = vmatpush.msrb.mxu1 %v4232_v58  ;;  %v4355_v7 = vunpack.c.l.bf16 %v9761_v43  ;;  %v4292_v58 = vunpack.c.h.bf16 %v9628_v32  ;;  %v4128_v32 = vunpack.c.h.bf16 %v9631_v19  ;;  %v4196_v19 = vunpack.c.h.bf16 %v9646_v15 }
 0x440   : > { %4443 = vmatpush.msra.mxu3 %v4359_v24  ;;  %4503 = vmatpush.msrb.mxu2 %v4296_v39  ;;  %v4192_v15 = vunpack.c.h.bf16 %v9658_v56  ;;  %v9827_v39 = vld [vmem:[%s7250_s11 + $0x350] sm:$0xff] }
 0x441   : > { %4466 = vmatpush.msrb.mxu0 %v4156_v18  ;;  %4484 = vmatpush.msrb.mxu1 %v4228_v54  ;;  %v3680_v17 = vpop.f32.mrf.mxu0  ;;  %v9768_v18 = vld [vmem:[%s7250_s11 + $0x3b0] sm:$0xff] }
 0x442   : > { %v3681_v22 = vadd.f32 %v3680_v17, %v3655_v44  ;;  %4444 = vmatpush.msra.mxu3 %v4355_v7  ;;  %v4351_v54 = vunpack.c.l.bf16 %v9768_v18  ;;  %4504 = vmatpush.msrb.mxu2 %v4292_v58  ;;  %v4339_v17 = vunpack.c.l.bf16 %v9796_v12  ;;  %v4264_v7 = vunpack.c.h.bf16 %v9700_v51 }
 0x443   : > { %4467 = vmatpush.msrb.mxu0 %v4152_v41  ;;  %4485 = vmatpush.msrb.mxu1 %v4224_v49  ;;  %v9775_v41 = vld [vmem:[%s7250_s11 + $0x3a0] sm:$0xff]  ;;  %v4284_v49 = vunpack.c.h.bf16 %v9652_v55  ;;  %v4120_v55 = vunpack.c.h.bf16 %v9655_v21  ;;  %v9802_v21 = vld [vmem:[%s7250_s11 + $0xe8] sm:$0xff]  ;;  %v4260_v51 = vunpack.c.h.bf16 %v9706_v28 }
 0x444   : > { %v3700_v11 = vpop.f32.mrf.mxu1  ;;  %4445 = vmatpush.msra.mxu3 %v4351_v54  ;;  %v4347_v47 = vunpack.c.l.bf16 %v9775_v41  ;;  %4505 = vmatpush.msrb.mxu2 %v4288_v0  ;;  %v4173_v61 = vunpack.c.l.bf16 %v9802_v21  ;;  %v9849_v0 = vld [vmem:[%s7250_s11 + $0x330] sm:$0xff]  ;;  %v9861_v28 = vld [vmem:[%s7250_s11 + $0x320] sm:$0xff] }
 0x445   : > { %4468 = vmatpush.msrb.mxu0 %v4148_v37  ;;  %4486 = vmatpush.msrb.mxu1 %v4220_v33  ;;  %v3701_v40 = vadd.f32 %v3700_v11, %v3681_v22  ;;  %v3720_v62 = vpop.f32.mrf.mxu2  ;;  %v4280_v37 = vunpack.c.h.bf16 %v9664_v42  ;;  %v9791_v33 = vld [vmem:[%s7250_s11 + $0xf8] sm:$0xff]  ;;  %v4276_v42 = vunpack.c.h.bf16 %v9676_v53  ;;  %v9820_v11 = vld [vmem:[%s7250_s11 + $0xc8] sm:$0xff] }
 0x446   : > { %4446 = vmatpush.msra.mxu3 %v4347_v47  ;;  %4506 = vmatpush.msrb.mxu2 %v4284_v49  ;;  %v4177_v56 = vunpack.c.l.bf16 %v9791_v33  ;;  %v9855_v47 = vld [vmem:[%s7250_s11 + $0x1e8] sm:$0xff]  ;;  %v4319_v49 = vunpack.c.l.bf16 %v9849_v0 }
 0x447   : > { %4469 = vmatpush.msrb.mxu0 %v4144_v10  ;;  %4487 = vmatpush.msrb.mxu1 %v4216_v60  ;;  %v3721_v4 = vadd.f32 %v3720_v62, %v3701_v40  ;;  %v9806_v10 = vld [vmem:[%s7250_s11 + $0x370] sm:$0xff] }
 0x448   : > { %v3740_v20 = vpop.f32.mrf.mxu3  ;;  %4447 = vmatpush.msra.mxu3 %v4343_v45  ;;  %4507 = vmatpush.msrb.mxu2 %v4280_v37  ;;  %v4335_v60 = vunpack.c.l.bf16 %v9806_v10  ;;  %v9866_v37 = vld [vmem:[%s7250_s11 + $0x88] sm:$0xff] }
 0x449   : > { %4470 = vmatpush.msrb.mxu0 %v4140_v29  ;;  %4488 = vmatpush.msrb.mxu1 %v4212_v34  ;;  %v3741_v63 = vadd.f32 %v3740_v20, %v3721_v4  ;;  %v9817_v29 = vld [vmem:[%s7250_s11 + $0x360] sm:$0xff]  ;;  %v4180_v34 = vunpack.c.h.bf16 %v9689_v35  ;;  %v4327_v35 = vunpack.c.l.bf16 %v9827_v39  ;;  %v4165_v4 = vunpack.c.l.bf16 %v9820_v11  ;;  %v9840_v20 = vld [vmem:[%s7250_s11 + $0xa8] sm:$0xff] }
 0x44a   : > { %4448 = vmatpush.msra.mxu3 %v4339_v17  ;;  %4508 = vmatpush.msrb.mxu2 %v4276_v42  ;;  %v4331_v40 = vunpack.c.l.bf16 %v9817_v29  ;;  %v4237_v42 = vunpack.c.l.bf16 %v9855_v47 }
 0x44b   : > { %4471 = vmatpush.msrb.mxu0 %v4136_v14  ;;  %4489 = vmatpush.msrb.mxu1 %v4208_v9  ;;  %v9777_v44 = vmax.f32 %v3741_v63, 0.0  ;;  %v9830_v9 = vld [vmem:[%s7250_s11 + $0xb8] sm:$0xff]  ;;  %v4323_v63 = vunpack.c.l.bf16 %v9837_v27 }
 0x44c   : > { %4449 = vmatpush.msra.mxu3 %v4335_v60  ;;  %4509 = vmatpush.msrb.mxu2 %v4272_v30  ;;  %v4161_v54 = vunpack.c.l.bf16 %v9830_v9  ;;  %v4149_v60 = vunpack.c.l.bf16 %v9866_v37  ;;  %v9896_v30 = vld [vmem:[%s7250_s11 + $0x1b8] sm:$0xff] }
 0x44d   : > { %4472 = vmatpush.msrb.mxu0 %v4132_v16  ;;  %4490 = vmatpush.msrb.mxu1 %v4204_v57  ;;  %v9843_v57 = vld [vmem:[%s7250_s11 + $0x1f8] sm:$0xff] }
 0x44e   : > { %4397 = vmatmul.f32.vlgmr.msra.gmra.mxu0 %v9777_v44  ;;  %4450 = vmatpush.msra.mxu3 %v4331_v40 }
 0x44f   : > { %4473 = vmatpush.msrb.mxu0 %v4128_v32  ;;  %4491 = vmatpush.msrb.mxu1 %v4200_v50  ;;  %v9852_v50 = vld [vmem:[%s7250_s11 + $0x98] sm:$0xff] }
 0x450   : > { %4510 = vmatpush.msrb.mxu2 %v4268_v1  ;;  %4451 = vmatpush.msra.mxu3 %v4327_v35  ;;  %v4153_v17 = vunpack.c.l.bf16 %v9852_v50  ;;  %v4244_v1 = vunpack.c.h.bf16 %v9734_v59  ;;  %v9912_v35 = vld [vmem:[%s7250_s11 + $0x48] sm:$0xff] }
 0x451   : > { %4474 = vmatpush.msrb.mxu0 %v4124_v25  ;;  %4492 = vmatpush.msrb.mxu1 %v4196_v19  ;;  %v3760_v22 = vpop.f32.mrf.mxu0  ;;  %v4157_v25 = vunpack.c.l.bf16 %v9840_v20  ;;  %v4241_v19 = vunpack.c.l.bf16 %v9843_v57 }
 0x452   : > { %v3761_v53 = vadd.f32 %v3760_v22, %v3656_v3  ;;  %4511 = vmatpush.msrb.mxu2 %v4264_v7  ;;  %4452 = vmatpush.msra.mxu3 %v4323_v63  ;;  %v4256_v3 = vunpack.c.h.bf16 %v9712_v2  ;;  %v4252_v2 = vunpack.c.h.bf16 %v9721_v8  ;;  %v4248_v8 = vunpack.c.h.bf16 %v9727_v6  ;;  %v9925_v63 = vld [vmem:[%s7250_s11 + $0x188] sm:$0xff] }
 0x453   : > { %4475 = vmatpush.msrb.mxu0 %v4120_v55  ;;  %4493 = vmatpush.msrb.mxu1 %v4192_v15  ;;  %v9869_v55 = vld [vmem:[%s7250_s11 + $0x1d8] sm:$0xff]  ;;  %v4315_v15 = vunpack.c.l.bf16 %v9861_v28  ;;  %v4368_v7 = vunpack.c.h.bf16 %v9740_v38  ;;  %v4133_v38 = vunpack.c.l.bf16 %v9912_v35 }
 0x454   : > { %4512 = vmatpush.msrb.mxu2 %v4260_v51  ;;  %4453 = vmatpush.msra.mxu3 %v4319_v49  ;;  %v9934_v49 = vld [vmem:[%s7250_s11 + $0x178] sm:$0xff] }
 0x455   : > { %4476 = vmatpush.msrb.mxu0 %v4116_v36  ;;  %4494 = vmatpush.msrb.mxu1 %v4188_v26  ;;  %v3780_v62 = vpop.f32.mrf.mxu1  ;;  %v3800_v24 = vpop.f32.mrf.mxu2  ;;  %v9876_v36 = vld [vmem:[%s7250_s11 + $0x310] sm:$0xff]  ;;  %v9880_v26 = vld [vmem:[%s7250_s11 + $0x78] sm:$0xff] }
 0x456   : > { %v3781_v14 = vadd.f32 %v3780_v62, %v3761_v53  ;;  %4477 = vmatmul.f32.vlgmr.msrb.gmra.mxu0 %v9777_v44  ;;  %v4311_v22 = vunpack.c.l.bf16 %v9876_v36  ;;  %v4233_v53 = vunpack.c.l.bf16 %v9869_v55  ;;  %4513 = vmatpush.msrb.mxu2 %v4256_v3  ;;  %v4145_v40 = vunpack.c.l.bf16 %v9880_v26  ;;  %v9903_v62 = vld [vmem:[%s7250_s11 + $0x58] sm:$0xff] }
 0x457   : > { %4541 = vmatpush.msra.mxu0 %v4177_v56  ;;  %4495 = vmatpush.msrb.mxu1 %v4184_v5  ;;  %v9883_v56 = vld [vmem:[%s7250_s11 + $0x1c8] sm:$0xff]  ;;  %v9890_v5 = vld [vmem:[%s7250_s11 + $0x300] sm:$0xff]  ;;  %v4137_v59 = vunpack.c.l.bf16 %v9903_v62  ;;  %v9940_v3 = vld [vmem:[%s7250_s11 + $0x18] sm:$0xff] }
 0x458   : > { %v3801_v58 = vadd.f32 %v3800_v24, %v3781_v14  ;;  %v3820_v16 = vpop.f32.mrf.mxu3  ;;  %4454 = vmatpush.msra.mxu3 %v4315_v15  ;;  %v9906_v24 = vld [vmem:[%s7250_s11 + $0x1a8] sm:$0xff]  ;;  %4514 = vmatpush.msrb.mxu2 %v4252_v2  ;;  %v4225_v14 = vunpack.c.l.bf16 %v9896_v30 }
 0x459   : > { %4542 = vmatpush.msra.mxu0 %v4173_v61  ;;  %4496 = vmatpush.msrb.mxu1 %v4180_v34  ;;  %v9893_v61 = vld [vmem:[%s7250_s11 + $0x68] sm:$0xff]  ;;  %v4307_v34 = vunpack.c.l.bf16 %v9890_v5 }
 0x45a   : > { %v3821_v32 = vadd.f32 %v3820_v16, %v3801_v58  ;;  %4455 = vmatpush.msra.mxu3 %v4311_v22  ;;  %v4141_v6 = vunpack.c.l.bf16 %v9893_v61  ;;  %4515 = vmatpush.msrb.mxu2 %v4248_v8  ;;  %v4221_v58 = vunpack.c.l.bf16 %v9906_v24  ;;  %v9922_v16 = vld [vmem:[%s7250_s11 + $0x38] sm:$0xff]  ;;  %v9943_v15 = vld [vmem:[%s7250_s11 + $0x168] sm:$0xff] }
 0x45b   : > { %4543 = vmatpush.msra.mxu0 %v4169_v13  ;;  %v4229_v13 = vunpack.c.l.bf16 %v9883_v56  ;;  %v9949_v2 = vld [vmem:[%s7250_s11 + $0x8] sm:$0xff]  ;;  %v9952_v22 = vld [vmem:[%s7250_s11 + $0x158] sm:$0xff] }
 0x45c   : > { %v9863_v45 = vmax.f32 %v3821_v32, 0.0  ;;  %4456 = vmatpush.msra.mxu3 %v4307_v34  ;;  %4516 = vmatpush.msrb.mxu2 %v4244_v1  ;;  %v9931_v32 = vld [vmem:[%s7250_s11 + $0x28] sm:$0xff]  ;;  %v4348_v34 = vunpack.c.h.bf16 %v9775_v41  ;;  %v9965_v1 = vld [vmem:[%s7250_s11 + $0x138] sm:$0xff] }
 0x45d   : > { %4544 = vmatpush.msra.mxu0 %v4165_v4  ;;  %v9915_v4 = vld [vmem:[%s7250_s11 + $0x198] sm:$0xff]  ;;  %v9958_v8 = vld [vmem:[%s7250_s11 + $0x148] sm:$0xff] }
 0x45e   : > { %4417 = vmatmul.f32.vlgmr.msra.gmra.mxu1 %v9863_v45  ;;  %v4217_v51 = vunpack.c.l.bf16 %v9915_v4  ;;  %4521 = vmatpush.msrb.mxu3 %v4368_v7  ;;  %v4197_v41 = vunpack.c.l.bf16 %v9958_v8  ;;  %v9971_v7 = vld [vmem:[%s7250_s11 + $0x128] sm:$0xff] }
 0x45f   : > { %4545 = vmatpush.msra.mxu0 %v4161_v54  ;;  %4561 = vmatpush.msra.mxu1 %v4241_v19  ;;  %v4364_v54 = vunpack.c.h.bf16 %v9747_v46  ;;  %v4129_v19 = vunpack.c.l.bf16 %v9922_v16  ;;  %v4213_v46 = vunpack.c.l.bf16 %v9925_v63 }
 0x461   : > { %4546 = vmatpush.msra.mxu0 %v4157_v25  ;;  %4562 = vmatpush.msra.mxu1 %v4237_v42  ;;  %v4360_v25 = vunpack.c.h.bf16 %v9754_v48  ;;  %v4125_v42 = vunpack.c.l.bf16 %v9931_v32  ;;  %v4209_v48 = vunpack.c.l.bf16 %v9934_v49 }
 0x462   : > { %4522 = vmatpush.msrb.mxu3 %v4364_v54 }
 0x463   : > { %4547 = vmatpush.msra.mxu0 %v4153_v17  ;;  %4563 = vmatpush.msra.mxu1 %v4233_v53  ;;  %v4356_v17 = vunpack.c.h.bf16 %v9761_v43  ;;  %v4121_v53 = vunpack.c.l.bf16 %v9940_v3  ;;  %v4205_v43 = vunpack.c.l.bf16 %v9943_v15 }
 0x464   : > { %4523 = vmatpush.msrb.mxu3 %v4360_v25  ;;  %v4170_v25 = vunpack.c.h.bf16 %v9811_v31  ;;  %v4328_v31 = vunpack.c.h.bf16 %v9827_v39  ;;  %v4242_v39 = vunpack.c.h.bf16 %v9843_v57  ;;  %v10009_v57 = vld [vmem:[%s7250_s11 + $0x2d8] sm:$0xff] }
 0x465   : > { %4548 = vmatpush.msra.mxu0 %v4149_v60  ;;  %4564 = vmatpush.msra.mxu1 %v4229_v13  ;;  %v4352_v60 = vunpack.c.h.bf16 %v9768_v18  ;;  %v4201_v13 = vunpack.c.l.bf16 %v9952_v22  ;;  %v3657_v18 = vperm.slane %v9718_v52, 2 }
 0x466   : > { %4497 = vmatmul.f32.vlgmr.msrb.gmra.mxu1 %v9863_v45  ;;  %4524 = vmatpush.msrb.mxu3 %v4356_v17  ;;  %v4166_v17 = vunpack.c.h.bf16 %v9820_v11  ;;  %v4324_v11 = vunpack.c.h.bf16 %v9837_v27 }
 0x467   : > { %4549 = vmatpush.msra.mxu0 %v4145_v40  ;;  %4565 = vmatpush.msra.mxu1 %v4225_v14  ;;  %v4117_v40 = vunpack.c.l.bf16 %v9949_v2  ;;  %v4178_v14 = vunpack.c.h.bf16 %v9791_v33  ;;  %v9978_v33 = vld [vmem:[%s7250_s11 + $0x118] sm:$0xff] }
 0x468   : > { %4525 = vmatpush.msrb.mxu3 %v4352_v60  ;;  %v4162_v60 = vunpack.c.h.bf16 %v9830_v9  ;;  %v4320_v9 = vunpack.c.h.bf16 %v9849_v0  ;;  %v4150_v0 = vunpack.c.h.bf16 %v9866_v37  ;;  %v4230_v37 = vunpack.c.h.bf16 %v9883_v56 }
 0x469   : > { %4550 = vmatpush.msra.mxu0 %v4141_v6  ;;  %4566 = vmatpush.msra.mxu1 %v4221_v58  ;;  %v4344_v6 = vunpack.c.h.bf16 %v9784_v23  ;;  %v4174_v58 = vunpack.c.h.bf16 %v9802_v21  ;;  %v4332_v21 = vunpack.c.h.bf16 %v9817_v29  ;;  %v4138_v56 = vunpack.c.h.bf16 %v9903_v62 }
 0x46a   : > { %4526 = vmatpush.msrb.mxu3 %v4348_v34  ;;  %v9993_v34 = vld [vmem:[%s7250_s11 + $0x2f8] sm:$0xff]  ;;  %v4218_v62 = vunpack.c.h.bf16 %v9915_v4 }
 0x46b   : > { %4551 = vmatpush.msra.mxu0 %v4137_v59  ;;  %4567 = vmatpush.msra.mxu1 %v4217_v51  ;;  %v4340_v59 = vunpack.c.h.bf16 %v9796_v12  ;;  %v4336_v51 = vunpack.c.h.bf16 %v9806_v10  ;;  %v4189_v12 = vunpack.c.l.bf16 %v9971_v7  ;;  %v4185_v10 = vunpack.c.l.bf16 %v9978_v33 }
 0x46c   : > { %4527 = vmatpush.msrb.mxu3 %v4344_v6  ;;  %v4154_v6 = vunpack.c.h.bf16 %v9852_v50  ;;  %v4305_v27 = vunpack.c.l.bf16 %v9993_v34 }
 0x46d   : > { %4552 = vmatpush.msra.mxu0 %v4133_v38  ;;  %4568 = vmatpush.msra.mxu1 %v4213_v46  ;;  %v4193_v38 = vunpack.c.l.bf16 %v9965_v1 }
 0x46e   : > { %4528 = vmatpush.msrb.mxu3 %v4340_v59  ;;  %v4234_v59 = vunpack.c.h.bf16 %v9869_v55  ;;  %v4308_v55 = vunpack.c.h.bf16 %v9890_v5  ;;  %v4222_v5 = vunpack.c.h.bf16 %v9906_v24  ;;  %v4130_v24 = vunpack.c.h.bf16 %v9922_v16 }
 0x46f   : > { %4553 = vmatpush.msra.mxu0 %v4129_v19  ;;  %4569 = vmatpush.msra.mxu1 %v4209_v48  ;;  %v9984_v19 = vld [vmem:[%s7250_s11 + $0x108] sm:$0xff]  ;;  %v4122_v16 = vunpack.c.h.bf16 %v9940_v3 }
 0x470   : > { %4529 = vmatpush.msrb.mxu3 %v4336_v51  ;;  %v4181_v29 = vunpack.c.l.bf16 %v9984_v19  ;;  %v10031_v51 = vld [vmem:[%s7250_s11 + $0x2a8] sm:$0xff] }
 0x471   : > { %4554 = vmatpush.msra.mxu0 %v4125_v42  ;;  %4570 = vmatpush.msra.mxu1 %v4205_v43 }
 0x472   : > { %4530 = vmatpush.msrb.mxu3 %v4332_v21  ;;  %v10044_v21 = vld [vmem:[%s7250_s11 + $0x288] sm:$0xff] }
 0x473   : > { %4555 = vmatpush.msra.mxu0 %v4121_v53  ;;  %v3840_v54 = vpop.f32.mrf.mxu0  ;;  %4571 = vmatpush.msra.mxu1 %v4201_v13  ;;  %v4277_v4 = vunpack.c.l.bf16 %v10044_v21 }
 0x474   : > { %v3841_v23 = vadd.f32 %v3840_v54, %v3657_v18  ;;  %v9999_v18 = vld [vmem:[%s7250_s11 + $0x2e8] sm:$0xff]  ;;  %4531 = vmatpush.msrb.mxu3 %v4328_v31  ;;  %v4297_v54 = vunpack.c.l.bf16 %v10009_v57  ;;  %v4206_v31 = vunpack.c.h.bf16 %v9943_v15  ;;  %v3658_v15 = vperm.slane %v9718_v52, 3 }
 0x475   : > { %4556 = vmatpush.msra.mxu0 %v4117_v40  ;;  %4572 = vmatpush.msra.mxu1 %v4197_v41  ;;  %v4158_v40 = vunpack.c.h.bf16 %v9840_v20  ;;  %v4238_v20 = vunpack.c.h.bf16 %v9855_v47  ;;  %v4316_v41 = vunpack.c.h.bf16 %v9861_v28  ;;  %v4301_v50 = vunpack.c.l.bf16 %v9999_v18 }
 0x476   : > { %4557 = vmatmul.f32.vlgmr.msra.gmra.mxu0 %v9777_v44  ;;  %4532 = vmatpush.msrb.mxu3 %v4324_v11  ;;  %v4312_v47 = vunpack.c.h.bf16 %v9876_v36  ;;  %v4146_v28 = vunpack.c.h.bf16 %v9880_v26  ;;  %v4142_v36 = vunpack.c.h.bf16 %v9893_v61  ;;  %v4226_v26 = vunpack.c.h.bf16 %v9896_v30  ;;  %v10074_v11 = vld [vmem:[%s7250_s11 + $0x238] sm:$0xff] }
 0x477   : > { %4621 = vmatpush.msrb.mxu0 %v4178_v14  ;;  %v3860_v46 = vpop.f32.mrf.mxu1  ;;  %v3880_v42 = vpop.f32.mrf.mxu2  ;;  %4573 = vmatpush.msra.mxu1 %v4193_v38  ;;  %v10024_v38 = vld [vmem:[%s7250_s11 + $0x2b8] sm:$0xff]  ;;  %v4134_v61 = vunpack.c.h.bf16 %v9912_v35  ;;  %v4285_v30 = vunpack.c.l.bf16 %v10031_v51  ;;  %v4214_v35 = vunpack.c.h.bf16 %v9925_v63  ;;  %v4257_v52 = vunpack.c.l.bf16 %v10074_v11 }
 0x478   : > { %v3861_v48 = vadd.f32 %v3860_v46, %v3841_v23  ;;  %4533 = vmatpush.msrb.mxu3 %v4320_v9  ;;  %v10085_v9 = vld [vmem:[%s7250_s11 + $0x218] sm:$0xff] }
 0x479   : > { %4622 = vmatpush.msrb.mxu0 %v4174_v58  ;;  %4574 = vmatpush.msra.mxu1 %v4189_v12  ;;  %v10017_v58 = vld [vmem:[%s7250_s11 + $0x2c8] sm:$0xff]  ;;  %v10037_v12 = vld [vmem:[%s7250_s11 + $0x298] sm:$0xff] }
 0x47a   : > { %v3881_v53 = vadd.f32 %v3880_v42, %v3861_v48  ;;  %v3900_v43 = vpop.f32.mrf.mxu3  ;;  %4534 = vmatpush.msrb.mxu3 %v4316_v41  ;;  %v4293_v23 = vunpack.c.l.bf16 %v10017_v58  ;;  %v4281_v46 = vunpack.c.l.bf16 %v10037_v12  ;;  %v4126_v42 = vunpack.c.h.bf16 %v9931_v32  ;;  %v10056_v48 = vld [vmem:[%s7250_s11 + $0x268] sm:$0xff] }
 0x47b   : > { %4623 = vmatpush.msrb.mxu0 %v4170_v25  ;;  %4575 = vmatpush.msra.mxu1 %v4185_v10  ;;  %v4289_v25 = vunpack.c.l.bf16 %v10024_v38  ;;  %v4210_v10 = vunpack.c.h.bf16 %v9934_v49  ;;  %v4118_v32 = vunpack.c.h.bf16 %v9949_v2  ;;  %v4269_v49 = vunpack.c.l.bf16 %v10056_v48 }
 0x47c   : > { %v3901_v13 = vadd.f32 %v3900_v43, %v3881_v53  ;;  %4535 = vmatpush.msrb.mxu3 %v4312_v47  ;;  %v10068_v53 = vld [vmem:[%s7250_s11 + $0x248] sm:$0xff]  ;;  %v4198_v43 = vunpack.c.h.bf16 %v9958_v8  ;;  %v4190_v8 = vunpack.c.h.bf16 %v9971_v7  ;;  %v4182_v7 = vunpack.c.h.bf16 %v9984_v19  ;;  %v10106_v19 = vld [vmem:[%s7250_s11 + $0x3d8] sm:$0xff] }
 0x47d   : > { %4624 = vmatpush.msrb.mxu0 %v4166_v17  ;;  %4576 = vmatpush.msra.mxu1 %v4181_v29  ;;  %v10050_v17 = vld [vmem:[%s7250_s11 + $0x278] sm:$0xff]  ;;  %v4202_v29 = vunpack.c.h.bf16 %v9952_v22  ;;  %v4261_v2 = vunpack.c.l.bf16 %v10068_v53  ;;  %v4194_v22 = vunpack.c.h.bf16 %v9965_v1  ;;  %v4186_v1 = vunpack.c.h.bf16 %v9978_v33  ;;  %v10099_v33 = vld [vmem:[%s7250_s11 + $0x3e8] sm:$0xff] }
 0x47e   : > { %v10004_v14 = vmax.f32 %v3901_v13, 0.0  ;;  %4577 = vmatmul.f32.vlgmr.msra.gmra.mxu1 %v9863_v45  ;;  %4536 = vmatpush.msrb.mxu3 %v4308_v55  ;;  %v4273_v63 = vunpack.c.l.bf16 %v10050_v17  ;;  %v4306_v55 = vunpack.c.h.bf16 %v9993_v34  ;;  %v4361_v34 = vunpack.c.l.bf16 %v10106_v19 }
 0x47f   : > { %4625 = vmatpush.msrb.mxu0 %v4162_v60  ;;  %4641 = vmatpush.msrb.mxu1 %v4242_v39  ;;  %v10062_v60 = vld [vmem:[%s7250_s11 + $0x258] sm:$0xff] }
 0x480   : > { %4437 = vmatmul.f32.vlgmr.msra.gmra.mxu2 %v10004_v14  ;;  %v4265_v3 = vunpack.c.l.bf16 %v10062_v60 }
 0x481   : > { %4626 = vmatpush.msrb.mxu0 %v4158_v40  ;;  %4581 = vmatpush.msra.mxu2 %v4305_v27  ;;  %v10080_v40 = vld [vmem:[%s7250_s11 + $0x228] sm:$0xff] }
 0x482   : > { %4642 = vmatpush.msrb.mxu1 %v4238_v20  ;;  %v10090_v20 = vld [vmem:[%s7250_s11 + $0x208] sm:$0xff] }
 0x483   : > { %4627 = vmatpush.msrb.mxu0 %v4154_v6  ;;  %4582 = vmatpush.msra.mxu2 %v4301_v50 }
 0x484   : > { %4643 = vmatpush.msrb.mxu1 %v4234_v59  ;;  %v10095_v59 = vld [vmem:[%s7250_s11 + $0x3f8] sm:$0xff] }
 0x485   : > { %4628 = vmatpush.msrb.mxu0 %v4150_v0  ;;  %4583 = vmatpush.msra.mxu2 %v4297_v54  ;;  %v4249_v0 = vunpack.c.l.bf16 %v10085_v9 }
 0x486   : > { %4644 = vmatpush.msrb.mxu1 %v4230_v37  ;;  %v4369_v37 = vunpack.c.l.bf16 %v10095_v59 }
 0x487   : > { %4629 = vmatpush.msrb.mxu0 %v4146_v28  ;;  %4584 = vmatpush.msra.mxu2 %v4293_v23  ;;  %v4245_v28 = vunpack.c.l.bf16 %v10090_v20  ;;  %v4365_v23 = vunpack.c.l.bf16 %v10099_v33 }
 0x488   : > { %4517 = vmatmul.f32.vlgmr.msrb.gmra.mxu2 %v10004_v14  ;;  %4645 = vmatpush.msrb.mxu1 %v4226_v26  ;;  %v4302_v26 = vunpack.c.h.bf16 %v9999_v18  ;;  %v4294_v18 = vunpack.c.h.bf16 %v10017_v58  ;;  %v10135_v58 = vld [vmem:[%s7250_s11 + $0x388] sm:$0xff] }
 0x489   : > { %4630 = vmatpush.msrb.mxu0 %v4142_v36  ;;  %4585 = vmatpush.msra.mxu2 %v4289_v25  ;;  %v4298_v25 = vunpack.c.h.bf16 %v10009_v57 }
 0x48a   : > { %4646 = vmatpush.msrb.mxu1 %v4222_v5  ;;  %v10119_v5 = vld [vmem:[%s7250_s11 + $0x3b8] sm:$0xff] }
 0x48b   : > { %4631 = vmatpush.msrb.mxu0 %v4138_v56  ;;  %4586 = vmatpush.msra.mxu2 %v4285_v30  ;;  %v10114_v56 = vld [vmem:[%s7250_s11 + $0x3c8] sm:$0xff]  ;;  %v4353_v30 = vunpack.c.l.bf16 %v10119_v5 }
 0x48c   : > { %4647 = vmatpush.msrb.mxu1 %v4218_v62  ;;  %v4290_v62 = vunpack.c.h.bf16 %v10024_v38  ;;  %v4282_v38 = vunpack.c.h.bf16 %v10037_v12  ;;  %v10150_v12 = vld [vmem:[%s7250_s11 + $0x358] sm:$0xff] }
 0x48d   : > { %4632 = vmatpush.msrb.mxu0 %v4134_v61  ;;  %4587 = vmatpush.msra.mxu2 %v4281_v46  ;;  %v10124_v61 = vld [vmem:[%s7250_s11 + $0x3a8] sm:$0xff]  ;;  %v4286_v46 = vunpack.c.h.bf16 %v10031_v51  ;;  %v4278_v51 = vunpack.c.h.bf16 %v10044_v21 }
 0x48e   : > { %4648 = vmatpush.msrb.mxu1 %v4214_v35  ;;  %v4349_v57 = vunpack.c.l.bf16 %v10124_v61  ;;  %v10155_v21 = vld [vmem:[%s7250_s11 + $0x348] sm:$0xff] }
 0x48f   : > { %4633 = vmatpush.msrb.mxu0 %v4130_v24  ;;  %4588 = vmatpush.msra.mxu2 %v4277_v4  ;;  %v10129_v24 = vld [vmem:[%s7250_s11 + $0x398] sm:$0xff]  ;;  %v4341_v4 = vunpack.c.l.bf16 %v10135_v58 }
 0x490   : > { %4649 = vmatpush.msrb.mxu1 %v4210_v10  ;;  %v4345_v35 = vunpack.c.l.bf16 %v10129_v24  ;;  %v10145_v10 = vld [vmem:[%s7250_s11 + $0x368] sm:$0xff] }
 0x491   : > { %4634 = vmatpush.msrb.mxu0 %v4126_v42  ;;  %4589 = vmatpush.msra.mxu2 %v4273_v63  ;;  %v10140_v42 = vld [vmem:[%s7250_s11 + $0x378] sm:$0xff]  ;;  %v4274_v63 = vunpack.c.h.bf16 %v10050_v17 }
 0x492   : > { %4650 = vmatpush.msrb.mxu1 %v4206_v31  ;;  %v4333_v31 = vunpack.c.l.bf16 %v10145_v10  ;;  %v10160_v17 = vld [vmem:[%s7250_s11 + $0x338] sm:$0xff] }
 0x493   : > { %4635 = vmatpush.msrb.mxu0 %v4122_v16  ;;  %4590 = vmatpush.msra.mxu2 %v4269_v49  ;;  %v4337_v16 = vunpack.c.l.bf16 %v10140_v42  ;;  %v4329_v49 = vunpack.c.l.bf16 %v10150_v12 }
 0x494   : > { %4651 = vmatpush.msrb.mxu1 %v4202_v29  ;;  %v4266_v29 = vunpack.c.h.bf16 %v10062_v60 }
 0x495   : > { %4636 = vmatpush.msrb.mxu0 %v4118_v32  ;;  %v3920_v39 = vpop.f32.mrf.mxu0  ;;  %4591 = vmatpush.msra.mxu2 %v4265_v3  ;;  %v4270_v32 = vunpack.c.h.bf16 %v10056_v48  ;;  %v4325_v3 = vunpack.c.l.bf16 %v10155_v21  ;;  %v4321_v48 = vunpack.c.l.bf16 %v10160_v17 }
 0x496   : > { %4637 = vmatmul.f32.vlgmr.msrb.gmra.mxu0 %v9777_v44  ;;  %v3921_v13 = vadd.f32 %v3920_v39, %v3658_v15  ;;  %4652 = vmatpush.msrb.mxu1 %v4198_v43  ;;  %v4253_v44 = vunpack.c.l.bf16 %v10080_v40  ;;  %v4262_v15 = vunpack.c.h.bf16 %v10068_v53  ;;  %v10165_v43 = vld [vmem:[%s7250_s11 + $0x328] sm:$0xff]  ;;  %v4254_v39 = vunpack.c.h.bf16 %v10080_v40 }
 0x497   : > { %v3940_v6 = vpop.f32.mrf.mxu1  ;;  %4592 = vmatpush.msra.mxu2 %v4261_v2  ;;  %v4258_v2 = vunpack.c.h.bf16 %v10074_v11  ;;  %v4317_v60 = vunpack.c.l.bf16 %v10165_v43  ;;  %v4370_v40 = vunpack.c.h.bf16 %v10095_v59  ;;  %v4346_v59 = vunpack.c.h.bf16 %v10129_v24  ;;  %v10237_v24 = vld [vmem:[%s7254_s20 + $0x1c0] sm:$0xff] }
 0x498   : > { %v3941_v27 = vadd.f32 %v3940_v6, %v3921_v13  ;;  %4653 = vmatpush.msrb.mxu1 %v4194_v22  ;;  %v10170_v22 = vld [vmem:[%s7250_s11 + $0x318] sm:$0xff]  ;;  %v4250_v13 = vunpack.c.h.bf16 %v10085_v9  ;;  %v4366_v6 = vunpack.c.h.bf16 %v10099_v33  ;;  %v4362_v9 = vunpack.c.h.bf16 %v10106_v19  ;;  %v10206_v33 = vld [vmem:[%s7254_s20 + $0xc0] sm:$0xff] }
 0x499   : > { %v3960_v41 = vpop.f32.mrf.mxu2  ;;  %4593 = vmatpush.msra.mxu2 %v4257_v52  ;;  %v10175_v52 = vld [vmem:[%s7250_s11 + $0x308] sm:$0xff]  ;;  %v4313_v53 = vunpack.c.l.bf16 %v10170_v22  ;;  %v10211_v19 = vld [vmem:[%s7254_s20 + $0xb0] sm:$0xff] }
 0x49a   : > { %v3961_v50 = vadd.f32 %v3960_v41, %v3941_v27  ;;  %4654 = vmatpush.msrb.mxu1 %v4190_v8  ;;  %v4309_v11 = vunpack.c.l.bf16 %v10175_v52  ;;  %v4246_v8 = vunpack.c.h.bf16 %v10090_v20  ;;  %v10188_v27 = vld [vmem:[%s7254_s20 + $0xf0] sm:$0xff]  ;;  %v4354_v41 = vunpack.c.h.bf16 %v10119_v5 }
 0x49b   : > { %v3980_v47 = vpop.f32.mrf.mxu3  ;;  %4594 = vmatpush.msra.mxu2 %v4253_v44  ;;  %v4358_v44 = vunpack.c.h.bf16 %v10114_v56  ;;  %v10194_v20 = vld [vmem:[%s7254_s20 + $0xd0] sm:$0xff] }
 0x49c   : > { %v3981_v54 = vadd.f32 %v3980_v47, %v3961_v50  ;;  %4655 = vmatpush.msrb.mxu1 %v4186_v1  ;;  %v10191_v1 = vld [vmem:[%s7254_s20 + $0xe0] sm:$0xff]  ;;  %v4350_v50 = vunpack.c.h.bf16 %v10124_v61  ;;  %v4342_v47 = vunpack.c.h.bf16 %v10135_v58  ;;  %v10225_v5 = vld [vmem:[%s7254_s20 + $0x90] sm:$0xff]  ;;  %v4322_v58 = vunpack.c.h.bf16 %v10160_v17 }
 0x49d   : > { %4595 = vmatpush.msra.mxu2 %v4249_v0  ;;  %v4893_v0 = vunpack.c.l.bf16 %v10188_v27  ;;  %v10267_v17 = vld [vmem:[%s7254_s20 + $0x190] sm:$0xff] }
 0x49e   : > { %v10103_v36 = vmax.f32 %v3981_v54, 0.0  ;;  %4656 = vmatpush.msrb.mxu1 %v4182_v7  ;;  %v4885_v7 = vunpack.c.l.bf16 %v10194_v20  ;;  %v4334_v54 = vunpack.c.h.bf16 %v10145_v10  ;;  %v10252_v10 = vld [vmem:[%s7254_s20 + $0x60] sm:$0xff] }
 0x49f   : > { %4596 = vmatpush.msra.mxu2 %v4245_v28  ;;  %4657 = vmatmul.f32.vlgmr.msrb.gmra.mxu1 %v9863_v45  ;;  %v4357_v45 = vunpack.c.l.bf16 %v10114_v56  ;;  %v4338_v28 = vunpack.c.h.bf16 %v10140_v42 }
 0x4a0   : > { %4457 = vmatmul.f32.vlgmr.msra.gmra.mxu3 %v10103_v36  ;;  %4597 = vmatmul.f32.vlgmr.msra.gmra.mxu2 %v10004_v14 }
 0x4a1   : > { %4601 = vmatpush.msra.mxu3 %v4369_v37  ;;  %4661 = vmatpush.msrb.mxu2 %v4306_v55  ;;  %v4881_v37 = vunpack.c.l.bf16 %v10206_v33  ;;  %v4330_v55 = vunpack.c.h.bf16 %v10150_v12 }
 0x4a2   : > { %5099 = vmatpush.msra.mxu0 %v4893_v0  ;;  %v10308_v0 = vld [vmem:[%s7254_s20 + $0x140] sm:$0xff] }
 0x4a3   : > { %4602 = vmatpush.msra.mxu3 %v4365_v23  ;;  %4662 = vmatpush.msrb.mxu2 %v4302_v26  ;;  %v10214_v23 = vld [vmem:[%s7254_s20 + $0x1f0] sm:$0xff]  ;;  %v4877_v26 = vunpack.c.l.bf16 %v10211_v19 }
 0x4a4   : > { %v4957_v56 = vunpack.c.l.bf16 %v10214_v23 }
 0x4a5   : > { %4603 = vmatpush.msra.mxu3 %v4361_v34  ;;  %4663 = vmatpush.msrb.mxu2 %v4298_v25  ;;  %v10219_v34 = vld [vmem:[%s7254_s20 + $0xa0] sm:$0xff] }
 0x4a6   : > { %v10222_v25 = vld [vmem:[%s7254_s20 + $0x1e0] sm:$0xff]  ;;  %5119 = vmatpush.msra.mxu1 %v4957_v56 }
 0x4a7   : > { %4604 = vmatpush.msra.mxu3 %v4357_v45  ;;  %4664 = vmatpush.msrb.mxu2 %v4294_v18  ;;  %v4326_v45 = vunpack.c.h.bf16 %v10155_v21  ;;  %v4873_v18 = vunpack.c.l.bf16 %v10219_v34  ;;  %v4953_v61 = vunpack.c.l.bf16 %v10222_v25  ;;  %v10327_v56 = vld [vmem:[%s7254_s20 + $0x120] sm:$0xff] }
 0x4a8   : > { %4537 = vmatmul.f32.vlgmr.msrb.gmra.mxu3 %v10103_v36 }
 0x4a9   : > { %4605 = vmatpush.msra.mxu3 %v4353_v30  ;;  %4665 = vmatpush.msrb.mxu2 %v4290_v62  ;;  %v10231_v30 = vld [vmem:[%s7254_s20 + $0x1d0] sm:$0xff]  ;;  %v10234_v62 = vld [vmem:[%s7254_s20 + $0x80] sm:$0xff] }
 0x4aa   : > { %5120 = vmatpush.msra.mxu1 %v4953_v61  ;;  %v4865_v42 = vunpack.c.l.bf16 %v10234_v62  ;;  %v10335_v61 = vld [vmem:[%s7254_s20 + $0x110] sm:$0xff] }
 0x4ab   : > { %4606 = vmatpush.msra.mxu3 %v4349_v57  ;;  %4666 = vmatpush.msrb.mxu2 %v4286_v46  ;;  %v4869_v57 = vunpack.c.l.bf16 %v10225_v5  ;;  %v4949_v46 = vunpack.c.l.bf16 %v10231_v30 }
 0x4ad   : > { %4607 = vmatpush.msra.mxu3 %v4345_v35  ;;  %4667 = vmatpush.msrb.mxu2 %v4282_v38  ;;  %v10243_v35 = vld [vmem:[%s7254_s20 + $0x70] sm:$0xff] }
 0x4ae   : > { %v10246_v38 = vld [vmem:[%s7254_s20 + $0x1b0] sm:$0xff]  ;;  %5121 = vmatpush.msra.mxu1 %v4949_v46  ;;  %v10340_v46 = vld [vmem:[%s7254_s20 + $0x2c0] sm:$0xff] }
 0x4af   : > { %4608 = vmatpush.msra.mxu3 %v4341_v4  ;;  %4668 = vmatpush.msrb.mxu2 %v4278_v51  ;;  %v4945_v4 = vunpack.c.l.bf16 %v10237_v24  ;;  %v4318_v51 = vunpack.c.h.bf16 %v10165_v43  ;;  %v4941_v12 = vunpack.c.l.bf16 %v10246_v38  ;;  %v4933_v43 = vunpack.c.l.bf16 %v10267_v17 }
 0x4b1   : > { %4609 = vmatpush.msra.mxu3 %v4337_v16  ;;  %4669 = vmatpush.msrb.mxu2 %v4274_v63  ;;  %v10255_v16 = vld [vmem:[%s7254_s20 + $0x1a0] sm:$0xff]  ;;  %v4861_v63 = vunpack.c.l.bf16 %v10243_v35 }
 0x4b2   : > { %5122 = vmatpush.msra.mxu1 %v4945_v4  ;;  %v4937_v21 = vunpack.c.l.bf16 %v10255_v16 }
 0x4b3   : > { %4610 = vmatpush.msra.mxu3 %v4333_v31  ;;  %4670 = vmatpush.msrb.mxu2 %v4270_v32  ;;  %v4314_v31 = vunpack.c.h.bf16 %v10170_v22  ;;  %v4857_v32 = vunpack.c.l.bf16 %v10252_v10 }
 0x4b4   : > { %5123 = vmatpush.msra.mxu1 %v4941_v12  ;;  %v4878_v12 = vunpack.c.h.bf16 %v10211_v19 }
 0x4b5   : > { %4611 = vmatpush.msra.mxu3 %v4329_v49  ;;  %4671 = vmatpush.msrb.mxu2 %v4266_v29  ;;  %v4310_v49 = vunpack.c.h.bf16 %v10175_v52  ;;  %v10264_v29 = vld [vmem:[%s7254_s20 + $0x50] sm:$0xff] }
 0x4b6   : > { %5124 = vmatpush.msra.mxu1 %v4937_v21  ;;  %v4954_v21 = vunpack.c.h.bf16 %v10222_v25 }
 0x4b7   : > { %4612 = vmatpush.msra.mxu3 %v4325_v3  ;;  %4672 = vmatpush.msrb.mxu2 %v4262_v15  ;;  %v10270_v3 = vld [vmem:[%s7254_s20 + $0x40] sm:$0xff]  ;;  %v4853_v15 = vunpack.c.l.bf16 %v10264_v29 }
 0x4b8   : > { %v4849_v22 = vunpack.c.l.bf16 %v10270_v3  ;;  %5125 = vmatpush.msra.mxu1 %v4933_v43 }
 0x4b9   : > { %4613 = vmatpush.msra.mxu3 %v4321_v48  ;;  %4673 = vmatpush.msrb.mxu2 %v4258_v2  ;;  %v10275_v48 = vld [vmem:[%s7254_s20 + $0x180] sm:$0xff]  ;;  %v10278_v2 = vld [vmem:[%s7254_s20 + $0x30] sm:$0xff] }
 0x4ba   : > { %v4845_v52 = vunpack.c.l.bf16 %v10278_v2 }
 0x4bb   : > { %4614 = vmatpush.msra.mxu3 %v4317_v60  ;;  %4674 = vmatpush.msrb.mxu2 %v4254_v39  ;;  %v10282_v60 = vld [vmem:[%s7254_s20 + $0x170] sm:$0xff]  ;;  %v4929_v39 = vunpack.c.l.bf16 %v10275_v48 }
 0x4bd   : > { %4615 = vmatpush.msra.mxu3 %v4313_v53  ;;  %4675 = vmatpush.msrb.mxu2 %v4250_v13  ;;  %v4925_v53 = vunpack.c.l.bf16 %v10282_v60  ;;  %v10289_v13 = vld [vmem:[%s7254_s20 + $0x20] sm:$0xff] }
 0x4be   : > { %5126 = vmatpush.msra.mxu1 %v4929_v39  ;;  %v4866_v39 = vunpack.c.h.bf16 %v10234_v62  ;;  %v4858_v62 = vunpack.c.h.bf16 %v10252_v10 }
 0x4bf   : > { %4616 = vmatpush.msra.mxu3 %v4309_v11  ;;  %4676 = vmatpush.msrb.mxu2 %v4246_v8  ;;  %v10292_v11 = vld [vmem:[%s7254_s20 + $0x160] sm:$0xff]  ;;  %v4841_v8 = vunpack.c.l.bf16 %v10289_v13 }
 0x4c0   : > { %4617 = vmatmul.f32.vlgmr.msra.gmra.mxu3 %v10103_v36  ;;  %4677 = vmatmul.f32.vlgmr.msrb.gmra.mxu2 %v10004_v14  ;;  %v4889_v14 = vunpack.c.l.bf16 %v10191_v1 }
 0x4c1   : > { %4681 = vmatpush.msrb.mxu3 %v4370_v40  ;;  %v10297_v40 = vld [vmem:[%s7254_s20 + $0x10] sm:$0xff]  ;;  %5127 = vmatpush.msra.mxu1 %v4925_v53  ;;  %v10376_v53 = vld [vmem:[%s7254_s20 + $0x260] sm:$0xff] }
 0x4c2   : > { %5100 = vmatpush.msra.mxu0 %v4889_v14  ;;  %v10311_v14 = vld [vmem:[%s7254_s20 + $0x2f0] sm:$0xff] }
 0x4c3   : > { %4682 = vmatpush.msrb.mxu3 %v4366_v6  ;;  %v10300_v6 = vld [vmem:[%s7254_s20 + $0x150] sm:$0xff] }
 0x4c4   : > { %5101 = vmatpush.msra.mxu0 %v4885_v7  ;;  %v5021_v7 = vunpack.c.l.bf16 %v10311_v14 }
 0x4c5   : > { %4683 = vmatpush.msrb.mxu3 %v4362_v9  ;;  %v10303_v9 = vld [vmem:[%s7254_s20] sm:$0xff] }
 0x4c6   : > { %5102 = vmatpush.msra.mxu0 %v4881_v37  ;;  %5139 = vmatpush.msra.mxu2 %v5021_v7  ;;  %v10394_v7 = vld [vmem:[%s7254_s20 + $0x230] sm:$0xff] }
 0x4c7   : > { %4684 = vmatpush.msrb.mxu3 %v4358_v44  ;;  %v4837_v44 = vunpack.c.l.bf16 %v10297_v40 }
 0x4c8   : > { %5103 = vmatpush.msra.mxu0 %v4877_v26  ;;  %v4890_v26 = vunpack.c.h.bf16 %v10191_v1 }
 0x4c9   : > { %4685 = vmatpush.msrb.mxu3 %v4354_v41  ;;  %v4917_v41 = vunpack.c.l.bf16 %v10300_v6 }
 0x4ca   : > { %5104 = vmatpush.msra.mxu0 %v4873_v18  ;;  %v4886_v18 = vunpack.c.h.bf16 %v10194_v20  ;;  %v10345_v20 = vld [vmem:[%s7254_s20 + $0x100] sm:$0xff] }
 0x4cb   : > { %4686 = vmatpush.msrb.mxu3 %v4350_v50  ;;  %v4833_v50 = vunpack.c.l.bf16 %v10303_v9  ;;  %v4897_v4 = vunpack.c.l.bf16 %v10345_v20 }
 0x4cc   : > { %5105 = vmatpush.msra.mxu0 %v4869_v57  ;;  %v4901_v57 = vunpack.c.l.bf16 %v10335_v61 }
 0x4cd   : > { %4687 = vmatpush.msrb.mxu3 %v4346_v59  ;;  %v10316_v59 = vld [vmem:[%s7254_s20 + $0x130] sm:$0xff] }
 0x4ce   : > { %5106 = vmatpush.msra.mxu0 %v4865_v42  ;;  %v4882_v42 = vunpack.c.h.bf16 %v10206_v33  ;;  %v4874_v33 = vunpack.c.h.bf16 %v10219_v34  ;;  %v10370_v34 = vld [vmem:[%s7254_s20 + $0x270] sm:$0xff] }
 0x4cf   : > { %4688 = vmatpush.msrb.mxu3 %v4342_v47  ;;  %v10319_v47 = vld [vmem:[%s7254_s20 + $0x2e0] sm:$0xff] }
 0x4d0   : > { %5107 = vmatpush.msra.mxu0 %v4861_v63  ;;  %v5017_v37 = vunpack.c.l.bf16 %v10319_v47 }
 0x4d1   : > { %4689 = vmatpush.msrb.mxu3 %v4338_v28  ;;  %v4913_v28 = vunpack.c.l.bf16 %v10308_v0 }
 0x4d2   : > { %5108 = vmatpush.msra.mxu0 %v4857_v32  ;;  %5140 = vmatpush.msra.mxu2 %v5017_v37  ;;  %v10355_v32 = vld [vmem:[%s7254_s20 + $0x2a0] sm:$0xff] }
 0x4d3   : > { %4690 = vmatpush.msrb.mxu3 %v4334_v54  ;;  %v4894_v54 = vunpack.c.h.bf16 %v10188_v27  ;;  %v10331_v27 = vld [vmem:[%s7254_s20 + $0x2d0] sm:$0xff]  ;;  %v5001_v43 = vunpack.c.l.bf16 %v10355_v32  ;;  %v10403_v37 = vld [vmem:[%s7254_s20 + $0x220] sm:$0xff] }
 0x4d4   : > { %5109 = vmatpush.msra.mxu0 %v4853_v15  ;;  %v5013_v1 = vunpack.c.l.bf16 %v10331_v27  ;;  %v10363_v15 = vld [vmem:[%s7254_s20 + $0x280] sm:$0xff] }
 0x4d5   : > { %4691 = vmatpush.msrb.mxu3 %v4330_v55  ;;  %v4909_v55 = vunpack.c.l.bf16 %v10316_v59  ;;  %v4993_v25 = vunpack.c.l.bf16 %v10363_v15 }
 0x4d6   : > { %5110 = vmatpush.msra.mxu0 %v4849_v22  ;;  %5141 = vmatpush.msra.mxu2 %v5013_v1  ;;  %v4950_v22 = vunpack.c.h.bf16 %v10231_v30  ;;  %v4942_v30 = vunpack.c.h.bf16 %v10246_v38  ;;  %v4854_v38 = vunpack.c.h.bf16 %v10264_v29  ;;  %v4846_v29 = vunpack.c.h.bf16 %v10278_v2 }
 0x4d7   : > { %4692 = vmatpush.msrb.mxu3 %v4326_v45  ;;  %v4905_v45 = vunpack.c.l.bf16 %v10327_v56 }
 0x4d8   : > { %5111 = vmatpush.msra.mxu0 %v4845_v52  ;;  %v4946_v52 = vunpack.c.h.bf16 %v10237_v24  ;;  %v4938_v24 = vunpack.c.h.bf16 %v10255_v16  ;;  %v4850_v16 = vunpack.c.h.bf16 %v10270_v3  ;;  %v4969_v3 = vunpack.c.l.bf16 %v10403_v37 }
 0x4d9   : > { %4693 = vmatpush.msrb.mxu3 %v4322_v58  ;;  %v5009_v58 = vunpack.c.l.bf16 %v10340_v46 }
 0x4da   : > { %5112 = vmatpush.msra.mxu0 %v4841_v8  ;;  %v4989_v8 = vunpack.c.l.bf16 %v10370_v34 }
 0x4db   : > { %4694 = vmatpush.msrb.mxu3 %v4318_v51  ;;  %v10349_v51 = vld [vmem:[%s7254_s20 + $0x2b0] sm:$0xff]  ;;  %5142 = vmatpush.msra.mxu2 %v5009_v58  ;;  %v4910_v58 = vunpack.c.h.bf16 %v10316_v59  ;;  %v5014_v59 = vunpack.c.h.bf16 %v10331_v27 }
 0x4dc   : > { %5113 = vmatpush.msra.mxu0 %v4837_v44  ;;  %v5005_v63 = vunpack.c.l.bf16 %v10349_v51  ;;  %v10385_v44 = vld [vmem:[%s7254_s20 + $0x250] sm:$0xff] }
 0x4dd   : > { %4695 = vmatpush.msrb.mxu3 %v4314_v31  ;;  %v4958_v31 = vunpack.c.h.bf16 %v10214_v23  ;;  %v4870_v23 = vunpack.c.h.bf16 %v10225_v5  ;;  %v4862_v5 = vunpack.c.h.bf16 %v10243_v35  ;;  %v4981_v35 = vunpack.c.l.bf16 %v10385_v44 }
 0x4de   : > { %5114 = vmatpush.msra.mxu0 %v4833_v50  ;;  %5143 = vmatpush.msra.mxu2 %v5005_v63  ;;  %v10391_v50 = vld [vmem:[%s7254_s20 + $0x240] sm:$0xff]  ;;  %v10433_v63 = vld [vmem:[%s7254_s20 + $0x3d0] sm:$0xff] }
 0x4df   : > { %4696 = vmatpush.msrb.mxu3 %v4310_v49  ;;  %v10360_v49 = vld [vmem:[%s7254_s20 + $0x290] sm:$0xff]  ;;  %v4977_v10 = vunpack.c.l.bf16 %v10391_v50 }
 0x4e0   : > { %4697 = vmatmul.f32.vlgmr.msrb.gmra.mxu3 %v10103_v36  ;;  %v4921_v36 = vunpack.c.l.bf16 %v10292_v11  ;;  %5179 = vmatpush.msrb.mxu0 %v4894_v54  ;;  %v4997_v19 = vunpack.c.l.bf16 %v10360_v49  ;;  %v4973_v54 = vunpack.c.l.bf16 %v10394_v7 }
 0x4e1   : > { %5144 = vmatpush.msra.mxu2 %v5001_v43  ;;  %v10450_v43 = vld [vmem:[%s7254_s20 + $0x3a0] sm:$0xff] }
 0x4e2   : > { %5128 = vmatpush.msra.mxu1 %v4921_v36  ;;  %5180 = vmatpush.msrb.mxu0 %v4890_v26  ;;  %v4985_v36 = vunpack.c.l.bf16 %v10376_v53  ;;  %v10409_v26 = vld [vmem:[%s7254_s20 + $0x210] sm:$0xff] }
 0x4e3   : > { %5145 = vmatpush.msra.mxu2 %v4997_v19  ;;  %v4965_v2 = vunpack.c.l.bf16 %v10409_v26  ;;  %v5065_v19 = vunpack.c.l.bf16 %v10450_v43 }
 0x4e4   : > { %5129 = vmatpush.msra.mxu1 %v4917_v41  ;;  %5181 = vmatpush.msrb.mxu0 %v4886_v18  ;;  %v4934_v41 = vunpack.c.h.bf16 %v10267_v17  ;;  %v4926_v17 = vunpack.c.h.bf16 %v10282_v60  ;;  %v4838_v60 = vunpack.c.h.bf16 %v10297_v40  ;;  %v10415_v18 = vld [vmem:[%s7254_s20 + $0x200] sm:$0xff] }
 0x4e5   : > { %5146 = vmatpush.msra.mxu2 %v4993_v25  ;;  %v4961_v1 = vunpack.c.l.bf16 %v10415_v18  ;;  %v10463_v25 = vld [vmem:[%s7254_s20 + $0x380] sm:$0xff] }
 0x4e6   : > { %5130 = vmatpush.msra.mxu1 %v4913_v28  ;;  %5182 = vmatpush.msrb.mxu0 %v4882_v42  ;;  %v4930_v28 = vunpack.c.h.bf16 %v10275_v48  ;;  %v4842_v48 = vunpack.c.h.bf16 %v10289_v13  ;;  %v4834_v13 = vunpack.c.h.bf16 %v10303_v9  ;;  %v10427_v42 = vld [vmem:[%s7254_s20 + $0x3e0] sm:$0xff]  ;;  %v5018_v9 = vunpack.c.h.bf16 %v10319_v47 }
 0x4e7   : > { %5147 = vmatpush.msra.mxu2 %v4989_v8  ;;  %v4902_v47 = vunpack.c.h.bf16 %v10335_v61  ;;  %v5006_v61 = vunpack.c.h.bf16 %v10349_v51  ;;  %v10460_v51 = vld [vmem:[%s7252_s21] sm:$0xf] }
 0x4e8   : > { %5131 = vmatpush.msra.mxu1 %v4909_v55  ;;  %5183 = vmatpush.msrb.mxu0 %v4878_v12  ;;  %v4922_v55 = vunpack.c.h.bf16 %v10292_v11  ;;  %v4914_v11 = vunpack.c.h.bf16 %v10308_v0  ;;  %v5081_v0 = vunpack.c.l.bf16 %v10427_v42  ;;  %v10439_v12 = vld [vmem:[%s7254_s20 + $0x3c0] sm:$0xff] }
 0x4e9   : > { %5148 = vmatpush.msra.mxu2 %v4985_v36  ;;  %v10474_v36 = vld [vmem:[%s7254_s20 + $0x360] sm:$0xff] }
 0x4ea   : > { %5132 = vmatpush.msra.mxu1 %v4905_v45  ;;  %5184 = vmatpush.msrb.mxu0 %v4874_v33  ;;  %v4918_v45 = vunpack.c.h.bf16 %v10300_v6  ;;  %v5022_v6 = vunpack.c.h.bf16 %v10311_v14  ;;  %v5077_v14 = vunpack.c.l.bf16 %v10433_v63  ;;  %v5010_v33 = vunpack.c.h.bf16 %v10340_v46 }
 0x4eb   : > { %5149 = vmatpush.msra.mxu2 %v4981_v35  ;;  %v5002_v46 = vunpack.c.h.bf16 %v10355_v32  ;;  %v4994_v32 = vunpack.c.h.bf16 %v10363_v15  ;;  %v4986_v15 = vunpack.c.h.bf16 %v10376_v53  ;;  %v10479_v35 = vld [vmem:[%s7254_s20 + $0x350] sm:$0xff]  ;;  %v4978_v53 = vunpack.c.h.bf16 %v10391_v50 }
 0x4ec   : > { %5133 = vmatpush.msra.mxu1 %v4901_v57  ;;  %5185 = vmatpush.msrb.mxu0 %v4870_v23  ;;  %v10421_v57 = vld [vmem:[%s7254_s20 + $0x3f0] sm:$0xff]  ;;  %v4998_v23 = vunpack.c.h.bf16 %v10360_v49  ;;  %v4373_v49 = vperm.slane %v10460_v51, 0 }
 0x4ed   : > { %5150 = vmatpush.msra.mxu2 %v4977_v10  ;;  %v5085_v40 = vunpack.c.l.bf16 %v10421_v57 }
 0x4ee   : > { %5134 = vmatpush.msra.mxu1 %v4897_v4  ;;  %5186 = vmatpush.msrb.mxu0 %v4866_v39  ;;  %v4906_v4 = vunpack.c.h.bf16 %v10327_v56  ;;  %v4898_v56 = vunpack.c.h.bf16 %v10345_v20  ;;  %v10455_v20 = vld [vmem:[%s7254_s20 + $0x390] sm:$0xff]  ;;  %v5057_v39 = vunpack.c.l.bf16 %v10463_v25 }
 0x4ef   : > { %5151 = vmatpush.msra.mxu2 %v4973_v54  ;;  %5159 = vmatpush.msra.mxu3 %v5085_v40  ;;  %v10489_v54 = vld [vmem:[%s7254_s20 + $0x330] sm:$0xff] }
 0x4f0   : > { %5199 = vmatpush.msrb.mxu1 %v4958_v31  ;;  %5187 = vmatpush.msrb.mxu0 %v4862_v5  ;;  %v5073_v31 = vunpack.c.l.bf16 %v10439_v12  ;;  %v4990_v5 = vunpack.c.h.bf16 %v10370_v34  ;;  %v5045_v34 = vunpack.c.l.bf16 %v10479_v35 }
 0x4f1   : > { %5152 = vmatpush.msra.mxu2 %v4969_v3  ;;  %5160 = vmatpush.msra.mxu3 %v5081_v0  ;;  %v10494_v3 = vld [vmem:[%s7254_s20 + $0x320] sm:$0xff] }
 0x4f2   : > { %5200 = vmatpush.msrb.mxu1 %v4954_v21  ;;  %5188 = vmatpush.msrb.mxu0 %v4858_v62  ;;  %v10445_v21 = vld [vmem:[%s7254_s20 + $0x3b0] sm:$0xff]  ;;  %v5049_v62 = vunpack.c.l.bf16 %v10474_v36 }
 0x4f3   : > { %5153 = vmatpush.msra.mxu2 %v4965_v2  ;;  %5161 = vmatpush.msra.mxu3 %v5077_v14  ;;  %v5069_v27 = vunpack.c.l.bf16 %v10445_v21  ;;  %v5033_v2 = vunpack.c.l.bf16 %v10494_v3  ;;  %v10517_v14 = vld [vmem:[%s7254_s20 + $0xd8] sm:$0xff] }
 0x4f4   : > { %5201 = vmatpush.msrb.mxu1 %v4950_v22  ;;  %5189 = vmatpush.msrb.mxu0 %v4854_v38  ;;  %v5061_v22 = vunpack.c.l.bf16 %v10455_v20  ;;  %v4982_v38 = vunpack.c.h.bf16 %v10385_v44  ;;  %v4974_v44 = vunpack.c.h.bf16 %v10394_v7 }
 0x4f5   : > { %5154 = vmatpush.msra.mxu2 %v4961_v1  ;;  %5162 = vmatpush.msra.mxu3 %v5073_v31  ;;  %v10506_v1 = vld [vmem:[%s7254_s20 + $0xe8] sm:$0xff] }
 0x4f6   : > { %5202 = vmatpush.msrb.mxu1 %v4946_v52  ;;  %5190 = vmatpush.msrb.mxu0 %v4850_v16  ;;  %v10468_v52 = vld [vmem:[%s7254_s20 + $0x370] sm:$0xff]  ;;  %v10484_v16 = vld [vmem:[%s7254_s20 + $0x340] sm:$0xff]  ;;  %v4891_v31 = vunpack.c.l.bf16 %v10506_v1 }
 0x4f7   : > { %5219 = vmatpush.msrb.mxu2 %v5022_v6  ;;  %5163 = vmatpush.msra.mxu3 %v5069_v27  ;;  %v5053_v8 = vunpack.c.l.bf16 %v10468_v52  ;;  %v4966_v6 = vunpack.c.h.bf16 %v10409_v26  ;;  %v10525_v27 = vld [vmem:[%s7254_s20 + $0xc8] sm:$0xff] }
 0x4f8   : > { %5203 = vmatpush.msrb.mxu1 %v4942_v30  ;;  %5191 = vmatpush.msrb.mxu0 %v4846_v29  ;;  %v4398_v30 = vpop.f32.mrf.mxu0 }
 0x4f9   : > { %5220 = vmatpush.msrb.mxu2 %v5018_v9  ;;  %5164 = vmatpush.msra.mxu3 %v5065_v19  ;;  %v10530_v19 = vld [vmem:[%s7254_s20 + $0xb8] sm:$0xff] }
 0x4fa   : > { %5204 = vmatpush.msrb.mxu1 %v4938_v24  ;;  %5192 = vmatpush.msrb.mxu0 %v4842_v48  ;;  %v4418_v24 = vpop.f32.mrf.mxu1  ;;  %v4374_v48 = vperm.slane %v10460_v51, 1 }
 0x4fb   : > { %5221 = vmatpush.msrb.mxu2 %v5014_v59  ;;  %5165 = vmatpush.msra.mxu3 %v5061_v22  ;;  %v4883_v22 = vunpack.c.l.bf16 %v10525_v27 }
 0x4fc   : > { %5205 = vmatpush.msrb.mxu1 %v4934_v41  ;;  %5193 = vmatpush.msrb.mxu0 %v4838_v60  ;;  %v4399_v41 = vadd.f32 %v4398_v30, %v4373_v49  ;;  %v4970_v60 = vunpack.c.h.bf16 %v10403_v37  ;;  %v10512_v37 = vld [vmem:[%s7254_s20 + $0x300] sm:$0xff]  ;;  %v10538_v49 = vld [vmem:[%s7254_s20 + $0xa8] sm:$0xff] }
 0x4fd   : > { %5222 = vmatpush.msrb.mxu2 %v5010_v33  ;;  %5166 = vmatpush.msra.mxu3 %v5057_v39  ;;  %v5025_v59 = vunpack.c.l.bf16 %v10512_v37  ;;  %v5086_v33 = vunpack.c.h.bf16 %v10421_v57 }
 0x4fe   : > { %5206 = vmatpush.msrb.mxu1 %v4930_v28  ;;  %5194 = vmatpush.msrb.mxu0 %v4834_v13  ;;  %v5041_v28 = vunpack.c.l.bf16 %v10484_v16  ;;  %v4419_v29 = vadd.f32 %v4418_v24, %v4399_v41  ;;  %v10503_v13 = vld [vmem:[%s7254_s20 + $0x310] sm:$0xff]  ;;  %v4875_v24 = vunpack.c.l.bf16 %v10538_v49  ;;  %v10559_v41 = vld [vmem:[%s7254_s20 + $0x88] sm:$0xff] }
 0x4ff   : > { %5223 = vmatpush.msrb.mxu2 %v5006_v61  ;;  %5167 = vmatpush.msra.mxu3 %v5053_v8  ;;  %v5029_v40 = vunpack.c.l.bf16 %v10503_v13  ;;  %v4887_v61 = vunpack.c.l.bf16 %v10517_v14  ;;  %v4879_v8 = vunpack.c.l.bf16 %v10530_v19 }
 0x500   : > { %5207 = vmatpush.msrb.mxu1 %v4926_v17  ;;  %v5037_v17 = vunpack.c.l.bf16 %v10489_v54 }
 0x501   : > { %5224 = vmatpush.msrb.mxu2 %v5002_v46  ;;  %5168 = vmatpush.msra.mxu3 %v5049_v62  ;;  %v10551_v62 = vld [vmem:[%s7254_s20 + $0x1d8] sm:$0xff] }
 0x502   : > { %5208 = vmatpush.msrb.mxu1 %v4922_v55  ;;  %v10498_v55 = vld [vmem:[%s7254_s20 + $0xf8] sm:$0xff] }
 0x503   : > { %5225 = vmatpush.msrb.mxu2 %v4998_v23  ;;  %v4438_v10 = vpop.f32.mrf.mxu2  ;;  %5169 = vmatpush.msra.mxu3 %v5045_v34  ;;  %v4895_v9 = vunpack.c.l.bf16 %v10498_v55  ;;  %v10533_v23 = vld [vmem:[%s7254_s20 + $0x1f8] sm:$0xff]  ;;  %v10562_v34 = vld [vmem:[%s7254_s20 + $0x1c8] sm:$0xff] }
 0x504   : > { %5209 = vmatpush.msrb.mxu1 %v4918_v45  ;;  %v4439_v50 = vadd.f32 %v4438_v10, %v4419_v29  ;;  %v4478_v45 = vpop.f32.mrf.mxu0  ;;  %v5070_v10 = vunpack.c.h.bf16 %v10445_v21  ;;  %v5066_v29 = vunpack.c.h.bf16 %v10450_v43  ;;  %v4947_v21 = vunpack.c.l.bf16 %v10562_v34 }
 0x505   : > { %5226 = vmatpush.msrb.mxu2 %v4994_v32  ;;  %5170 = vmatpush.msra.mxu3 %v5041_v28  ;;  %v4479_v0 = vadd.f32 %v4478_v45, %v4374_v48  ;;  %v5078_v32 = vunpack.c.h.bf16 %v10433_v63  ;;  %v5074_v63 = vunpack.c.h.bf16 %v10439_v12  ;;  %v10568_v28 = vld [vmem:[%s7254_s20 + $0x78] sm:$0xff]  ;;  %v10577_v48 = vld [vmem:[%s7254_s20 + $0x68] sm:$0xff] }
 0x506   : > { %5210 = vmatpush.msrb.mxu1 %v4914_v11  ;;  %v10586_v45 = vld [vmem:[%s7254_s20 + $0x58] sm:$0xff] }
 0x507   : > { %5227 = vmatpush.msrb.mxu2 %v4990_v5  ;;  %5171 = vmatpush.msra.mxu3 %v5037_v17  ;;  %v4959_v5 = vunpack.c.l.bf16 %v10533_v23  ;;  %v4867_v17 = vunpack.c.l.bf16 %v10559_v41 }
 0x508   : > { %5211 = vmatpush.msrb.mxu1 %v4910_v58  ;;  %v4498_v58 = vpop.f32.mrf.mxu1 }
 0x509   : > { %5228 = vmatpush.msrb.mxu2 %v4986_v15  ;;  %5172 = vmatpush.msra.mxu3 %v5033_v2  ;;  %v10548_v15 = vld [vmem:[%s7254_s20 + $0x98] sm:$0xff]  ;;  %v5062_v2 = vunpack.c.h.bf16 %v10455_v20 }
 0x50a   : > { %5212 = vmatpush.msrb.mxu1 %v4906_v4  ;;  %v4871_v12 = vunpack.c.l.bf16 %v10548_v15 }
 0x50b   : > { %5229 = vmatpush.msrb.mxu2 %v4982_v38  ;;  %v4518_v26 = vpop.f32.mrf.mxu2  ;;  %5173 = vmatpush.msra.mxu3 %v5029_v40  ;;  %v4859_v40 = vunpack.c.l.bf16 %v10577_v48 }
 0x50c   : > { %5213 = vmatpush.msrb.mxu1 %v4902_v47  ;;  %v4962_v47 = vunpack.c.h.bf16 %v10415_v18  ;;  %v5082_v18 = vunpack.c.h.bf16 %v10427_v42  ;;  %v10541_v42 = vld [vmem:[%s7254_s20 + $0x1e8] sm:$0xff] }
 0x50d   : > { %5230 = vmatpush.msrb.mxu2 %v4978_v53  ;;  %5174 = vmatpush.msra.mxu3 %v5025_v59  ;;  %v4955_v38 = vunpack.c.l.bf16 %v10541_v42  ;;  %v4951_v53 = vunpack.c.l.bf16 %v10551_v62  ;;  %v4375_v59 = vperm.slane %v10460_v51, 2 }
 0x50e   : > { %5214 = vmatpush.msrb.mxu1 %v4898_v56  ;;  %v4499_v56 = vadd.f32 %v4498_v58, %v4479_v0  ;;  %v10599_v58 = vld [vmem:[%s7254_s20 + $0x188] sm:$0xff] }
 0x50f   : > { %5231 = vmatpush.msrb.mxu2 %v4974_v44  ;;  %5239 = vmatpush.msrb.mxu3 %v5086_v33  ;;  %v10571_v44 = vld [vmem:[%s7254_s20 + $0x1b8] sm:$0xff]  ;;  %v4558_v33 = vpop.f32.mrf.mxu0 }
 0x510   : > { %v4519_v46 = vadd.f32 %v4518_v26, %v4499_v56  ;;  %v4943_v43 = vunpack.c.l.bf16 %v10571_v44  ;;  %v10609_v26 = vld [vmem:[%s7254_s20 + $0x178] sm:$0xff]  ;;  %v4931_v56 = vunpack.c.l.bf16 %v10599_v58 }
 0x511   : > { %5232 = vmatpush.msrb.mxu2 %v4970_v60  ;;  %5240 = vmatpush.msrb.mxu3 %v5082_v18  ;;  %v4863_v60 = vunpack.c.l.bf16 %v10568_v28  ;;  %v10618_v18 = vld [vmem:[%s7254_s20 + $0x168] sm:$0xff] }
 0x513   : > { %5233 = vmatpush.msrb.mxu2 %v4966_v6  ;;  %5241 = vmatpush.msrb.mxu3 %v5078_v32  ;;  %v10596_v6 = vld [vmem:[%s7254_s20 + $0x48] sm:$0xff]  ;;  %v4559_v32 = vadd.f32 %v4558_v33, %v4375_v59  ;;  %v5030_v33 = vunpack.c.h.bf16 %v10503_v13 }
 0x515   : > { %5234 = vmatpush.msrb.mxu2 %v4962_v47  ;;  %5242 = vmatpush.msrb.mxu3 %v5074_v63  ;;  %v10606_v47 = vld [vmem:[%s7254_s20 + $0x38] sm:$0xff] }
 0x517   : > { %5243 = vmatpush.msrb.mxu3 %v5070_v10  ;;  %v10633_v10 = vld [vmem:[%s7254_s20 + $0x8] sm:$0xff] }
 0x519   : > { %5244 = vmatpush.msrb.mxu3 %v5066_v29 }
 0x51b   : > { %5245 = vmatpush.msrb.mxu3 %v5062_v2  ;;  %v5034_v2 = vunpack.c.h.bf16 %v10494_v3  ;;  %v4896_v3 = vunpack.c.h.bf16 %v10498_v55  ;;  %v10668_v55 = vld [vmem:[%s7254_s20 + $0x118] sm:$0xff] }
 0x523   : > { %v4458_v7 = vpop.f32.mrf.mxu3  ;;  %v4598_v63 = vpop.f32.mrf.mxu2 }
 0x524   : > { %v4459_v11 = vadd.f32 %v4458_v7, %v4439_v50  ;;  %v10580_v50 = vld [vmem:[%s7254_s20 + $0x1a8] sm:$0xff]  ;;  %v10589_v7 = vld [vmem:[%s7254_s20 + $0x198] sm:$0xff] }
 0x525   : > { %v4939_v20 = vunpack.c.l.bf16 %v10580_v50  ;;  %v4935_v0 = vunpack.c.l.bf16 %v10589_v7 }
 0x526   : > { %v10514_v4 = vmax.f32 %v4459_v11, 0.0  ;;  %v5058_v11 = vunpack.c.h.bf16 %v10463_v25  ;;  %v4855_v25 = vunpack.c.l.bf16 %v10586_v45 }
 0x528   : > { %5115 = vmatmul.f32.vlgmr.msra.gmra.mxu0 %v10514_v4  ;;  %5246 = vmatpush.msrb.mxu3 %v5058_v11  ;;  %v10648_v11 = vld [vmem:[%s7254_s20 + $0x138] sm:$0xff] }
 0x529   : > { %5259 = vmatpush.msra.mxu0 %v4895_v9  ;;  %v5054_v9 = vunpack.c.h.bf16 %v10468_v52  ;;  %v4851_v52 = vunpack.c.l.bf16 %v10596_v6  ;;  %v4911_v59 = vunpack.c.l.bf16 %v10648_v11 }
 0x52b   : > { %5260 = vmatpush.msra.mxu0 %v4891_v31  ;;  %v4538_v57 = vpop.f32.mrf.mxu3  ;;  %v5050_v31 = vunpack.c.h.bf16 %v10474_v36  ;;  %5247 = vmatpush.msrb.mxu3 %v5054_v9  ;;  %v4847_v36 = vunpack.c.l.bf16 %v10606_v47 }
 0x52c   : > { %v4539_v39 = vadd.f32 %v4538_v57, %v4519_v46  ;;  %v5046_v46 = vunpack.c.h.bf16 %v10479_v35  ;;  %v4578_v57 = vpop.f32.mrf.mxu1 }
 0x52d   : > { %5261 = vmatpush.msra.mxu0 %v4887_v61  ;;  %v10615_v61 = vld [vmem:[%s7254_s20 + $0x28] sm:$0xff]  ;;  %5248 = vmatpush.msrb.mxu3 %v5050_v31  ;;  %v10662_v31 = vld [vmem:[%s7254_s20 + $0x2d8] sm:$0xff] }
 0x52e   : > { %v10545_v30 = vmax.f32 %v4539_v39, 0.0  ;;  %v10624_v39 = vld [vmem:[%s7254_s20 + $0x18] sm:$0xff]  ;;  %v4843_v35 = vunpack.c.l.bf16 %v10615_v61  ;;  %v5015_v13 = vunpack.c.l.bf16 %v10662_v31 }
 0x52f   : > { %5262 = vmatpush.msra.mxu0 %v4883_v22  ;;  %v4927_v22 = vunpack.c.l.bf16 %v10609_v26  ;;  %5249 = vmatpush.msrb.mxu3 %v5046_v46 }
 0x530   : > { %5135 = vmatmul.f32.vlgmr.msra.gmra.mxu1 %v10545_v30  ;;  %5195 = vmatmul.f32.vlgmr.msrb.gmra.mxu0 %v10514_v4 }
 0x531   : > { %5263 = vmatpush.msra.mxu0 %v4879_v8  ;;  %5279 = vmatpush.msra.mxu1 %v4959_v5  ;;  %v10627_v8 = vld [vmem:[%s7254_s20 + $0x158] sm:$0xff]  ;;  %v5042_v5 = vunpack.c.h.bf16 %v10484_v16  ;;  %v4839_v16 = vunpack.c.l.bf16 %v10624_v39 }
 0x532   : > { %v4919_v29 = vunpack.c.l.bf16 %v10627_v8 }
 0x533   : > { %5264 = vmatpush.msra.mxu0 %v4875_v24  ;;  %5280 = vmatpush.msra.mxu1 %v4955_v38  ;;  %v4923_v24 = vunpack.c.l.bf16 %v10618_v18  ;;  %v4579_v38 = vadd.f32 %v4578_v57, %v4559_v32  ;;  %v10674_v57 = vld [vmem:[%s7254_s20 + $0x2c8] sm:$0xff]  ;;  %v4903_v32 = vunpack.c.l.bf16 %v10668_v55 }
 0x534   : > { %5250 = vmatpush.msrb.mxu3 %v5042_v5  ;;  %v10684_v5 = vld [vmem:[%s7254_s20 + $0x2b8] sm:$0xff] }
 0x535   : > { %5265 = vmatpush.msra.mxu0 %v4871_v12  ;;  %5281 = vmatpush.msra.mxu1 %v4951_v53  ;;  %v10636_v12 = vld [vmem:[%s7254_s20 + $0x148] sm:$0xff]  ;;  %v5038_v53 = vunpack.c.h.bf16 %v10489_v54  ;;  %v4835_v54 = vunpack.c.l.bf16 %v10633_v10 }
 0x537   : > { %5266 = vmatpush.msra.mxu0 %v4867_v17  ;;  %5282 = vmatpush.msra.mxu1 %v4947_v21  ;;  %v4599_v17 = vadd.f32 %v4598_v63, %v4579_v38  ;;  %v10642_v21 = vld [vmem:[%s7254_s20 + $0x2f8] sm:$0xff]  ;;  %v4884_v63 = vunpack.c.h.bf16 %v10525_v27  ;;  %v4880_v38 = vunpack.c.h.bf16 %v10530_v19 }
 0x538   : > { %5215 = vmatmul.f32.vlgmr.msrb.gmra.mxu1 %v10545_v30  ;;  %5251 = vmatpush.msrb.mxu3 %v5038_v53  ;;  %v5023_v9 = vunpack.c.l.bf16 %v10642_v21  ;;  %v4960_v53 = vunpack.c.h.bf16 %v10533_v23  ;;  %v4872_v23 = vunpack.c.h.bf16 %v10548_v15 }
 0x539   : > { %5267 = vmatpush.msra.mxu0 %v4863_v60  ;;  %5283 = vmatpush.msra.mxu1 %v4943_v43  ;;  %v4915_v43 = vunpack.c.l.bf16 %v10636_v12 }
 0x53a   : > { %5252 = vmatpush.msrb.mxu3 %v5034_v2  ;;  %v10703_v2 = vld [vmem:[%s7254_s20 + $0x288] sm:$0xff] }
 0x53b   : > { %5268 = vmatpush.msra.mxu0 %v4859_v40  ;;  %5284 = vmatpush.msra.mxu1 %v4939_v20  ;;  %v10651_v20 = vld [vmem:[%s7254_s20 + $0x2e8] sm:$0xff] }
 0x53c   : > { %5253 = vmatpush.msrb.mxu3 %v5030_v33  ;;  %v10728_v33 = vld [vmem:[%s7254_s20 + $0x248] sm:$0xff] }
 0x53d   : > { %5269 = vmatpush.msra.mxu0 %v4855_v25  ;;  %5285 = vmatpush.msra.mxu1 %v4935_v0  ;;  %v10656_v25 = vld [vmem:[%s7254_s20 + $0x128] sm:$0xff] }
 0x53e   : > { %v4907_v46 = vunpack.c.l.bf16 %v10656_v25 }
 0x53f   : > { %5270 = vmatpush.msra.mxu0 %v4851_v52  ;;  %5286 = vmatpush.msra.mxu1 %v4931_v56  ;;  %v5019_v52 = vunpack.c.l.bf16 %v10651_v20  ;;  %v4892_v56 = vunpack.c.h.bf16 %v10506_v1  ;;  %v10680_v1 = vld [vmem:[%s7254_s20 + $0x108] sm:$0xff] }
 0x541   : > { %5271 = vmatpush.msra.mxu0 %v4847_v36  ;;  %5287 = vmatpush.msra.mxu1 %v4927_v22  ;;  %v5026_v36 = vunpack.c.h.bf16 %v10512_v37  ;;  %v4888_v22 = vunpack.c.h.bf16 %v10517_v14  ;;  %v5011_v37 = vunpack.c.l.bf16 %v10674_v57  ;;  %v5007_v14 = vunpack.c.l.bf16 %v10684_v5 }
 0x543   : > { %v4618_v60 = vpop.f32.mrf.mxu3  ;;  %5272 = vmatpush.msra.mxu0 %v4843_v35  ;;  %5288 = vmatpush.msra.mxu1 %v4923_v24  ;;  %v4899_v35 = vunpack.c.l.bf16 %v10680_v1  ;;  %v10690_v24 = vld [vmem:[%s7254_s20 + $0x2a8] sm:$0xff] }
 0x544   : > { %v4619_v40 = vadd.f32 %v4618_v60, %v4599_v17  ;;  %5254 = vmatpush.msrb.mxu3 %v5026_v36  ;;  %v5003_v27 = vunpack.c.l.bf16 %v10690_v24  ;;  %v4956_v17 = vunpack.c.h.bf16 %v10541_v42  ;;  %v4952_v60 = vunpack.c.h.bf16 %v10551_v62  ;;  %v4638_v36 = vpop.f32.mrf.mxu0 }
 0x545   : > { %5273 = vmatpush.msra.mxu0 %v4839_v16  ;;  %5289 = vmatpush.msra.mxu1 %v4919_v29  ;;  %v10696_v16 = vld [vmem:[%s7254_s20 + $0x298] sm:$0xff]  ;;  %v4876_v29 = vunpack.c.h.bf16 %v10538_v49  ;;  %v4995_v49 = vunpack.c.l.bf16 %v10703_v2  ;;  %v4868_v42 = vunpack.c.h.bf16 %v10559_v41  ;;  %v4864_v62 = vunpack.c.h.bf16 %v10568_v28 }
 0x546   : > { %v10658_v0 = vmax.f32 %v4619_v40, 0.0  ;;  %v4999_v19 = vunpack.c.l.bf16 %v10696_v16  ;;  %v10716_v40 = vld [vmem:[%s7254_s20 + $0x268] sm:$0xff] }
 0x547   : > { %5274 = vmatpush.msra.mxu0 %v4835_v54  ;;  %5290 = vmatpush.msra.mxu1 %v4915_v43  ;;  %v10710_v54 = vld [vmem:[%s7254_s20 + $0x278] sm:$0xff]  ;;  %v4948_v43 = vunpack.c.h.bf16 %v10562_v34  ;;  %v4987_v41 = vunpack.c.l.bf16 %v10716_v40  ;;  %v4860_v34 = vunpack.c.h.bf16 %v10577_v48  ;;  %v4979_v48 = vunpack.c.l.bf16 %v10728_v33 }
 0x548   : > { %5155 = vmatmul.f32.vlgmr.msra.gmra.mxu2 %v10658_v0  ;;  %5275 = vmatmul.f32.vlgmr.msra.gmra.mxu0 %v10514_v4  ;;  %v4991_v15 = vunpack.c.l.bf16 %v10710_v54 }
 0x549   : > { %5299 = vmatpush.msra.mxu2 %v5023_v9  ;;  %5339 = vmatpush.msrb.mxu0 %v4896_v3  ;;  %v4944_v9 = vunpack.c.h.bf16 %v10571_v44  ;;  %v10722_v3 = vld [vmem:[%s7254_s20 + $0x258] sm:$0xff]  ;;  %v4376_v44 = vperm.slane %v10460_v51, 3  ;;  %v10741_v51 = vld [vmem:[%s7254_s20 + $0x228] sm:$0xff] }
 0x54a   : > { %5291 = vmatpush.msra.mxu1 %v4911_v59  ;;  %v4940_v59 = vunpack.c.h.bf16 %v10580_v50  ;;  %v4983_v28 = vunpack.c.l.bf16 %v10722_v3  ;;  %v4852_v50 = vunpack.c.h.bf16 %v10596_v6  ;;  %v4971_v6 = vunpack.c.l.bf16 %v10741_v51 }
 0x54b   : > { %5300 = vmatpush.msra.mxu2 %v5019_v52  ;;  %5340 = vmatpush.msrb.mxu0 %v4892_v56  ;;  %v4856_v52 = vunpack.c.h.bf16 %v10586_v45  ;;  %v4936_v56 = vunpack.c.h.bf16 %v10589_v7  ;;  %v4639_v7 = vadd.f32 %v4638_v36, %v4376_v44  ;;  %v10806_v44 = vld [vmem:[%s7254_s20 + $0x388] sm:$0xff]  ;;  %v4996_v36 = vunpack.c.h.bf16 %v10703_v2 }
 0x54c   : > { %5292 = vmatpush.msra.mxu1 %v4907_v46  ;;  %v10735_v46 = vld [vmem:[%s7254_s20 + $0x238] sm:$0xff] }
 0x54d   : > { %5301 = vmatpush.msra.mxu2 %v5015_v13  ;;  %5341 = vmatpush.msrb.mxu0 %v4888_v22  ;;  %v4932_v13 = vunpack.c.h.bf16 %v10599_v58  ;;  %v4658_v22 = vpop.f32.mrf.mxu1  ;;  %v4975_v45 = vunpack.c.l.bf16 %v10735_v46 }
 0x54e   : > { %5293 = vmatpush.msra.mxu1 %v4903_v32  ;;  %v4848_v32 = vunpack.c.h.bf16 %v10606_v47  ;;  %v4659_v58 = vadd.f32 %v4658_v22, %v4639_v7  ;;  %v4988_v22 = vunpack.c.h.bf16 %v10716_v40  ;;  %v4984_v7 = vunpack.c.h.bf16 %v10722_v3  ;;  %v4802_v3 = vld [vmem:[%s7254_s20 + $0x308] sm:$0xff] }
 0x54f   : > { %5302 = vmatpush.msra.mxu2 %v5011_v37  ;;  %5342 = vmatpush.msrb.mxu0 %v4884_v63  ;;  %v4928_v37 = vunpack.c.h.bf16 %v10609_v26  ;;  %v10747_v63 = vld [vmem:[%s7254_s20 + $0x218] sm:$0xff]  ;;  %v4976_v40 = vunpack.c.h.bf16 %v10735_v46 }
 0x550   : > { %5294 = vmatpush.msra.mxu1 %v4899_v35  ;;  %5235 = vmatmul.f32.vlgmr.msrb.gmra.mxu2 %v10658_v0  ;;  %v4678_v35 = vpop.f32.mrf.mxu2  ;;  %v4967_v47 = vunpack.c.l.bf16 %v10747_v63 }
 0x551   : > { %5295 = vmatmul.f32.vlgmr.msra.gmra.mxu1 %v10545_v30  ;;  %5303 = vmatpush.msra.mxu2 %v5007_v14  ;;  %v4844_v14 = vunpack.c.h.bf16 %v10615_v61  ;;  %v4679_v26 = vadd.f32 %v4678_v35, %v4659_v58  ;;  %v10760_v61 = vld [vmem:[%s7254_s20 + $0x3f8] sm:$0xff]  ;;  %v4806_v35 = vld [vmem:[%s7254_s20 + $0x328] sm:$0xff] }
 0x552   : > { %5343 = vmatpush.msrb.mxu0 %v4880_v38  ;;  %5359 = vmatpush.msrb.mxu1 %v4960_v53  ;;  %v4924_v38 = vunpack.c.h.bf16 %v10618_v18  ;;  %v10753_v53 = vld [vmem:[%s7254_s20 + $0x208] sm:$0xff]  ;;  %v4804_v58 = vld [vmem:[%s7254_s20 + $0x318] sm:$0xff]  ;;  %v5088_v46 = vunpack.c.h.bf16 %v10760_v61 }
 0x553   : > { %5304 = vmatpush.msra.mxu2 %v5003_v27  ;;  %v4840_v27 = vunpack.c.h.bf16 %v10624_v39 }
 0x554   : > { %5344 = vmatpush.msrb.mxu0 %v4876_v29  ;;  %5360 = vmatpush.msrb.mxu1 %v4956_v17  ;;  %v4920_v29 = vunpack.c.h.bf16 %v10627_v8  ;;  %v5087_v8 = vunpack.c.l.bf16 %v10760_v61  ;;  %v5060_v61 = vunpack.c.h.bf16 %v10806_v44 }
 0x555   : > { %5305 = vmatpush.msra.mxu2 %v4999_v19  ;;  %v4963_v19 = vunpack.c.l.bf16 %v10753_v53 }
 0x556   : > { %5345 = vmatpush.msrb.mxu0 %v4872_v23  ;;  %5361 = vmatpush.msrb.mxu1 %v4952_v60  ;;  %v4836_v23 = vunpack.c.h.bf16 %v10633_v10  ;;  %v4916_v60 = vunpack.c.h.bf16 %v10636_v12  ;;  %v5020_v12 = vunpack.c.h.bf16 %v10651_v20 }
 0x557   : > { %5306 = vmatpush.msra.mxu2 %v4995_v49  ;;  %v10765_v49 = vld [vmem:[%s7254_s20 + $0x3e8] sm:$0xff] }
 0x558   : > { %5346 = vmatpush.msrb.mxu0 %v4868_v42  ;;  %5362 = vmatpush.msrb.mxu1 %v4948_v43  ;;  %v5024_v42 = vunpack.c.h.bf16 %v10642_v21  ;;  %v4912_v43 = vunpack.c.h.bf16 %v10648_v11  ;;  %v5083_v10 = vunpack.c.l.bf16 %v10765_v49  ;;  %v5016_v11 = vunpack.c.h.bf16 %v10662_v31 }
 0x559   : > { %5307 = vmatpush.msra.mxu2 %v4991_v15  ;;  %v10773_v15 = vld [vmem:[%s7254_s20 + $0x3d8] sm:$0xff] }
 0x55a   : > { %5347 = vmatpush.msrb.mxu0 %v4864_v62  ;;  %5363 = vmatpush.msrb.mxu1 %v4944_v9  ;;  %v4908_v62 = vunpack.c.h.bf16 %v10656_v25  ;;  %v10781_v9 = vld [vmem:[%s7254_s20 + $0x3c8] sm:$0xff]  ;;  %v5079_v21 = vunpack.c.l.bf16 %v10773_v15  ;;  %v5012_v25 = vunpack.c.h.bf16 %v10674_v57 }
 0x55b   : > { %5308 = vmatpush.msra.mxu2 %v4987_v41  ;;  %v4904_v41 = vunpack.c.h.bf16 %v10668_v55  ;;  %v5075_v20 = vunpack.c.l.bf16 %v10781_v9  ;;  %v5008_v55 = vunpack.c.h.bf16 %v10684_v5 }
 0x55c   : > { %5348 = vmatpush.msrb.mxu0 %v4860_v34  ;;  %5364 = vmatpush.msrb.mxu1 %v4940_v59  ;;  %v10789_v34 = vld [vmem:[%s7254_s20 + $0x3b8] sm:$0xff]  ;;  %v10794_v59 = vld [vmem:[%s7254_s20 + $0x3a8] sm:$0xff] }
 0x55d   : > { %5309 = vmatpush.msra.mxu2 %v4983_v28  ;;  %v5071_v31 = vunpack.c.l.bf16 %v10789_v34  ;;  %v10799_v28 = vld [vmem:[%s7254_s20 + $0x398] sm:$0xff]  ;;  %v5067_v57 = vunpack.c.l.bf16 %v10794_v59 }
 0x55e   : > { %5349 = vmatpush.msrb.mxu0 %v4856_v52  ;;  %5365 = vmatpush.msrb.mxu1 %v4936_v56  ;;  %v5063_v5 = vunpack.c.l.bf16 %v10799_v28  ;;  %v5000_v52 = vunpack.c.h.bf16 %v10696_v16  ;;  %v10811_v56 = vld [vmem:[%s7254_s20 + $0x378] sm:$0xff] }
 0x55f   : > { %5310 = vmatpush.msra.mxu2 %v4979_v48  ;;  %v5055_v48 = vunpack.c.l.bf16 %v10811_v56  ;;  %v4812_v16 = vld [vmem:[%s7254_s20 + $0x358] sm:$0xff] }
 0x560   : > { %5350 = vmatpush.msrb.mxu0 %v4852_v50  ;;  %5366 = vmatpush.msrb.mxu1 %v4932_v13  ;;  %v4992_v50 = vunpack.c.h.bf16 %v10710_v54  ;;  %v5047_v2 = vunpack.c.l.bf16 %v4812_v16 }
 0x561   : > { %5311 = vmatpush.msra.mxu2 %v4975_v45  ;;  %v4810_v45 = vld [vmem:[%s7254_s20 + $0x348] sm:$0xff] }
 0x562   : > { %5351 = vmatpush.msrb.mxu0 %v4848_v32  ;;  %5367 = vmatpush.msrb.mxu1 %v4928_v37  ;;  %v4808_v32 = vld [vmem:[%s7254_s20 + $0x338] sm:$0xff]  ;;  %v5043_v54 = vunpack.c.l.bf16 %v4810_v45  ;;  %v4980_v37 = vunpack.c.h.bf16 %v10728_v33  ;;  %v5027_v33 = vunpack.c.l.bf16 %v4802_v3 }
 0x563   : > { %v4698_v17 = vpop.f32.mrf.mxu3  ;;  %5312 = vmatpush.msra.mxu2 %v4971_v6  ;;  %v5039_v6 = vunpack.c.l.bf16 %v4808_v32 }
 0x564   : > { %v4699_v18 = vadd.f32 %v4698_v17, %v4679_v26  ;;  %5352 = vmatpush.msrb.mxu0 %v4844_v14  ;;  %5368 = vmatpush.msrb.mxu1 %v4924_v38  ;;  %v5035_v14 = vunpack.c.l.bf16 %v4806_v35  ;;  %v4972_v38 = vunpack.c.h.bf16 %v10741_v51  ;;  %v4968_v26 = vunpack.c.h.bf16 %v10747_v63 }
 0x565   : > { %5313 = vmatpush.msra.mxu2 %v4967_v47  ;;  %v5031_v47 = vunpack.c.l.bf16 %v4804_v58  ;;  %v5080_v51 = vunpack.c.h.bf16 %v10773_v15  ;;  %v5076_v63 = vunpack.c.h.bf16 %v10781_v9  ;;  %v5068_v17 = vunpack.c.h.bf16 %v10794_v59  ;;  %v6139_v15 = vld [vmem:[%s7258_s28 + $0x38] sm:$0xff]   ;;  %v6137_v9 = vld [vmem:[%s7258_s28 + $0x28] sm:$0xff]   ;;  %v6136_v59 = vld [vmem:[%s7258_s28 + $0x20] sm:$0xff]  }
 0x566   : > { %v10767_v39 = vmax.f32 %v4699_v18, 0.0  ;;  %5353 = vmatpush.msrb.mxu0 %v4840_v27  ;;  %5369 = vmatpush.msrb.mxu1 %v4920_v29  ;;  %v4964_v27 = vunpack.c.h.bf16 %v10753_v53  ;;  %v5084_v29 = vunpack.c.h.bf16 %v10765_v49  ;;  %v5072_v53 = vunpack.c.h.bf16 %v10789_v34  ;;  %v6146_v34 = vld [vmem:[%s7258_s28 + $0x70] sm:$0xff]  }
 0x567   : > { %5314 = vmatpush.msra.mxu2 %v4963_v19  ;;  %v5064_v19 = vunpack.c.h.bf16 %v10799_v28  ;;  %v5040_v49 = vunpack.c.h.bf16 %v4808_v32  ;;  %v6063_v28 = vunpack.c.l.bf16 %v6146_v34 }
 0x568   : > { %5354 = vmatpush.msrb.mxu0 %v4836_v23  ;;  %5370 = vmatpush.msrb.mxu1 %v4916_v60  ;;  %v5048_v23 = vunpack.c.h.bf16 %v4812_v16  ;;  %v5044_v60 = vunpack.c.h.bf16 %v4810_v45  ;;  %v6143_v45 = vld [vmem:[%s7258_s28 + $0x58] sm:$0xff]  }
 0x569   : > { %5175 = vmatmul.f32.vlgmr.msra.gmra.mxu3 %v10767_v39  ;;  %5315 = vmatmul.f32.vlgmr.msra.gmra.mxu2 %v10658_v0 }
 0x56a   : > { %5319 = vmatpush.msra.mxu3 %v5087_v8  ;;  %5355 = vmatmul.f32.vlgmr.msrb.gmra.mxu0 %v10514_v4  ;;  %v4900_v4 = vunpack.c.h.bf16 %v10680_v1  ;;  %v5004_v1 = vunpack.c.h.bf16 %v10690_v24  ;;  %v5059_v24 = vunpack.c.l.bf16 %v10806_v44  ;;  %v5036_v8 = vunpack.c.h.bf16 %v4806_v35  ;;  %v6135_v44 = vld [vmem:[%s7258_s28 + $0x18] sm:$0xff]   ;;  %v6142_v35 = vld [vmem:[%s7258_s28 + $0x50] sm:$0xff]  }
 0x56b   : > { %5379 = vmatpush.msrb.mxu2 %v5024_v42  ;;  %5371 = vmatpush.msrb.mxu1 %v4912_v43  ;;  %v5032_v42 = vunpack.c.h.bf16 %v4804_v58  ;;  %v5028_v43 = vunpack.c.h.bf16 %v4802_v3  ;;  %v6141_v3 = vld [vmem:[%s7258_s28 + $0x48] sm:$0xff]  }
 0x56c   : > { %5320 = vmatpush.msra.mxu3 %v5083_v10  ;;  %v6036_v10 = vunpack.c.h.bf16 %v6139_v15 }
 0x56d   : > { %5380 = vmatpush.msrb.mxu2 %v5020_v12  ;;  %5372 = vmatpush.msrb.mxu1 %v4908_v62  ;;  %v6035_v12 = vunpack.c.l.bf16 %v6139_v15  ;;  %v6138_v62 = vld [vmem:[%s7258_s28 + $0x30] sm:$0xff]  }
 0x56e   : > { %5321 = vmatpush.msra.mxu3 %v5079_v21  ;;  %5555 = vmatpush.msra.mxu0 %v6036_v10  ;;  %v6147_v21 = vld [vmem:[%s7258_s28 + $0x78] sm:$0xff]  }
 0x56f   : > { %5381 = vmatpush.msrb.mxu2 %v5016_v11  ;;  %5373 = vmatpush.msrb.mxu1 %v4904_v41  ;;  %v6032_v11 = vunpack.c.h.bf16 %v6138_v62  ;;  %v6031_v41 = vunpack.c.l.bf16 %v6138_v62 }
 0x570   : > { %5322 = vmatpush.msra.mxu3 %v5075_v20  ;;  %5556 = vmatpush.msra.mxu0 %v6035_v12  ;;  %v6068_v20 = vunpack.c.h.bf16 %v6147_v21 }
 0x571   : > { %5382 = vmatpush.msrb.mxu2 %v5012_v25  ;;  %5374 = vmatpush.msrb.mxu1 %v4900_v4  ;;  %v6067_v25 = vunpack.c.l.bf16 %v6147_v21  ;;  %v6028_v4 = vunpack.c.h.bf16 %v6137_v9  ;;  %v6149_v21 = vld [vmem:[%s7258_s28 + $0x88] sm:$0xff]  }
 0x572   : > { %5255 = vmatmul.f32.vlgmr.msrb.gmra.mxu3 %v10767_v39  ;;  %5375 = vmatmul.f32.vlgmr.msrb.gmra.mxu1 %v10545_v30  ;;  %v10816_v30 = vld [vmem:[%s7254_s20 + $0x368] sm:$0xff] }
 0x573   : > { %5323 = vmatpush.msra.mxu3 %v5071_v31  ;;  %5383 = vmatpush.msrb.mxu2 %v5008_v55  ;;  %v5051_v13 = vunpack.c.l.bf16 %v10816_v30  ;;  %v5052_v18 = vunpack.c.h.bf16 %v10816_v30  ;;  %v6145_v31 = vld [vmem:[%s7258_s28 + $0x68] sm:$0xff]   ;;  %v6027_v55 = vunpack.c.l.bf16 %v6137_v9  ;;  %v6144_v30 = vld [vmem:[%s7258_s28 + $0x60] sm:$0xff]  }
 0x574   : > { %5557 = vmatpush.msra.mxu0 %v6032_v11  ;;  %5575 = vmatpush.msra.mxu1 %v6068_v20 }
 0x575   : > { %5324 = vmatpush.msra.mxu3 %v5067_v57  ;;  %5384 = vmatpush.msrb.mxu2 %v5004_v1  ;;  %v6024_v57 = vunpack.c.h.bf16 %v6136_v59  ;;  %v6060_v1 = vunpack.c.h.bf16 %v6145_v31 }
 0x576   : > { %5558 = vmatpush.msra.mxu0 %v6031_v41  ;;  %5576 = vmatpush.msra.mxu1 %v6067_v25 }
 0x577   : > { %5325 = vmatpush.msra.mxu3 %v5063_v5  ;;  %5385 = vmatpush.msrb.mxu2 %v5000_v52  ;;  %v6023_v5 = vunpack.c.l.bf16 %v6136_v59  ;;  %v6059_v52 = vunpack.c.l.bf16 %v6145_v31  ;;  %v6075_v31 = vunpack.c.l.bf16 %v6149_v21 }
 0x578   : > { %5559 = vmatpush.msra.mxu0 %v6028_v4 }
 0x579   : > { %5326 = vmatpush.msra.mxu3 %v5059_v24  ;;  %5386 = vmatpush.msrb.mxu2 %v4996_v36  ;;  %v6019_v24 = vunpack.c.l.bf16 %v6135_v44  ;;  %v6134_v36 = vld [vmem:[%s7258_s28 + $0x10] sm:$0xff]  }
 0x57a   : > { %5560 = vmatpush.msra.mxu0 %v6027_v55  ;;  %v6015_v16 = vunpack.c.l.bf16 %v6134_v36 }
 0x57b   : > { %5327 = vmatpush.msra.mxu3 %v5055_v48  ;;  %5387 = vmatpush.msrb.mxu2 %v4992_v50  ;;  %v6016_v48 = vunpack.c.h.bf16 %v6134_v36  ;;  %v6056_v50 = vunpack.c.h.bf16 %v6144_v30 }
 0x57c   : > { %5561 = vmatpush.msra.mxu0 %v6024_v57  ;;  %v6148_v57 = vld [vmem:[%s7258_s28 + $0x80] sm:$0xff]  }
 0x57d   : > { %5328 = vmatpush.msra.mxu3 %v5051_v13  ;;  %5388 = vmatpush.msrb.mxu2 %v4988_v22  ;;  %v6055_v13 = vunpack.c.l.bf16 %v6144_v30  ;;  %v6133_v22 = vld [vmem:[%s7258_s28 + $0x8] sm:$0xff]  }
 0x57e   : > { %5562 = vmatpush.msra.mxu0 %v6023_v5  ;;  %v6011_v32 = vunpack.c.l.bf16 %v6133_v22 }
 0x57f   : > { %5329 = vmatpush.msra.mxu3 %v5047_v2  ;;  %5389 = vmatpush.msrb.mxu2 %v4984_v7  ;;  %v6012_v2 = vunpack.c.h.bf16 %v6133_v22  ;;  %v6052_v7 = vunpack.c.h.bf16 %v6143_v45 }
 0x581   : > { %5330 = vmatpush.msra.mxu3 %v5043_v54  ;;  %5390 = vmatpush.msrb.mxu2 %v4980_v37  ;;  %v6051_v54 = vunpack.c.l.bf16 %v6143_v45  ;;  %v6006_v37 = vld [vmem:[%s7258_s28] sm:$0xff]   ;;  %v6161_v45 = vld [vmem:[%s7258_s28 + $0xe8] sm:$0xff]  }
 0x582   : > { %v6007_v58 = vunpack.c.l.bf16 %v6006_v37 }
 0x583   : > { %5331 = vmatpush.msra.mxu3 %v5039_v6  ;;  %5391 = vmatpush.msrb.mxu2 %v4976_v40  ;;  %v6008_v6 = vunpack.c.h.bf16 %v6006_v37  ;;  %v6048_v40 = vunpack.c.h.bf16 %v6142_v35 }
 0x585   : > { %5332 = vmatpush.msra.mxu3 %v5035_v14  ;;  %5392 = vmatpush.msrb.mxu2 %v4972_v38  ;;  %v6047_v14 = vunpack.c.l.bf16 %v6142_v35  ;;  %v6155_v38 = vld [vmem:[%s7258_s28 + $0xb8] sm:$0xff]   ;;  %v6160_v35 = vld [vmem:[%s7258_s28 + $0xe0] sm:$0xff]  }
 0x587   : > { %5333 = vmatpush.msra.mxu3 %v5031_v47  ;;  %5393 = vmatpush.msrb.mxu2 %v4968_v26  ;;  %v6100_v47 = vunpack.c.h.bf16 %v6155_v38  ;;  %v6044_v26 = vunpack.c.h.bf16 %v6141_v3 }
 0x589   : > { %5334 = vmatpush.msra.mxu3 %v5027_v33  ;;  %5394 = vmatpush.msrb.mxu2 %v4964_v27  ;;  %v6099_v33 = vunpack.c.l.bf16 %v6155_v38  ;;  %v6043_v27 = vunpack.c.l.bf16 %v6141_v3  ;;  %v6158_v3 = vld [vmem:[%s7258_s28 + $0xd0] sm:$0xff]  }
 0x58a   : > { %5335 = vmatmul.f32.vlgmr.msra.gmra.mxu3 %v10767_v39  ;;  %5395 = vmatmul.f32.vlgmr.msrb.gmra.mxu2 %v10658_v0  ;;  %v5056_v0 = vunpack.c.h.bf16 %v10811_v56  ;;  %v6020_v56 = vunpack.c.h.bf16 %v6135_v44 }
 0x58b   : > { %5399 = vmatpush.msrb.mxu3 %v5088_v46  ;;  %5595 = vmatpush.msra.mxu2 %v6100_v47  ;;  %v6154_v46 = vld [vmem:[%s7258_s28 + $0xb0] sm:$0xff]  }
 0x58c   : > { %5563 = vmatpush.msra.mxu0 %v6020_v56  ;;  %v6071_v56 = vunpack.c.l.bf16 %v6148_v57 }
 0x58d   : > { %5400 = vmatpush.msrb.mxu3 %v5084_v29  ;;  %5596 = vmatpush.msra.mxu2 %v6099_v33  ;;  %v6096_v29 = vunpack.c.h.bf16 %v6154_v46 }
 0x58e   : > { %5564 = vmatpush.msra.mxu0 %v6019_v24  ;;  %v6163_v24 = vld [vmem:[%s7258_s28 + $0xf8] sm:$0xff]  }
 0x58f   : > { %5401 = vmatpush.msrb.mxu3 %v5080_v51  ;;  %v6140_v51 = vld [vmem:[%s7258_s28 + $0x40] sm:$0xff]   ;;  %5597 = vmatpush.msra.mxu2 %v6096_v29  ;;  %v6132_v30 = vunpack.c.h.bf16 %v6163_v24  ;;  %v6111_v29 = vunpack.c.l.bf16 %v6158_v3 }
 0x590   : > { %5565 = vmatpush.msra.mxu0 %v6016_v48 }
 0x591   : > { %5402 = vmatpush.msrb.mxu3 %v5076_v63  ;;  %v6040_v63 = vunpack.c.h.bf16 %v6140_v51 }
 0x592   : > { %5566 = vmatpush.msra.mxu0 %v6015_v16  ;;  %v6162_v16 = vld [vmem:[%s7258_s28 + $0xf0] sm:$0xff]  }
 0x593   : > { %5403 = vmatpush.msrb.mxu3 %v5072_v53  ;;  %v6095_v53 = vunpack.c.l.bf16 %v6154_v46 }
 0x594   : > { %5567 = vmatpush.msra.mxu0 %v6012_v2 }
 0x595   : > { %5404 = vmatpush.msrb.mxu3 %v5068_v17  ;;  %v6039_v17 = vunpack.c.l.bf16 %v6140_v51  ;;  %5598 = vmatpush.msra.mxu2 %v6095_v53 }
 0x596   : > { %5568 = vmatpush.msra.mxu0 %v6011_v32 }
 0x597   : > { %5405 = vmatpush.msrb.mxu3 %v5064_v19  ;;  %v6153_v19 = vld [vmem:[%s7258_s28 + $0xa8] sm:$0xff]  }
 0x598   : > { %5569 = vmatpush.msra.mxu0 %v6008_v6  ;;  %v6123_v6 = vunpack.c.l.bf16 %v6161_v45 }
 0x599   : > { %5406 = vmatpush.msrb.mxu3 %v5060_v61  ;;  %v6092_v61 = vunpack.c.h.bf16 %v6153_v19 }
 0x59a   : > { %5570 = vmatpush.msra.mxu0 %v6007_v58  ;;  %v6159_v58 = vld [vmem:[%s7258_s28 + $0xd8] sm:$0xff]  }
 0x59b   : > { %5407 = vmatpush.msrb.mxu3 %v5056_v0  ;;  %v6091_v0 = vunpack.c.l.bf16 %v6153_v19  ;;  %5599 = vmatpush.msra.mxu2 %v6092_v61  ;;  %v6116_v38 = vunpack.c.h.bf16 %v6159_v58  ;;  %v6115_v47 = vunpack.c.l.bf16 %v6159_v58 }
 0x59d   : > { %5408 = vmatpush.msrb.mxu3 %v5052_v18  ;;  %v6152_v18 = vld [vmem:[%s7258_s28 + $0xa0] sm:$0xff]   ;;  %5600 = vmatpush.msra.mxu2 %v6091_v0 }
 0x59f   : > { %5409 = vmatpush.msrb.mxu3 %v5048_v23  ;;  %v6088_v23 = vunpack.c.h.bf16 %v6152_v18 }
 0x5a1   : > { %5410 = vmatpush.msrb.mxu3 %v5044_v60  ;;  %v6151_v60 = vld [vmem:[%s7258_s28 + $0x98] sm:$0xff]   ;;  %5601 = vmatpush.msra.mxu2 %v6088_v23 }
 0x5a2   : > { %v6083_v15 = vunpack.c.l.bf16 %v6151_v60 }
 0x5a3   : > { %5411 = vmatpush.msrb.mxu3 %v5040_v49  ;;  %v6087_v49 = vunpack.c.l.bf16 %v6152_v18  ;;  %v6156_v18 = vld [vmem:[%s7258_s28 + $0xc0] sm:$0xff]  }
 0x5a5   : > { %5412 = vmatpush.msrb.mxu3 %v5036_v8  ;;  %v10869_v8 = vld [vmem:[%s7256_s27] sm:$0xf]  ;;  %5602 = vmatpush.msra.mxu2 %v6087_v49  ;;  %v5116_v12 = vpop.f32.mrf.mxu0 }
 0x5a6   : > { %v5091_v10 = vperm.slane %v10869_v8, 0  ;;  %v5093_v33 = vperm.slane %v10869_v8, 2 }
 0x5a7   : > { %5413 = vmatpush.msrb.mxu3 %v5032_v42  ;;  %v6084_v42 = vunpack.c.h.bf16 %v6151_v60  ;;  %v6104_v60 = vunpack.c.h.bf16 %v6156_v18 }
 0x5a8   : > { %v5117_v41 = vadd.f32 %v5116_v12, %v5091_v10  ;;  %v5637_v10 = vstv %s11175_s9  ;;  %v6893_v12 = vmov 0  }
 0x5a9   : > { %5414 = vmatpush.msrb.mxu3 %v5028_v43  ;;  %v6150_v43 = vld [vmem:[%s7258_s28 + $0x90] sm:$0xff]   ;;  %5603 = vmatpush.msra.mxu2 %v6084_v42  ;;  %v6103_v42 = vunpack.c.l.bf16 %v6156_v18 }
 0x5aa   : > { %5415 = vmatmul.f32.vlgmr.msrb.gmra.mxu3 %v10767_v39  ;;  %v6064_v39 = vunpack.c.h.bf16 %v6146_v34  ;;  %v6080_v62 = vunpack.c.h.bf16 %v6150_v43  ;;  %v6079_v11 = vunpack.c.l.bf16 %v6150_v43  ;;  %v6076_v34 = vunpack.c.h.bf16 %v6149_v21  ;;  %6339 = vset.pattern.permute.xlu0 %v6893_v12 }
 0x5ab   : > { %5604 = vmatpush.msra.mxu2 %v6083_v15  ;;  %5615 = vmatpush.msra.mxu3 %v6132_v30  ;;  %v5636_v15 = vld [vmem:[%s11176_s13] sm:$0xff] }
 0x5ac   : > { %5577 = vmatpush.msra.mxu1 %v6064_v39  ;;  %v5092_v39 = vperm.slane %v10869_v8, 1  ;;  %vm5638_vm1 = vcmp.eq.s32.totalorder %v5636_v15, %v5637_v10 }
 0x5ad   : > { %v5136_v9 = vpop.f32.mrf.mxu1  ;;  %5605 = vmatpush.msra.mxu2 %v6080_v62  ;;  %v5196_v55 = vpop.f32.mrf.mxu0  ;;  %v5639_v62 = vsel %vm5638_vm1, 1, %v6893_v12 }
 0x5ae   : > { %5578 = vmatpush.msra.mxu1 %v6063_v28  ;;  %v5137_v25 = vadd.f32 %v5136_v9, %v5117_v41  ;;  %5641 = vperm.xlu0 %6339, %v5639_v62   ;;  %v5094_v9 = vperm.slane %v10869_v8, 3 }
 0x5af   : > { %5606 = vmatpush.msra.mxu2 %v6079_v11 }
 0x5b0   : > { %5579 = vmatpush.msra.mxu1 %v6060_v1  ;;  %v6072_v1 = vunpack.c.h.bf16 %v6148_v57 }
 0x5b1   : > { %5607 = vmatpush.msra.mxu2 %v6076_v34 }
 0x5b2   : > { %5580 = vmatpush.msra.mxu1 %v6059_v52  ;;  %v5197_v52 = vadd.f32 %v5196_v55, %v5092_v39 }
 0x5b3   : > { %5608 = vmatpush.msra.mxu2 %v6075_v31  ;;  %v6340_v31 = vld [vmem:[%s985_s22] ss:$0 sm:$0xff] }
 0x5b4   : > { %5581 = vmatpush.msra.mxu1 %v6056_v50  ;;  %v6131_v50 = vunpack.c.l.bf16 %v6163_v24  ;;  %v5635_v24 = vld [vmem:[#allocation25] sm:$0xff] }
 0x5b5   : > { %v5216_v44 = vpop.f32.mrf.mxu1  ;;  %5609 = vmatpush.msra.mxu2 %v6072_v1 }
 0x5b6   : > { %5582 = vmatpush.msra.mxu1 %v6055_v13  ;;  %v5217_v48 = vadd.f32 %v5216_v44, %v5197_v52  ;;  %v6128_v13 = vunpack.c.h.bf16 %v6162_v16  ;;  %5616 = vmatpush.msra.mxu3 %v6131_v50 }
 0x5b7   : > { %5610 = vmatpush.msra.mxu2 %v6071_v56 }
 0x5b8   : > { %5583 = vmatpush.msra.mxu1 %v6052_v7  ;;  %v6127_v7 = vunpack.c.l.bf16 %v6162_v16  ;;  %5617 = vmatpush.msra.mxu3 %v6128_v13 }
 0x5ba   : > { %5584 = vmatpush.msra.mxu1 %v6051_v54  ;;  %v6124_v54 = vunpack.c.h.bf16 %v6161_v45  ;;  %5618 = vmatpush.msra.mxu3 %v6127_v7 }
 0x5bc   : > { %5585 = vmatpush.msra.mxu1 %v6048_v40  ;;  %5619 = vmatpush.msra.mxu3 %v6124_v54  ;;  %v6120_v40 = vunpack.c.h.bf16 %v6160_v35 }
 0x5be   : > { %5586 = vmatpush.msra.mxu1 %v6047_v14  ;;  %5620 = vmatpush.msra.mxu3 %v6123_v6  ;;  %v6119_v14 = vunpack.c.l.bf16 %v6160_v35 }
 0x5c0   : > { %5587 = vmatpush.msra.mxu1 %v6044_v26  ;;  %5621 = vmatpush.msra.mxu3 %v6120_v40  ;;  %v6112_v26 = vunpack.c.h.bf16 %v6158_v3 }
 0x5c2   : > { %5588 = vmatpush.msra.mxu1 %v6043_v27  ;;  %5622 = vmatpush.msra.mxu3 %v6119_v14  ;;  %v6157_v27 = vld [vmem:[%s7258_s28 + $0xc8] sm:$0xff]  }
 0x5c3   : > { %v6107_v61 = vunpack.c.l.bf16 %v6157_v27 }
 0x5c4   : > { %5589 = vmatpush.msra.mxu1 %v6040_v63  ;;  %5623 = vmatpush.msra.mxu3 %v6116_v38  ;;  %v6108_v63 = vunpack.c.h.bf16 %v6157_v27 }
 0x5c5   : > { %v5276_v46 = vpop.f32.mrf.mxu0 }
 0x5c6   : > { %5590 = vmatpush.msra.mxu1 %v6039_v17  ;;  %5624 = vmatpush.msra.mxu3 %v6115_v47  ;;  %v5277_v53 = vadd.f32 %v5276_v46, %v5093_v33 }
 0x5c8   : > { %5625 = vmatpush.msra.mxu3 %v6112_v26 }
 0x5ca   : > { %5626 = vmatpush.msra.mxu3 %v6111_v29 }
 0x5cb   : > { %v5156_v20 = vpop.f32.mrf.mxu2 }
 0x5cc   : > { %v5157_v4 = vadd.f32 %v5156_v20, %v5137_v25  ;;  %5627 = vmatpush.msra.mxu3 %v6108_v63 }
 0x5ce   : > { %v5296_v51 = vpop.f32.mrf.mxu1  ;;  %5628 = vmatpush.msra.mxu3 %v6107_v61 }
 0x5cf   : > { %v5297_v19 = vadd.f32 %v5296_v51, %v5277_v53 }
 0x5d0   : > { %5629 = vmatpush.msra.mxu3 %v6104_v60 }
 0x5d2   : > { %5630 = vmatpush.msra.mxu3 %v6103_v42 }
 0x5d3   : > { %v5236_v36 = vpop.f32.mrf.mxu2 }
 0x5d4   : > { %v5237_v22 = vadd.f32 %v5236_v36, %v5217_v48 }
 0x5e7   : > { %v5356_v21 = vpop.f32.mrf.mxu0 }
 0x5e8   : > { %v5357_v41 = vadd.f32 %v5356_v21, %v5094_v9 }
 0x5ec   : > { %v5176_v59 = vpop.f32.mrf.mxu3  ;;  %v5316_v17 = vpop.f32.mrf.mxu2 }
 0x5ed   : > { %v5177_v28 = vadd.f32 %v5176_v59, %v5157_v4  ;;  %v5317_v0 = vadd.f32 %v5316_v17, %v5297_v19 }
 0x5ef   : > { %v5419_v5 = vmax.f32 %v5177_v28, 0.0  ;;  %v5376_v11 = vpop.f32.mrf.mxu1 }
 0x5f0   : > { %v5377_v34 = vadd.f32 %v5376_v11, %v5357_v41 }
 0x5f1   : > { %5571 = vmatmul.f32.vlgmr.msra.gmra.mxu0 %v5419_v5 }
 0x5f5   : > { %v5256_v2 = vpop.f32.mrf.mxu3 }
 0x5f6   : > { %v5257_v32 = vadd.f32 %v5256_v2, %v5237_v22 }
 0x5f8   : > { %v5420_v37 = vmax.f32 %v5257_v32, 0.0 }
 0x5fa   : > { %5591 = vmatmul.f32.vlgmr.msra.gmra.mxu1 %v5420_v37 }
 0x60d   : > { %v5336_v23 = vpop.f32.mrf.mxu3  ;;  %v5396_v20 = vpop.f32.mrf.mxu2 }
 0x60e   : > { %v5337_v49 = vadd.f32 %v5336_v23, %v5317_v0  ;;  %v5397_v25 = vadd.f32 %v5396_v20, %v5377_v34 }
 0x610   : > { %v5421_v43 = vmax.f32 %v5337_v49, 0.0 }
 0x612   : > { %5611 = vmatmul.f32.vlgmr.msra.gmra.mxu2 %v5421_v43 }
 0x620   : > { %v5642_v44 = vpop.permute.xlu0 %5641 }
 0x621   : > { %vm5643_vm2 = vcmp.eq.s32.totalorder %v5642_v44, 1 }
 0x62d   : > { %v5416_v4 = vpop.f32.mrf.mxu3 }
 0x62e   : > { %v5417_v39 = vadd.f32 %v5416_v4, %v5397_v25 }
 0x630   : > { %v5422_v59 = vmax.f32 %v5417_v39, 0.0 }
 0x632   : > { %5631 = vmatmul.f32.vlgmr.msra.gmra.mxu3 %v5422_v59 }
 0x66e   : > { %v5572_v55 = vpop.f32.mrf.mxu0 }
 0x66f   : > { %v5573_v57 = vadd.f32 %v6340_v31, %v5572_v55 }
 0x677   : > { %v5592_v28 = vpop.f32.mrf.mxu1 }
 0x678   : > { %v5593_v8 = vadd.f32 %v5592_v28, %v5573_v57 }
 0x695   : > { %v5612_v1 = vpop.f32.mrf.mxu2 }
 0x696   : > { %v5613_v5 = vadd.f32 %v5612_v1, %v5593_v8 }
 0x6b5   : > { %v5632_v52 = vpop.f32.mrf.mxu3 }
 0x6b6   : > { %v5633_v56 = vadd.f32 %v5632_v52, %v5613_v5 }
 0x6b8   : > { %v5644_v36 = vsel %vm5643_vm2, %v5633_v56, 0.0 }
 0x6b9   : > { %v5645_v30 = vadd.f32 %v5644_v36, %v5635_v24 }
 0x6bb   : > { %5646 = vst [vmem:[#allocation25] sm:$0xff] %v5645_v30 }
 0x6bc PF: > { %s11178_s29 = sld [smem:[#allocation38_spill]]  ;;  %s6894_s11 = smov [#allocation25]  }
 0x6bd   : > { %s11179_s22 = sld [smem:[#allocation86_spill]]  ;;  %s5655_s21 = sshll.u32 %s6894_s11, 4  ;;  %s5656_s21 = int_to_ptr.vmem [resolvable:$true] %s5655_s21 }
 0x6c2   : > { %p6273_p4 = scmp.eq.s32.totalorder %s11178_s29, 1 }
 0x6c3   : > { %s5657_s0 = sshll.u32 %s11179_s22, 4  ;;  %s5658_s0 = int_to_ptr.hbm [resolvable:$true] %s5657_s0 }
 0x6c4   : > { %6209 = dma.vmem_to_hbm [thread:$0]  (%p6273_p4), %s5656_s21, 128, %s5658_s0, [#allocation7]  }
 0x6c5   : > { %6852 = dma.done.wait (%p6273_p4), [#allocation7], 128  }
 0x6c6   : > { %6854 = vsyncadd (%p6273_p4), [#allocation7], 4294967168 }
 0x6c7 PF: > { %s11180_s20 = sld [smem:[#allocation37_spill]]  ;;  %s11185_s23 = smov %s6873_s24 }
 0x6c8   : > { %s11181_s1 = sld [smem:[#allocation34_spill]] }
 0x6c9   : > { %s11182_s22 = sld [smem:[#allocation35_spill]] }
 0x6ca   : > { %s11183_s2 = sld [smem:[#allocation42_spill]] }
 0x6cb   : > { %s11184_s27 = sld [smem:[#allocation40_spill]] }
 0x6cd   : > { %s43_s12 = sadd.s32 1, %s11180_s20  }
 0x6ce   : > { %p40_p5 = scmp.ge.s32.totalorder %s43_s12, 4  }
 0x6d0   :  { %42 = sbr.rel (!%p40_p5) target bundleno = 32 (0x20), region = 236 }
 0x6d1   : > { %s11186_s24 = smov %s11184_s27 }
 0x6d5   :  { %5671 = vsyncpa [#allocation6], 1 }
 0x6d6   :  { %5673 = vsyncpa [#allocation6 + $0x1], 1 }
 0x6d7   :  { %5674 = vsyncpa [#allocation9], 1 }
 0x6d8   :  { %5675 = vsyncpa [#allocation12], 1 }
 0x6d9   :  { %5676 = vsyncpa [#allocation15], 1 }
 0x6da   :  { %5677 = vsyncpa [#allocation18], 1 }
 0x6db   :  { %5678 = vsyncpa [#allocation7], 1 }
 0x6dc   :  { %5680 = vsyncpa [#allocation7 + $0x1], 1 }

</bundles_post_ra>
